<compile_context>
chip_gen: v5e
topology: v5e:2x2
jax: 0.10.0
libtpu: 0.0.40
codegen_flags: <defaults>
</compile_context>

<pallas_src>
import functools

import jax
import jax.numpy as jnp
from jax import lax
from jax.experimental import pallas as pl
from jax.experimental.pallas import tpu as pltpu

EPS = 1e-5


def _choose_point_tile(n, target=512):
    """Largest point-axis tile that divides N and is a multiple of 8 (or == N)."""
    if n <= target:
        return n
    for t in range(target, 7, -1):
        if n % t == 0 and t % 8 == 0:
            return t
    return n  # no suitable divisor; fall back to the whole axis


def stn64d_kernel(
    x_ref,                                # (tile_n, 64) bf16 (batch dim squeezed)
    w1_ref, b1_ref, g1_ref, be1_ref,      # conv1 64->64, bn1
    w2_ref, b2_ref, g2_ref, be2_ref,      # conv2 64->128, bn2
    w3_ref, b3_ref, g3_ref, be3_ref,      # conv3 128->1024, bn3
    wf1_ref, bf1_ref,                     # fc1 1024->512
    wf2_ref, bf2_ref,                     # fc2 512->256
    wf3_ref, bf3_ref,                     # fc3 256->4096 (identity folded in bias)
    out_ref,                              # (B, 4096) f32
    sum1, sq1, sum2, sq2, sum3, sq3,      # (1, C) f32 BN stat accumulators
    maxacc, minacc,                       # (B, 1024) f32 pooling accumulators
    *, inv_m,                             # static: 1 / (B*N)
):
    p = pl.program_id(0)
    b = pl.program_id(1)
    t = pl.program_id(2)
    nb = pl.num_programs(1)
    nt = pl.num_programs(2)

    xt = x_ref[...]                       # (tile_n, 64) bf16

    @pl.when((p == 0) & (b == 0) & (t == 0))
    def _init():
        sum1[...] = jnp.zeros_like(sum1)
        sq1[...] = jnp.zeros_like(sq1)
        sum2[...] = jnp.zeros_like(sum2)
        sq2[...] = jnp.zeros_like(sq2)
        sum3[...] = jnp.zeros_like(sum3)
        sq3[...] = jnp.zeros_like(sq3)
        maxacc[...] = jnp.full_like(maxacc, -jnp.inf)
        minacc[...] = jnp.full_like(minacc, jnp.inf)

    def accum_stats(h, s_ref, q_ref):
        # per-channel sum / sum-of-squares via MXU (ones-row matmul), f32.
        ones = jnp.ones((1, h.shape[0]), jnp.float32)
        s_ref[...] += jnp.dot(ones, h, preferred_element_type=jnp.float32)
        q_ref[...] += jnp.dot(ones, h * h, preferred_element_type=jnp.float32)

    def bn_coeffs(s_ref, q_ref, g_ref, beta_ref):
        # Training-mode BN (biased variance) folded into per-channel scale/shift.
        mean = s_ref[...] * inv_m
        var = jnp.maximum(q_ref[...] * inv_m - mean * mean, 0.0)
        scale = g_ref[...] * lax.rsqrt(var + EPS)
        shift = beta_ref[...] - mean * scale
        return scale, shift

    def conv1_out():
        return jnp.dot(xt, w1_ref[...], preferred_element_type=jnp.float32) + b1_ref[...]

    def conv2_out():
        sc1, sh1 = bn_coeffs(sum1, sq1, g1_ref, be1_ref)
        a1 = jnp.maximum(conv1_out() * sc1 + sh1, 0.0).astype(jnp.bfloat16)
        return jnp.dot(a1, w2_ref[...], preferred_element_type=jnp.float32) + b2_ref[...]

    @pl.when(p == 0)
    def _pass0():
        accum_stats(conv1_out(), sum1, sq1)

    @pl.when(p == 1)
    def _pass1():
        accum_stats(conv2_out(), sum2, sq2)

    @pl.when(p == 2)
    def _pass2():
        sc2, sh2 = bn_coeffs(sum2, sq2, g2_ref, be2_ref)
        a2 = jnp.maximum(conv2_out() * sc2 + sh2, 0.0).astype(jnp.bfloat16)
        h3 = jnp.dot(a2, w3_ref[...], preferred_element_type=jnp.float32) + b3_ref[...]
        accum_stats(h3, sum3, sq3)
        # Per-batch running max/min of the pre-BN conv3 output.
        tmax = jnp.max(h3, axis=0, keepdims=True)           # (1, 1024)
        tmin = jnp.min(h3, axis=0, keepdims=True)
        row = lax.broadcasted_iota(jnp.int32, (maxacc.shape[0], 1), 0)
        sel = row == b
        maxacc[...] = jnp.where(sel, jnp.maximum(maxacc[...], tmax), maxacc[...])
        minacc[...] = jnp.where(sel, jnp.minimum(minacc[...], tmin), minacc[...])

    @pl.when((p == 2) & (b == nb - 1) & (t == nt - 1))
    def _head():
        # bn3 + relu applied to the pooled (pre-BN) extrema: max-pool commutes
        # through the monotone per-channel affine (sign decides max vs min).
        sc3, sh3 = bn_coeffs(sum3, sq3, g3_ref, be3_ref)
        pooled = jnp.where(sc3 >= 0.0,
                           maxacc[...] * sc3 + sh3,
                           minacc[...] * sc3 + sh3)
        pooled = jnp.maximum(pooled, 0.0).astype(jnp.bfloat16)   # (B, 1024)
        f = jnp.dot(pooled, wf1_ref[...], preferred_element_type=jnp.float32) + bf1_ref[...]
        f = jnp.maximum(f, 0.0).astype(jnp.bfloat16)             # (B, 512)
        f = jnp.dot(f, wf2_ref[...], preferred_element_type=jnp.float32) + bf2_ref[...]
        f = jnp.maximum(f, 0.0).astype(jnp.bfloat16)             # (B, 256)
        out_ref[...] = (jnp.dot(f, wf3_ref[...], preferred_element_type=jnp.float32)
                        + bf3_ref[...])                          # (B, 4096), iden folded


def stn64d_forward(x, params):
    """x: (B, 64, N) float32  ->  (B, 64, 64) float32."""
    B, C, N = x.shape
    assert C == 64
    x_pm = jnp.transpose(x, (0, 2, 1)).astype(jnp.bfloat16)      # (B, N, 64)

    tile_n = _choose_point_tile(N)
    assert N % tile_n == 0 and (tile_n % 8 == 0 or tile_n == N)
    grid = (3, B, N // tile_n)

    # Fold the flattened 64x64 identity into the fc3 bias (constant per call).
    iden = jnp.eye(64, dtype=jnp.float32).reshape(1, 64 * 64)
    bf3i = params["bf3"] + iden

    # bf16 matmul operands (f32 accumulation inside the kernel).
    w16 = {k: params[k].astype(jnp.bfloat16)
           for k in ("w1", "w2", "w3", "wf1", "wf2", "wf3")}

    param_args = (
        w16["w1"], params["b1"], params["g1"], params["be1"],
        w16["w2"], params["b2"], params["g2"], params["be2"],
        w16["w3"], params["b3"], params["g3"], params["be3"],
        w16["wf1"], params["bf1"],
        w16["wf2"], params["bf2"],
        w16["wf3"], bf3i,
    )

    in_specs = [pl.BlockSpec((None, tile_n, 64), lambda p, b, t: (b, t, 0))]
    # Weights/biases: whole-array blocks with constant index -> stay resident.
    in_specs += [pl.BlockSpec(a.shape, lambda p, b, t: (0, 0)) for a in param_args]

    scratch = [
        pltpu.VMEM((1, 64), jnp.float32), pltpu.VMEM((1, 64), jnp.float32),
        pltpu.VMEM((1, 128), jnp.float32), pltpu.VMEM((1, 128), jnp.float32),
        pltpu.VMEM((1, 1024), jnp.float32), pltpu.VMEM((1, 1024), jnp.float32),
        pltpu.VMEM((B, 1024), jnp.float32), pltpu.VMEM((B, 1024), jnp.float32),
    ]

    kernel = functools.partial(stn64d_kernel, inv_m=1.0 / float(B * N))

    out = pl.pallas_call(
        kernel,
        out_shape=jax.ShapeDtypeStruct((B, 64 * 64), jnp.float32),
        grid_spec=pltpu.PrefetchScalarGridSpec(
            num_scalar_prefetch=0,
            grid=grid,
            in_specs=in_specs,
            out_specs=pl.BlockSpec((B, 64 * 64), lambda p, b, t: (0, 0)),
            scratch_shapes=scratch,
        ),
        compiler_params=pltpu.CompilerParams(
            # All axes carry serial accumulator dependencies.
            dimension_semantics=("arbitrary", "arbitrary", "arbitrary"),
            vmem_limit_bytes=48 << 20,   # valid on v7x (64 MiB physical VMEM)
        ),
    )(x_pm, *param_args)
    return out.reshape(B, 64, 64)


def stn64d_reference(x, params):
    """Pure-JAX f32 reference (training-mode BN) for validation."""
    B, C, N = x.shape
    xp = jnp.transpose(x, (0, 2, 1)).reshape(B * N, C)

    def bn_relu(h, g, be):
        mean = jnp.mean(h, axis=0, keepdims=True)
        var = jnp.mean(h * h, axis=0, keepdims=True) - mean * mean
        return jnp.maximum((h - mean) * lax.rsqrt(var + EPS) * g + be, 0.0)

    h = bn_relu(xp @ params["w1"] + params["b1"], params["g1"], params["be1"])
    h = bn_relu(h @ params["w2"] + params["b2"], params["g2"], params["be2"])
    h = bn_relu(h @ params["w3"] + params["b3"], params["g3"], params["be3"])
    pooled = jnp.max(h.reshape(B, N, 1024), axis=1)
    f = jnp.maximum(pooled @ params["wf1"] + params["bf1"], 0.0)
    f = jnp.maximum(f @ params["wf2"] + params["bf2"], 0.0)
    f = f @ params["wf3"] + params["bf3"]
    iden = jnp.eye(64, dtype=jnp.float32).reshape(1, 64 * 64)
    return (f + iden).reshape(B, 64, 64)


def init_params(key):
    """Deterministic synthetic parameters matching STN64d.__init__ shapes.

    Matmul weights are stored as (in_features, out_features), i.e. the
    transpose of PyTorch's Conv1d (out,in,1) / Linear (out,in) layout.
    """
    ks = jax.random.split(key, 12)

    def u(k, shape, fan_in):
        bound = 1.0 / jnp.sqrt(fan_in)
        return jax.random.uniform(k, shape, jnp.float32, -bound, bound)

    p = {}
    p["w1"], p["b1"] = u(ks[0], (64, 64), 64), u(ks[1], (1, 64), 64)
    p["g1"], p["be1"] = jnp.ones((1, 64), jnp.float32), jnp.zeros((1, 64), jnp.float32)
    p["w2"], p["b2"] = u(ks[2], (64, 128), 64), u(ks[3], (1, 128), 64)
    p["g2"], p["be2"] = jnp.ones((1, 128), jnp.float32), jnp.zeros((1, 128), jnp.float32)
    p["w3"], p["b3"] = u(ks[4], (128, 1024), 128), u(ks[5], (1, 1024), 128)
    p["g3"], p["be3"] = jnp.ones((1, 1024), jnp.float32), jnp.zeros((1, 1024), jnp.float32)
    p["wf1"], p["bf1"] = u(ks[6], (1024, 512), 1024), u(ks[7], (1, 512), 1024)
    p["wf2"], p["bf2"] = u(ks[8], (512, 256), 512), u(ks[9], (1, 256), 512)
    p["wf3"], p["bf3"] = u(ks[10], (256, 4096), 256), u(ks[11], (1, 4096), 256)
    return p


if __name__ == "__main__":
    key = jax.random.PRNGKey(0)
    k_param, k_x = jax.random.split(key)

    B, C, N = 2, 64, 16                                   # small point cloud
    params = init_params(k_param)
    x = jax.random.normal(k_x, (B, C, N), jnp.float32)

    fwd = jax.jit(functools.partial(stn64d_forward, params=params))
    out = fwd(x)
    jax.block_until_ready(out)

    assert out.shape == (B, 64, 64)
    assert jnp.all(jnp.isfinite(out))

    ref = stn64d_reference(x, params)
    assert jnp.allclose(out, ref, atol=1e-1, rtol=1e-1), (
        float(jnp.max(jnp.abs(out - ref))))
    print("KERNEL_OK")
</pallas_src>

<mosaic_0001>
module attributes {stable_mosaic.version = 11 : i64} {
  func.func @stn64d_kernel(%arg0: i32, %arg1: i32, %arg2: i32, %arg3: memref<1x16x64xbf16, #tpu.memory_space<vmem>>, %arg4: memref<64x64xbf16, #tpu.memory_space<vmem>>, %arg5: memref<1x64xf32, #tpu.memory_space<vmem>>, %arg6: memref<1x64xf32, #tpu.memory_space<vmem>>, %arg7: memref<1x64xf32, #tpu.memory_space<vmem>>, %arg8: memref<64x128xbf16, #tpu.memory_space<vmem>>, %arg9: memref<1x128xf32, #tpu.memory_space<vmem>>, %arg10: memref<1x128xf32, #tpu.memory_space<vmem>>, %arg11: memref<1x128xf32, #tpu.memory_space<vmem>>, %arg12: memref<128x1024xbf16, #tpu.memory_space<vmem>>, %arg13: memref<1x1024xf32, #tpu.memory_space<vmem>>, %arg14: memref<1x1024xf32, #tpu.memory_space<vmem>>, %arg15: memref<1x1024xf32, #tpu.memory_space<vmem>>, %arg16: memref<1024x512xbf16, #tpu.memory_space<vmem>>, %arg17: memref<1x512xf32, #tpu.memory_space<vmem>>, %arg18: memref<512x256xbf16, #tpu.memory_space<vmem>>, %arg19: memref<1x256xf32, #tpu.memory_space<vmem>>, %arg20: memref<256x4096xbf16, #tpu.memory_space<vmem>>, %arg21: memref<1x4096xf32, #tpu.memory_space<vmem>>, %arg22: memref<2x4096xf32, #tpu.memory_space<vmem>>, %arg23: memref<1x64xf32, #tpu.memory_space<vmem>>, %arg24: memref<1x64xf32, #tpu.memory_space<vmem>>, %arg25: memref<1x128xf32, #tpu.memory_space<vmem>>, %arg26: memref<1x128xf32, #tpu.memory_space<vmem>>, %arg27: memref<1x1024xf32, #tpu.memory_space<vmem>>, %arg28: memref<1x1024xf32, #tpu.memory_space<vmem>>, %arg29: memref<2x1024xf32, #tpu.memory_space<vmem>>, %arg30: memref<2x1024xf32, #tpu.memory_space<vmem>>) attributes {dimension_semantics = [#tpu.dimension_semantics<arbitrary>, #tpu.dimension_semantics<arbitrary>, #tpu.dimension_semantics<arbitrary>], iteration_bounds = array<i64: 3, 2, 1>, scalar_prefetch = 0 : i64, scratch_operands = 8 : i64, tpu.core_type = #tpu.core_type<tc>, window_params = [{transform_indices = @transform_0, window_bounds = array<i64: 1, 16, 64>}, {pipeline_mode = #tpu.pipeline_mode<synchronous>, transform_indices = @transform_1, window_bounds = array<i64: 64, 64>}, {pipeline_mode = #tpu.pipeline_mode<synchronous>, transform_indices = @transform_2, window_bounds = array<i64: 1, 64>}, {pipeline_mode = #tpu.pipeline_mode<synchronous>, transform_indices = @transform_3, window_bounds = array<i64: 1, 64>}, {pipeline_mode = #tpu.pipeline_mode<synchronous>, transform_indices = @transform_4, window_bounds = array<i64: 1, 64>}, {pipeline_mode = #tpu.pipeline_mode<synchronous>, transform_indices = @transform_5, window_bounds = array<i64: 64, 128>}, {pipeline_mode = #tpu.pipeline_mode<synchronous>, transform_indices = @transform_6, window_bounds = array<i64: 1, 128>}, {pipeline_mode = #tpu.pipeline_mode<synchronous>, transform_indices = @transform_7, window_bounds = array<i64: 1, 128>}, {pipeline_mode = #tpu.pipeline_mode<synchronous>, transform_indices = @transform_8, window_bounds = array<i64: 1, 128>}, {pipeline_mode = #tpu.pipeline_mode<synchronous>, transform_indices = @transform_9, window_bounds = array<i64: 128, 1024>}, {pipeline_mode = #tpu.pipeline_mode<synchronous>, transform_indices = @transform_10, window_bounds = array<i64: 1, 1024>}, {pipeline_mode = #tpu.pipeline_mode<synchronous>, transform_indices = @transform_11, window_bounds = array<i64: 1, 1024>}, {pipeline_mode = #tpu.pipeline_mode<synchronous>, transform_indices = @transform_12, window_bounds = array<i64: 1, 1024>}, {pipeline_mode = #tpu.pipeline_mode<synchronous>, transform_indices = @transform_13, window_bounds = array<i64: 1024, 512>}, {pipeline_mode = #tpu.pipeline_mode<synchronous>, transform_indices = @transform_14, window_bounds = array<i64: 1, 512>}, {pipeline_mode = #tpu.pipeline_mode<synchronous>, transform_indices = @transform_15, window_bounds = array<i64: 512, 256>}, {pipeline_mode = #tpu.pipeline_mode<synchronous>, transform_indices = @transform_16, window_bounds = array<i64: 1, 256>}, {pipeline_mode = #tpu.pipeline_mode<synchronous>, transform_indices = @transform_17, window_bounds = array<i64: 256, 4096>}, {pipeline_mode = #tpu.pipeline_mode<synchronous>, transform_indices = @transform_18, window_bounds = array<i64: 1, 4096>}, {pipeline_mode = #tpu.pipeline_mode<synchronous>, transform_indices = @transform_19, window_bounds = array<i64: 2, 4096>}]} {
    %c0 = arith.constant 0 : index
    %c0_0 = arith.constant 0 : index
    %c0_1 = arith.constant 0 : index
    %0 = vector.load %arg3[%c0, %c0_0, %c0_1] : memref<1x16x64xbf16, #tpu.memory_space<vmem>>, vector<1x16x64xbf16>
    %1 = vector.shape_cast %0 : vector<1x16x64xbf16> to vector<16x64xbf16>
    %c0_i32 = arith.constant 0 : i32
    %2 = arith.cmpi eq, %arg0, %c0_i32 : i32
    %c0_i32_2 = arith.constant 0 : i32
    %3 = arith.cmpi eq, %arg1, %c0_i32_2 : i32
    %4 = arith.andi %2, %3 : i1
    %c0_i32_3 = arith.constant 0 : i32
    %5 = arith.cmpi eq, %arg2, %c0_i32_3 : i32
    %6 = arith.andi %4, %5 : i1
    %7 = arith.extui %6 : i1 to i32
    %c0_i32_4 = arith.constant 0 : i32
    %8 = arith.cmpi ne, %7, %c0_i32_4 : i32
    scf.if %8 {
      %cst = arith.constant 0.000000e+00 : f32
      %25 = vector.broadcast %cst : f32 to vector<1x64xf32>
      %c0_13 = arith.constant 0 : index
      %c0_14 = arith.constant 0 : index
      %26 = vector.load %arg23[%c0_13, %c0_14] : memref<1x64xf32, #tpu.memory_space<vmem>>, vector<1x64xf32>
      tpu.vector_store %arg23[%c0_13, %c0_14], %25 {strides = array<i32>} : memref<1x64xf32, #tpu.memory_space<vmem>>, vector<1x64xf32>,
      %cst_15 = arith.constant 0.000000e+00 : f32
      %27 = vector.broadcast %cst_15 : f32 to vector<1x64xf32>
      %c0_16 = arith.constant 0 : index
      %c0_17 = arith.constant 0 : index
      %28 = vector.load %arg24[%c0_16, %c0_17] : memref<1x64xf32, #tpu.memory_space<vmem>>, vector<1x64xf32>
      tpu.vector_store %arg24[%c0_16, %c0_17], %27 {strides = array<i32>} : memref<1x64xf32, #tpu.memory_space<vmem>>, vector<1x64xf32>,
      %cst_18 = arith.constant 0.000000e+00 : f32
      %29 = vector.broadcast %cst_18 : f32 to vector<1x128xf32>
      %c0_19 = arith.constant 0 : index
      %c0_20 = arith.constant 0 : index
      %30 = vector.load %arg25[%c0_19, %c0_20] : memref<1x128xf32, #tpu.memory_space<vmem>>, vector<1x128xf32>
      tpu.vector_store %arg25[%c0_19, %c0_20], %29 {strides = array<i32>} : memref<1x128xf32, #tpu.memory_space<vmem>>, vector<1x128xf32>,
      %cst_21 = arith.constant 0.000000e+00 : f32
      %31 = vector.broadcast %cst_21 : f32 to vector<1x128xf32>
      %c0_22 = arith.constant 0 : index
      %c0_23 = arith.constant 0 : index
      %32 = vector.load %arg26[%c0_22, %c0_23] : memref<1x128xf32, #tpu.memory_space<vmem>>, vector<1x128xf32>
      tpu.vector_store %arg26[%c0_22, %c0_23], %31 {strides = array<i32>} : memref<1x128xf32, #tpu.memory_space<vmem>>, vector<1x128xf32>,
      %cst_24 = arith.constant 0.000000e+00 : f32
      %33 = vector.broadcast %cst_24 : f32 to vector<1x1024xf32>
      %c0_25 = arith.constant 0 : index
      %c0_26 = arith.constant 0 : index
      %34 = vector.load %arg27[%c0_25, %c0_26] : memref<1x1024xf32, #tpu.memory_space<vmem>>, vector<1x1024xf32>
      tpu.vector_store %arg27[%c0_25, %c0_26], %33 {strides = array<i32>} : memref<1x1024xf32, #tpu.memory_space<vmem>>, vector<1x1024xf32>,
      %cst_27 = arith.constant 0.000000e+00 : f32
      %35 = vector.broadcast %cst_27 : f32 to vector<1x1024xf32>
      %c0_28 = arith.constant 0 : index
      %c0_29 = arith.constant 0 : index
      %36 = vector.load %arg28[%c0_28, %c0_29] : memref<1x1024xf32, #tpu.memory_space<vmem>>, vector<1x1024xf32>
      tpu.vector_store %arg28[%c0_28, %c0_29], %35 {strides = array<i32>} : memref<1x1024xf32, #tpu.memory_space<vmem>>, vector<1x1024xf32>,
      %cst_30 = arith.constant 0xFF800000 : f32
      %37 = vector.broadcast %cst_30 : f32 to vector<2x1024xf32>
      %c0_31 = arith.constant 0 : index
      %c0_32 = arith.constant 0 : index
      %38 = vector.load %arg29[%c0_31, %c0_32] : memref<2x1024xf32, #tpu.memory_space<vmem>>, vector<2x1024xf32>
      tpu.vector_store %arg29[%c0_31, %c0_32], %37 {strides = array<i32>} : memref<2x1024xf32, #tpu.memory_space<vmem>>, vector<2x1024xf32>,
      %cst_33 = arith.constant 0x7F800000 : f32
      %39 = vector.broadcast %cst_33 : f32 to vector<2x1024xf32>
      %c0_34 = arith.constant 0 : index
      %c0_35 = arith.constant 0 : index
      %40 = vector.load %arg30[%c0_34, %c0_35] : memref<2x1024xf32, #tpu.memory_space<vmem>>, vector<2x1024xf32>
      tpu.vector_store %arg30[%c0_34, %c0_35], %39 {strides = array<i32>} : memref<2x1024xf32, #tpu.memory_space<vmem>>, vector<2x1024xf32>,
    } else {
    }
    %c0_i32_5 = arith.constant 0 : i32
    %9 = arith.cmpi eq, %arg0, %c0_i32_5 : i32
    %10 = arith.extui %9 : i1 to i32
    %c0_i32_6 = arith.constant 0 : i32
    %11 = arith.cmpi ne, %10, %c0_i32_6 : i32
    scf.if %11 {
      %c0_13 = arith.constant 0 : index
      %c0_14 = arith.constant 0 : index
      %25 = vector.load %arg4[%c0_13, %c0_14] : memref<64x64xbf16, #tpu.memory_space<vmem>>, vector<64x64xbf16>
      %cst = arith.constant dense<0.000000e+00> : vector<16x64xf32>
      %26 = tpu.matmul %1, %25, %cst {dimension_numbers = #tpu.dot_dimension_numbers<[1], [0], [0], [1], [0, 0, 1, 1], [], []>} : vector<16x64xbf16>, vector<64x64xbf16>, vector<16x64xf32> -> vector<16x64xf32>
      %c0_15 = arith.constant 0 : index
      %c0_16 = arith.constant 0 : index
      %27 = vector.load %arg5[%c0_15, %c0_16] : memref<1x64xf32, #tpu.memory_space<vmem>>, vector<1x64xf32>
      %28 = vector.broadcast %27 : vector<1x64xf32> to vector<16x64xf32>
      %29 = arith.addf %26, %28 : vector<16x64xf32>
      %cst_17 = arith.constant 1.000000e+00 : f32
      %30 = vector.broadcast %cst_17 : f32 to vector<1x16xf32>
      %c0_18 = arith.constant 0 : index
      %c0_19 = arith.constant 0 : index
      %31 = vector.load %arg23[%c0_18, %c0_19] : memref<1x64xf32, #tpu.memory_space<vmem>>, vector<1x64xf32>
      %cst_20 = arith.constant dense<0.000000e+00> : vector<1x64xf32>
      %32 = tpu.matmul %30, %29, %cst_20 {dimension_numbers = #tpu.dot_dimension_numbers<[1], [0], [0], [1], [0, 0, 1, 1], [], []>} : vector<1x16xf32>, vector<16x64xf32>, vector<1x64xf32> -> vector<1x64xf32>
      %33 = arith.addf %31, %32 : vector<1x64xf32>
      %c0_21 = arith.constant 0 : index
      %c0_22 = arith.constant 0 : index
      %34 = vector.load %arg23[%c0_21, %c0_22] : memref<1x64xf32, #tpu.memory_space<vmem>>, vector<1x64xf32>
      tpu.vector_store %arg23[%c0_21, %c0_22], %33 {strides = array<i32>} : memref<1x64xf32, #tpu.memory_space<vmem>>, vector<1x64xf32>,
      %c0_23 = arith.constant 0 : index
      %c0_24 = arith.constant 0 : index
      %35 = vector.load %arg24[%c0_23, %c0_24] : memref<1x64xf32, #tpu.memory_space<vmem>>, vector<1x64xf32>
      %36 = arith.mulf %29, %29 : vector<16x64xf32>
      %cst_25 = arith.constant dense<0.000000e+00> : vector<1x64xf32>
      %37 = tpu.matmul %30, %36, %cst_25 {dimension_numbers = #tpu.dot_dimension_numbers<[1], [0], [0], [1], [0, 0, 1, 1], [], []>} : vector<1x16xf32>, vector<16x64xf32>, vector<1x64xf32> -> vector<1x64xf32>
      %38 = arith.addf %35, %37 : vector<1x64xf32>
      %c0_26 = arith.constant 0 : index
      %c0_27 = arith.constant 0 : index
      %39 = vector.load %arg24[%c0_26, %c0_27] : memref<1x64xf32, #tpu.memory_space<vmem>>, vector<1x64xf32>
      tpu.vector_store %arg24[%c0_26, %c0_27], %38 {strides = array<i32>} : memref<1x64xf32, #tpu.memory_space<vmem>>, vector<1x64xf32>,
    } else {
    }
    %c1_i32 = arith.constant 1 : i32
    %12 = arith.cmpi eq, %arg0, %c1_i32 : i32
    %13 = arith.extui %12 : i1 to i32
    %c0_i32_7 = arith.constant 0 : i32
    %14 = arith.cmpi ne, %13, %c0_i32_7 : i32
    scf.if %14 {
      %c0_13 = arith.constant 0 : index
      %c0_14 = arith.constant 0 : index
      %25 = vector.load %arg23[%c0_13, %c0_14] : memref<1x64xf32, #tpu.memory_space<vmem>>, vector<1x64xf32>
      %cst = arith.constant 3.125000e-02 : f32
      %26 = vector.broadcast %cst : f32 to vector<1x64xf32>
      %27 = arith.mulf %25, %26 : vector<1x64xf32>
      %c0_15 = arith.constant 0 : index
      %c0_16 = arith.constant 0 : index
      %28 = vector.load %arg24[%c0_15, %c0_16] : memref<1x64xf32, #tpu.memory_space<vmem>>, vector<1x64xf32>
      %cst_17 = arith.constant 3.125000e-02 : f32
      %29 = vector.broadcast %cst_17 : f32 to vector<1x64xf32>
      %30 = arith.mulf %28, %29 : vector<1x64xf32>
      %31 = arith.mulf %27, %27 : vector<1x64xf32>
      %32 = arith.subf %30, %31 : vector<1x64xf32>
      %cst_18 = arith.constant 0.000000e+00 : f32
      %33 = vector.broadcast %cst_18 : f32 to vector<1x64xf32>
      %34 = arith.maximumf %32, %33 : vector<1x64xf32>
      %c0_19 = arith.constant 0 : index
      %c0_20 = arith.constant 0 : index
      %35 = vector.load %arg6[%c0_19, %c0_20] : memref<1x64xf32, #tpu.memory_space<vmem>>, vector<1x64xf32>
      %cst_21 = arith.constant 9.99999974E-6 : f32
      %36 = vector.broadcast %cst_21 : f32 to vector<1x64xf32>
      %37 = arith.addf %34, %36 : vector<1x64xf32>
      %38 = math.rsqrt %37 : vector<1x64xf32>
      %39 = arith.mulf %35, %38 : vector<1x64xf32>
      %c0_22 = arith.constant 0 : index
      %c0_23 = arith.constant 0 : index
      %40 = vector.load %arg7[%c0_22, %c0_23] : memref<1x64xf32, #tpu.memory_space<vmem>>, vector<1x64xf32>
      %41 = arith.mulf %27, %39 : vector<1x64xf32>
      %42 = arith.subf %40, %41 : vector<1x64xf32>
      %c0_24 = arith.constant 0 : index
      %c0_25 = arith.constant 0 : index
      %43 = vector.load %arg4[%c0_24, %c0_25] : memref<64x64xbf16, #tpu.memory_space<vmem>>, vector<64x64xbf16>
      %cst_26 = arith.constant dense<0.000000e+00> : vector<16x64xf32>
      %44 = tpu.matmul %1, %43, %cst_26 {dimension_numbers = #tpu.dot_dimension_numbers<[1], [0], [0], [1], [0, 0, 1, 1], [], []>} : vector<16x64xbf16>, vector<64x64xbf16>, vector<16x64xf32> -> vector<16x64xf32>
      %c0_27 = arith.constant 0 : index
      %c0_28 = arith.constant 0 : index
      %45 = vector.load %arg5[%c0_27, %c0_28] : memref<1x64xf32, #tpu.memory_space<vmem>>, vector<1x64xf32>
      %46 = vector.broadcast %45 : vector<1x64xf32> to vector<16x64xf32>
      %47 = arith.addf %44, %46 : vector<16x64xf32>
      %48 = vector.broadcast %39 : vector<1x64xf32> to vector<16x64xf32>
      %49 = arith.mulf %47, %48 : vector<16x64xf32>
      %50 = vector.broadcast %42 : vector<1x64xf32> to vector<16x64xf32>
      %51 = arith.addf %49, %50 : vector<16x64xf32>
      %cst_29 = arith.constant 0.000000e+00 : f32
      %52 = vector.broadcast %cst_29 : f32 to vector<16x64xf32>
      %53 = arith.maximumf %51, %52 : vector<16x64xf32>
      %54 = arith.truncf %53 : vector<16x64xf32> to vector<16x64xbf16>
      %c0_30 = arith.constant 0 : index
      %c0_31 = arith.constant 0 : index
      %55 = vector.load %arg8[%c0_30, %c0_31] : memref<64x128xbf16, #tpu.memory_space<vmem>>, vector<64x128xbf16>
      %cst_32 = arith.constant dense<0.000000e+00> : vector<16x128xf32>
      %56 = tpu.matmul %54, %55, %cst_32 {dimension_numbers = #tpu.dot_dimension_numbers<[1], [0], [0], [1], [0, 0, 1, 1], [], []>} : vector<16x64xbf16>, vector<64x128xbf16>, vector<16x128xf32> -> vector<16x128xf32>
      %c0_33 = arith.constant 0 : index
      %c0_34 = arith.constant 0 : index
      %57 = vector.load %arg9[%c0_33, %c0_34] : memref<1x128xf32, #tpu.memory_space<vmem>>, vector<1x128xf32>
      %58 = vector.broadcast %57 : vector<1x128xf32> to vector<16x128xf32>
      %59 = arith.addf %56, %58 : vector<16x128xf32>
      %cst_35 = arith.constant 1.000000e+00 : f32
      %60 = vector.broadcast %cst_35 : f32 to vector<1x16xf32>
      %c0_36 = arith.constant 0 : index
      %c0_37 = arith.constant 0 : index
      %61 = vector.load %arg25[%c0_36, %c0_37] : memref<1x128xf32, #tpu.memory_space<vmem>>, vector<1x128xf32>
      %cst_38 = arith.constant dense<0.000000e+00> : vector<1x128xf32>
      %62 = tpu.matmul %60, %59, %cst_38 {dimension_numbers = #tpu.dot_dimension_numbers<[1], [0], [0], [1], [0, 0, 1, 1], [], []>} : vector<1x16xf32>, vector<16x128xf32>, vector<1x128xf32> -> vector<1x128xf32>
      %63 = arith.addf %61, %62 : vector<1x128xf32>
      %c0_39 = arith.constant 0 : index
      %c0_40 = arith.constant 0 : index
      %64 = vector.load %arg25[%c0_39, %c0_40] : memref<1x128xf32, #tpu.memory_space<vmem>>, vector<1x128xf32>
      tpu.vector_store %arg25[%c0_39, %c0_40], %63 {strides = array<i32>} : memref<1x128xf32, #tpu.memory_space<vmem>>, vector<1x128xf32>,
      %c0_41 = arith.constant 0 : index
      %c0_42 = arith.constant 0 : index
      %65 = vector.load %arg26[%c0_41, %c0_42] : memref<1x128xf32, #tpu.memory_space<vmem>>, vector<1x128xf32>
      %66 = arith.mulf %59, %59 : vector<16x128xf32>
      %cst_43 = arith.constant dense<0.000000e+00> : vector<1x128xf32>
      %67 = tpu.matmul %60, %66, %cst_43 {dimension_numbers = #tpu.dot_dimension_numbers<[1], [0], [0], [1], [0, 0, 1, 1], [], []>} : vector<1x16xf32>, vector<16x128xf32>, vector<1x128xf32> -> vector<1x128xf32>
      %68 = arith.addf %65, %67 : vector<1x128xf32>
      %c0_44 = arith.constant 0 : index
      %c0_45 = arith.constant 0 : index
      %69 = vector.load %arg26[%c0_44, %c0_45] : memref<1x128xf32, #tpu.memory_space<vmem>>, vector<1x128xf32>
      tpu.vector_store %arg26[%c0_44, %c0_45], %68 {strides = array<i32>} : memref<1x128xf32, #tpu.memory_space<vmem>>, vector<1x128xf32>,
    } else {
    }
    %c2_i32 = arith.constant 2 : i32
    %15 = arith.cmpi eq, %arg0, %c2_i32 : i32
    %16 = arith.extui %15 : i1 to i32
    %c0_i32_8 = arith.constant 0 : i32
    %17 = arith.cmpi ne, %16, %c0_i32_8 : i32
    scf.if %17 {
      %c0_13 = arith.constant 0 : index
      %c0_14 = arith.constant 0 : index
      %25 = vector.load %arg25[%c0_13, %c0_14] : memref<1x128xf32, #tpu.memory_space<vmem>>, vector<1x128xf32>
      %cst = arith.constant 3.125000e-02 : f32
      %26 = vector.broadcast %cst : f32 to vector<1x128xf32>
      %27 = arith.mulf %25, %26 : vector<1x128xf32>
      %c0_15 = arith.constant 0 : index
      %c0_16 = arith.constant 0 : index
      %28 = vector.load %arg26[%c0_15, %c0_16] : memref<1x128xf32, #tpu.memory_space<vmem>>, vector<1x128xf32>
      %cst_17 = arith.constant 3.125000e-02 : f32
      %29 = vector.broadcast %cst_17 : f32 to vector<1x128xf32>
      %30 = arith.mulf %28, %29 : vector<1x128xf32>
      %31 = arith.mulf %27, %27 : vector<1x128xf32>
      %32 = arith.subf %30, %31 : vector<1x128xf32>
      %cst_18 = arith.constant 0.000000e+00 : f32
      %33 = vector.broadcast %cst_18 : f32 to vector<1x128xf32>
      %34 = arith.maximumf %32, %33 : vector<1x128xf32>
      %c0_19 = arith.constant 0 : index
      %c0_20 = arith.constant 0 : index
      %35 = vector.load %arg10[%c0_19, %c0_20] : memref<1x128xf32, #tpu.memory_space<vmem>>, vector<1x128xf32>
      %cst_21 = arith.constant 9.99999974E-6 : f32
      %36 = vector.broadcast %cst_21 : f32 to vector<1x128xf32>
      %37 = arith.addf %34, %36 : vector<1x128xf32>
      %38 = math.rsqrt %37 : vector<1x128xf32>
      %39 = arith.mulf %35, %38 : vector<1x128xf32>
      %c0_22 = arith.constant 0 : index
      %c0_23 = arith.constant 0 : index
      %40 = vector.load %arg11[%c0_22, %c0_23] : memref<1x128xf32, #tpu.memory_space<vmem>>, vector<1x128xf32>
      %41 = arith.mulf %27, %39 : vector<1x128xf32>
      %42 = arith.subf %40, %41 : vector<1x128xf32>
      %c0_24 = arith.constant 0 : index
      %c0_25 = arith.constant 0 : index
      %43 = vector.load %arg23[%c0_24, %c0_25] : memref<1x64xf32, #tpu.memory_space<vmem>>, vector<1x64xf32>
      %cst_26 = arith.constant 3.125000e-02 : f32
      %44 = vector.broadcast %cst_26 : f32 to vector<1x64xf32>
      %45 = arith.mulf %43, %44 : vector<1x64xf32>
      %c0_27 = arith.constant 0 : index
      %c0_28 = arith.constant 0 : index
      %46 = vector.load %arg24[%c0_27, %c0_28] : memref<1x64xf32, #tpu.memory_space<vmem>>, vector<1x64xf32>
      %cst_29 = arith.constant 3.125000e-02 : f32
      %47 = vector.broadcast %cst_29 : f32 to vector<1x64xf32>
      %48 = arith.mulf %46, %47 : vector<1x64xf32>
      %49 = arith.mulf %45, %45 : vector<1x64xf32>
      %50 = arith.subf %48, %49 : vector<1x64xf32>
      %cst_30 = arith.constant 0.000000e+00 : f32
      %51 = vector.broadcast %cst_30 : f32 to vector<1x64xf32>
      %52 = arith.maximumf %50, %51 : vector<1x64xf32>
      %c0_31 = arith.constant 0 : index
      %c0_32 = arith.constant 0 : index
      %53 = vector.load %arg6[%c0_31, %c0_32] : memref<1x64xf32, #tpu.memory_space<vmem>>, vector<1x64xf32>
      %cst_33 = arith.constant 9.99999974E-6 : f32
      %54 = vector.broadcast %cst_33 : f32 to vector<1x64xf32>
      %55 = arith.addf %52, %54 : vector<1x64xf32>
      %56 = math.rsqrt %55 : vector<1x64xf32>
      %57 = arith.mulf %53, %56 : vector<1x64xf32>
      %c0_34 = arith.constant 0 : index
      %c0_35 = arith.constant 0 : index
      %58 = vector.load %arg7[%c0_34, %c0_35] : memref<1x64xf32, #tpu.memory_space<vmem>>, vector<1x64xf32>
      %59 = arith.mulf %45, %57 : vector<1x64xf32>
      %60 = arith.subf %58, %59 : vector<1x64xf32>
      %c0_36 = arith.constant 0 : index
      %c0_37 = arith.constant 0 : index
      %61 = vector.load %arg4[%c0_36, %c0_37] : memref<64x64xbf16, #tpu.memory_space<vmem>>, vector<64x64xbf16>
      %cst_38 = arith.constant dense<0.000000e+00> : vector<16x64xf32>
      %62 = tpu.matmul %1, %61, %cst_38 {dimension_numbers = #tpu.dot_dimension_numbers<[1], [0], [0], [1], [0, 0, 1, 1], [], []>} : vector<16x64xbf16>, vector<64x64xbf16>, vector<16x64xf32> -> vector<16x64xf32>
      %c0_39 = arith.constant 0 : index
      %c0_40 = arith.constant 0 : index
      %63 = vector.load %arg5[%c0_39, %c0_40] : memref<1x64xf32, #tpu.memory_space<vmem>>, vector<1x64xf32>
      %64 = vector.broadcast %63 : vector<1x64xf32> to vector<16x64xf32>
      %65 = arith.addf %62, %64 : vector<16x64xf32>
      %66 = vector.broadcast %57 : vector<1x64xf32> to vector<16x64xf32>
      %67 = arith.mulf %65, %66 : vector<16x64xf32>
      %68 = vector.broadcast %60 : vector<1x64xf32> to vector<16x64xf32>
      %69 = arith.addf %67, %68 : vector<16x64xf32>
      %cst_41 = arith.constant 0.000000e+00 : f32
      %70 = vector.broadcast %cst_41 : f32 to vector<16x64xf32>
      %71 = arith.maximumf %69, %70 : vector<16x64xf32>
      %72 = arith.truncf %71 : vector<16x64xf32> to vector<16x64xbf16>
      %c0_42 = arith.constant 0 : index
      %c0_43 = arith.constant 0 : index
      %73 = vector.load %arg8[%c0_42, %c0_43] : memref<64x128xbf16, #tpu.memory_space<vmem>>, vector<64x128xbf16>
      %cst_44 = arith.constant dense<0.000000e+00> : vector<16x128xf32>
      %74 = tpu.matmul %72, %73, %cst_44 {dimension_numbers = #tpu.dot_dimension_numbers<[1], [0], [0], [1], [0, 0, 1, 1], [], []>} : vector<16x64xbf16>, vector<64x128xbf16>, vector<16x128xf32> -> vector<16x128xf32>
      %c0_45 = arith.constant 0 : index
      %c0_46 = arith.constant 0 : index
      %75 = vector.load %arg9[%c0_45, %c0_46] : memref<1x128xf32, #tpu.memory_space<vmem>>, vector<1x128xf32>
      %76 = vector.broadcast %75 : vector<1x128xf32> to vector<16x128xf32>
      %77 = arith.addf %74, %76 : vector<16x128xf32>
      %78 = vector.broadcast %39 : vector<1x128xf32> to vector<16x128xf32>
      %79 = arith.mulf %77, %78 : vector<16x128xf32>
      %80 = vector.broadcast %42 : vector<1x128xf32> to vector<16x128xf32>
      %81 = arith.addf %79, %80 : vector<16x128xf32>
      %cst_47 = arith.constant 0.000000e+00 : f32
      %82 = vector.broadcast %cst_47 : f32 to vector<16x128xf32>
      %83 = arith.maximumf %81, %82 : vector<16x128xf32>
      %84 = arith.truncf %83 : vector<16x128xf32> to vector<16x128xbf16>
      %c0_48 = arith.constant 0 : index
      %c0_49 = arith.constant 0 : index
      %85 = vector.load %arg12[%c0_48, %c0_49] : memref<128x1024xbf16, #tpu.memory_space<vmem>>, vector<128x1024xbf16>
      %cst_50 = arith.constant dense<0.000000e+00> : vector<16x1024xf32>
      %86 = tpu.matmul %84, %85, %cst_50 {dimension_numbers = #tpu.dot_dimension_numbers<[1], [0], [0], [1], [0, 0, 1, 1], [], []>} : vector<16x128xbf16>, vector<128x1024xbf16>, vector<16x1024xf32> -> vector<16x1024xf32>
      %c0_51 = arith.constant 0 : index
      %c0_52 = arith.constant 0 : index
      %87 = vector.load %arg13[%c0_51, %c0_52] : memref<1x1024xf32, #tpu.memory_space<vmem>>, vector<1x1024xf32>
      %88 = vector.broadcast %87 : vector<1x1024xf32> to vector<16x1024xf32>
      %89 = arith.addf %86, %88 : vector<16x1024xf32>
      %cst_53 = arith.constant 1.000000e+00 : f32
      %90 = vector.broadcast %cst_53 : f32 to vector<1x16xf32>
      %c0_54 = arith.constant 0 : index
      %c0_55 = arith.constant 0 : index
      %91 = vector.load %arg27[%c0_54, %c0_55] : memref<1x1024xf32, #tpu.memory_space<vmem>>, vector<1x1024xf32>
      %cst_56 = arith.constant dense<0.000000e+00> : vector<1x1024xf32>
      %92 = tpu.matmul %90, %89, %cst_56 {dimension_numbers = #tpu.dot_dimension_numbers<[1], [0], [0], [1], [0, 0, 1, 1], [], []>} : vector<1x16xf32>, vector<16x1024xf32>, vector<1x1024xf32> -> vector<1x1024xf32>
      %93 = arith.addf %91, %92 : vector<1x1024xf32>
      %c0_57 = arith.constant 0 : index
      %c0_58 = arith.constant 0 : index
      %94 = vector.load %arg27[%c0_57, %c0_58] : memref<1x1024xf32, #tpu.memory_space<vmem>>, vector<1x1024xf32>
      tpu.vector_store %arg27[%c0_57, %c0_58], %93 {strides = array<i32>} : memref<1x1024xf32, #tpu.memory_space<vmem>>, vector<1x1024xf32>,
      %c0_59 = arith.constant 0 : index
      %c0_60 = arith.constant 0 : index
      %95 = vector.load %arg28[%c0_59, %c0_60] : memref<1x1024xf32, #tpu.memory_space<vmem>>, vector<1x1024xf32>
      %96 = arith.mulf %89, %89 : vector<16x1024xf32>
      %cst_61 = arith.constant dense<0.000000e+00> : vector<1x1024xf32>
      %97 = tpu.matmul %90, %96, %cst_61 {dimension_numbers = #tpu.dot_dimension_numbers<[1], [0], [0], [1], [0, 0, 1, 1], [], []>} : vector<1x16xf32>, vector<16x1024xf32>, vector<1x1024xf32> -> vector<1x1024xf32>
      %98 = arith.addf %95, %97 : vector<1x1024xf32>
      %c0_62 = arith.constant 0 : index
      %c0_63 = arith.constant 0 : index
      %99 = vector.load %arg28[%c0_62, %c0_63] : memref<1x1024xf32, #tpu.memory_space<vmem>>, vector<1x1024xf32>
      tpu.vector_store %arg28[%c0_62, %c0_63], %98 {strides = array<i32>} : memref<1x1024xf32, #tpu.memory_space<vmem>>, vector<1x1024xf32>,
      %cst_64 = arith.constant dense<0xFF800000> : vector<1024xf32>
      %100 = vector.multi_reduction <maximumf>, %89, %cst_64 [0] : vector<16x1024xf32> to vector<1024xf32>
      %101 = vector.shape_cast %100 : vector<1024xf32> to vector<1x1024xf32>
      %cst_65 = arith.constant dense<0x7F800000> : vector<1024xf32>
      %102 = vector.multi_reduction <minimumf>, %89, %cst_65 [0] : vector<16x1024xf32> to vector<1024xf32>
      %103 = vector.shape_cast %102 : vector<1024xf32> to vector<1x1024xf32>
      %104 = tpu.iota {dimensions = array<i32: 0>} : vector<2x1xi32>
      %105 = vector.broadcast %arg1 : i32 to vector<2x1xi32>
      %106 = arith.cmpi eq, %104, %105 : vector<2x1xi32>
      %c0_66 = arith.constant 0 : index
      %c0_67 = arith.constant 0 : index
      %107 = vector.load %arg29[%c0_66, %c0_67] : memref<2x1024xf32, #tpu.memory_space<vmem>>, vector<2x1024xf32>
      %108 = vector.broadcast %101 : vector<1x1024xf32> to vector<2x1024xf32>
      %109 = arith.maximumf %107, %108 : vector<2x1024xf32>
      %c0_68 = arith.constant 0 : index
      %c0_69 = arith.constant 0 : index
      %110 = vector.load %arg29[%c0_68, %c0_69] : memref<2x1024xf32, #tpu.memory_space<vmem>>, vector<2x1024xf32>
      %111 = vector.shape_cast %106 : vector<2x1xi1> to vector<2x1xi1>
      %112 = vector.broadcast %111 : vector<2x1xi1> to vector<2x1024xi1>
      %113 = arith.select %112, %109, %110 : vector<2x1024xi1>, vector<2x1024xf32>
      %c0_70 = arith.constant 0 : index
      %c0_71 = arith.constant 0 : index
      %114 = vector.load %arg29[%c0_70, %c0_71] : memref<2x1024xf32, #tpu.memory_space<vmem>>, vector<2x1024xf32>
      tpu.vector_store %arg29[%c0_70, %c0_71], %113 {strides = array<i32>} : memref<2x1024xf32, #tpu.memory_space<vmem>>, vector<2x1024xf32>,
      %c0_72 = arith.constant 0 : index
      %c0_73 = arith.constant 0 : index
      %115 = vector.load %arg30[%c0_72, %c0_73] : memref<2x1024xf32, #tpu.memory_space<vmem>>, vector<2x1024xf32>
      %116 = vector.broadcast %103 : vector<1x1024xf32> to vector<2x1024xf32>
      %117 = arith.minimumf %115, %116 : vector<2x1024xf32>
      %c0_74 = arith.constant 0 : index
      %c0_75 = arith.constant 0 : index
      %118 = vector.load %arg30[%c0_74, %c0_75] : memref<2x1024xf32, #tpu.memory_space<vmem>>, vector<2x1024xf32>
      %119 = vector.shape_cast %106 : vector<2x1xi1> to vector<2x1xi1>
      %120 = vector.broadcast %119 : vector<2x1xi1> to vector<2x1024xi1>
      %121 = arith.select %120, %117, %118 : vector<2x1024xi1>, vector<2x1024xf32>
      %c0_76 = arith.constant 0 : index
      %c0_77 = arith.constant 0 : index
      %122 = vector.load %arg30[%c0_76, %c0_77] : memref<2x1024xf32, #tpu.memory_space<vmem>>, vector<2x1024xf32>
      tpu.vector_store %arg30[%c0_76, %c0_77], %121 {strides = array<i32>} : memref<2x1024xf32, #tpu.memory_space<vmem>>, vector<2x1024xf32>,
    } else {
    }
    %c2_i32_9 = arith.constant 2 : i32
    %18 = arith.cmpi eq, %arg0, %c2_i32_9 : i32
    %c1_i32_10 = arith.constant 1 : i32
    %19 = arith.cmpi eq, %arg1, %c1_i32_10 : i32
    %20 = arith.andi %18, %19 : i1
    %c0_i32_11 = arith.constant 0 : i32
    %21 = arith.cmpi eq, %arg2, %c0_i32_11 : i32
    %22 = arith.andi %20, %21 : i1
    %23 = arith.extui %22 : i1 to i32
    %c0_i32_12 = arith.constant 0 : i32
    %24 = arith.cmpi ne, %23, %c0_i32_12 : i32
    scf.if %24 {
      %c0_13 = arith.constant 0 : index
      %c0_14 = arith.constant 0 : index
      %25 = vector.load %arg27[%c0_13, %c0_14] : memref<1x1024xf32, #tpu.memory_space<vmem>>, vector<1x1024xf32>
      %cst = arith.constant 3.125000e-02 : f32
      %26 = vector.broadcast %cst : f32 to vector<1x1024xf32>
      %27 = arith.mulf %25, %26 : vector<1x1024xf32>
      %c0_15 = arith.constant 0 : index
      %c0_16 = arith.constant 0 : index
      %28 = vector.load %arg28[%c0_15, %c0_16] : memref<1x1024xf32, #tpu.memory_space<vmem>>, vector<1x1024xf32>
      %cst_17 = arith.constant 3.125000e-02 : f32
      %29 = vector.broadcast %cst_17 : f32 to vector<1x1024xf32>
      %30 = arith.mulf %28, %29 : vector<1x1024xf32>
      %31 = arith.mulf %27, %27 : vector<1x1024xf32>
      %32 = arith.subf %30, %31 : vector<1x1024xf32>
      %cst_18 = arith.constant 0.000000e+00 : f32
      %33 = vector.broadcast %cst_18 : f32 to vector<1x1024xf32>
      %34 = arith.maximumf %32, %33 : vector<1x1024xf32>
      %c0_19 = arith.constant 0 : index
      %c0_20 = arith.constant 0 : index
      %35 = vector.load %arg14[%c0_19, %c0_20] : memref<1x1024xf32, #tpu.memory_space<vmem>>, vector<1x1024xf32>
      %cst_21 = arith.constant 9.99999974E-6 : f32
      %36 = vector.broadcast %cst_21 : f32 to vector<1x1024xf32>
      %37 = arith.addf %34, %36 : vector<1x1024xf32>
      %38 = math.rsqrt %37 : vector<1x1024xf32>
      %39 = arith.mulf %35, %38 : vector<1x1024xf32>
      %c0_22 = arith.constant 0 : index
      %c0_23 = arith.constant 0 : index
      %40 = vector.load %arg15[%c0_22, %c0_23] : memref<1x1024xf32, #tpu.memory_space<vmem>>, vector<1x1024xf32>
      %41 = arith.mulf %27, %39 : vector<1x1024xf32>
      %42 = arith.subf %40, %41 : vector<1x1024xf32>
      %cst_24 = arith.constant 0.000000e+00 : f32
      %43 = vector.broadcast %cst_24 : f32 to vector<1x1024xf32>
      %44 = arith.cmpf oge, %39, %43 : vector<1x1024xf32>
      %c0_25 = arith.constant 0 : index
      %c0_26 = arith.constant 0 : index
      %45 = vector.load %arg29[%c0_25, %c0_26] : memref<2x1024xf32, #tpu.memory_space<vmem>>, vector<2x1024xf32>
      %46 = vector.broadcast %39 : vector<1x1024xf32> to vector<2x1024xf32>
      %47 = arith.mulf %45, %46 : vector<2x1024xf32>
      %48 = vector.broadcast %42 : vector<1x1024xf32> to vector<2x1024xf32>
      %49 = arith.addf %47, %48 : vector<2x1024xf32>
      %c0_27 = arith.constant 0 : index
      %c0_28 = arith.constant 0 : index
      %50 = vector.load %arg30[%c0_27, %c0_28] : memref<2x1024xf32, #tpu.memory_space<vmem>>, vector<2x1024xf32>
      %51 = vector.broadcast %39 : vector<1x1024xf32> to vector<2x1024xf32>
      %52 = arith.mulf %50, %51 : vector<2x1024xf32>
      %53 = vector.broadcast %42 : vector<1x1024xf32> to vector<2x1024xf32>
      %54 = arith.addf %52, %53 : vector<2x1024xf32>
      %55 = vector.shape_cast %44 : vector<1x1024xi1> to vector<1x1024xi1>
      %56 = vector.broadcast %55 : vector<1x1024xi1> to vector<2x1024xi1>
      %57 = arith.select %56, %49, %54 : vector<2x1024xi1>, vector<2x1024xf32>
      %cst_29 = arith.constant 0.000000e+00 : f32
      %58 = vector.broadcast %cst_29 : f32 to vector<2x1024xf32>
      %59 = arith.maximumf %57, %58 : vector<2x1024xf32>
      %60 = arith.truncf %59 : vector<2x1024xf32> to vector<2x1024xbf16>
      %c0_30 = arith.constant 0 : index
      %c0_31 = arith.constant 0 : index
      %61 = vector.load %arg16[%c0_30, %c0_31] : memref<1024x512xbf16, #tpu.memory_space<vmem>>, vector<1024x512xbf16>
      %cst_32 = arith.constant dense<0.000000e+00> : vector<2x512xf32>
      %62 = tpu.matmul %60, %61, %cst_32 {dimension_numbers = #tpu.dot_dimension_numbers<[1], [0], [0], [1], [0, 0, 1, 1], [], []>} : vector<2x1024xbf16>, vector<1024x512xbf16>, vector<2x512xf32> -> vector<2x512xf32>
      %c0_33 = arith.constant 0 : index
      %c0_34 = arith.constant 0 : index
      %63 = vector.load %arg17[%c0_33, %c0_34] : memref<1x512xf32, #tpu.memory_space<vmem>>, vector<1x512xf32>
      %64 = vector.broadcast %63 : vector<1x512xf32> to vector<2x512xf32>
      %65 = arith.addf %62, %64 : vector<2x512xf32>
      %cst_35 = arith.constant 0.000000e+00 : f32
      %66 = vector.broadcast %cst_35 : f32 to vector<2x512xf32>
      %67 = arith.maximumf %65, %66 : vector<2x512xf32>
      %68 = arith.truncf %67 : vector<2x512xf32> to vector<2x512xbf16>
      %c0_36 = arith.constant 0 : index
      %c0_37 = arith.constant 0 : index
      %69 = vector.load %arg18[%c0_36, %c0_37] : memref<512x256xbf16, #tpu.memory_space<vmem>>, vector<512x256xbf16>
      %cst_38 = arith.constant dense<0.000000e+00> : vector<2x256xf32>
      %70 = tpu.matmul %68, %69, %cst_38 {dimension_numbers = #tpu.dot_dimension_numbers<[1], [0], [0], [1], [0, 0, 1, 1], [], []>} : vector<2x512xbf16>, vector<512x256xbf16>, vector<2x256xf32> -> vector<2x256xf32>
      %c0_39 = arith.constant 0 : index
      %c0_40 = arith.constant 0 : index
      %71 = vector.load %arg19[%c0_39, %c0_40] : memref<1x256xf32, #tpu.memory_space<vmem>>, vector<1x256xf32>
      %72 = vector.broadcast %71 : vector<1x256xf32> to vector<2x256xf32>
      %73 = arith.addf %70, %72 : vector<2x256xf32>
      %cst_41 = arith.constant 0.000000e+00 : f32
      %74 = vector.broadcast %cst_41 : f32 to vector<2x256xf32>
      %75 = arith.maximumf %73, %74 : vector<2x256xf32>
      %76 = arith.truncf %75 : vector<2x256xf32> to vector<2x256xbf16>
      %c0_42 = arith.constant 0 : index
      %c0_43 = arith.constant 0 : index
      %77 = vector.load %arg20[%c0_42, %c0_43] : memref<256x4096xbf16, #tpu.memory_space<vmem>>, vector<256x4096xbf16>
      %cst_44 = arith.constant dense<0.000000e+00> : vector<2x4096xf32>
      %78 = tpu.matmul %76, %77, %cst_44 {dimension_numbers = #tpu.dot_dimension_numbers<[1], [0], [0], [1], [0, 0, 1, 1], [], []>} : vector<2x256xbf16>, vector<256x4096xbf16>, vector<2x4096xf32> -> vector<2x4096xf32>
      %c0_45 = arith.constant 0 : index
      %c0_46 = arith.constant 0 : index
      %79 = vector.load %arg21[%c0_45, %c0_46] : memref<1x4096xf32, #tpu.memory_space<vmem>>, vector<1x4096xf32>
      %80 = vector.broadcast %79 : vector<1x4096xf32> to vector<2x4096xf32>
      %81 = arith.addf %78, %80 : vector<2x4096xf32>
      %c0_47 = arith.constant 0 : index
      %c0_48 = arith.constant 0 : index
      %82 = vector.load %arg22[%c0_47, %c0_48] : memref<2x4096xf32, #tpu.memory_space<vmem>>, vector<2x4096xf32>
      tpu.vector_store %arg22[%c0_47, %c0_48], %81 {strides = array<i32>} : memref<2x4096xf32, #tpu.memory_space<vmem>>, vector<2x4096xf32>,
    } else {
    }
    return
  }
  func.func @transform_0(%arg0: i32, %arg1: i32, %arg2: i32) -> (i32, i32, i32) {
    %c0_i32 = arith.constant 0 : i32
    %c0_i32_0 = arith.constant 0 : i32
    return %arg1, %arg2, %c0_i32 : i32, i32, i32
  }
  func.func @transform_1(%arg0: i32, %arg1: i32, %arg2: i32) -> (i32, i32) {
    %c0_i32 = arith.constant 0 : i32
    %c0_i32_0 = arith.constant 0 : i32
    %c0_i32_1 = arith.constant 0 : i32
    return %c0_i32, %c0_i32_0 : i32, i32
  }
  func.func @transform_2(%arg0: i32, %arg1: i32, %arg2: i32) -> (i32, i32) {
    %c0_i32 = arith.constant 0 : i32
    %c0_i32_0 = arith.constant 0 : i32
    %c0_i32_1 = arith.constant 0 : i32
    return %c0_i32, %c0_i32_0 : i32, i32
  }
  func.func @transform_3(%arg0: i32, %arg1: i32, %arg2: i32) -> (i32, i32) {
    %c0_i32 = arith.constant 0 : i32
    %c0_i32_0 = arith.constant 0 : i32
    %c0_i32_1 = arith.constant 0 : i32
    return %c0_i32, %c0_i32_0 : i32, i32
  }
  func.func @transform_4(%arg0: i32, %arg1: i32, %arg2: i32) -> (i32, i32) {
    %c0_i32 = arith.constant 0 : i32
    %c0_i32_0 = arith.constant 0 : i32
    %c0_i32_1 = arith.constant 0 : i32
    return %c0_i32, %c0_i32_0 : i32, i32
  }
  func.func @transform_5(%arg0: i32, %arg1: i32, %arg2: i32) -> (i32, i32) {
    %c0_i32 = arith.constant 0 : i32
    %c0_i32_0 = arith.constant 0 : i32
    %c0_i32_1 = arith.constant 0 : i32
    return %c0_i32, %c0_i32_0 : i32, i32
  }
  func.func @transform_6(%arg0: i32, %arg1: i32, %arg2: i32) -> (i32, i32) {
    %c0_i32 = arith.constant 0 : i32
    %c0_i32_0 = arith.constant 0 : i32
    %c0_i32_1 = arith.constant 0 : i32
    return %c0_i32, %c0_i32_0 : i32, i32
  }
  func.func @transform_7(%arg0: i32, %arg1: i32, %arg2: i32) -> (i32, i32) {
    %c0_i32 = arith.constant 0 : i32
    %c0_i32_0 = arith.constant 0 : i32
    %c0_i32_1 = arith.constant 0 : i32
    return %c0_i32, %c0_i32_0 : i32, i32
  }
  func.func @transform_8(%arg0: i32, %arg1: i32, %arg2: i32) -> (i32, i32) {
    %c0_i32 = arith.constant 0 : i32
    %c0_i32_0 = arith.constant 0 : i32
    %c0_i32_1 = arith.constant 0 : i32
    return %c0_i32, %c0_i32_0 : i32, i32
  }
  func.func @transform_9(%arg0: i32, %arg1: i32, %arg2: i32) -> (i32, i32) {
    %c0_i32 = arith.constant 0 : i32
    %c0_i32_0 = arith.constant 0 : i32
    %c0_i32_1 = arith.constant 0 : i32
    return %c0_i32, %c0_i32_0 : i32, i32
  }
  func.func @transform_10(%arg0: i32, %arg1: i32, %arg2: i32) -> (i32, i32) {
    %c0_i32 = arith.constant 0 : i32
    %c0_i32_0 = arith.constant 0 : i32
    %c0_i32_1 = arith.constant 0 : i32
    return %c0_i32, %c0_i32_0 : i32, i32
  }
  func.func @transform_11(%arg0: i32, %arg1: i32, %arg2: i32) -> (i32, i32) {
    %c0_i32 = arith.constant 0 : i32
    %c0_i32_0 = arith.constant 0 : i32
    %c0_i32_1 = arith.constant 0 : i32
    return %c0_i32, %c0_i32_0 : i32, i32
  }
  func.func @transform_12(%arg0: i32, %arg1: i32, %arg2: i32) -> (i32, i32) {
    %c0_i32 = arith.constant 0 : i32
    %c0_i32_0 = arith.constant 0 : i32
    %c0_i32_1 = arith.constant 0 : i32
    return %c0_i32, %c0_i32_0 : i32, i32
  }
  func.func @transform_13(%arg0: i32, %arg1: i32, %arg2: i32) -> (i32, i32) {
    %c0_i32 = arith.constant 0 : i32
    %c0_i32_0 = arith.constant 0 : i32
    %c0_i32_1 = arith.constant 0 : i32
    return %c0_i32, %c0_i32_0 : i32, i32
  }
  func.func @transform_14(%arg0: i32, %arg1: i32, %arg2: i32) -> (i32, i32) {
    %c0_i32 = arith.constant 0 : i32
    %c0_i32_0 = arith.constant 0 : i32
    %c0_i32_1 = arith.constant 0 : i32
    return %c0_i32, %c0_i32_0 : i32, i32
  }
  func.func @transform_15(%arg0: i32, %arg1: i32, %arg2: i32) -> (i32, i32) {
    %c0_i32 = arith.constant 0 : i32
    %c0_i32_0 = arith.constant 0 : i32
    %c0_i32_1 = arith.constant 0 : i32
    return %c0_i32, %c0_i32_0 : i32, i32
  }
  func.func @transform_16(%arg0: i32, %arg1: i32, %arg2: i32) -> (i32, i32) {
    %c0_i32 = arith.constant 0 : i32
    %c0_i32_0 = arith.constant 0 : i32
    %c0_i32_1 = arith.constant 0 : i32
    return %c0_i32, %c0_i32_0 : i32, i32
  }
  func.func @transform_17(%arg0: i32, %arg1: i32, %arg2: i32) -> (i32, i32) {
    %c0_i32 = arith.constant 0 : i32
    %c0_i32_0 = arith.constant 0 : i32
    %c0_i32_1 = arith.constant 0 : i32
    return %c0_i32, %c0_i32_0 : i32, i32
  }
  func.func @transform_18(%arg0: i32, %arg1: i32, %arg2: i32) -> (i32, i32) {
    %c0_i32 = arith.constant 0 : i32
    %c0_i32_0 = arith.constant 0 : i32
    %c0_i32_1 = arith.constant 0 : i32
    return %c0_i32, %c0_i32_0 : i32, i32
  }
  func.func @transform_19(%arg0: i32, %arg1: i32, %arg2: i32) -> (i32, i32) {
    %c0_i32 = arith.constant 0 : i32
    %c0_i32_0 = arith.constant 0 : i32
    %c0_i32_1 = arith.constant 0 : i32
    return %c0_i32, %c0_i32_0 : i32, i32
  }
}

</mosaic_0001>

<bundles_post_ra>
// kernel: stn64d_forward.1
= control target key start
LH: loop header
LB: loop body
LE: loop exit
PB: predicated region body
PF: predicated region fallthrough
CT: control target
= control target key end

     0   :  { %s15736_s0 = inlined_call_operand.vmem [shape: bf16[2,16,64], index: 0, kind: input, shape index: {}]   ;;  %s15737_s1 = inlined_call_operand.hbm [shape: bf16[64,64], index: 1, kind: input, shape index: {}]   ;;  %s15738_s2 = inlined_call_operand.hbm [shape: f32[1,64], index: 2, kind: input, shape index: {}]   ;;  %s15739_s3 = inlined_call_operand.vmem [shape: f32[1,64], index: 3, kind: input, shape index: {}]   ;;  %s15740_s4 = inlined_call_operand.vmem [shape: f32[1,64], index: 4, kind: input, shape index: {}]   ;;  %s15741_s5 = inlined_call_operand.hbm [shape: bf16[64,128], index: 5, kind: input, shape index: {}]   ;;  %s15742_s6 = inlined_call_operand.hbm [shape: f32[1,128], index: 6, kind: input, shape index: {}]   ;;  %s15743_s7 = inlined_call_operand.vmem [shape: f32[1,128], index: 7, kind: input, shape index: {}]   ;;  %s15744_s8 = inlined_call_operand.vmem [shape: f32[1,128], index: 8, kind: input, shape index: {}]   ;;  %s15745_s9 = inlined_call_operand.hbm [shape: bf16[128,1024], index: 9, kind: input, shape index: {}]   ;;  %s15746_s10 = inlined_call_operand.hbm [shape: f32[1,1024], index: 10, kind: input, shape index: {}]   ;;  %s15747_s11 = inlined_call_operand.vmem [shape: f32[1,1024], index: 11, kind: input, shape index: {}]   ;;  %s15748_s12 = inlined_call_operand.vmem [shape: f32[1,1024], index: 12, kind: input, shape index: {}]   ;;  %s15749_s13 = inlined_call_operand.hbm [shape: bf16[1024,512], index: 13, kind: input, shape index: {}]   ;;  %s15750_s14 = inlined_call_operand.hbm [shape: f32[1,512], index: 14, kind: input, shape index: {}]   ;;  %s15751_s15 = inlined_call_operand.hbm [shape: bf16[512,256], index: 15, kind: input, shape index: {}]   ;;  %s15752_s16 = inlined_call_operand.hbm [shape: f32[1,256], index: 16, kind: input, shape index: {}]   ;;  %s15753_s17 = inlined_call_operand.hbm [shape: bf16[256,4096], index: 17, kind: input, shape index: {}]   ;;  %s15754_s18 = inlined_call_operand.vmem [shape: f32[1,4096], index: 18, kind: input, shape index: {}]   ;;  %s15755_s19 = inlined_call_operand.vmem [shape: f32[2,4096], index: 19, kind: output, shape index: {}]  }
   0x1   :  { %15759 = sst [smem:[#allocation35_spill]] %s15736_s0 }
   0x2   :  { %15760 = sst [smem:[#allocation36_spill]] %s15737_s1 }
   0x3   :  { %15761 = sst [smem:[#allocation37_spill]] %s15738_s2 }
   0x4   :  { %15762 = sst [smem:[#allocation38_spill]] %s15739_s3 }
   0x5   :  { %15763 = sst [smem:[#allocation39_spill]] %s15741_s5 }
   0x6   :  { %15764 = sst [smem:[#allocation40_spill]] %s15742_s6 }
   0x7   :  { %15765 = sst [smem:[#allocation41_spill]] %s15745_s9 }
   0x8   :  { %15766 = sst [smem:[#allocation42_spill]] %s15746_s10 }
   0x9   :  { %15767 = sst [smem:[#allocation43_spill]] %s15748_s12 }
   0xa   :  { %15768 = sst [smem:[#allocation44_spill]] %s15750_s14 }
   0xb   :  { %15769 = sst [smem:[#allocation45_spill]] %s15752_s16 }
   0xc   :  { %15770 = sst [smem:[#allocation46_spill]] %s15754_s18 }
   0xd   :  { %15771 = sst [smem:[#allocation47_spill]] %s15755_s19 }
   0xe   :  { %24 = vsyncpa [#allocation11], 0 }
   0xf   :  { %25 = vsyncpa [#allocation13], 0 }
  0x10   :  { %26 = vsyncpa [#allocation16], 0 }
  0x11   :  { %27 = vsyncpa [#allocation19], 0 }
  0x12   :  { %28 = vsyncpa [#allocation22], 0 }
  0x13   :  { %29 = vsyncpa [#allocation25], 0  ;;  %s14785_s0 = smov 0   ;;  %s14787_s30 = smov 0  }
  0x14   :  { %s14789_s20 = smov 0   ;;  %s14791_s21 = smov 0  }
  0x15   :  { %s14793_s1 = smov 0  }
  0x16 LB: > { %15772 = sst [smem:[#allocation33_spill]] %s14656_s1  ;;  %s9427_s25 = sadd.s32 4294967295, %s14656_s1   ;;  %s14656_s1 = sphi %s14793_s1, %s35_s1   ;;  %s14652_s21 = sphi %s14791_s21, %s15818_s21   ;;  %s14648_s20 = sphi %s14789_s20, %s15817_s20   ;;  %s14644_s30 = sphi %s14787_s30, %s15816_s30   ;;  %s14640_s0 = sphi %s14785_s0, %s15815_s0  }
  0x17   : > { %s15773_s23 = sld [smem:[#allocation37_spill]]  ;;  %p9428_p0 = scmp.ge.s32.totalorder %s14656_s1, 1 }
  0x18   : > { %p486_p1 = scmp.lt.s32.totalorder %s14656_s1, 7  ;;  %p14816_p2 = scmp.eq.s32.totalorder %s9427_s25, 0 }
  0x19   : > { %s14658_s27 = smov [#allocation12]   ;;  %s15776_s6 = sld [smem:[#allocation40_spill]] }
  0x1a   : > { %p14820_p3 = pnand %p9428_p0, %p486_p1  ;;  %s514_s28 = sshll.u32 %s14658_s27, 4  ;;  %s515_s28 = int_to_ptr.vmem [resolvable:$true] %s514_s28 }
  0x1b   : > { %s15777_s10 = sld [smem:[#allocation42_spill]]  ;;  %s14659_s27 = smov [#allocation15]  }
  0x1c   : > { %p14127_p4 = pneg %p14820_p3  ;;  %s546_s18 = sshll.u32 %s14659_s27, 4  ;;  %s547_s18 = int_to_ptr.vmem [resolvable:$true] %s546_s18 }
  0x1d   : > { %s512_s24 = sshll.u32 %s15773_s23, 4  ;;  %s14660_s29 = smov [#allocation18]   ;;  %s513_s24 = int_to_ptr.hbm [resolvable:$true] %s512_s24 }
  0x1e   : > { %p14834_p5 = pnand %p14816_p2, %p14127_p4  ;;  %s578_s22 = sshll.u32 %s14660_s29, 4  ;;  %s579_s22 = int_to_ptr.vmem [resolvable:$true] %s578_s22 }
  0x1f   : > { %s544_s2 = sshll.u32 %s15776_s6, 4  ;;  %s15779_s14 = sld [smem:[#allocation44_spill]]  ;;  %s545_s2 = int_to_ptr.hbm [resolvable:$true] %s544_s2 }
  0x20   : > { %14133 = dma.hbm_to_vmem [thread:$0]  (!%p14834_p5), %s513_s24, 16, %s515_s28, [#allocation13]  }
  0x21   : > { %s576_s1 = sshll.u32 %s15777_s10, 4  ;;  %s15780_s16 = sld [smem:[#allocation45_spill]]  ;;  %s577_s1 = int_to_ptr.hbm [resolvable:$true] %s576_s1 }
  0x22   : > { %14139 = dma.hbm_to_vmem [thread:$0]  (!%p14834_p5), %s545_s2, 16, %s547_s18, [#allocation16]  }
  0x23   : > { %14145 = dma.hbm_to_vmem [thread:$0]  (!%p14834_p5), %s577_s1, 128, %s579_s22, [#allocation19]  }
  0x24   : > { %s14661_s24 = smov [#allocation21]   ;;  %s14662_s28 = smov [#allocation24]  }
  0x25   : > { %s608_s6 = sshll.u32 %s15779_s14, 4  ;;  %s610_s18 = sshll.u32 %s14661_s24, 4  ;;  %s609_s6 = int_to_ptr.hbm [resolvable:$true] %s608_s6  ;;  %s611_s18 = int_to_ptr.vmem [resolvable:$true] %s610_s18 }
  0x26   : > { %14151 = dma.hbm_to_vmem [thread:$0]  (!%p14834_p5), %s609_s6, 64, %s611_s18, [#allocation22]  }
  0x27   : > { %s634_s12 = sshll.u32 %s15780_s16, 4  ;;  %s636_s2 = sshll.u32 %s14662_s28, 4  ;;  %s635_s12 = int_to_ptr.hbm [resolvable:$true] %s634_s12  ;;  %s637_s2 = int_to_ptr.vmem [resolvable:$true] %s636_s2 }
  0x28   : > { %14157 = dma.hbm_to_vmem [thread:$0]  (!%p14834_p5), %s635_s12, 32, %s637_s2, [#allocation25]  }
  0x29   : > { %s50_s29 = sadd.s32 1, %s14648_s20  ;;  %s54_s23 = sadd.s32 1, %s14652_s21 }
  0x2a   : > { %p52_p6 = scmp.ge.s32.totalorder %s50_s29, 2  ;;  %s15781_s10 = sld [smem:[#allocation36_spill]] }
  0x2b   : > { %s14663_s27 = smov [#allocation10]   ;;  %s15782_s5 = sld [smem:[#allocation39_spill]] }
  0x2c   : > { %s15820_s29 = smov (%p52_p6, %s50_s29), 0  ;;  %s15822_s23 = smov (!%p52_p6, %s54_s23), %s14652_s21 }
  0x2d   : > { %s499_s6 = sshll.u32 %s14663_s27, 4  ;;  %p56_p7 = scmp.ge.s32.totalorder %s15822_s23, 3  ;;  %s500_s6 = int_to_ptr.vmem [resolvable:$true] %s499_s6 }
  0x2e   : > { %s14664_s28 = smov 64   ;;  %s14665_s2 = smov 4  }
  0x2f   : > { %s15824_s23 = smov (%p56_p7, %s15822_s23), 0  ;;  %s14666_s1 = smov [#allocation14]  }
  0x30   : > { %s497_s25 = sshll.u32 %s15781_s10, 4  ;;  %15783 = sst [smem:[#allocation34_spill]] %s15824_s23  ;;  %s498_s25 = int_to_ptr.hbm [resolvable:$true] %s497_s25 }
  0x31   : > { %s529_s12 = sshll.u32 %s15782_s5, 4  ;;  %s531_s22 = sshll.u32 %s14666_s1, 4  ;;  %s530_s12 = int_to_ptr.hbm [resolvable:$true] %s529_s12  ;;  %s532_s22 = int_to_ptr.vmem [resolvable:$true] %s531_s22 }
  0x32   : > { %14130 = dma.hbm_to_vmem [thread:$0]  (!%p14834_p5), %s498_s25, 512, %s500_s6, [#allocation11], %s14664_s28, %s14664_s28, %s14665_s2  }
  0x33   : > { %s15784_s9 = sld [smem:[#allocation41_spill]]  ;;  %s14667_s24 = smov [#allocation17]  }
  0x34   : > { %14136 = dma.hbm_to_vmem [thread:$0]  (!%p14834_p5), %s530_s12, 512, %s532_s22, [#allocation13], %s14664_s28, %s14664_s28, %s14665_s2  }
  0x35   : > { %s563_s18 = sshll.u32 %s14667_s24, 4  ;;  %s593_s23 = sshll.u32 %s15749_s13, 4  ;;  %s564_s18 = int_to_ptr.vmem [resolvable:$true] %s563_s18  ;;  %s594_s23 = int_to_ptr.hbm [resolvable:$true] %s593_s23 }
  0x36   : > { %s14668_s25 = smov 512   ;;  %s14669_s6 = smov 32  }
  0x37   : > { %s14670_s14 = smov [#allocation20]   ;;  %s14671_s10 = smov 256  }
  0x38   : > { %s595_s1 = sshll.u32 %s14670_s14, 4  ;;  %s619_s2 = sshll.u32 %s15751_s15, 4  ;;  %s596_s1 = int_to_ptr.vmem [resolvable:$true] %s595_s1  ;;  %s620_s2 = int_to_ptr.hbm [resolvable:$true] %s619_s2 }
  0x39   : > { %s561_s27 = sshll.u32 %s15784_s9, 4  ;;  %s14672_s9 = smov 16   ;;  %s562_s27 = int_to_ptr.hbm [resolvable:$true] %s561_s27 }
  0x3a   : > { %14142 = dma.hbm_to_vmem [thread:$0]  (!%p14834_p5), %s562_s27, 8192, %s564_s18, [#allocation16], %s14668_s25, %s14668_s25, %s14669_s6  }
  0x3b   : > { %14148 = dma.hbm_to_vmem [thread:$0]  (!%p14834_p5), %s594_s23, 32768, %s596_s1, [#allocation19], %s14671_s10, %s14671_s10, %s14672_s9  }
  0x3c   : > { %s14673_s5 = smov [#allocation23]   ;;  %s645_s24 = sshll.u32 %s15753_s17, 4  ;;  %s646_s24 = int_to_ptr.hbm [resolvable:$true] %s645_s24 }
  0x3d   : > { %s621_s16 = sshll.u32 %s14673_s5, 4  ;;  %s14674_s18 = smov 128   ;;  %s622_s16 = int_to_ptr.vmem [resolvable:$true] %s621_s16 }
  0x3e   : > { %s14675_s25 = smov 8   ;;  %s14676_s6 = smov [#allocation26]  }
  0x3f   : > { %14154 = dma.hbm_to_vmem [thread:$0]  (!%p14834_p5), %s620_s2, 8192, %s622_s16, [#allocation22], %s14674_s18, %s14674_s18, %s14675_s25  }
  0x40   : > { %s647_s14 = sshll.u32 %s14676_s6, 4  ;;  %s14677_s9 = smov 2048   ;;  %s648_s14 = int_to_ptr.vmem [resolvable:$true] %s647_s14 }
  0x41   : > { %14160 = dma.hbm_to_vmem [thread:$0]  (!%p14834_p5), %s646_s24, 65536, %s648_s14, [#allocation25], %s14677_s9, %s14677_s9, %s14674_s18  }
  0x42   : > { %679 = sbr.rel (%p14820_p3) target bundleno = 2681 (0xa79), region = 96 }
  0x47   : > { %14615 = dma.done.wait (%p14816_p2), [#allocation11], 512  }
  0x48   : > { %14617 = vsyncadd (%p14816_p2), [#allocation11], 4294966784 }
  0x49   : > { %14619 = dma.done.wait (%p14816_p2), [#allocation13], 528  }
  0x4a   : > { %14621 = vsyncadd (%p14816_p2), [#allocation13], 4294966768 }
  0x4b   : > { %14623 = dma.done.wait (%p14816_p2), [#allocation16], 8208  }
  0x4c   : > { %14625 = vsyncadd (%p14816_p2), [#allocation16], 4294959088 }
  0x4d   : > { %14627 = dma.done.wait (%p14816_p2), [#allocation19], 32896  }
  0x4e   : > { %14629 = vsyncadd (%p14816_p2), [#allocation19], 4294934400 }
  0x4f   : > { %14631 = dma.done.wait (%p14816_p2), [#allocation22], 8256  }
  0x50   : > { %14633 = vsyncadd (%p14816_p2), [#allocation22], 4294959040 }
  0x51   : > { %14635 = dma.done.wait (%p14816_p2), [#allocation25], 65568  }
  0x52   : > { %14637 = vsyncadd (%p14816_p2), [#allocation25], 4294901728  ;;  %p786_p8 = scmp.lt.s32.totalorder %s14640_s0, 1  ;;  %p798_p9 = scmp.eq.s32.totalorder %s14644_s30, 0 }
  0x53   : > { %p799_p10 = scmp.eq.s32.totalorder %s14640_s0, 0  ;;  %s15785_s10 = sld [smem:[#allocation35_spill]] }
  0x54   : > { %s787_s19 = scalar_select %p786_p8, %s14640_s0, 1 }
  0x55   : > { %p800_p11 = pnand %p799_p10, %p798_p9 }
  0x56   : > { %s13163_s26 = sshll.u32 %s787_s19, 3 }
  0x58   : > { %806 = sbr.rel (%p800_p11) target bundleno = 104 (0x68), region = 144 }
  0x59   : > { %s793_s12 = scalar_lea.vmem %s15785_s10, %s13163_s26 }
  0x5a   : > { %v14924_v0 = vld [vmem:[%s793_s12] sm:$0xf]  ;;  %v14928_v3 = vld [vmem:[%s793_s12] sm:$0xf0] }
  0x5b   : > { %v14926_v1 = vld [vmem:[%s793_s12] sm:$0xf]  ;;  %v14930_v4 = vld [vmem:[%s793_s12] sm:$0xf0] }
  0x5c   : > { %v9459_v2 = vld [vmem:[%s793_s12] sm:$0xf]  ;;  %v13166_v5 = vld [vmem:[%s793_s12] sm:$0xf0] }
  0x5d   : > { %vm807_vm0 = vcmask 516096   ;;  %v14678_v6 = vmov 0.0   ;;  %v14679_v7 = vmov -inf   ;;  %v14680_v8 = vmov inf  }
  0x5e   : > { %808 = vst.msk [vmem:[#allocation2] sm:$0x1] %vm807_vm0, %v14678_v6 }
  0x5f   : > { %809 = vst.msk [vmem:[#allocation3] sm:$0x1] %vm807_vm0, %v14678_v6 }
  0x60   : > { %810 = vst [vmem:[#allocation4] sm:$0x1] %v14678_v6 }
  0x61   : > { %811 = vst [vmem:[#allocation5] sm:$0x1] %v14678_v6 }
  0x62   : > { %812 = vst [vmem:[#allocation6] sm:$0xff] %v14678_v6 }
  0x63   : > { %813 = vst [vmem:[#allocation7] sm:$0xff] %v14678_v6 }
  0x64   : > { %814 = vst [vmem:[#allocation8] sm:$0xff] %v14679_v7 }
  0x65   : > { %815 = vst [vmem:[#allocation8 + $0x8] sm:$0xff] %v14679_v7 }
  0x66   : > { %816 = vst [vmem:[#allocation9 + $0x8] sm:$0xff] %v14680_v8 }
  0x67   : > { %817 = vst [vmem:[#allocation9] sm:$0xff] %v14680_v8 }
  0x68 PF: > { %p9456_p12 = scmp.ne.s32.totalorder %s14644_s30, 0 }
  0x6a   : > { %820 = sbr.rel (%p9456_p12) target bundleno = 403 (0x193), region = 148 }
  0x6f   : > { %v13170_v9 = vld [vmem:[#allocation10 + $0x18] sm:$0xff]  ;;  %v13169_v10 = vld [vmem:[#allocation10 + $0x10] sm:$0xff]  ;;  %v13168_v11 = vld [vmem:[#allocation10 + $0x8] sm:$0xff]  ;;  %v9460_v13 = vor.u32 %v13166_v5, %v9459_v2  ;;  %vm862_vm1 = vcmask 523264   ;;  %vm881_vm2 = vcmask 130048   ;;  %v14681_v21 = vmov 1.0  }
  0x70   : > { %870 = vmatpush.bf16.msra.mxu0 %v13170_v9  ;;  %v13167_v12 = vld [vmem:[#allocation10] sm:$0xff]  ;;  %v880_v22 = vld [vmem:[#allocation2] sm:$0x1]  ;;  %vm906_vm3 = vcmask 516096   ;;  %v908_v25 = vld [vmem:[#allocation3] sm:$0x1] }
  0x71   : > { %v14250_v15 = vld [vmem:[#allocation12] ss:$0 sm:$0xff] }
  0x74   : > { %871 = vmatpush.bf16.msra.mxu0 %v13169_v10 }
  0x78   : > { %872 = vmatpush.bf16.msra.mxu0 %v13168_v11 }
  0x7c   : > { %873 = vmatpush.bf16.msra.mxu0 %v13167_v12 }
  0x7f   : > { %9477 = vmatmul.msk.bf16.vlgmr.msra.gmra.mxu0 %vm862_vm1, %v9460_v13 }
  0xfc   : > { %v875_v14 = vpop.f32.mrf.mxu0 }
  0xfd   : > { %v876_v17 = vadd.f32 %v14250_v15, %v875_v14 }
  0xff   : > { %v909_v20 = vmul.f32 %v876_v17, %v876_v17 }
 0x104   : > { %v877_v16 = vpop.f32.mrf.mxu0 }
 0x105   : > { %v878_v18 = vadd.f32 %v14250_v15, %v877_v16 }
 0x107   : > { %899 = vmatpush.msra.mxu1 %v878_v18  ;;  %v910_v19 = vmul.f32 %v878_v18, %v878_v18 }
 0x109   : > { %900 = vmatpush.msra.mxu1 %v876_v17  ;;  %925 = vmatpush.msra.mxu2 %v910_v19 }
 0x10a   : > { %9478 = vmatmul.msk.f32.vlgmr.msra.gmra.mxu1 %vm881_vm2, %v14681_v21 }
 0x10b   : > { %926 = vmatpush.msra.mxu2 %v909_v20 }
 0x10c   : > { %9479 = vmatmul.msk.f32.vlgmr.msra.gmra.mxu2 %vm881_vm2, %v14681_v21 }
 0x187   : > { %v902_v23 = vpop.f32.mrf.mxu1 }
 0x188   : > { %v905_v24 = vadd.f32 %v902_v23, %v880_v22 }
 0x18a   : > { %907 = vst.msk [vmem:[#allocation2] sm:$0x1] %vm906_vm3, %v905_v24 }
 0x18f   : > { %v928_v26 = vpop.f32.mrf.mxu2 }
 0x190   : > { %v931_v27 = vadd.f32 %v928_v26, %v908_v25 }
 0x192   : > { %932 = vst.msk [vmem:[#allocation3] sm:$0x1] %vm906_vm3, %v931_v27 }
 0x193 PF: > { %p9480_p13 = scmp.ne.s32.totalorder %s14644_s30, 1 }
 0x194   : > { %s15786_s2 = sld [smem:[#allocation38_spill]] (!%p9480_p13) }
 0x195   : > { %936 = sbr.rel (%p9480_p13) target bundleno = 846 (0x34e), region = 152 }
 0x19a   : > { %v13174_v28 = vld [vmem:[#allocation10 + $0x18] sm:$0xff]  ;;  %v13173_v29 = vld [vmem:[#allocation10 + $0x10] sm:$0xff]  ;;  %v13172_v30 = vld [vmem:[#allocation10 + $0x8] sm:$0xff]  ;;  %v9484_v32 = vor.u32 %v14930_v4, %v14926_v1  ;;  %vm1001_vm4 = vcmask 523264   ;;  %vm1086_vm8 = vcmask 130048   ;;  %v14682_v16 = vmov 1.0  }
 0x19b   : > { %1009 = vmatpush.bf16.msra.mxu0 %v13174_v28  ;;  %v13171_v31 = vld [vmem:[#allocation10] sm:$0xff]  ;;  %v937_v33 = vld [vmem:[#allocation2] sm:$0x1]  ;;  %v939_v35 = vld [vmem:[#allocation3] sm:$0x1] }
 0x19c   : > { %v938_v34 = vmul.f32 0.03125, %v937_v33  ;;  %v940_v36 = vmul.f32 0.03125, %v939_v35  ;;  %v13178_v42 = vld [vmem:[#allocation14 + $0x18] sm:$0xff]  ;;  %v13177_v44 = vld [vmem:[#allocation14 + $0x10] sm:$0xff]  ;;  %v13176_v46 = vld [vmem:[#allocation14 + $0x8] sm:$0xff] }
 0x19d   : > { %1075 = vmatpush.bf16.msra.mxu1 %v13178_v42  ;;  %v13175_v48 = vld [vmem:[#allocation14] sm:$0xff]  ;;  %v14251_v55 = vld [vmem:[#allocation12] ss:$0 sm:$0xff]  ;;  %v1085_v17 = vld [vmem:[#allocation4] sm:$0x1] }
 0x19e   : > { %v941_v37 = vmul.f32 %v938_v34, %v938_v34  ;;  %v944_v51 = vld [vmem:[%s15786_s2] sm:$0x1]  ;;  %v14252_v10 = vld [vmem:[#allocation15] ss:$0 sm:$0xff]  ;;  %v1112_v19 = vld [vmem:[#allocation5] sm:$0x1] }
 0x19f   : > { %1010 = vmatpush.bf16.msra.mxu0 %v13173_v29  ;;  %v957_v56 = vld [vmem:[%s15740_s4] sm:$0x1] }
 0x1a0   : > { %v942_v38 = vsub.f32 %v940_v36, %v941_v37 }
 0x1a1   : > { %1076 = vmatpush.bf16.msra.mxu1 %v13177_v44 }
 0x1a2   : > { %v943_v39 = vmax.f32 %v942_v38, 0.0 }
 0x1a3   : > { %1011 = vmatpush.bf16.msra.mxu0 %v13172_v30 }
 0x1a4   : > { %v945_v40 = vadd.f32 1e-05, %v943_v39 }
 0x1a5   : > { %1077 = vmatpush.bf16.msra.mxu1 %v13176_v46 }
 0x1a6   : > { %14253 = vrsqrt.f32 %v945_v40  ;;  %vm952_vm5 = vweird.f32 %v945_v40 }
 0x1a7   : > { %1012 = vmatpush.bf16.msra.mxu0 %v13171_v31 }
 0x1a9   : > { %1078 = vmatpush.bf16.msra.mxu1 %v13175_v48 }
 0x1aa   : > { %9501 = vmatmul.msk.bf16.vlgmr.msra.gmra.mxu0 %vm1001_vm4, %v9484_v32 }
 0x1ac   : > { %v14254_v41 = vpop.eup %14253 }
 0x1ad   : > { %v947_v43 = vmul.f32 %v14254_v41, %v945_v40  ;;  %vm953_vm6 = vweird.f32 %v14254_v41 }
 0x1ae   : > { %vm954_vm7 = vmor %vm952_vm5, %vm953_vm6 }
 0x1af   : > { %v948_v45 = vmul.f32 %v14254_v41, %v947_v43 }
 0x1b1   : > { %v949_v47 = vmul.f32 0.5, %v948_v45 }
 0x1b3   : > { %v950_v49 = vsub.f32 1.5, %v949_v47 }
 0x1b5   : > { %v951_v50 = vmul.f32 %v14254_v41, %v950_v49 }
 0x1b7   : > { %v955_v52 = vsel %vm954_vm7, %v14254_v41, %v951_v50 }
 0x1b8   : > { %v956_v53 = vmul.f32 %v955_v52, %v944_v51 }
 0x1ba   : > { %v958_v54 = vmul.f32 %v956_v53, %v938_v34  ;;  %v1020_v60 = vperm.slane %v956_v53, 0 }
 0x1bc   : > { %v959_v58 = vsub.f32 %v957_v56, %v958_v54 }
 0x1be   : > { %v1025_v62 = vperm.slane %v959_v58, 0 }
 0x227   : > { %v1014_v57 = vpop.f32.mrf.mxu0 }
 0x228   : > { %v1015_v59 = vadd.f32 %v14251_v55, %v1014_v57 }
 0x22a   : > { %v1022_v61 = vmul.f32 %v1020_v60, %v1015_v59 }
 0x22c   : > { %v1027_v2 = vadd.f32 %v1025_v62, %v1022_v61 }
 0x22e   : > { %v1029_v6 = vmax.f32 %v1027_v2, 0.0 }
 0x22f   : > { %v1016_v63 = vpop.f32.mrf.mxu0 }
 0x230   : > { %v1017_v1 = vadd.f32 %v14251_v55, %v1016_v63 }
 0x232   : > { %v1023_v4 = vmul.f32 %v1020_v60, %v1017_v1 }
 0x234   : > { %v1028_v5 = vadd.f32 %v1025_v62, %v1023_v4 }
 0x236   : > { %v1030_v7 = vmax.f32 %v1028_v5, 0.0 }
 0x238   : > { %v1031_v8 = vpack.c.bf16 %v1030_v7, %v1029_v6 }
 0x23a   : > { %9518 = vmatmul.msk.bf16.vlgmr.msra.gmra.mxu1 %vm1001_vm4, %v1031_v8 }
 0x2b7   : > { %v1080_v9 = vpop.f32.mrf.mxu1 }
 0x2b8   : > { %v1081_v12 = vadd.f32 %v14252_v10, %v1080_v9 }
 0x2ba   : > { %v1113_v15 = vmul.f32 %v1081_v12, %v1081_v12 }
 0x2bf   : > { %v1082_v11 = vpop.f32.mrf.mxu1 }
 0x2c0   : > { %v1083_v13 = vadd.f32 %v14252_v10, %v1082_v11 }
 0x2c2   : > { %1104 = vmatpush.msra.mxu2 %v1083_v13  ;;  %v1114_v14 = vmul.f32 %v1083_v13, %v1083_v13 }
 0x2c4   : > { %1105 = vmatpush.msra.mxu2 %v1081_v12  ;;  %1129 = vmatpush.msra.mxu3 %v1114_v14 }
 0x2c5   : > { %9519 = vmatmul.msk.f32.vlgmr.msra.gmra.mxu2 %vm1086_vm8, %v14682_v16 }
 0x2c6   : > { %1130 = vmatpush.msra.mxu3 %v1113_v15 }
 0x2c7   : > { %9520 = vmatmul.msk.f32.vlgmr.msra.gmra.mxu3 %vm1086_vm8, %v14682_v16 }
 0x348   : > { %v1107_v18 = vpop.f32.mrf.mxu2 }
 0x349   : > { %v1110_v20 = vadd.f32 %v1107_v18, %v1085_v17 }
 0x34a   : > { %v1132_v21 = vpop.f32.mrf.mxu3 }
 0x34b   : > { %1111 = vst [vmem:[#allocation4] sm:$0x1] %v1110_v20  ;;  %v1135_v22 = vadd.f32 %v1132_v21, %v1112_v19 }
 0x34d   : > { %1136 = vst [vmem:[#allocation5] sm:$0x1] %v1135_v22 }
 0x34e PF: > { %p1137_p0 = scmp.eq.s32.totalorder %s14644_s30, 2  ;;  %p9521_p1 = scmp.ne.s32.totalorder %s14644_s30, 2 }
 0x34f   : > { %s15789_s24 = sld [smem:[#allocation38_spill]] (!%p9521_p1) }
 0x350   : > { %1140 = sbr.rel (%p9521_p1) target bundleno = 1477 (0x5c5), region = 156 }
 0x355   : > { %v13182_v23 = vld [vmem:[#allocation10 + $0x18] sm:$0xff]  ;;  %v13181_v24 = vld [vmem:[#allocation10 + $0x10] sm:$0xff]  ;;  %v13180_v25 = vld [vmem:[#allocation10 + $0x8] sm:$0xff]  ;;  %v9525_v27 = vor.u32 %v14928_v3, %v14924_v0  ;;  %vm1228_vm9 = vcmask 523264   ;;  %vm1840_vm0 = vcmask 130048   ;;  %vm2029_vm1 = vcmask 1045508  }
 0x356   : > { %1236 = vmatpush.bf16.msra.mxu0 %v13182_v23  ;;  %v13179_v26 = vld [vmem:[#allocation10] sm:$0xff]  ;;  %v1164_v28 = vld [vmem:[#allocation2] sm:$0x1]  ;;  %v1166_v30 = vld [vmem:[#allocation3] sm:$0x1]  ;;  %vm2023_vm2 = vcmask 1041408  }
 0x357   : > { %v14949_v29 = vmul.f32 0.03125, %v1164_v28  ;;  %v1167_v31 = vmul.f32 0.03125, %v1166_v30  ;;  %v13186_v37 = vld [vmem:[#allocation14 + $0x18] sm:$0xff]  ;;  %v13185_v0 = vld [vmem:[#allocation14 + $0x10] sm:$0xff]  ;;  %v13184_v39 = vld [vmem:[#allocation14 + $0x8] sm:$0xff]  ;;  %vm2031_vm3 = vcmask 1043456  }
 0x358   : > { %1302 = vmatpush.bf16.msra.mxu1 %v13186_v37  ;;  %v13183_v41 = vld [vmem:[#allocation14] sm:$0xff]  ;;  %v9794_v50 = vld [vmem:[#allocation17 + $0x1c8] sm:$0xf]  ;;  %v13244_v55 = vld [vmem:[#allocation17 + $0x1cc] sm:$0xf]  ;;  %vm2021_vm5 = vcmask 1042434  }
 0x359   : > { %v1168_v32 = vmul.f32 %v14949_v29, %v14949_v29  ;;  %v9786_v45 = vld [vmem:[#allocation17 + $0x1c0] sm:$0xf]  ;;  %v13243_v47 = vld [vmem:[#allocation17 + $0x1c4] sm:$0xf]  ;;  %v13248_v51 = vld [vmem:[#allocation17 + $0x1e4] sm:$0xf0] }
 0x35a   : > { %1237 = vmatpush.bf16.msra.mxu0 %v13181_v24  ;;  %v13247_v46 = vld [vmem:[#allocation17 + $0x1dc] sm:$0xf0]  ;;  %v9788_v49 = vld [vmem:[#allocation17 + $0x1e0] sm:$0xf0]  ;;  %v9795_v54 = vor.u32 %v13248_v51, %v9794_v50  ;;  %v9796_v56 = vld [vmem:[#allocation17 + $0x1e8] sm:$0xf0] }
 0x35b   : > { %v1169_v33 = vsub.f32 %v1167_v31, %v1168_v32  ;;  %v9787_v48 = vor.u32 %v13247_v46, %v9786_v45  ;;  %v1171_v52 = vld [vmem:[%s15789_s24] sm:$0x1]  ;;  %v9791_v53 = vor.u32 %v13243_v47, %v9788_v49  ;;  %v9799_v58 = vor.u32 %v13244_v55, %v9796_v56  ;;  %v13235_v60 = vld [vmem:[#allocation17 + $0x184] sm:$0xf]  ;;  %v9762_v2 = vld [vmem:[#allocation17 + $0x188] sm:$0xf] }
 0x35c   : > { %1303 = vmatpush.bf16.msra.mxu1 %v13185_v0  ;;  %v9754_v57 = vld [vmem:[#allocation17 + $0x180] sm:$0xf]  ;;  %v9756_v61 = vld [vmem:[#allocation17 + $0x1a0] sm:$0xf0]  ;;  %v13240_v4 = vld [vmem:[#allocation17 + $0x1a4] sm:$0xf0] }
 0x35d   : > { %v1170_v34 = vmax.f32 %v1169_v33, 0.0  ;;  %1727 = vmatpush.bf16.msra.mxu2 %v9787_v48  ;;  %v13239_v59 = vld [vmem:[#allocation17 + $0x19c] sm:$0xf0]  ;;  %1741 = vmatpush.bf16.msra.mxu3 %v9791_v53  ;;  %v9759_v1 = vor.u32 %v13235_v60, %v9756_v61  ;;  %v13236_v5 = vld [vmem:[#allocation17 + $0x18c] sm:$0xf]  ;;  %v9763_v6 = vor.u32 %v13240_v4, %v9762_v2  ;;  %vm2025_vm6 = vcmask 1044484  }
 0x35e   : > { %1238 = vmatpush.bf16.msra.mxu0 %v13180_v25  ;;  %v9755_v63 = vor.u32 %v13239_v59, %v9754_v57  ;;  %v9764_v7 = vld [vmem:[#allocation17 + $0x1a8] sm:$0xf0]  ;;  %v9722_v8 = vld [vmem:[#allocation17 + $0x140] sm:$0xf]  ;;  %v13227_v11 = vld [vmem:[#allocation17 + $0x144] sm:$0xf] }
 0x35f   : > { %v1172_v35 = vadd.f32 1e-05, %v1170_v34  ;;  %v13231_v9 = vld [vmem:[#allocation17 + $0x15c] sm:$0xf0]  ;;  %v9767_v10 = vor.u32 %v13236_v5, %v9764_v7  ;;  %v9724_v12 = vld [vmem:[#allocation17 + $0x160] sm:$0xf0] }
 0x360   : > { %1304 = vmatpush.bf16.msra.mxu1 %v13184_v39  ;;  %v9730_v13 = vld [vmem:[#allocation17 + $0x148] sm:$0xf]  ;;  %v9723_v15 = vor.u32 %v13231_v9, %v9722_v8  ;;  %v13228_v17 = vld [vmem:[#allocation17 + $0x14c] sm:$0xf]  ;;  %v9727_v19 = vor.u32 %v13227_v11, %v9724_v12  ;;  %v9690_v21 = vld [vmem:[#allocation17 + $0x100] sm:$0xf] }
 0x361   : > { %14257 = vrsqrt.f32 %v1172_v35  ;;  %vm1179_vm10 = vweird.f32 %v1172_v35  ;;  %1728 = vmatpush.bf16.msra.mxu2 %v9755_v63  ;;  %v13232_v16 = vld [vmem:[#allocation17 + $0x164] sm:$0xf0]  ;;  %v9732_v18 = vld [vmem:[#allocation17 + $0x168] sm:$0xf0]  ;;  %1742 = vmatpush.bf16.msra.mxu3 %v9759_v1  ;;  %v13223_v22 = vld [vmem:[#allocation17 + $0x11c] sm:$0xf0] }
 0x362   : > { %1239 = vmatpush.bf16.msra.mxu0 %v13179_v26  ;;  %v9731_v20 = vor.u32 %v13232_v16, %v9730_v13  ;;  %v13219_v23 = vld [vmem:[#allocation17 + $0x104] sm:$0xf]  ;;  %v9735_v24 = vor.u32 %v13228_v17, %v9732_v18  ;;  %v9698_v26 = vld [vmem:[#allocation17 + $0x108] sm:$0xf]  ;;  %v13220_v28 = vld [vmem:[#allocation17 + $0x10c] sm:$0xf]  ;;  %v9691_v34 = vor.u32 %v13223_v22, %v9690_v21 }
 0x363   : > { %v9692_v25 = vld [vmem:[#allocation17 + $0x120] sm:$0xf0]  ;;  %v9700_v30 = vld [vmem:[#allocation17 + $0x128] sm:$0xf0]  ;;  %v1184_v31 = vld [vmem:[%s15740_s4] sm:$0x1] }
 0x364   : > { %1305 = vmatpush.bf16.msra.mxu1 %v13183_v41  ;;  %v14255_v33 = vld [vmem:[#allocation12] ss:$0 sm:$0xff]  ;;  %v9658_v37 = vld [vmem:[#allocation17 + $0xc0] sm:$0xf]  ;;  %v13211_v0 = vld [vmem:[#allocation17 + $0xc4] sm:$0xf]  ;;  %v9703_v39 = vor.u32 %v13220_v28, %v9700_v30 }
 0x365   : > { %9542 = vmatmul.msk.bf16.vlgmr.msra.gmra.mxu0 %vm1228_vm9, %v9525_v27  ;;  %v13224_v27 = vld [vmem:[#allocation17 + $0x124] sm:$0xf0]  ;;  %1729 = vmatpush.bf16.msra.mxu2 %v9723_v15  ;;  %v13212_v43 = vld [vmem:[#allocation17 + $0xcc] sm:$0xf]  ;;  %v9626_v50 = vld [vmem:[#allocation17 + $0x80] sm:$0xf] }
 0x366   : > { %1755 = vmatpush.bf16.msrb.mxu0 %v9795_v54  ;;  %1743 = vmatpush.bf16.msra.mxu3 %v9727_v19  ;;  %v9666_v41 = vld [vmem:[#allocation17 + $0xc8] sm:$0xf]  ;;  %v13207_v51 = vld [vmem:[#allocation17 + $0x9c] sm:$0xf0]  ;;  %v9628_v54 = vld [vmem:[#allocation17 + $0xa0] sm:$0xf0] }
 0x367   : > { %v14258_v36 = vpop.eup %14257  ;;  %v9634_v55 = vld [vmem:[#allocation17 + $0x88] sm:$0xf]  ;;  %v13204_v57 = vld [vmem:[#allocation17 + $0x8c] sm:$0xf]  ;;  %v9627_v61 = vor.u32 %v13207_v51, %v9626_v50  ;;  %v9594_v1 = vld [vmem:[#allocation17 + $0x40] sm:$0xf] }
 0x368   : > { %v1174_v38 = vmul.f32 %v14258_v36, %v1172_v35  ;;  %vm1180_vm11 = vweird.f32 %v14258_v36  ;;  %1769 = vmatpush.bf16.msrb.mxu1 %v9799_v58  ;;  %v9695_v35 = vor.u32 %v13219_v23, %v9692_v25  ;;  %v13208_v56 = vld [vmem:[#allocation17 + $0xa4] sm:$0xf0]  ;;  %v9636_v58 = vld [vmem:[#allocation17 + $0xa8] sm:$0xf0]  ;;  %v13199_v2 = vld [vmem:[#allocation17 + $0x5c] sm:$0xf0] }
 0x369   : > { %vm14953_vm12 = vmor %vm1179_vm10, %vm1180_vm11  ;;  %1730 = vmatpush.bf16.msra.mxu2 %v9691_v34  ;;  %v9635_v63 = vor.u32 %v13208_v56, %v9634_v55  ;;  %v13195_v4 = vld [vmem:[#allocation17 + $0x44] sm:$0xf]  ;;  %v9602_v8 = vld [vmem:[#allocation17 + $0x48] sm:$0xf]  ;;  %vm2019_vm7 = vcmask 1040384   ;;  %vm2027_vm8 = vcmask 1046534  }
 0x36a   : > { %v1175_v3 = vmul.f32 %v14258_v36, %v1174_v38  ;;  %1756 = vmatpush.bf16.msrb.mxu0 %v9763_v6  ;;  %v13215_v38 = vld [vmem:[#allocation17 + $0xdc] sm:$0xf0]  ;;  %1744 = vmatpush.bf16.msra.mxu3 %v9695_v35  ;;  %v9639_v6 = vor.u32 %v13204_v57, %v9636_v58  ;;  %v9596_v7 = vld [vmem:[#allocation17 + $0x60] sm:$0xf0]  ;;  %v13200_v9 = vld [vmem:[#allocation17 + $0x64] sm:$0xf0] }
 0x36b   : > { %v9659_v47 = vor.u32 %v13215_v38, %v9658_v37  ;;  %v13196_v11 = vld [vmem:[#allocation17 + $0x4c] sm:$0xf]  ;;  %v9599_v16 = vor.u32 %v13195_v4, %v9596_v7  ;;  %v9603_v17 = vor.u32 %v13200_v9, %v9602_v8  ;;  %v1141_v23 = vld [vmem:[#allocation4] sm:$0x1]  ;;  %v1143_v25 = vld [vmem:[#allocation5] sm:$0x1] }
 0x36c   : > { %v1176_v40 = vmul.f32 0.5, %v1175_v3  ;;  %1770 = vmatpush.bf16.msrb.mxu1 %v9767_v10  ;;  %v9604_v12 = vld [vmem:[#allocation17 + $0x68] sm:$0xf0]  ;;  %v13187_v34 = vld [vmem:[#allocation17 + $0x4] sm:$0xf] }
 0x36d   : > { %1731 = vmatpush.bf16.msra.mxu2 %v9659_v47  ;;  %v9607_v18 = vor.u32 %v13196_v11, %v9604_v12  ;;  %v9564_v37 = vld [vmem:[#allocation17 + $0x20] sm:$0xf0]  ;;  %v9570_v38 = vld [vmem:[#allocation17 + $0x8] sm:$0xf]  ;;  %v9804_v47 = vld [vmem:[#allocation17 + $0x1f0] sm:$0xf0] }
 0x36e   : > { %v1177_v42 = vsub.f32 1.5, %v1176_v40  ;;  %1757 = vmatpush.bf16.msrb.mxu0 %v9731_v20  ;;  %v9660_v40 = vld [vmem:[#allocation17 + $0xe0] sm:$0xf0]  ;;  %v13250_v50 = vld [vmem:[#allocation17 + $0x1f4] sm:$0xf0] }
 0x36f   : > { %v9663_v48 = vor.u32 %v13211_v0, %v9660_v40  ;;  %v9567_v0 = vor.u32 %v13187_v34, %v9564_v37  ;;  %v9572_v40 = vld [vmem:[#allocation17 + $0x28] sm:$0xf0]  ;;  %v13246_v51 = vld [vmem:[#allocation17 + $0x1dc] sm:$0xf]  ;;  %v9770_v55 = vld [vmem:[#allocation17 + $0x190] sm:$0xf] }
 0x370   : > { %v1178_v44 = vmul.f32 %v14258_v36, %v1177_v42  ;;  %1771 = vmatpush.bf16.msrb.mxu1 %v9735_v24  ;;  %v13216_v42 = vld [vmem:[#allocation17 + $0xe4] sm:$0xf0]  ;;  %v14971_v24 = vmul.f32 0.03125, %v1141_v23  ;;  %v13241_v56 = vld [vmem:[#allocation17 + $0x1ac] sm:$0xf0] }
 0x371   : > { %v9667_v49 = vor.u32 %v13216_v42, %v9666_v41  ;;  %1745 = vmatpush.bf16.msra.mxu3 %v9663_v48  ;;  %1732 = vmatpush.bf16.msra.mxu2 %v9627_v61  ;;  %v9810_v48 = vld [vmem:[#allocation17 + $0x1d8] sm:$0xf]  ;;  %v13237_v57 = vld [vmem:[#allocation17 + $0x194] sm:$0xf]  ;;  %v9771_v58 = vor.u32 %v13241_v56, %v9770_v55  ;;  %v9780_v4 = vld [vmem:[#allocation17 + $0x1b8] sm:$0xf0] }
 0x372   : > { %v1182_v62 = vsel %vm14953_vm12, %v14258_v36, %v1178_v44  ;;  %v9699_v36 = vor.u32 %v13224_v27, %v9698_v26  ;;  %v9668_v44 = vld [vmem:[#allocation17 + $0xe8] sm:$0xf0]  ;;  %v1144_v26 = vmul.f32 0.03125, %v1143_v25  ;;  %v1145_v27 = vmul.f32 %v14971_v24, %v14971_v24  ;;  %v13242_v61 = vld [vmem:[#allocation17 + $0x1b4] sm:$0xf0] }
 0x373   : > { %v14962_v14 = vmul.f32 %v1182_v62, %v1171_v52  ;;  %v13203_v52 = vld [vmem:[#allocation17 + $0x84] sm:$0xf]  ;;  %v9671_v53 = vor.u32 %v13212_v43, %v9668_v44  ;;  %v9802_v43 = vld [vmem:[#allocation17 + $0x1d0] sm:$0xf]  ;;  %v13229_v8 = vld [vmem:[#allocation17 + $0x154] sm:$0xf] }
 0x374   : > { %1758 = vmatpush.bf16.msrb.mxu0 %v9699_v36  ;;  %1772 = vmatpush.bf16.msrb.mxu1 %v9703_v39  ;;  %v9631_v62 = vor.u32 %v13203_v52, %v9628_v54  ;;  %v1146_v28 = vsub.f32 %v1144_v26, %v1145_v27  ;;  %v13188_v39 = vld [vmem:[#allocation17 + $0xc] sm:$0xf]  ;;  %v13249_v44 = vld [vmem:[#allocation17 + $0x1ec] sm:$0xf0]  ;;  %v9812_v52 = vld [vmem:[#allocation17 + $0x1f8] sm:$0xf0] }
 0x375   : > { %v1185_v32 = vmul.f32 %v14962_v14, %v14949_v29  ;;  %v1247_v46 = vperm.slane %v14962_v14, 0  ;;  %v9595_v14 = vor.u32 %v13199_v2, %v9594_v1  ;;  %v9575_v42 = vor.u32 %v13188_v39, %v9572_v40  ;;  %v13238_v2 = vld [vmem:[#allocation17 + $0x19c] sm:$0xf]  ;;  %v13233_v7 = vld [vmem:[#allocation17 + $0x16c] sm:$0xf0] }
 0x376   : > { %1746 = vmatpush.bf16.msra.mxu3 %v9631_v62  ;;  %v1147_v30 = vmax.f32 %v1146_v28, 0.0  ;;  %v9815_v54 = vor.u32 %v13246_v51, %v9812_v52  ;;  %v9746_v11 = vld [vmem:[#allocation17 + $0x158] sm:$0xf]  ;;  %v9708_v23 = vld [vmem:[#allocation17 + $0x130] sm:$0xf0] }
 0x377   : > { %v1186_v45 = vsub.f32 %v1184_v31, %v1185_v32  ;;  %1733 = vmatpush.bf16.msra.mxu2 %v9595_v14  ;;  %v9562_v32 = vld [vmem:[#allocation17] sm:$0xf]  ;;  %v13234_v12 = vld [vmem:[#allocation17 + $0x174] sm:$0xf0]  ;;  %v13230_v14 = vld [vmem:[#allocation17 + $0x15c] sm:$0xf] }
 0x378   : > { %1759 = vmatpush.bf16.msrb.mxu0 %v9667_v49  ;;  %1773 = vmatpush.bf16.msrb.mxu1 %v9671_v53  ;;  %v14975_v31 = vadd.f32 1e-05, %v1147_v30  ;;  %v9811_v53 = vor.u32 %v13250_v50, %v9810_v48  ;;  %v9714_v25 = vld [vmem:[#allocation17 + $0x118] sm:$0xf]  ;;  %v13222_v28 = vld [vmem:[#allocation17 + $0x11c] sm:$0xf] }
 0x379   : > { %v1252_v60 = vperm.slane %v1186_v45, 0  ;;  %v13226_v26 = vld [vmem:[#allocation17 + $0x134] sm:$0xf0]  ;;  %v9716_v30 = vld [vmem:[#allocation17 + $0x138] sm:$0xf0] }
 0x37a   : > { %1747 = vmatpush.bf16.msra.mxu3 %v9599_v16  ;;  %14259 = vrsqrt.f32 %v14975_v31  ;;  %vm1156_vm13 = vweird.f32 %v14975_v31  ;;  %v9719_v34 = vor.u32 %v13222_v28, %v9716_v30  ;;  %v9674_v37 = vld [vmem:[#allocation17 + $0xd0] sm:$0xf]  ;;  %v9676_v39 = vld [vmem:[#allocation17 + $0xf0] sm:$0xf0]  ;;  %v9682_v40 = vld [vmem:[#allocation17 + $0xd8] sm:$0xf] }
 0x37b   : > { %v13205_v48 = vld [vmem:[#allocation17 + $0x94] sm:$0xf]  ;;  %v1148_v50 = vld [vmem:[%s15743_s7] sm:$0x1]  ;;  %v9650_v52 = vld [vmem:[#allocation17 + $0x98] sm:$0xf] }
 0x37c   : > { %1760 = vmatpush.bf16.msrb.mxu0 %v9635_v63  ;;  %1774 = vmatpush.bf16.msrb.mxu1 %v9639_v6  ;;  %v9738_v6 = vld [vmem:[#allocation17 + $0x150] sm:$0xf]  ;;  %v9652_v56 = vld [vmem:[#allocation17 + $0xb8] sm:$0xf0] }
 0x37d   : > { %v9739_v9 = vor.u32 %v13233_v7, %v9738_v6 }
 0x37e   : > { %1748 = vmatpush.bf16.msra.mxu3 %v9567_v0  ;;  %v13213_v0 = vld [vmem:[#allocation17 + $0xd4] sm:$0xf] }
 0x380   : > { %1761 = vmatpush.bf16.msrb.mxu0 %v9603_v17  ;;  %1775 = vmatpush.bf16.msrb.mxu1 %v9607_v18  ;;  %v14978_v35 = vpop.eup %14259  ;;  %v9747_v17 = vor.u32 %v13234_v12, %v9746_v11  ;;  %v13189_v12 = vld [vmem:[#allocation17 + $0x14] sm:$0xf] }
 0x381   : > { %v1151_v45 = vmul.f32 %v14978_v35, %v14975_v31  ;;  %vm1157_vm14 = vweird.f32 %v14978_v35  ;;  %v13214_v31 = vld [vmem:[#allocation17 + $0xdc] sm:$0xf] }
 0x382   : > { %vm14989_vm15 = vmor %vm1156_vm13, %vm1157_vm14 }
 0x383   : > { %v1152_v62 = vmul.f32 %v14978_v35, %v1151_v45  ;;  %v9684_v45 = vld [vmem:[#allocation17 + $0xf8] sm:$0xf0] }
 0x384   : > { %1776 = vmatpush.bf16.msrb.mxu1 %v9575_v42 }
 0x385   : > { %v1153_v16 = vmul.f32 0.5, %v1152_v62  ;;  %v13197_v62 = vld [vmem:[#allocation17 + $0x54] sm:$0xf] }
 0x3e2   : > { %v1241_v3 = vpop.f32.mrf.mxu0 }
 0x3e3   : > { %v1242_v29 = vadd.f32 %v14255_v33, %v1241_v3  ;;  %v13192_v3 = vld [vmem:[#allocation17 + $0x24] sm:$0xf0] }
 0x3e4   : > { %v9571_v41 = vor.u32 %v13192_v3, %v9570_v38  ;;  %v13217_v38 = vld [vmem:[#allocation17 + $0xec] sm:$0xf0] }
 0x3e5   : > { %v1249_v59 = vmul.f32 %v1247_v46, %v1242_v29  ;;  %v9803_v29 = vor.u32 %v13249_v44, %v9802_v43  ;;  %v9675_v3 = vor.u32 %v13217_v38, %v9674_v37  ;;  %v9679_v43 = vor.u32 %v13213_v0, %v9676_v39 }
 0x3e6   : > { %1762 = vmatpush.bf16.msrb.mxu0 %v9571_v41  ;;  %v13218_v41 = vld [vmem:[#allocation17 + $0xf4] sm:$0xf0] }
 0x3e7   : > { %v1254_v13 = vadd.f32 %v1252_v60, %v1249_v59  ;;  %v9772_v59 = vld [vmem:[#allocation17 + $0x1b0] sm:$0xf0]  ;;  %v9683_v44 = vor.u32 %v13218_v41, %v9682_v40 }
 0x3e8   : > { %v9775_v63 = vor.u32 %v13237_v57, %v9772_v59  ;;  %v9610_v57 = vld [vmem:[#allocation17 + $0x50] sm:$0xf] }
 0x3e9   : > { %v1256_v20 = vmax.f32 %v1254_v13, 0.0 }
 0x3ea   : > { %v1243_v5 = vpop.f32.mrf.mxu0  ;;  %1811 = vmatpush.bf16.msra.mxu0 %v9811_v53  ;;  %v13210_v53 = vld [vmem:[#allocation17 + $0xb4] sm:$0xf0] }
 0x3eb   : > { %v1244_v10 = vadd.f32 %v14255_v33, %v1243_v5  ;;  %v13191_v33 = vld [vmem:[#allocation17 + $0x1c] sm:$0xf0]  ;;  %v9783_v5 = vor.u32 %v13238_v2, %v9780_v4  ;;  %v13202_v2 = vld [vmem:[#allocation17 + $0x74] sm:$0xf0]  ;;  %v13198_v4 = vld [vmem:[#allocation17 + $0x5c] sm:$0xf] }
 0x3ec   : > { %v9563_v36 = vor.u32 %v13191_v33, %v9562_v32  ;;  %v1154_v32 = vsub.f32 1.5, %v1153_v16  ;;  %v9715_v33 = vor.u32 %v13226_v26, %v9714_v25  ;;  %v13190_v16 = vld [vmem:[#allocation17 + $0x1c] sm:$0xf] }
 0x3ed   : > { %v1250_v15 = vmul.f32 %v1247_v46, %v1244_v10  ;;  %v13245_v46 = vld [vmem:[#allocation17 + $0x1d4] sm:$0xf] }
 0x3ee   : > { %1734 = vmatpush.bf16.msra.mxu2 %v9563_v36  ;;  %v9807_v49 = vor.u32 %v13245_v46, %v9804_v47  ;;  %v9740_v10 = vld [vmem:[#allocation17 + $0x170] sm:$0xf0]  ;;  %v1155_v42 = vmul.f32 %v14978_v35, %v1154_v32  ;;  %v9687_v46 = vor.u32 %v13214_v31, %v9684_v45  ;;  %v13209_v47 = vld [vmem:[#allocation17 + $0xac] sm:$0xf0] }
 0x3ef   : > { %v1255_v19 = vadd.f32 %v1252_v60, %v1250_v15  ;;  %v9778_v60 = vld [vmem:[#allocation17 + $0x198] sm:$0xf]  ;;  %v9743_v13 = vor.u32 %v13229_v8, %v9740_v10  ;;  %v9748_v15 = vld [vmem:[#allocation17 + $0x178] sm:$0xf0]  ;;  %v13193_v10 = vld [vmem:[#allocation17 + $0x2c] sm:$0xf0] }
 0x3f0   : > { %1797 = vmatpush.bf16.msrb.mxu3 %v9807_v49  ;;  %v9779_v1 = vor.u32 %v13242_v61, %v9778_v60  ;;  %v9751_v18 = vor.u32 %v13230_v14, %v9748_v15  ;;  %v9644_v49 = vld [vmem:[#allocation17 + $0xb0] sm:$0xf0]  ;;  %v1159_v59 = vsel %vm14989_vm15, %v14978_v35, %v1155_v42  ;;  %v9651_v60 = vor.u32 %v13210_v53, %v9650_v52  ;;  %v9586_v14 = vld [vmem:[#allocation17 + $0x18] sm:$0xf]  ;;  %v15004_v42 = vld [vmem:[#allocation18] sm:$0xff] }
 0x3f1   : > { %v1257_v21 = vmax.f32 %v1255_v19, 0.0  ;;  %v9706_v19 = vld [vmem:[#allocation17 + $0x110] sm:$0xf]  ;;  %v9647_v55 = vor.u32 %v13205_v48, %v9644_v49  ;;  %v1160_v7 = vmul.f32 %v1159_v59, %v1148_v50  ;;  %v13194_v15 = vld [vmem:[#allocation17 + $0x34] sm:$0xf0]  ;;  %v1392_v52 = vperm.slane %v15004_v42, 1 }
 0x3f2   : > { %1783 = vmatpush.bf16.msrb.mxu2 %v9803_v29  ;;  %1812 = vmatpush.bf16.msra.mxu0 %v9779_v1  ;;  %v9642_v29 = vld [vmem:[#allocation17 + $0x90] sm:$0xf]  ;;  %v9618_v1 = vld [vmem:[#allocation17 + $0x58] sm:$0xf]  ;;  %v9587_v25 = vor.u32 %v13194_v15, %v9586_v14 }
 0x3f3   : > { %v1258_v22 = vpack.c.bf16 %v1257_v21, %v1256_v20  ;;  %v13225_v20 = vld [vmem:[#allocation17 + $0x12c] sm:$0xf0]  ;;  %v13221_v21 = vld [vmem:[#allocation17 + $0x114] sm:$0xf]  ;;  %v9643_v51 = vor.u32 %v13209_v47, %v9642_v29  ;;  %v9619_v35 = vor.u32 %v13202_v2, %v9618_v1  ;;  %v1313_v30 = vperm.slane %v1160_v7, 0 }
 0x3f4   : > { %1798 = vmatpush.bf16.msrb.mxu3 %v9775_v63  ;;  %v9711_v27 = vor.u32 %v13221_v21, %v9708_v23  ;;  %v9612_v63 = vld [vmem:[#allocation17 + $0x70] sm:$0xf0] }
 0x3f5   : > { %9559 = vmatmul.msk.bf16.vlgmr.msra.gmra.mxu1 %vm1228_vm9, %v1258_v22  ;;  %v9707_v22 = vor.u32 %v13225_v20, %v9706_v19  ;;  %v9615_v8 = vor.u32 %v13197_v62, %v9612_v63  ;;  %v1162_v19 = vmul.f32 %v1160_v7, %v14971_v24  ;;  %v14256_v20 = vld [vmem:[#allocation15] ss:$0 sm:$0xff] }
 0x3f6   : > { %1825 = vmatpush.bf16.msra.mxu1 %v9815_v54  ;;  %1784 = vmatpush.bf16.msrb.mxu2 %v9771_v58  ;;  %v13206_v54 = vld [vmem:[#allocation17 + $0x9c] sm:$0xf]  ;;  %v13201_v58 = vld [vmem:[#allocation17 + $0x6c] sm:$0xf0] }
 0x3f7   : > { %1813 = vmatpush.bf16.msra.mxu0 %v9747_v17  ;;  %v9655_v61 = vor.u32 %v13206_v54, %v9652_v56  ;;  %v9611_v6 = vor.u32 %v13201_v58, %v9610_v57  ;;  %v9588_v17 = vld [vmem:[#allocation17 + $0x38] sm:$0xf0] }
 0x3f8   : > { %1799 = vmatpush.bf16.msrb.mxu3 %v9743_v13  ;;  %v9580_v13 = vld [vmem:[#allocation17 + $0x30] sm:$0xf0]  ;;  %v9591_v26 = vor.u32 %v13190_v16, %v9588_v17 }
 0x3f9   : > { %v9583_v21 = vor.u32 %v13189_v12, %v9580_v13 }
 0x3fa   : > { %1826 = vmatpush.bf16.msra.mxu1 %v9783_v5  ;;  %1785 = vmatpush.bf16.msrb.mxu2 %v9739_v9  ;;  %v9620_v5 = vld [vmem:[#allocation17 + $0x78] sm:$0xf0]  ;;  %v9578_v9 = vld [vmem:[#allocation17 + $0x10] sm:$0xf] }
 0x3fb   : > { %1814 = vmatpush.bf16.msra.mxu0 %v9715_v33  ;;  %v9623_v11 = vor.u32 %v13198_v4, %v9620_v5 }
 0x3fc   : > { %1800 = vmatpush.bf16.msrb.mxu3 %v9711_v27 }
 0x3fe   : > { %1827 = vmatpush.bf16.msra.mxu1 %v9751_v18  ;;  %1786 = vmatpush.bf16.msrb.mxu2 %v9707_v22  ;;  %v9579_v18 = vor.u32 %v13193_v10, %v9578_v9  ;;  %v1161_v22 = vld [vmem:[%s15744_s8] sm:$0x1] }
 0x3ff   : > { %1815 = vmatpush.bf16.msra.mxu0 %v9683_v44  ;;  %v1163_v27 = vsub.f32 %v1161_v22, %v1162_v19  ;;  %v1394_v44 = vperm.slane %v15004_v42, 3 }
 0x400   : > { %1801 = vmatpush.bf16.msrb.mxu3 %v9679_v43  ;;  %v1393_v43 = vperm.slane %v15004_v42, 2 }
 0x401   : > { %v1318_v32 = vperm.slane %v1163_v27, 0  ;;  %v1397_v27 = vperm.slane %v15004_v42, 6 }
 0x402   : > { %1828 = vmatpush.bf16.msra.mxu1 %v9719_v34  ;;  %1787 = vmatpush.bf16.msrb.mxu2 %v9675_v3 }
 0x403   : > { %1816 = vmatpush.bf16.msra.mxu0 %v9651_v60 }
 0x404   : > { %1802 = vmatpush.bf16.msrb.mxu3 %v9647_v55 }
 0x406   : > { %1829 = vmatpush.bf16.msra.mxu1 %v9687_v46  ;;  %1788 = vmatpush.bf16.msrb.mxu2 %v9643_v51  ;;  %v1391_v51 = vperm.slane %v15004_v42, 0 }
 0x407   : > { %1817 = vmatpush.bf16.msra.mxu0 %v9619_v35 }
 0x408   : > { %1803 = vmatpush.bf16.msrb.mxu3 %v9615_v8 }
 0x40a   : > { %1830 = vmatpush.bf16.msra.mxu1 %v9655_v61  ;;  %1789 = vmatpush.bf16.msrb.mxu2 %v9611_v6 }
 0x40b   : > { %1818 = vmatpush.bf16.msra.mxu0 %v9587_v25 }
 0x40c   : > { %1804 = vmatpush.bf16.msrb.mxu3 %v9583_v21 }
 0x40e   : > { %1831 = vmatpush.bf16.msra.mxu1 %v9623_v11  ;;  %1790 = vmatpush.bf16.msrb.mxu2 %v9579_v18 }
 0x412   : > { %1832 = vmatpush.bf16.msra.mxu1 %v9591_v26 }
 0x472   : > { %v1307_v23 = vpop.f32.mrf.mxu1 }
 0x473   : > { %v1308_v28 = vadd.f32 %v14256_v20, %v1307_v23 }
 0x475   : > { %v1315_v24 = vmul.f32 %v1313_v30, %v1308_v28  ;;  %v14683_v28 = vmov 1.0  }
 0x477   : > { %v1320_v36 = vadd.f32 %v1318_v32, %v1315_v24 }
 0x479   : > { %v1322_v0 = vmax.f32 %v1320_v36, 0.0 }
 0x47a   : > { %v1309_v33 = vpop.f32.mrf.mxu1 }
 0x47b   : > { %v1310_v34 = vadd.f32 %v14256_v20, %v1309_v33 }
 0x47d   : > { %v1316_v37 = vmul.f32 %v1313_v30, %v1310_v34 }
 0x47f   : > { %v1321_v38 = vadd.f32 %v1318_v32, %v1316_v37  ;;  %v1398_v32 = vperm.slane %v15004_v42, 7 }
 0x481   : > { %v1323_v3 = vmax.f32 %v1321_v38, 0.0 }
 0x483   : > { %v1324_v39 = vpack.c.bf16 %v1323_v3, %v1322_v0 }
 0x485   : > { %1735 = vmatmul.bf16.vlgmr.msra.gmra.mxu2 %v1324_v39  ;;  %1749 = vmatmul.bf16.vlgmr.msra.gmra.mxu3 %v1324_v39 }
 0x486   : > { %1763 = vmatmul.bf16.vlgmr.msrb.gmra.mxu0 %v1324_v39  ;;  %1777 = vmatmul.bf16.vlgmr.msrb.gmra.mxu1 %v1324_v39 }
 0x495   : > { %1791 = vmatmul.bf16.vlgmr.msrb.gmra.mxu2 %v1324_v39  ;;  %1805 = vmatmul.bf16.vlgmr.msrb.gmra.mxu3 %v1324_v39 }
 0x496   : > { %1819 = vmatmul.bf16.vlgmr.msra.gmra.mxu0 %v1324_v39  ;;  %1833 = vmatmul.bf16.vlgmr.msra.gmra.mxu1 %v1324_v39 }
 0x503   : > { %v1764_v40 = vpop.f32.mrf.mxu0  ;;  %v1778_v41 = vpop.f32.mrf.mxu1 }
 0x504   : > { %v15008_v47 = vadd.f32 %v1764_v40, %v1393_v43  ;;  %v15010_v48 = vadd.f32 %v1778_v41, %v1394_v44 }
 0x508   : > { %v1736_v31 = vpop.f32.mrf.mxu2  ;;  %v1750_v45 = vpop.f32.mrf.mxu3 }
 0x509   : > { %v15026_v63 = vadd.f32 %v1736_v31, %v1391_v51  ;;  %v15028_v1 = vadd.f32 %v1750_v45, %v1392_v52  ;;  %v2350_v31 = vlaneseq  ;;  %v2352_v45 = vstv %s14640_s0 }
 0x50b   : > { %v1766_v29 = vpop.f32.mrf.mxu0  ;;  %v1780_v46 = vpop.f32.mrf.mxu1 }
 0x50c   : > { %v15012_v49 = vadd.f32 %v1766_v29, %v1393_v43  ;;  %v15014_v50 = vadd.f32 %v1780_v46, %v1394_v44  ;;  %v1395_v29 = vperm.slane %v15004_v42, 4  ;;  %v1396_v46 = vperm.slane %v15004_v42, 5 }
 0x50e   : > { %v2252_v53 = vmax.f32 %v15008_v47, %v15012_v49  ;;  %v2308_v54 = vmin.f32 %v15008_v47, %v15012_v49  ;;  %v2259_v55 = vmax.f32 %v15010_v48, %v15014_v50  ;;  %v2315_v56 = vmin.f32 %v15010_v48, %v15014_v50 }
 0x510   : > { %v2253_v57 = vrot.slane %v2252_v53, 4  ;;  %v2309_v58 = vrot.slane %v2308_v54, 4  ;;  %v2260_v59 = vrot.slane %v2259_v55, 4  ;;  %v2316_v60 = vrot.slane %v2315_v56, 4  ;;  %v1738_v61 = vpop.f32.mrf.mxu2  ;;  %v1752_v62 = vpop.f32.mrf.mxu3 }
 0x511   : > { %v15030_v2 = vadd.f32 %v1738_v61, %v1391_v51  ;;  %v15032_v4 = vadd.f32 %v1752_v62, %v1392_v52 }
 0x512   : > { %v2254_v5 = vmax.f32 %v2252_v53, %v2253_v57  ;;  %v2310_v6 = vmin.f32 %v2308_v54, %v2309_v58  ;;  %v2261_v7 = vmax.f32 %v2259_v55, %v2260_v59  ;;  %v2317_v8 = vmin.f32 %v2315_v56, %v2316_v60 }
 0x513   : > { %v2238_v9 = vmax.f32 %v15026_v63, %v15030_v2  ;;  %v2245_v10 = vmax.f32 %v15028_v1, %v15032_v4  ;;  %v2301_v35 = vmin.f32 %v15028_v1, %v15032_v4  ;;  %v15040_v11 = vpop.f32.mrf.mxu0  ;;  %v15042_v12 = vpop.f32.mrf.mxu1  ;;  %1858 = vmatpush.msra.mxu2 %v15030_v2  ;;  %1878 = vmatpush.msra.mxu3 %v15032_v4 }
 0x514   : > { %v2255_v13 = vrot.slane %v2254_v5, 2  ;;  %v2262_v14 = vrot.slane %v2261_v7, 2  ;;  %v2294_v16 = vmin.f32 %v15026_v63, %v15030_v2  ;;  %v2311_v20 = vrot.slane %v2310_v6, 2 }
 0x515   : > { %v2239_v15 = vrot.slane %v2238_v9, 4  ;;  %v2246_v17 = vrot.slane %v2245_v10, 4  ;;  %v2302_v18 = vrot.slane %v2301_v35, 4  ;;  %1859 = vmatpush.msra.mxu2 %v15026_v63  ;;  %v2318_v22 = vrot.slane %v2317_v8, 2  ;;  %1879 = vmatpush.msra.mxu3 %v15028_v1 }
 0x516   : > { %v2256_v19 = vmax.f32 %v2254_v5, %v2255_v13  ;;  %v2263_v21 = vmax.f32 %v2261_v7, %v2262_v14  ;;  %9816 = vmatmul.msk.f32.vlgmr.msra.gmra.mxu2 %vm1840_vm0, %v14683_v28  ;;  %9817 = vmatmul.msk.f32.vlgmr.msra.gmra.mxu3 %vm1840_vm0, %v14683_v28  ;;  %v2312_v38 = vmin.f32 %v2310_v6, %v2311_v20  ;;  %v2295_v3 = vrot.slane %v2294_v16, 4  ;;  %v15089_v14 = vld [vmem:[#allocation8] sm:$0xff] }
 0x517   : > { %v2240_v23 = vmax.f32 %v2238_v9, %v2239_v15  ;;  %v2247_v25 = vmax.f32 %v2245_v10, %v2246_v17  ;;  %v2303_v26 = vmin.f32 %v2301_v35, %v2302_v18  ;;  %1898 = vmatpush.msrb.mxu2 %v15012_v49  ;;  %1918 = vmatpush.msrb.mxu3 %v15014_v50 }
 0x518   : > { %v2257_v30 = vrot.slane %v2256_v19, 1  ;;  %v2264_v24 = vrot.slane %v2263_v21, 1  ;;  %v1792_v33 = vpop.f32.mrf.mxu2  ;;  %v15057_v34 = vpop.f32.mrf.mxu3  ;;  %v2319_v0 = vmin.f32 %v2317_v8, %v2318_v22  ;;  %v2039_v55 = vmul.f32 %v15008_v47, %v15008_v47 }
 0x519   : > { %v2241_v36 = vrot.slane %v2240_v23, 2  ;;  %v2248_v37 = vrot.slane %v2247_v25, 2  ;;  %v2304_v39 = vrot.slane %v2303_v26, 2  ;;  %1899 = vmatpush.msrb.mxu2 %v15008_v47  ;;  %1919 = vmatpush.msrb.mxu3 %v15010_v48  ;;  %v2040_v56 = vmul.f32 %v15010_v48, %v15010_v48 }
 0x51a   : > { %v2258_v40 = vmax.f32 %v2256_v19, %v2257_v30  ;;  %v2265_v41 = vmax.f32 %v2263_v21, %v2264_v24  ;;  %v2313_v57 = vrot.slane %v2312_v38, 1  ;;  %v2320_v58 = vrot.slane %v2319_v0, 1 }
 0x51b   : > { %v2242_v43 = vmax.f32 %v2240_v23, %v2241_v36  ;;  %v2249_v44 = vmax.f32 %v2247_v25, %v2248_v37  ;;  %v1822_v53 = vpop.f32.mrf.mxu0  ;;  %v1836_v54 = vpop.f32.mrf.mxu1  ;;  %v2296_v59 = vmin.f32 %v2294_v16, %v2295_v3  ;;  %v2047_v60 = vmul.f32 %v15012_v49, %v15012_v49 }
 0x51c   : > { %v2365_v61 = vrot.slane %v2258_v40, 4  ;;  %v2366_v62 = vrot.slane %v2265_v41, 2  ;;  %v2305_v42 = vmin.f32 %v2303_v26, %v2304_v39  ;;  %v15074_v6 = vadd.f32 %v15040_v11, %v1397_v27 }
 0x51d   : > { %v2243_v51 = vrot.slane %v2242_v43, 1  ;;  %v2250_v52 = vrot.slane %v2249_v44, 1  ;;  %v15077_v47 = vadd.f32 %v15042_v12, %v1398_v32  ;;  %v15079_v48 = vadd.f32 %v1822_v53, %v1397_v27 }
 0x51e   : > { %9818 = vmatmul.msk.f32.vlgmr.msrb.gmra.mxu2 %vm1840_vm0, %v14683_v28  ;;  %v15081_v7 = vadd.f32 %v1836_v54, %v1398_v32  ;;  %9819 = vmatmul.msk.f32.vlgmr.msrb.gmra.mxu3 %vm1840_vm0, %v14683_v28  ;;  %v15085_v35 = vadd.f32 %v1792_v33, %v1395_v29  ;;  %v2297_v11 = vrot.slane %v2296_v59, 2  ;;  %v2371_v17 = vsel %vm2029_vm1, %v2365_v61, %v2366_v62 }
 0x51f   : > { %v2251_v5 = vmax.f32 %v2249_v44, %v2250_v52  ;;  %v2244_v9 = vmax.f32 %v2242_v43, %v2243_v51  ;;  %v2280_v12 = vmax.f32 %v15074_v6, %v15079_v48  ;;  %1978 = vmatpush.msra.mxu2 %v15079_v48  ;;  %v2306_v18 = vrot.slane %v2305_v42, 1 }
 0x520   : > { %v1794_v49 = vpop.f32.mrf.mxu2  ;;  %v1808_v8 = vpop.f32.mrf.mxu3  ;;  %v2287_v15 = vmax.f32 %v15077_v47, %v15081_v7  ;;  %1998 = vmatpush.msra.mxu3 %v15081_v7  ;;  %v2336_v23 = vmin.f32 %v15074_v6, %v15079_v48  ;;  %v2048_v25 = vmul.f32 %v15014_v50, %v15014_v50  ;;  %v15110_v26 = vmin.f32 %v2312_v38, %v2313_v57 }
 0x521   : > { %v2364_v10 = vrot.slane %v2251_v5, 6  ;;  %v15087_v13 = vadd.f32 %v1794_v49, %v1395_v29  ;;  %v15096_v16 = vadd.f32 %v1808_v8, %v1396_v46  ;;  %v2281_v22 = vrot.slane %v2280_v12, 4  ;;  %1979 = vmatpush.msra.mxu2 %v15074_v6 }
 0x522   : > { %v15114_v30 = vadd.f32 %v15057_v34, %v1396_v46  ;;  %v2288_v24 = vrot.slane %v2287_v15, 4  ;;  %1999 = vmatpush.msra.mxu3 %v15077_v47  ;;  %v15117_v32 = vmin.f32 %v2319_v0, %v2320_v58  ;;  %v2298_v33 = vmin.f32 %v2296_v59, %v2297_v11 }
 0x523   : > { %v2370_v19 = vsel %vm2023_vm2, %v2244_v9, %v2364_v10  ;;  %v2266_v20 = vmax.f32 %v15085_v35, %v15087_v13  ;;  %1938 = vmatpush.msrb.mxu0 %v15087_v13  ;;  %2107 = vmatpush.msrb.mxu2 %v2047_v60  ;;  %v2282_v36 = vmax.f32 %v2280_v12, %v2281_v22  ;;  %v2337_v40 = vrot.slane %v2336_v23, 4 }
 0x524   : > { %v2372_v21 = vsel %vm2031_vm3, %v2370_v19, %v2371_v17  ;;  %2127 = vmatpush.msrb.mxu3 %v2048_v25  ;;  %1958 = vmatpush.msrb.mxu1 %v15096_v16  ;;  %v2307_v50 = vmin.f32 %v2305_v42, %v2306_v18  ;;  %v2289_v38 = vmax.f32 %v2287_v15, %v2288_v24  ;;  %v2351_v43 = vshrl.u32 %v2350_v31, 7 }
 0x525   : > { %v2378_v27 = vmax.f32 %v15089_v14, %v2372_v21  ;;  %v2267_v37 = vrot.slane %v2266_v20, 4  ;;  %v2273_v3 = vmax.f32 %v15114_v30, %v15096_v16  ;;  %v2329_v34 = vmin.f32 %v15114_v30, %v15096_v16  ;;  %2108 = vmatpush.msrb.mxu2 %v2039_v55  ;;  %1939 = vmatpush.msrb.mxu0 %v15085_v35 }
 0x526   : > { %v2283_v39 = vrot.slane %v2282_v36, 2  ;;  %v2343_v0 = vmin.f32 %v15077_v47, %v15081_v7  ;;  %2128 = vmatpush.msrb.mxu3 %v2040_v56  ;;  %v2290_v44 = vrot.slane %v2289_v38, 2  ;;  %v2322_v29 = vmin.f32 %v15085_v35, %v15087_v13  ;;  %1959 = vmatpush.msrb.mxu1 %v15114_v30 }
 0x527   : > { %2384 = vst [vmem:[#allocation1] ss:$4 sm:$0xff] %v2378_v27  ;;  %v2268_v41 = vmax.f32 %v2266_v20, %v2267_v37  ;;  %v2274_v46 = vrot.slane %v2273_v3, 4  ;;  %v2299_v51 = vrot.slane %v2298_v33, 1  ;;  %v2330_v54 = vrot.slane %v2329_v34, 4  ;;  %9822 = vmatmul.msk.f32.vlgmr.msra.gmra.mxu2 %vm1840_vm0, %v14683_v28  ;;  %9823 = vmatmul.msk.f32.vlgmr.msra.gmra.mxu3 %vm1840_vm0, %v14683_v28 }
 0x528   : > { %v2284_v52 = vmax.f32 %v2282_v36, %v2283_v39  ;;  %v2467_v31 = vrot.slane %v15110_v26, 4  ;;  %v2468_v55 = vrot.slane %v15117_v32, 2  ;;  %v2291_v56 = vmax.f32 %v2289_v38, %v2290_v44  ;;  %9820 = vmatmul.msk.f32.vlgmr.msrb.gmra.mxu0 %vm1840_vm0, %v14683_v28  ;;  %9821 = vmatmul.msk.f32.vlgmr.msrb.gmra.mxu1 %vm1840_vm0, %v14683_v28  ;;  %v15164_v36 = vld [vmem:[#allocation9 + $0x8] sm:$0xff] }
 0x529   : > { %v2269_v53 = vrot.slane %v2268_v41, 2  ;;  %v2275_v57 = vmax.f32 %v2273_v3, %v2274_v46  ;;  %v2466_v58 = vrot.slane %v2307_v50, 6  ;;  %v2338_v60 = vmin.f32 %v2336_v23, %v2337_v40 }
 0x52a   : > { %v2285_v59 = vrot.slane %v2284_v52, 1  ;;  %v2344_v61 = vrot.slane %v2343_v0, 4  ;;  %v2292_v62 = vrot.slane %v2291_v56, 1  ;;  %v2323_v42 = vrot.slane %v2322_v29, 4 }
 0x52b   : > { %v2270_v5 = vmax.f32 %v2268_v41, %v2269_v53  ;;  %v2276_v49 = vrot.slane %v2275_v57, 2  ;;  %v2300_v8 = vmin.f32 %v2298_v33, %v2299_v51  ;;  %v2331_v11 = vmin.f32 %v2329_v34, %v2330_v54 }
 0x52c   : > { %v2045_v12 = vmul.f32 %v15030_v2, %v15030_v2  ;;  %v2046_v15 = vmul.f32 %v15032_v4, %v15032_v4  ;;  %v2286_v19 = vmax.f32 %v2284_v52, %v2285_v59  ;;  %v2293_v20 = vmax.f32 %v2291_v56, %v2292_v62 }
 0x52d   : > { %v2277_v21 = vmax.f32 %v2275_v57, %v2276_v49  ;;  %v2037_v22 = vmul.f32 %v15026_v63, %v15026_v63  ;;  %v2472_v23 = vsel %vm2023_vm2, %v2300_v8, %v2466_v58  ;;  %v2345_v25 = vmin.f32 %v2343_v0, %v2344_v61 }
 0x52e   : > { %v15141_v9 = vld.sshfl [vmem:[#allocation1] sm:$0xff pattern:$0x73625140]  ;;  %v15143_v10 = vld.sshfl [vmem:[#allocation1 + $0x8] sm:$0xff pattern:$0x73625140]  ;;  %2067 = vmatpush.msra.mxu0 %v2045_v12  ;;  %2087 = vmatpush.msra.mxu1 %v2046_v15  ;;  %v2038_v2 = vmul.f32 %v15028_v1, %v15028_v1  ;;  %v2473_v4 = vsel %vm2029_vm1, %v2467_v31, %v2468_v55  ;;  %v2324_v32 = vmin.f32 %v2322_v29, %v2323_v42 }
 0x52f   : > { %v15149_v17 = vld.sshfl [vmem:[#allocation1 + $0x10] sm:$0xff pattern:$0x73625140]  ;;  %v15151_v18 = vld.sshfl [vmem:[#allocation1 + $0x18] sm:$0xff pattern:$0x73625140]  ;;  %v2051_v63 = vmul.f32 %v15079_v48, %v15079_v48  ;;  %v2474_v37 = vsel %vm2031_vm3, %v2472_v23, %v2473_v4  ;;  %vm15169_vm4 = vcmp.eq.s32.totalorder %v2351_v43, %v2352_v45  ;;  %v2043_v48 = vmul.f32 %v15074_v6, %v15074_v6  ;;  %9826 = vmatmul.msk.f32.vlgmr.msrb.gmra.mxu2 %vm1840_vm0, %v14683_v28 }
 0x530   : > { %2405 = vst [vmem:[#allocation1] ss:$4 sm:$0xff] %v15089_v14  ;;  %v2339_v26 = vrot.slane %v2338_v60, 2  ;;  %v2271_v27 = vrot.slane %v2270_v5, 1  ;;  %v2278_v24 = vrot.slane %v2277_v21, 1  ;;  %v2332_v33 = vrot.slane %v2331_v11, 2  ;;  %2068 = vmatpush.msra.mxu0 %v2037_v22  ;;  %2088 = vmatpush.msra.mxu1 %v2038_v2 }
 0x531   : > { %v2052_v14 = vmul.f32 %v15081_v7, %v15081_v7  ;;  %v2368_v1 = vrot.slane %v2286_v19, 4  ;;  %v2369_v50 = vrot.slane %v2293_v20, 2  ;;  %v2346_v34 = vrot.slane %v2345_v25, 2  ;;  %2187 = vmatpush.msra.mxu2 %v2051_v63  ;;  %9827 = vmatmul.msk.f32.vlgmr.msrb.gmra.mxu3 %vm1840_vm0, %v14683_v28 }
 0x532   : > { %v2279_v38 = vmax.f32 %v2277_v21, %v2278_v24  ;;  %v2044_v7 = vmul.f32 %v15077_v47, %v15077_v47  ;;  %v2272_v39 = vmax.f32 %v2270_v5, %v2271_v27  ;;  %v2049_v0 = vmul.f32 %v15087_v13, %v15087_v13  ;;  %v2355_v47 = vld [vmem:[#allocation8 + $0x8] sm:$0xff]  ;;  %9824 = vmatmul.msk.f32.vlgmr.msra.gmra.mxu0 %vm1840_vm0, %v14683_v28 }
 0x533   : > { %2207 = vmatpush.msra.mxu3 %v2052_v14  ;;  %v2050_v45 = vmul.f32 %v15096_v16, %v15096_v16  ;;  %v2480_v41 = vmin.f32 %v15164_v36, %v2474_v37  ;;  %v2340_v6 = vmin.f32 %v2338_v60, %v2339_v26  ;;  %v2325_v43 = vrot.slane %v2324_v32, 2  ;;  %2188 = vmatpush.msra.mxu2 %v2043_v48 }
 0x534   : > { %v2367_v40 = vrot.slane %v2279_v38, 6  ;;  %v2333_v44 = vmin.f32 %v2331_v11, %v2332_v33  ;;  %v2374_v13 = vsel %vm2029_vm1, %v2368_v1, %v2369_v50  ;;  %2147 = vmatpush.msrb.mxu0 %v2049_v0  ;;  %v2041_v51 = vmul.f32 %v15085_v35, %v15085_v35  ;;  %9825 = vmatmul.msk.f32.vlgmr.msra.gmra.mxu1 %vm1840_vm0, %v14683_v28  ;;  %v2457_v33 = vld [vmem:[#allocation9] sm:$0xff] }
 0x535   : > { %2208 = vmatpush.msra.mxu3 %v2044_v7  ;;  %2167 = vmatpush.msrb.mxu1 %v2050_v45  ;;  %v2347_v31 = vmin.f32 %v2345_v25, %v2346_v34  ;;  %v2042_v56 = vmul.f32 %v15114_v30, %v15114_v30  ;;  %v2326_v42 = vmin.f32 %v2324_v32, %v2325_v43 }
 0x536   : > { %v2373_v16 = vsel %vm2023_vm2, %v2272_v39, %v2367_v40  ;;  %2148 = vmatpush.msrb.mxu0 %v2041_v51  ;;  %v2334_v62 = vrot.slane %v2333_v44, 1 }
 0x537   : > { %v2408_v29 = vld.sshfl [vmem:[#allocation1] sm:$0xff pattern:$0x73625140]  ;;  %v2409_v46 = vld.sshfl [vmem:[#allocation1 + $0x8] sm:$0xff pattern:$0x73625140]  ;;  %v2375_v55 = vsel %vm2031_vm3, %v2373_v16, %v2374_v13  ;;  %2168 = vmatpush.msrb.mxu1 %v2042_v56  ;;  %9830 = vmatmul.msk.f32.vlgmr.msra.gmra.mxu2 %vm1840_vm0, %v14683_v28 }
 0x538   : > { %v2410_v52 = vld.sshfl [vmem:[#allocation1 + $0x10] sm:$0xff pattern:$0x73625140]  ;;  %v2411_v53 = vld.sshfl [vmem:[#allocation1 + $0x18] sm:$0xff pattern:$0x73625140]  ;;  %v2425_v54 = vsel %vm15169_vm4, %v15143_v10, %v2409_v46  ;;  %v2379_v59 = vmax.f32 %v2355_v47, %v2375_v55  ;;  %v2424_v60 = vsel %vm15169_vm4, %v15141_v9, %v2408_v29  ;;  %v2335_v9 = vmin.f32 %v2333_v44, %v2334_v62 }
 0x539   : > { %v2426_v57 = vsel %vm15169_vm4, %v15149_v17, %v2410_v52  ;;  %v2427_v35 = vsel %vm15169_vm4, %v15151_v18, %v2411_v53  ;;  %v2440_v58 = vrot.slane %v2425_v54, 6  ;;  %2484 = vst [vmem:[#allocation1] ss:$4 sm:$0xff] %v2480_v41  ;;  %v2341_v10 = vrot.slane %v2340_v6, 1  ;;  %9831 = vmatmul.msk.f32.vlgmr.msra.gmra.mxu3 %vm1840_vm0, %v14683_v28 }
 0x53a   : > { %v2441_v30 = vrot.slane %v2426_v57, 4  ;;  %v2442_v61 = vrot.slane %v2427_v35, 2  ;;  %2386 = vst [vmem:[#allocation1 + $0x20] ss:$4 sm:$0xff] %v2379_v59  ;;  %v2348_v11 = vrot.slane %v2347_v31, 1  ;;  %v2327_v12 = vrot.slane %v2326_v42, 1  ;;  %9828 = vmatmul.msk.f32.vlgmr.msrb.gmra.mxu0 %vm1840_vm0, %v14683_v28 }
 0x53b   : > { %v2446_v5 = vsel %vm2023_vm2, %v2424_v60, %v2440_v58  ;;  %v2342_v20 = vmin.f32 %v2340_v6, %v2341_v10  ;;  %v2469_v23 = vrot.slane %v2335_v9, 6 }
 0x53c   : > { %v2447_v49 = vsel %vm2029_vm1, %v2441_v30, %v2442_v61  ;;  %v2349_v21 = vmin.f32 %v2347_v31, %v2348_v11  ;;  %9829 = vmatmul.msk.f32.vlgmr.msrb.gmra.mxu1 %vm1840_vm0, %v14683_v28  ;;  %v2328_v24 = vmin.f32 %v2326_v42, %v2327_v12 }
 0x53d   : > { %v2448_v8 = vsel %vm2031_vm3, %v2446_v5, %v2447_v49  ;;  %v2470_v26 = vrot.slane %v2342_v20, 4 }
 0x53e   : > { %2454 = vst [vmem:[#allocation8] sm:$0xff] %v2448_v8  ;;  %v2471_v27 = vrot.slane %v2349_v21, 2  ;;  %v2475_v32 = vsel %vm2023_vm2, %v2328_v24, %v2469_v23 }
 0x540   : > { %v2487_v15 = vld.sshfl [vmem:[#allocation1] sm:$0xff pattern:$0x73625140]  ;;  %v2488_v17 = vld.sshfl [vmem:[#allocation1 + $0x8] sm:$0xff pattern:$0x73625140]  ;;  %v2476_v37 = vsel %vm2029_vm1, %v2470_v26, %v2471_v27 }
 0x541   : > { %v2489_v18 = vld.sshfl [vmem:[#allocation1 + $0x10] sm:$0xff pattern:$0x73625140]  ;;  %v2490_v19 = vld.sshfl [vmem:[#allocation1 + $0x18] sm:$0xff pattern:$0x73625140]  ;;  %v2477_v38 = vsel %vm2031_vm3, %v2475_v32, %v2476_v37 }
 0x542   : > { %2505 = vst [vmem:[#allocation1] ss:$4 sm:$0xff] %v15164_v36  ;;  %v2391_v22 = vld.sshfl [vmem:[#allocation1 + $0x20] sm:$0xff pattern:$0x73625140]  ;;  %v2481_v43 = vmin.f32 %v2457_v33, %v2477_v38 }
 0x543   : > { %v2392_v25 = vld.sshfl [vmem:[#allocation1 + $0x28] sm:$0xff pattern:$0x73625140]  ;;  %v2393_v2 = vld.sshfl [vmem:[#allocation1 + $0x30] sm:$0xff pattern:$0x73625140] }
 0x544   : > { %v2394_v4 = vld.sshfl [vmem:[#allocation1 + $0x38] sm:$0xff pattern:$0x73625140] }
 0x545   : > { %2407 = vst [vmem:[#allocation1 + $0x20] ss:$4 sm:$0xff] %v2355_v47 }
 0x549   : > { %v2508_v63 = vld.sshfl [vmem:[#allocation1] sm:$0xff pattern:$0x73625140]  ;;  %v2509_v14 = vld.sshfl [vmem:[#allocation1 + $0x8] sm:$0xff pattern:$0x73625140] }
 0x54a   : > { %v2510_v36 = vld.sshfl [vmem:[#allocation1 + $0x10] sm:$0xff pattern:$0x73625140]  ;;  %v2511_v1 = vld.sshfl [vmem:[#allocation1 + $0x18] sm:$0xff pattern:$0x73625140]  ;;  %v2525_v50 = vsel %vm15169_vm4, %v2488_v17, %v2509_v14  ;;  %v2524_v7 = vsel %vm15169_vm4, %v2487_v15, %v2508_v63 }
 0x54b   : > { %v2526_v28 = vsel %vm15169_vm4, %v2489_v18, %v2510_v36  ;;  %v2527_v34 = vsel %vm15169_vm4, %v2490_v19, %v2511_v1  ;;  %v2540_v48 = vrot.slane %v2525_v50, 6  ;;  %v1839_v36 = vld [vmem:[#allocation6] sm:$0xff] }
 0x54c   : > { %v2541_v39 = vrot.slane %v2526_v28, 4  ;;  %v2542_v40 = vrot.slane %v2527_v34, 2  ;;  %v2412_v0 = vld.sshfl [vmem:[#allocation1 + $0x20] sm:$0xff pattern:$0x73625140] }
 0x54d   : > { %v2546_v45 = vsel %vm2023_vm2, %v2524_v7, %v2540_v48  ;;  %v2413_v41 = vld.sshfl [vmem:[#allocation1 + $0x28] sm:$0xff pattern:$0x73625140]  ;;  %v2414_v6 = vld.sshfl [vmem:[#allocation1 + $0x30] sm:$0xff pattern:$0x73625140]  ;;  %v2428_v53 = vsel %vm15169_vm4, %v2391_v22, %v2412_v0 }
 0x54e   : > { %v2547_v44 = vsel %vm2029_vm1, %v2541_v39, %v2542_v40  ;;  %v2415_v47 = vld.sshfl [vmem:[#allocation1 + $0x38] sm:$0xff pattern:$0x73625140]  ;;  %v2429_v29 = vsel %vm15169_vm4, %v2392_v25, %v2413_v41  ;;  %v2430_v46 = vsel %vm15169_vm4, %v2393_v2, %v2414_v6 }
 0x54f   : > { %v2548_v13 = vsel %vm2031_vm3, %v2546_v45, %v2547_v44  ;;  %v2431_v16 = vsel %vm15169_vm4, %v2394_v4, %v2415_v47  ;;  %v2443_v51 = vrot.slane %v2429_v29, 6  ;;  %v2444_v52 = vrot.slane %v2430_v46, 4  ;;  %2486 = vst [vmem:[#allocation1 + $0x20] ss:$4 sm:$0xff] %v2481_v43 }
 0x550   : > { %2554 = vst [vmem:[#allocation9 + $0x8] sm:$0xff] %v2548_v13  ;;  %v2445_v54 = vrot.slane %v2431_v16, 2 }
 0x551   : > { %v2449_v31 = vsel %vm2023_vm2, %v2428_v53, %v2443_v51 }
 0x552   : > { %v2450_v55 = vsel %vm2029_vm1, %v2444_v52, %v2445_v54  ;;  %v2036_v54 = vld [vmem:[#allocation7] sm:$0xff] }
 0x553   : > { %v2451_v56 = vsel %vm2031_vm3, %v2449_v31, %v2450_v55 }
 0x554   : > { %2455 = vst [vmem:[#allocation8 + $0x8] sm:$0xff] %v2451_v56 }
 0x556   : > { %v2491_v57 = vld.sshfl [vmem:[#allocation1 + $0x20] sm:$0xff pattern:$0x73625140]  ;;  %v2492_v35 = vld.sshfl [vmem:[#allocation1 + $0x28] sm:$0xff pattern:$0x73625140] }
 0x557   : > { %v2493_v58 = vld.sshfl [vmem:[#allocation1 + $0x30] sm:$0xff pattern:$0x73625140]  ;;  %v2494_v59 = vld.sshfl [vmem:[#allocation1 + $0x38] sm:$0xff pattern:$0x73625140] }
 0x558   : > { %2507 = vst [vmem:[#allocation1 + $0x20] ss:$4 sm:$0xff] %v2457_v33 }
 0x55f   : > { %v2512_v60 = vld.sshfl [vmem:[#allocation1 + $0x20] sm:$0xff pattern:$0x73625140]  ;;  %v2513_v30 = vld.sshfl [vmem:[#allocation1 + $0x28] sm:$0xff pattern:$0x73625140] }
 0x560   : > { %v2514_v61 = vld.sshfl [vmem:[#allocation1 + $0x30] sm:$0xff pattern:$0x73625140]  ;;  %v2515_v62 = vld.sshfl [vmem:[#allocation1 + $0x38] sm:$0xff pattern:$0x73625140]  ;;  %v2529_v5 = vsel %vm15169_vm4, %v2492_v35, %v2513_v30  ;;  %v2528_v10 = vsel %vm15169_vm4, %v2491_v57, %v2512_v60 }
 0x561   : > { %v2530_v42 = vsel %vm15169_vm4, %v2493_v58, %v2514_v61  ;;  %v2531_v49 = vsel %vm15169_vm4, %v2494_v59, %v2515_v62  ;;  %v2543_v8 = vrot.slane %v2529_v5, 6 }
 0x562   : > { %v2544_v11 = vrot.slane %v2530_v42, 4  ;;  %v2545_v9 = vrot.slane %v2531_v49, 2 }
 0x563   : > { %v2549_v12 = vsel %vm2023_vm2, %v2528_v10, %v2543_v8 }
 0x564   : > { %v2550_v15 = vsel %vm2029_vm1, %v2544_v11, %v2545_v9 }
 0x565   : > { %v2551_v17 = vsel %vm2031_vm3, %v2549_v12, %v2550_v15 }
 0x566   : > { %2555 = vst [vmem:[#allocation9] sm:$0xff] %v2551_v17 }
 0x599   : > { %v1861_v18 = vpop.f32.mrf.mxu2  ;;  %v1881_v19 = vpop.f32.mrf.mxu3 }
 0x59a   : > { %v2012_v26 = vrot.slane %v1881_v19, 7 }
 0x59c   : > { %v2020_v37 = vsel %vm2019_vm7, %v1861_v18, %v2012_v26 }
 0x5a1   : > { %v1901_v20 = vpop.f32.mrf.mxu2  ;;  %v1921_v21 = vpop.f32.mrf.mxu3 }
 0x5a2   : > { %v2013_v25 = vrot.slane %v1901_v20, 6  ;;  %v2014_v2 = vrot.slane %v1921_v21, 5 }
 0x5a4   : > { %v2022_v32 = vsel %vm2021_vm5, %v2013_v25, %v2014_v2 }
 0x5a5   : > { %v1941_v22 = vpop.f32.mrf.mxu0  ;;  %v1961_v23 = vpop.f32.mrf.mxu1  ;;  %v2024_v50 = vsel %vm2023_vm2, %v2020_v37, %v2022_v32 }
 0x5a6   : > { %v2015_v4 = vrot.slane %v1941_v22, 4  ;;  %v2016_v3 = vrot.slane %v1961_v23, 3 }
 0x5a8   : > { %v2026_v33 = vsel %vm2025_vm6, %v2015_v4, %v2016_v3 }
 0x5aa   : > { %v1981_v27 = vpop.f32.mrf.mxu2  ;;  %v2001_v24 = vpop.f32.mrf.mxu3 }
 0x5ab   : > { %v2017_v63 = vrot.slane %v1981_v27, 2  ;;  %v2018_v14 = vrot.slane %v2001_v24, 1 }
 0x5ad   : > { %v2028_v1 = vsel %vm2027_vm8, %v2017_v63, %v2018_v14 }
 0x5ae   : > { %v2030_v38 = vsel %vm2029_vm1, %v2026_v33, %v2028_v1 }
 0x5af   : > { %v2032_v28 = vsel %vm2031_vm3, %v2024_v50, %v2030_v38  ;;  %v2070_v48 = vpop.f32.mrf.mxu0 }
 0x5b0   : > { %v2034_v34 = vadd.f32 %v2032_v28, %v1839_v36 }
 0x5b1   : > { %v2090_v7 = vpop.f32.mrf.mxu1 }
 0x5b2   : > { %2035 = vst [vmem:[#allocation6] sm:$0xff] %v2034_v34  ;;  %v2110_v39 = vpop.f32.mrf.mxu2  ;;  %v2221_v43 = vrot.slane %v2090_v7, 7 }
 0x5b3   : > { %v2222_v45 = vrot.slane %v2110_v39, 6 }
 0x5b4   : > { %v2130_v40 = vpop.f32.mrf.mxu3  ;;  %v2228_v53 = vsel %vm2019_vm7, %v2070_v48, %v2221_v43 }
 0x5b5   : > { %v2223_v41 = vrot.slane %v2130_v40, 5 }
 0x5b7   : > { %v2150_v0 = vpop.f32.mrf.mxu0  ;;  %v2229_v16 = vsel %vm2021_vm5, %v2222_v45, %v2223_v41 }
 0x5b8   : > { %v2224_v6 = vrot.slane %v2150_v0, 4  ;;  %v2230_v55 = vsel %vm2023_vm2, %v2228_v53, %v2229_v16 }
 0x5b9   : > { %v2170_v44 = vpop.f32.mrf.mxu1 }
 0x5ba   : > { %v2190_v47 = vpop.f32.mrf.mxu2  ;;  %v2225_v29 = vrot.slane %v2170_v44, 3 }
 0x5bb   : > { %v2226_v46 = vrot.slane %v2190_v47, 2 }
 0x5bc   : > { %v2210_v13 = vpop.f32.mrf.mxu3  ;;  %v2231_v52 = vsel %vm2025_vm6, %v2224_v6, %v2225_v29 }
 0x5bd   : > { %v2227_v51 = vrot.slane %v2210_v13, 1 }
 0x5bf   : > { %v2232_v31 = vsel %vm2027_vm8, %v2226_v46, %v2227_v51 }
 0x5c0   : > { %v2233_v56 = vsel %vm2029_vm1, %v2231_v52, %v2232_v31 }
 0x5c1   : > { %v2234_v57 = vsel %vm2031_vm3, %v2230_v55, %v2233_v56 }
 0x5c2   : > { %v2236_v35 = vadd.f32 %v2234_v57, %v2036_v54 }
 0x5c4   : > { %2237 = vst [vmem:[#allocation7] sm:$0xff] %v2236_v35 }
 0x5c5 PF: > { %p2556_p2 = scmp.eq.s32.totalorder %s14640_s0, 1 }
 0x5c7   : > { %p2557_p3 = pnand %p2556_p2, %p1137_p0 }
 0x5c8   : > { %s15794_s1 = sld [smem:[#allocation43_spill]] (!%p2557_p3) }
 0x5c9   : > { %2562 = sbr.rel (%p2557_p3) target bundleno = 2681 (0xa79), region = 160  ;;  %s15811_s3 = sld [smem:[#allocation46_spill]] (!%p2557_p3) }
 0x5ca   : > { %s15812_s5 = sld [smem:[#allocation47_spill]] (!%p2557_p3) }
 0x5ce   : > { %v9947_v58 = vld [vmem:[#allocation20 + $0xe0] sm:$0xf]  ;;  %v13281_v59 = vld [vmem:[#allocation20 + $0xec] sm:$0xf0]  ;;  %vm2604_vm12 = vcmask 1041408   ;;  %vm2606_vm13 = vcmask 1045508  }
 0x5cf   : > { %v10075_v60 = vld [vmem:[#allocation20 + $0x1e0] sm:$0xf]  ;;  %v9948_v30 = vor.u32 %v13281_v59, %v9947_v58  ;;  %v13313_v61 = vld [vmem:[#allocation20 + $0x1ec] sm:$0xf0]  ;;  %vm2608_vm14 = vcmask 1043456  }
 0x5d0   : > { %v10203_v62 = vld [vmem:[#allocation20 + $0x2e0] sm:$0xf]  ;;  %v13345_v5 = vld [vmem:[#allocation20 + $0x2ec] sm:$0xf0]  ;;  %v10076_v42 = vor.u32 %v13313_v61, %v10075_v60 }
 0x5d1   : > { %v10204_v49 = vor.u32 %v13345_v5, %v10203_v62  ;;  %v10331_v8 = vld [vmem:[#allocation20 + $0x3e0] sm:$0xf]  ;;  %v13377_v10 = vld [vmem:[#allocation20 + $0x3ec] sm:$0xf0]  ;;  %4277 = vmatpush.bf16.msra.mxu0 %v9948_v30 }
 0x5d2   : > { %v9931_v11 = vld [vmem:[#allocation20 + $0xc0] sm:$0xf]  ;;  %v10332_v9 = vor.u32 %v13377_v10, %v10331_v8  ;;  %v13277_v12 = vld [vmem:[#allocation20 + $0xcc] sm:$0xf0]  ;;  %4290 = vmatpush.bf16.msra.mxu1 %v10076_v42 }
 0x5d3   : > { %v10059_v15 = vld [vmem:[#allocation20 + $0x1c0] sm:$0xf]  ;;  %v13309_v17 = vld [vmem:[#allocation20 + $0x1cc] sm:$0xf0]  ;;  %4303 = vmatpush.bf16.msra.mxu2 %v10204_v49  ;;  %v9932_v18 = vor.u32 %v13277_v12, %v9931_v11 }
 0x5d4   : > { %v10060_v19 = vor.u32 %v13309_v17, %v10059_v15  ;;  %v10187_v20 = vld [vmem:[#allocation20 + $0x2c0] sm:$0xf]  ;;  %v13341_v21 = vld [vmem:[#allocation20 + $0x2cc] sm:$0xf0]  ;;  %4316 = vmatpush.bf16.msra.mxu3 %v10332_v9 }
 0x5d5   : > { %v10315_v22 = vld [vmem:[#allocation20 + $0x3c0] sm:$0xf]  ;;  %v10188_v23 = vor.u32 %v13341_v21, %v10187_v20  ;;  %v13373_v25 = vld [vmem:[#allocation20 + $0x3cc] sm:$0xf0]  ;;  %4278 = vmatpush.bf16.msra.mxu0 %v9932_v18 }
 0x5d6   : > { %v9915_v2 = vld [vmem:[#allocation20 + $0xa0] sm:$0xf]  ;;  %v13273_v4 = vld [vmem:[#allocation20 + $0xac] sm:$0xf0]  ;;  %v10316_v3 = vor.u32 %v13373_v25, %v10315_v22  ;;  %4291 = vmatpush.bf16.msra.mxu1 %v10060_v19 }
 0x5d7   : > { %v10043_v26 = vld [vmem:[#allocation20 + $0x1a0] sm:$0xf]  ;;  %v13305_v27 = vld [vmem:[#allocation20 + $0x1ac] sm:$0xf0]  ;;  %v9916_v32 = vor.u32 %v13273_v4, %v9915_v2  ;;  %4304 = vmatpush.bf16.msra.mxu2 %v10188_v23 }
 0x5d8   : > { %v10171_v24 = vld [vmem:[#allocation20 + $0x2a0] sm:$0xf]  ;;  %v13337_v33 = vld [vmem:[#allocation20 + $0x2ac] sm:$0xf0]  ;;  %v10044_v37 = vor.u32 %v13305_v27, %v10043_v26  ;;  %4317 = vmatpush.bf16.msra.mxu3 %v10316_v3 }
 0x5d9   : > { %v10299_v63 = vld [vmem:[#allocation20 + $0x3a0] sm:$0xf]  ;;  %v13369_v14 = vld [vmem:[#allocation20 + $0x3ac] sm:$0xf0]  ;;  %v10172_v36 = vor.u32 %v13337_v33, %v10171_v24  ;;  %4279 = vmatpush.bf16.msra.mxu0 %v9916_v32 }
 0x5da   : > { %v9899_v1 = vld [vmem:[#allocation20 + $0x80] sm:$0xf]  ;;  %v13269_v50 = vld [vmem:[#allocation20 + $0x8c] sm:$0xf0]  ;;  %v10300_v28 = vor.u32 %v13369_v14, %v10299_v63  ;;  %4292 = vmatpush.bf16.msra.mxu1 %v10044_v37 }
 0x5db   : > { %v10027_v38 = vld [vmem:[#allocation20 + $0x180] sm:$0xf]  ;;  %v13301_v34 = vld [vmem:[#allocation20 + $0x18c] sm:$0xf0]  ;;  %v9900_v0 = vor.u32 %v13269_v50, %v9899_v1  ;;  %4305 = vmatpush.bf16.msra.mxu2 %v10172_v36 }
 0x5dc   : > { %v10155_v48 = vld [vmem:[#allocation20 + $0x280] sm:$0xf]  ;;  %v13333_v7 = vld [vmem:[#allocation20 + $0x28c] sm:$0xf0]  ;;  %v10028_v45 = vor.u32 %v13301_v34, %v10027_v38  ;;  %4318 = vmatpush.bf16.msra.mxu3 %v10300_v28 }
 0x5dd   : > { %v10283_v39 = vld [vmem:[#allocation20 + $0x380] sm:$0xf]  ;;  %v13365_v40 = vld [vmem:[#allocation20 + $0x38c] sm:$0xf0]  ;;  %v10156_v41 = vor.u32 %v13333_v7, %v10155_v48  ;;  %4280 = vmatpush.bf16.msra.mxu0 %v9900_v0 }
 0x5de   : > { %v9883_v6 = vld [vmem:[#allocation20 + $0x60] sm:$0xf]  ;;  %v13265_v43 = vld [vmem:[#allocation20 + $0x6c] sm:$0xf0]  ;;  %v10284_v47 = vor.u32 %v13365_v40, %v10283_v39  ;;  %4293 = vmatpush.bf16.msra.mxu1 %v10028_v45 }
 0x5df   : > { %v10011_v44 = vld [vmem:[#allocation20 + $0x160] sm:$0xf]  ;;  %v13297_v29 = vld [vmem:[#allocation20 + $0x16c] sm:$0xf0]  ;;  %v9884_v52 = vor.u32 %v13265_v43, %v9883_v6  ;;  %4306 = vmatpush.bf16.msra.mxu2 %v10156_v41 }
 0x5e0   : > { %v10139_v46 = vld [vmem:[#allocation20 + $0x260] sm:$0xf]  ;;  %v13329_v13 = vld [vmem:[#allocation20 + $0x26c] sm:$0xf0]  ;;  %v10012_v53 = vor.u32 %v13297_v29, %v10011_v44  ;;  %4319 = vmatpush.bf16.msra.mxu3 %v10284_v47 }
 0x5e1   : > { %v10267_v16 = vld [vmem:[#allocation20 + $0x360] sm:$0xf]  ;;  %v13361_v51 = vld [vmem:[#allocation20 + $0x36c] sm:$0xf0]  ;;  %v10140_v54 = vor.u32 %v13329_v13, %v10139_v46  ;;  %4281 = vmatpush.bf16.msra.mxu0 %v9884_v52 }
 0x5e2   : > { %v9867_v31 = vld [vmem:[#allocation20 + $0x40] sm:$0xf]  ;;  %v13261_v55 = vld [vmem:[#allocation20 + $0x4c] sm:$0xf0]  ;;  %v10268_v57 = vor.u32 %v13361_v51, %v10267_v16  ;;  %4294 = vmatpush.bf16.msra.mxu1 %v10012_v53 }
 0x5e3   : > { %v9995_v56 = vld [vmem:[#allocation20 + $0x140] sm:$0xf]  ;;  %v13293_v35 = vld [vmem:[#allocation20 + $0x14c] sm:$0xf0]  ;;  %v9868_v61 = vor.u32 %v13261_v55, %v9867_v31  ;;  %4307 = vmatpush.bf16.msra.mxu2 %v10140_v54 }
 0x5e4   : > { %v10123_v58 = vld [vmem:[#allocation20 + $0x240] sm:$0xf]  ;;  %v13325_v59 = vld [vmem:[#allocation20 + $0x24c] sm:$0xf0]  ;;  %v9996_v62 = vor.u32 %v13293_v35, %v9995_v56  ;;  %4320 = vmatpush.bf16.msra.mxu3 %v10268_v57 }
 0x5e5   : > { %v10251_v60 = vld [vmem:[#allocation20 + $0x340] sm:$0xf]  ;;  %v13357_v30 = vld [vmem:[#allocation20 + $0x34c] sm:$0xf0]  ;;  %v10124_v5 = vor.u32 %v13325_v59, %v10123_v58  ;;  %4282 = vmatpush.bf16.msra.mxu0 %v9868_v61 }
 0x5e6   : > { %v9851_v42 = vld [vmem:[#allocation20 + $0x20] sm:$0xf]  ;;  %v13257_v49 = vld [vmem:[#allocation20 + $0x2c] sm:$0xf0]  ;;  %v10252_v10 = vor.u32 %v13357_v30, %v10251_v60  ;;  %4295 = vmatpush.bf16.msra.mxu1 %v9996_v62 }
 0x5e7   : > { %v9979_v8 = vld [vmem:[#allocation20 + $0x120] sm:$0xf]  ;;  %v13289_v11 = vld [vmem:[#allocation20 + $0x12c] sm:$0xf0]  ;;  %v9852_v18 = vor.u32 %v13257_v49, %v9851_v42  ;;  %4308 = vmatpush.bf16.msra.mxu2 %v10124_v5 }
 0x5e8   : > { %v10107_v9 = vld [vmem:[#allocation20 + $0x220] sm:$0xf]  ;;  %v13321_v12 = vld [vmem:[#allocation20 + $0x22c] sm:$0xf0]  ;;  %v9980_v21 = vor.u32 %v13289_v11, %v9979_v8  ;;  %4321 = vmatpush.bf16.msra.mxu3 %v10252_v10 }
 0x5e9   : > { %v10235_v15 = vld [vmem:[#allocation20 + $0x320] sm:$0xf]  ;;  %v13353_v17 = vld [vmem:[#allocation20 + $0x32c] sm:$0xf0]  ;;  %v10108_v22 = vor.u32 %v13321_v12, %v10107_v9  ;;  %4283 = vmatpush.bf16.msra.mxu0 %v9852_v18 }
 0x5ea   : > { %v9835_v19 = vld [vmem:[#allocation20] sm:$0xf]  ;;  %v13253_v20 = vld [vmem:[#allocation20 + $0xc] sm:$0xf0]  ;;  %v10236_v4 = vor.u32 %v13353_v17, %v10235_v15  ;;  %4296 = vmatpush.bf16.msra.mxu1 %v9980_v21  ;;  %v2563_v21 = vld [vmem:[#allocation6] sm:$0xff] }
 0x5eb   : > { %v9963_v23 = vld [vmem:[#allocation20 + $0x100] sm:$0xf]  ;;  %v13285_v25 = vld [vmem:[#allocation20 + $0x10c] sm:$0xf0]  ;;  %v9836_v63 = vor.u32 %v13253_v20, %v9835_v19  ;;  %4309 = vmatpush.bf16.msra.mxu2 %v10108_v22 }
 0x5ec   : > { %v10091_v2 = vld [vmem:[#allocation20 + $0x200] sm:$0xf]  ;;  %v13317_v3 = vld [vmem:[#allocation20 + $0x20c] sm:$0xf0]  ;;  %v9964_v1 = vor.u32 %v13285_v25, %v9963_v23  ;;  %4322 = vmatpush.bf16.msra.mxu3 %v10236_v4 }
 0x5ed   : > { %v10219_v26 = vld [vmem:[#allocation20 + $0x300] sm:$0xf]  ;;  %v13349_v27 = vld [vmem:[#allocation20 + $0x30c] sm:$0xf0]  ;;  %v10092_v50 = vor.u32 %v13317_v3, %v10091_v2  ;;  %4284 = vmatpush.bf16.msra.mxu0 %v9836_v63  ;;  %v15274_v2 = vmul.f32 0.03125, %v2563_v21 }
 0x5ee   : > { %v10459_v24 = vld [vmem:[#allocation20 + $0x4e0] sm:$0xf]  ;;  %v13409_v32 = vld [vmem:[#allocation20 + $0x4ec] sm:$0xf0]  ;;  %v10220_v34 = vor.u32 %v13349_v27, %v10219_v26  ;;  %4297 = vmatpush.bf16.msra.mxu1 %v9964_v1 }
 0x5ef   : > { %v10587_v33 = vld [vmem:[#allocation20 + $0x5e0] sm:$0xf]  ;;  %v13441_v14 = vld [vmem:[#allocation20 + $0x5ec] sm:$0xf0]  ;;  %v10460_v48 = vor.u32 %v13409_v32, %v10459_v24  ;;  %4310 = vmatpush.bf16.msra.mxu2 %v10092_v50  ;;  %v2567_v32 = vmul.f32 %v15274_v2, %v15274_v2 }
 0x5f0   : > { %v10715_v37 = vld [vmem:[#allocation20 + $0x6e0] sm:$0xf]  ;;  %v13473_v36 = vld [vmem:[#allocation20 + $0x6ec] sm:$0xf0]  ;;  %v10588_v7 = vor.u32 %v13441_v14, %v10587_v33  ;;  %4323 = vmatpush.bf16.msra.mxu3 %v10220_v34 }
 0x5f1   : > { %v10843_v38 = vld [vmem:[#allocation20 + $0x7e0] sm:$0xf]  ;;  %v13505_v28 = vld [vmem:[#allocation20 + $0x7ec] sm:$0xf0]  ;;  %v10716_v39 = vor.u32 %v13473_v36, %v10715_v37  ;;  %4329 = vmatpush.bf16.msrb.mxu0 %v10460_v48 }
 0x5f2   : > { %v10443_v40 = vld [vmem:[#allocation20 + $0x4c0] sm:$0xf]  ;;  %v13405_v0 = vld [vmem:[#allocation20 + $0x4cc] sm:$0xf0]  ;;  %v10844_v41 = vor.u32 %v13505_v28, %v10843_v38  ;;  %4342 = vmatpush.bf16.msrb.mxu1 %v10588_v7 }
 0x5f3   : > { %v10571_v45 = vld [vmem:[#allocation20 + $0x5c0] sm:$0xf]  ;;  %v13437_v6 = vld [vmem:[#allocation20 + $0x5cc] sm:$0xf0]  ;;  %v10444_v46 = vor.u32 %v13405_v0, %v10443_v40  ;;  %4355 = vmatpush.bf16.msrb.mxu2 %v10716_v39 }
 0x5f4   : > { %v10699_v43 = vld [vmem:[#allocation20 + $0x6c0] sm:$0xf]  ;;  %v13469_v44 = vld [vmem:[#allocation20 + $0x6cc] sm:$0xf0]  ;;  %v10572_v13 = vor.u32 %v13437_v6, %v10571_v45  ;;  %4368 = vmatpush.bf16.msrb.mxu3 %v10844_v41 }
 0x5f5   : > { %v10827_v47 = vld [vmem:[#allocation20 + $0x7c0] sm:$0xf]  ;;  %v13501_v29 = vld [vmem:[#allocation20 + $0x7cc] sm:$0xf0]  ;;  %v10700_v16 = vor.u32 %v13469_v44, %v10699_v43  ;;  %4330 = vmatpush.bf16.msrb.mxu0 %v10444_v46 }
 0x5f6   : > { %v10427_v51 = vld [vmem:[#allocation20 + $0x4a0] sm:$0xf]  ;;  %v13401_v52 = vld [vmem:[#allocation20 + $0x4ac] sm:$0xf0]  ;;  %v10828_v54 = vor.u32 %v13501_v29, %v10827_v47  ;;  %4343 = vmatpush.bf16.msrb.mxu1 %v10572_v13 }
 0x5f7   : > { %v10555_v53 = vld [vmem:[#allocation20 + $0x5a0] sm:$0xf]  ;;  %v13433_v31 = vld [vmem:[#allocation20 + $0x5ac] sm:$0xf0]  ;;  %v10428_v58 = vor.u32 %v13401_v52, %v10427_v51  ;;  %4356 = vmatpush.bf16.msrb.mxu2 %v10700_v16 }
 0x5f8   : > { %v10683_v55 = vld [vmem:[#allocation20 + $0x6a0] sm:$0xf]  ;;  %v13465_v56 = vld [vmem:[#allocation20 + $0x6ac] sm:$0xf0]  ;;  %v10556_v59 = vor.u32 %v13433_v31, %v10555_v53  ;;  %4369 = vmatpush.bf16.msrb.mxu3 %v10828_v54 }
 0x5f9   : > { %v10811_v57 = vld [vmem:[#allocation20 + $0x7a0] sm:$0xf]  ;;  %v13497_v35 = vld [vmem:[#allocation20 + $0x7ac] sm:$0xf0]  ;;  %v10684_v60 = vor.u32 %v13465_v56, %v10683_v55  ;;  %4331 = vmatpush.bf16.msrb.mxu0 %v10428_v58 }
 0x5fa   : > { %v10411_v30 = vld [vmem:[#allocation20 + $0x480] sm:$0xf]  ;;  %v13397_v61 = vld [vmem:[#allocation20 + $0x48c] sm:$0xf0]  ;;  %v10812_v5 = vor.u32 %v13497_v35, %v10811_v57  ;;  %4344 = vmatpush.bf16.msrb.mxu1 %v10556_v59 }
 0x5fb   : > { %v10539_v62 = vld [vmem:[#allocation20 + $0x580] sm:$0xf]  ;;  %v13429_v42 = vld [vmem:[#allocation20 + $0x58c] sm:$0xf0]  ;;  %v10412_v9 = vor.u32 %v13397_v61, %v10411_v30  ;;  %4357 = vmatpush.bf16.msrb.mxu2 %v10684_v60 }
 0x5fc   : > { %v10667_v49 = vld [vmem:[#allocation20 + $0x680] sm:$0xf]  ;;  %v13461_v8 = vld [vmem:[#allocation20 + $0x68c] sm:$0xf0]  ;;  %v10540_v17 = vor.u32 %v13429_v42, %v10539_v62  ;;  %4370 = vmatpush.bf16.msrb.mxu3 %v10812_v5 }
 0x5fd   : > { %v10795_v10 = vld [vmem:[#allocation20 + $0x780] sm:$0xf]  ;;  %v13493_v11 = vld [vmem:[#allocation20 + $0x78c] sm:$0xf0]  ;;  %v10668_v18 = vor.u32 %v13461_v8, %v10667_v49  ;;  %4332 = vmatpush.bf16.msrb.mxu0 %v10412_v9 }
 0x5fe   : > { %v10395_v12 = vld [vmem:[#allocation20 + $0x460] sm:$0xf]  ;;  %v13393_v15 = vld [vmem:[#allocation20 + $0x46c] sm:$0xf0]  ;;  %v10796_v22 = vor.u32 %v13493_v11, %v10795_v10  ;;  %4345 = vmatpush.bf16.msrb.mxu1 %v10540_v17 }
 0x5ff   : > { %v10523_v19 = vld [vmem:[#allocation20 + $0x560] sm:$0xf]  ;;  %v13425_v20 = vld [vmem:[#allocation20 + $0x56c] sm:$0xf0]  ;;  %v10396_v24 = vor.u32 %v13393_v15, %v10395_v12  ;;  %4358 = vmatpush.bf16.msrb.mxu2 %v10668_v18  ;;  %v2570_v12 = vld [vmem:[%s15747_s11] sm:$0xff] }
 0x600   : > { %v10651_v23 = vld [vmem:[#allocation20 + $0x660] sm:$0xf]  ;;  %v13457_v25 = vld [vmem:[#allocation20 + $0x66c] sm:$0xf0]  ;;  %v10524_v33 = vor.u32 %v13425_v20, %v10523_v19  ;;  %4371 = vmatpush.bf16.msrb.mxu3 %v10796_v22  ;;  %v2583_v19 = vld [vmem:[%s15794_s1] sm:$0xff] }
 0x601   : > { %v2565_v4 = vld [vmem:[#allocation7] sm:$0xff]  ;;  %v10779_v3 = vld [vmem:[#allocation20 + $0x760] sm:$0xf]  ;;  %v10652_v63 = vor.u32 %v13457_v25, %v10651_v23  ;;  %4333 = vmatpush.bf16.msrb.mxu0 %v10396_v24  ;;  %v2587_v24 = vld [vmem:[#allocation8] sm:$0xff] }
 0x602   : > { %v13489_v26 = vld [vmem:[#allocation20 + $0x76c] sm:$0xf0]  ;;  %v2566_v27 = vmul.f32 0.03125, %v2565_v4  ;;  %v10379_v14 = vld [vmem:[#allocation20 + $0x440] sm:$0xf]  ;;  %4346 = vmatpush.bf16.msrb.mxu1 %v10524_v33 }
 0x603   : > { %v13389_v37 = vld [vmem:[#allocation20 + $0x44c] sm:$0xf0]  ;;  %v10507_v36 = vld [vmem:[#allocation20 + $0x540] sm:$0xf]  ;;  %v10780_v1 = vor.u32 %v13489_v26, %v10779_v3  ;;  %4359 = vmatpush.bf16.msrb.mxu2 %v10652_v63 }
 0x604   : > { %v13421_v50 = vld [vmem:[#allocation20 + $0x54c] sm:$0xf0]  ;;  %v10635_v38 = vld [vmem:[#allocation20 + $0x640] sm:$0xf]  ;;  %v2568_v34 = vsub.f32 %v2566_v27, %v2567_v32  ;;  %v10380_v39 = vor.u32 %v13389_v37, %v10379_v14 }
 0x605   : > { %v13453_v28 = vld [vmem:[#allocation20 + $0x64c] sm:$0xf0]  ;;  %v10763_v48 = vld [vmem:[#allocation20 + $0x740] sm:$0xf]  ;;  %v10508_v45 = vor.u32 %v13421_v50, %v10507_v36  ;;  %4372 = vmatpush.bf16.msrb.mxu3 %v10780_v1 }
 0x606   : > { %v13485_v7 = vld [vmem:[#allocation20 + $0x74c] sm:$0xf0]  ;;  %v10363_v40 = vld [vmem:[#allocation20 + $0x420] sm:$0xf]  ;;  %v2569_v0 = vmax.f32 %v2568_v34, 0.0  ;;  %v10636_v41 = vor.u32 %v13453_v28, %v10635_v38  ;;  %4334 = vmatpush.bf16.msrb.mxu0 %v10380_v39 }
 0x607   : > { %v13385_v6 = vld [vmem:[#allocation20 + $0x42c] sm:$0xf0]  ;;  %v10491_v43 = vld [vmem:[#allocation20 + $0x520] sm:$0xf]  ;;  %v10764_v47 = vor.u32 %v13485_v7, %v10763_v48  ;;  %4347 = vmatpush.bf16.msrb.mxu1 %v10508_v45 }
 0x608   : > { %v13417_v44 = vld [vmem:[#allocation20 + $0x52c] sm:$0xf0]  ;;  %v10619_v29 = vld [vmem:[#allocation20 + $0x620] sm:$0xf]  ;;  %v2571_v13 = vadd.f32 1e-05, %v2569_v0  ;;  %v10364_v52 = vor.u32 %v13385_v6, %v10363_v40  ;;  %4360 = vmatpush.bf16.msrb.mxu2 %v10636_v41 }
 0x609   : > { %v13449_v46 = vld [vmem:[#allocation20 + $0x62c] sm:$0xf0]  ;;  %v10747_v16 = vld [vmem:[#allocation20 + $0x720] sm:$0xf]  ;;  %v10492_v53 = vor.u32 %v13417_v44, %v10491_v43  ;;  %4373 = vmatpush.bf16.msrb.mxu3 %v10764_v47 }
 0x60a   : > { %v13481_v51 = vld [vmem:[#allocation20 + $0x72c] sm:$0xf0]  ;;  %14261 = vrsqrt.f32 %v2571_v13  ;;  %v10620_v54 = vor.u32 %v13449_v46, %v10619_v29  ;;  %v10347_v31 = vld [vmem:[#allocation20 + $0x400] sm:$0xf]  ;;  %4335 = vmatpush.bf16.msrb.mxu0 %v10364_v52  ;;  %vm2578_vm9 = vweird.f32 %v2571_v13  ;;  %v14684_v52 = vmov 0  }
 0x60b   : > { %v13381_v55 = vld [vmem:[#allocation20 + $0x40c] sm:$0xf0]  ;;  %v10475_v56 = vld [vmem:[#allocation20 + $0x500] sm:$0xf]  ;;  %v10748_v57 = vor.u32 %v13481_v51, %v10747_v16  ;;  %4348 = vmatpush.bf16.msrb.mxu1 %v10492_v53 }
 0x60c   : > { %v13413_v35 = vld [vmem:[#allocation20 + $0x50c] sm:$0xf0]  ;;  %v10603_v58 = vld [vmem:[#allocation20 + $0x600] sm:$0xf]  ;;  %v10348_v61 = vor.u32 %v13381_v55, %v10347_v31  ;;  %4361 = vmatpush.bf16.msrb.mxu2 %v10620_v54 }
 0x60d   : > { %v13445_v59 = vld [vmem:[#allocation20 + $0x60c] sm:$0xf0]  ;;  %v10731_v60 = vld [vmem:[#allocation20 + $0x700] sm:$0xf]  ;;  %v10476_v62 = vor.u32 %v13413_v35, %v10475_v56  ;;  %4374 = vmatpush.bf16.msrb.mxu3 %v10748_v57 }
 0x60e   : > { %v13477_v30 = vld [vmem:[#allocation20 + $0x70c] sm:$0xf0]  ;;  %v10604_v5 = vor.u32 %v13445_v59, %v10603_v58  ;;  %4336 = vmatpush.bf16.msrb.mxu0 %v10348_v61  ;;  %v2588_v54 = vld [vmem:[#allocation8 + $0x8] sm:$0xff] }
 0x60f   : > { %v10732_v49 = vor.u32 %v13477_v30, %v10731_v60  ;;  %4349 = vmatpush.bf16.msrb.mxu1 %v10476_v62  ;;  %v2642_v39 = vld [vmem:[#allocation9 + $0x8] sm:$0xff] }
 0x610   : > { %v14262_v42 = vpop.eup %14261  ;;  %4362 = vmatpush.bf16.msrb.mxu2 %v10604_v5 }
 0x611   : > { %v2573_v8 = vmul.f32 %v14262_v42, %v2571_v13  ;;  %4375 = vmatpush.bf16.msrb.mxu3 %v10732_v49  ;;  %vm2579_vm10 = vweird.f32 %v14262_v42 }
 0x612   : > { %vm2580_vm11 = vmor %vm2578_vm9, %vm2579_vm10 }
 0x613   : > { %v2574_v10 = vmul.f32 %v14262_v42, %v2573_v8 }
 0x615   : > { %v2575_v11 = vmul.f32 0.5, %v2574_v10 }
 0x617   : > { %v2576_v9 = vsub.f32 1.5, %v2575_v11 }
 0x619   : > { %v2577_v15 = vmul.f32 %v14262_v42, %v2576_v9 }
 0x61b   : > { %v2581_v17 = vsel %vm2580_vm11, %v14262_v42, %v2577_v15 }
 0x61c   : > { %v2582_v18 = vmul.f32 %v2581_v17, %v2570_v12  ;;  %v2643_v17 = vld [vmem:[#allocation9] sm:$0xff] }
 0x61e   : > { %v2584_v20 = vmul.f32 %v2582_v18, %v15274_v2  ;;  %v2590_v21 = vperm.slane %v2582_v18, 0  ;;  %v2591_v22 = vperm.slane %v2582_v18, 1  ;;  %v2592_v23 = vperm.slane %v2582_v18, 2 }
 0x61f   : > { %v2593_v25 = vperm.slane %v2582_v18, 3  ;;  %v2595_v45 = vperm.slane %v2582_v18, 5  ;;  %v2596_v41 = vperm.slane %v2582_v18, 6  ;;  %v2597_v6 = vperm.slane %v2582_v18, 7 }
 0x620   : > { %v2585_v4 = vsub.f32 %v2583_v19, %v2584_v20  ;;  %v2598_v3 = vrot.slane %v2591_v22, 6  ;;  %v2599_v26 = vrot.slane %v2592_v23, 4  ;;  %v2594_v43 = vperm.slane %v2582_v18, 4  ;;  %v13279_v20 = vld [vmem:[#allocation20 + $0xe4] sm:$0xf] }
 0x621   : > { %v2600_v27 = vrot.slane %v2593_v25, 2  ;;  %vm2586_vm15 = vcmp.ge.f32.partialorder %v2582_v18, 0.0  ;;  %v2601_v47 = vrot.slane %v2595_v45, 6  ;;  %v2602_v29 = vrot.slane %v2596_v41, 4  ;;  %v13311_v25 = vld [vmem:[#allocation20 + $0x1e4] sm:$0xf] }
 0x622   : > { %v2605_v32 = vsel %vm2604_vm12, %v2590_v21, %v2598_v3  ;;  %v2618_v33 = vperm.slane %v2585_v4, 0  ;;  %v2619_v63 = vperm.slane %v2585_v4, 1  ;;  %v2620_v14 = vperm.slane %v2585_v4, 2  ;;  %v9949_v21 = vld [vmem:[#allocation20 + $0xf0] sm:$0xf0] }
 0x623   : > { %v2607_v37 = vsel %vm2606_vm13, %v2599_v26, %v2600_v27  ;;  %v2621_v2 = vperm.slane %v2585_v4, 3  ;;  %v2603_v46 = vrot.slane %v2597_v6, 2  ;;  %v2623_v13 = vperm.slane %v2585_v4, 5  ;;  %v13343_v27 = vld [vmem:[#allocation20 + $0x2e4] sm:$0xf] }
 0x624   : > { %v2609_v36 = vsel %vm2608_vm14, %v2605_v32, %v2607_v37  ;;  %v2626_v1 = vrot.slane %v2619_v63, 6  ;;  %v2627_v50 = vrot.slane %v2620_v14, 4  ;;  %v2624_v16 = vperm.slane %v2585_v4, 6  ;;  %v13307_v6 = vld [vmem:[#allocation20 + $0x1c4] sm:$0xf] }
 0x625   : > { %v2615_v38 = vmul.f32 %v2609_v36, %v2587_v24  ;;  %v2628_v28 = vrot.slane %v2621_v2, 2  ;;  %v2644_v0 = vmul.f32 %v2642_v39, %v2609_v36  ;;  %v2625_v51 = vperm.slane %v2585_v4, 7  ;;  %v10205_v24 = vld [vmem:[#allocation20 + $0x2f0] sm:$0xf0]  ;;  %v13275_v39 = vld [vmem:[#allocation20 + $0xc4] sm:$0xf] }
 0x626   : > { %v2632_v34 = vsel %vm2604_vm12, %v2618_v33, %v2626_v1  ;;  %v15291_v53 = vsel %vm2586_vm15, 1, %v14684_v52  ;;  %v2610_v31 = vsel %vm2604_vm12, %v2594_v43, %v2601_v47  ;;  %v2622_v55 = vperm.slane %v2585_v4, 4  ;;  %v10077_v4 = vld [vmem:[#allocation20 + $0x1f0] sm:$0xf0]  ;;  %v13371_v52 = vld [vmem:[#allocation20 + $0x3c4] sm:$0xf] }
 0x627   : > { %v2633_v48 = vsel %vm2606_vm13, %v2627_v50, %v2628_v28  ;;  %v2611_v35 = vsel %vm2606_vm13, %v2602_v29, %v2603_v46  ;;  %v2629_v61 = vrot.slane %v2623_v13, 6  ;;  %v2630_v62 = vrot.slane %v2624_v16, 4  ;;  %v10333_v28 = vld [vmem:[#allocation20 + $0x3f0] sm:$0xf0]  ;;  %v13299_v19 = vld [vmem:[#allocation20 + $0x184] sm:$0xf] }
 0x628   : > { %v2634_v7 = vsel %vm2608_vm14, %v2632_v34, %v2633_v48  ;;  %v2612_v60 = vsel %vm2608_vm14, %v2610_v31, %v2611_v35  ;;  %v2631_v5 = vrot.slane %v2625_v51, 2  ;;  %v2649_v42 = vperm.slane %v15291_v53, 0  ;;  %v10061_v43 = vld [vmem:[#allocation20 + $0x1d0] sm:$0xf0]  ;;  %v13331_v23 = vld [vmem:[#allocation20 + $0x284] sm:$0xf] }
 0x629   : > { %v2640_v40 = vadd.f32 %v2634_v7, %v2615_v38  ;;  %v2646_v44 = vadd.f32 %v2644_v0, %v2634_v7  ;;  %v2616_v30 = vmul.f32 %v2612_v60, %v2588_v54  ;;  %v2650_v49 = vperm.slane %v15291_v53, 1  ;;  %v13375_v38 = vld [vmem:[#allocation20 + $0x3e4] sm:$0xf]  ;;  %v10189_v51 = vld [vmem:[#allocation20 + $0x2d0] sm:$0xf0] }
 0x62a   : > { %v2651_v8 = vperm.slane %v15291_v53, 2  ;;  %v2652_v10 = vperm.slane %v15291_v53, 3  ;;  %v2635_v11 = vsel %vm2604_vm12, %v2622_v55, %v2629_v61  ;;  %v2636_v9 = vsel %vm2606_vm13, %v2630_v62, %v2631_v5  ;;  %v10317_v54 = vld [vmem:[#allocation20 + $0x3d0] sm:$0xf0] }
 0x62b   : > { %2667 = vst [vmem:[#allocation1] ss:$4 sm:$0xff] %v2640_v40  ;;  %v2637_v12 = vsel %vm2608_vm14, %v2635_v11, %v2636_v9  ;;  %vm15303_vm0 = vcmp.eq.s32.totalorder %v2649_v42, 1  ;;  %vm15307_vm1 = vcmp.eq.s32.totalorder %v2650_v49, 1  ;;  %v2645_v32 = vmul.f32 %v2643_v17, %v2612_v60  ;;  %v9933_v40 = vld [vmem:[#allocation20 + $0xd0] sm:$0xf0] }
 0x62c   : > { %v2641_v15 = vadd.f32 %v2637_v12, %v2616_v30  ;;  %vm15311_vm2 = vcmp.eq.s32.totalorder %v2651_v8, 1  ;;  %vm15315_vm3 = vcmp.eq.s32.totalorder %v2652_v10, 1  ;;  %v9952_v7 = vor.u32 %v13279_v20, %v9949_v21  ;;  %v13303_v30 = vld [vmem:[#allocation20 + $0x1a4] sm:$0xf]  ;;  %v10045_v61 = vld [vmem:[#allocation20 + $0x1b0] sm:$0xf0] }
 0x62d   : > { %v10080_v41 = vor.u32 %v13311_v25, %v10077_v4  ;;  %v2647_v47 = vadd.f32 %v2645_v32, %v2637_v12  ;;  %v10208_v13 = vor.u32 %v13343_v27, %v10205_v24  ;;  %v10336_v16 = vor.u32 %v13375_v38, %v10333_v28  ;;  %v13335_v42 = vld [vmem:[#allocation20 + $0x2a4] sm:$0xf]  ;;  %v10173_v49 = vld [vmem:[#allocation20 + $0x2b0] sm:$0xf0] }
 0x62e   : > { %2669 = vst [vmem:[#allocation1 + $0x20] ss:$4 sm:$0xff] %v2641_v15  ;;  %v10064_v60 = vor.u32 %v13307_v6, %v10061_v43  ;;  %v10320_v5 = vor.u32 %v13371_v52, %v10317_v54  ;;  %v2653_v8 = vperm.slane %v15291_v53, 4  ;;  %v2655_v10 = vperm.slane %v15291_v53, 6  ;;  %v13367_v11 = vld [vmem:[#allocation20 + $0x3a4] sm:$0xf] }
 0x62f   : > { %v10301_v9 = vld [vmem:[#allocation20 + $0x3b0] sm:$0xf0]  ;;  %v2654_v12 = vperm.slane %v15291_v53, 5  ;;  %v2656_v15 = vperm.slane %v15291_v53, 7  ;;  %v13267_v17 = vld [vmem:[#allocation20 + $0x84] sm:$0xf]  ;;  %v10048_v21 = vor.u32 %v13303_v30, %v10045_v61  ;;  %v10176_v4 = vor.u32 %v13335_v42, %v10173_v49 }
 0x630   : > { %v9901_v18 = vld [vmem:[#allocation20 + $0x90] sm:$0xf0]  ;;  %vm15349_vm4 = vcmp.eq.s32.totalorder %v2653_v8, 1  ;;  %vm15353_vm5 = vcmp.eq.s32.totalorder %v2655_v10, 1  ;;  %v13263_v32 = vld [vmem:[#allocation20 + $0x64] sm:$0xf] }
 0x631   : > { %v10029_v22 = vld [vmem:[#allocation20 + $0x190] sm:$0xf0]  ;;  %vm15357_vm6 = vcmp.eq.s32.totalorder %v2654_v12, 1  ;;  %vm15361_vm7 = vcmp.eq.s32.totalorder %v2656_v15, 1  ;;  %v13295_v38 = vld [vmem:[#allocation20 + $0x164] sm:$0xf] }
 0x632   : > { %v2670_v56 = vld.sshfl [vmem:[#allocation1] sm:$0xff pattern:$0x73625140]  ;;  %v2671_v57 = vld.sshfl [vmem:[#allocation1 + $0x8] sm:$0xff pattern:$0x73625140] }
 0x633   : > { %v2672_v58 = vld.sshfl [vmem:[#allocation1 + $0x10] sm:$0xff pattern:$0x73625140]  ;;  %v2673_v59 = vld.sshfl [vmem:[#allocation1 + $0x18] sm:$0xff pattern:$0x73625140] }
 0x634   : > { %2688 = vst [vmem:[#allocation1] ss:$4 sm:$0xff] %v2646_v44  ;;  %v13339_v44 = vld [vmem:[#allocation20 + $0x2c4] sm:$0xf]  ;;  %v10157_v25 = vld [vmem:[#allocation20 + $0x290] sm:$0xf0] }
 0x635   : > { %v15337_v31 = vld.sshfl [vmem:[#allocation1 + $0x20] sm:$0xff pattern:$0x73625140]  ;;  %v15339_v55 = vld.sshfl [vmem:[#allocation1 + $0x28] sm:$0xff pattern:$0x73625140]  ;;  %v10192_v62 = vor.u32 %v13339_v44, %v10189_v51 }
 0x636   : > { %v2676_v35 = vld.sshfl [vmem:[#allocation1 + $0x30] sm:$0xff pattern:$0x73625140]  ;;  %v10285_v27 = vld [vmem:[#allocation20 + $0x390] sm:$0xf0] }
 0x637   : > { %v10013_v28 = vld [vmem:[#allocation20 + $0x170] sm:$0xf0]  ;;  %v13327_v43 = vld [vmem:[#allocation20 + $0x264] sm:$0xf] }
 0x638   : > { %v10141_v44 = vld [vmem:[#allocation20 + $0x270] sm:$0xf0]  ;;  %v13323_v42 = vld [vmem:[#allocation20 + $0x244] sm:$0xf] }
 0x639   : > { %v10269_v51 = vld [vmem:[#allocation20 + $0x370] sm:$0xf0]  ;;  %v13355_v8 = vld [vmem:[#allocation20 + $0x344] sm:$0xf] }
 0x63a   : > { %v9869_v30 = vld [vmem:[#allocation20 + $0x50] sm:$0xf0]  ;;  %v13255_v12 = vld [vmem:[#allocation20 + $0x24] sm:$0xf] }
 0x63b   : > { %v2691_v3 = vld.sshfl [vmem:[#allocation1] sm:$0xff pattern:$0x73625140]  ;;  %v2692_v26 = vld.sshfl [vmem:[#allocation1 + $0x8] sm:$0xff pattern:$0x73625140] }
 0x63c   : > { %v2707_v33 = vsel %vm15303_vm0, %v2670_v56, %v2691_v3  ;;  %v2708_v63 = vsel %vm15307_vm1, %v2671_v57, %v2692_v26  ;;  %v2693_v14 = vld.sshfl [vmem:[#allocation1 + $0x10] sm:$0xff pattern:$0x73625140]  ;;  %v2694_v37 = vld.sshfl [vmem:[#allocation1 + $0x18] sm:$0xff pattern:$0x73625140]  ;;  %v10304_v3 = vor.u32 %v13367_v11, %v10301_v9 }
 0x63d   : > { %v2715_v2 = vmax.f32 %v2707_v33, 0.0  ;;  %v2716_v36 = vmax.f32 %v2708_v63, 0.0  ;;  %v2709_v1 = vsel %vm15311_vm2, %v2672_v58, %v2693_v14  ;;  %v2710_v50 = vsel %vm15315_vm3, %v2673_v59, %v2694_v37  ;;  %v13271_v56 = vld [vmem:[#allocation20 + $0xa4] sm:$0xf]  ;;  %v9917_v57 = vld [vmem:[#allocation20 + $0xb0] sm:$0xf0] }
 0x63e   : > { %v2717_v34 = vmax.f32 %v2709_v1, 0.0  ;;  %v2718_v48 = vmax.f32 %v2710_v50, 0.0  ;;  %v15343_v58 = vld.sshfl [vmem:[#allocation1 + $0x38] sm:$0xff pattern:$0x73625140]  ;;  %v9936_v59 = vor.u32 %v13275_v39, %v9933_v40  ;;  %v9920_v20 = vor.u32 %v13271_v56, %v9917_v57 }
 0x63f   : > { %v15327_v0 = vpack.c.bf16 %v2715_v2, %v2715_v2  ;;  %v15329_v45 = vpack.c.bf16 %v2716_v36, %v2716_v36  ;;  %2690 = vst [vmem:[#allocation1 + $0x20] ss:$4 sm:$0xff] %v2647_v47  ;;  %v13363_v26 = vld [vmem:[#allocation20 + $0x384] sm:$0xf]  ;;  %v9885_v33 = vld [vmem:[#allocation20 + $0x70] sm:$0xf0]  ;;  %v9904_v37 = vor.u32 %v13267_v17, %v9901_v18  ;;  %v10032_v2 = vor.u32 %v13299_v19, %v10029_v22 }
 0x640   : > { %v15331_v29 = vpack.c.bf16 %v2717_v34, %v2717_v34  ;;  %v15333_v46 = vpack.c.bf16 %v2718_v48, %v2718_v48  ;;  %v10160_v36 = vor.u32 %v13331_v23, %v10157_v25  ;;  %v10288_v34 = vor.u32 %v13363_v26, %v10285_v27  ;;  %v10125_v49 = vld [vmem:[#allocation20 + $0x250] sm:$0xf0]  ;;  %v13287_v19 = vld [vmem:[#allocation20 + $0x124] sm:$0xf] }
 0x641   : > { %4285 = vmatmul.bf16.vlgmr.msra.gmra.mxu0 %v15327_v0  ;;  %4298 = vmatmul.bf16.vlgmr.msra.gmra.mxu1 %v15329_v45  ;;  %v9888_v57 = vor.u32 %v13263_v32, %v9885_v33  ;;  %v10253_v10 = vld [vmem:[#allocation20 + $0x350] sm:$0xf0]  ;;  %v10128_v17 = vor.u32 %v13323_v42, %v10125_v49  ;;  %v13351_v23 = vld [vmem:[#allocation20 + $0x324] sm:$0xf] }
 0x642   : > { %4311 = vmatmul.bf16.vlgmr.msra.gmra.mxu2 %v15331_v29  ;;  %4324 = vmatmul.bf16.vlgmr.msra.gmra.mxu3 %v15333_v46  ;;  %v9853_v15 = vld [vmem:[#allocation20 + $0x30] sm:$0xf0]  ;;  %v10256_v18 = vor.u32 %v13355_v8, %v10253_v10  ;;  %v13283_v24 = vld [vmem:[#allocation20 + $0x104] sm:$0xf] }
 0x643   : > { %4381 = vmatpush.bf16.msra.mxu0 %v9952_v7  ;;  %4394 = vmatpush.bf16.msra.mxu1 %v10080_v41  ;;  %v10109_v22 = vld [vmem:[#allocation20 + $0x230] sm:$0xf0]  ;;  %v13315_v63 = vld [vmem:[#allocation20 + $0x204] sm:$0xf] }
 0x644   : > { %4407 = vmatpush.bf16.msra.mxu2 %v10208_v13  ;;  %4420 = vmatpush.bf16.msra.mxu3 %v10336_v16  ;;  %v13359_v16 = vld [vmem:[#allocation20 + $0x364] sm:$0xf]  ;;  %v10237_v25 = vld [vmem:[#allocation20 + $0x330] sm:$0xf0] }
 0x645   : > { %v10272_v61 = vor.u32 %v13359_v16, %v10269_v51  ;;  %v9837_v27 = vld [vmem:[#allocation20 + $0x10] sm:$0xf0]  ;;  %v10240_v33 = vor.u32 %v13351_v23, %v10237_v25  ;;  %v13431_v8 = vld [vmem:[#allocation20 + $0x5a4] sm:$0xf] }
 0x646   : > { %v2695_v1 = vld.sshfl [vmem:[#allocation1 + $0x20] sm:$0xff pattern:$0x73625140]  ;;  %v2697_v50 = vld.sshfl [vmem:[#allocation1 + $0x30] sm:$0xff pattern:$0x73625140] }
 0x647   : > { %4382 = vmatpush.bf16.msra.mxu0 %v9936_v59  ;;  %4395 = vmatpush.bf16.msra.mxu1 %v10064_v60  ;;  %v2711_v48 = vsel %vm15349_vm4, %v15337_v31, %v2695_v1  ;;  %v2713_v7 = vsel %vm15353_vm5, %v2676_v35, %v2697_v50  ;;  %v2696_v39 = vld.sshfl [vmem:[#allocation1 + $0x28] sm:$0xff pattern:$0x73625140]  ;;  %v2698_v40 = vld.sshfl [vmem:[#allocation1 + $0x38] sm:$0xff pattern:$0x73625140]  ;;  %v10016_v35 = vor.u32 %v13295_v38, %v10013_v28 }
 0x648   : > { %4408 = vmatpush.bf16.msra.mxu2 %v10192_v62  ;;  %4421 = vmatpush.bf16.msra.mxu3 %v10320_v5  ;;  %v2719_v41 = vmax.f32 %v2711_v48, 0.0  ;;  %v2721_v6 = vmax.f32 %v2713_v7, 0.0  ;;  %v2712_v47 = vsel %vm15357_vm6, %v15339_v55, %v2696_v39  ;;  %v2714_v13 = vsel %vm15361_vm7, %v15343_v58, %v2698_v40  ;;  %v13259_v55 = vld [vmem:[#allocation20 + $0x44] sm:$0xf]  ;;  %v9997_v5 = vld [vmem:[#allocation20 + $0x150] sm:$0xf0] }
 0x649   : > { %v2720_v52 = vmax.f32 %v2712_v47, 0.0  ;;  %v2722_v54 = vmax.f32 %v2714_v13, 0.0  ;;  %v10144_v58 = vor.u32 %v13327_v43, %v10141_v44  ;;  %v13291_v62 = vld [vmem:[#allocation20 + $0x144] sm:$0xf]  ;;  %v9872_v11 = vor.u32 %v13259_v55, %v9869_v30  ;;  %v9965_v53 = vld [vmem:[#allocation20 + $0x110] sm:$0xf0] }
 0x64a   : > { %v15376_v31 = vpack.c.bf16 %v2719_v41, %v2719_v41  ;;  %v15378_v56 = vpack.c.bf16 %v2721_v6, %v2721_v6  ;;  %v10000_v9 = vor.u32 %v13291_v62, %v9997_v5  ;;  %v10093_v14 = vld [vmem:[#allocation20 + $0x210] sm:$0xf0]  ;;  %v13439_v50 = vld [vmem:[#allocation20 + $0x5e4] sm:$0xf]  ;;  %v9968_v48 = vor.u32 %v13283_v24, %v9965_v53 }
 0x64b   : > { %4383 = vmatpush.bf16.msra.mxu0 %v9920_v20  ;;  %4396 = vmatpush.bf16.msra.mxu1 %v10048_v21  ;;  %v15380_v59 = vpack.c.bf16 %v2720_v52, %v2720_v52  ;;  %v15382_v60 = vpack.c.bf16 %v2722_v54, %v2722_v54  ;;  %v9981_v20 = vld [vmem:[#allocation20 + $0x130] sm:$0xf0]  ;;  %v13319_v21 = vld [vmem:[#allocation20 + $0x224] sm:$0xf]  ;;  %v10096_v41 = vor.u32 %v13315_v63, %v10093_v14 }
 0x64c   : > { %4409 = vmatpush.bf16.msra.mxu2 %v10176_v4  ;;  %4422 = vmatpush.bf16.msra.mxu3 %v10304_v3  ;;  %v13251_v4 = vld [vmem:[#allocation20 + $0x4] sm:$0xf]  ;;  %v9856_v3 = vor.u32 %v13255_v12, %v9853_v15  ;;  %v9984_v26 = vor.u32 %v13287_v19, %v9981_v20  ;;  %v10112_v32 = vor.u32 %v13319_v21, %v10109_v22  ;;  %v10461_v1 = vld [vmem:[#allocation20 + $0x4f0] sm:$0xf0] }
 0x64d   : > { %v10589_v38 = vld [vmem:[#allocation20 + $0x5f0] sm:$0xf0]  ;;  %v13471_v28 = vld [vmem:[#allocation20 + $0x6e4] sm:$0xf] }
 0x64e   : > { %v10717_v7 = vld [vmem:[#allocation20 + $0x6f0] sm:$0xf0]  ;;  %v13503_v39 = vld [vmem:[#allocation20 + $0x7e4] sm:$0xf]  ;;  %v10592_v44 = vor.u32 %v13439_v50, %v10589_v38 }
 0x64f   : > { %4384 = vmatpush.bf16.msra.mxu0 %v9904_v37  ;;  %4397 = vmatpush.bf16.msra.mxu1 %v10032_v2  ;;  %v13347_v37 = vld [vmem:[#allocation20 + $0x304] sm:$0xf]  ;;  %v10221_v2 = vld [vmem:[#allocation20 + $0x310] sm:$0xf0]  ;;  %v10720_v16 = vor.u32 %v13471_v28, %v10717_v7 }
 0x650   : > { %4410 = vmatpush.bf16.msra.mxu2 %v10160_v36  ;;  %4423 = vmatpush.bf16.msra.mxu3 %v10288_v34  ;;  %v13407_v36 = vld [vmem:[#allocation20 + $0x4e4] sm:$0xf]  ;;  %v9840_v34 = vor.u32 %v13251_v4, %v9837_v27  ;;  %v10845_v40 = vld [vmem:[#allocation20 + $0x7f0] sm:$0xf0]  ;;  %v10224_v6 = vor.u32 %v13347_v37, %v10221_v2 }
 0x651   : > { %4337 = vmatmul.bf16.vlgmr.msrb.gmra.mxu0 %v15376_v31  ;;  %4350 = vmatmul.bf16.vlgmr.msrb.gmra.mxu1 %v15380_v59  ;;  %v10464_v43 = vor.u32 %v13407_v36, %v10461_v1  ;;  %v13403_v47 = vld [vmem:[#allocation20 + $0x4c4] sm:$0xf]  ;;  %v10445_v13 = vld [vmem:[#allocation20 + $0x4d0] sm:$0xf0]  ;;  %v10848_v51 = vor.u32 %v13503_v39, %v10845_v40 }
 0x652   : > { %4363 = vmatmul.bf16.vlgmr.msrb.gmra.mxu2 %v15378_v56  ;;  %4376 = vmatmul.bf16.vlgmr.msrb.gmra.mxu3 %v15382_v60  ;;  %v13435_v52 = vld [vmem:[#allocation20 + $0x5c4] sm:$0xf]  ;;  %v10573_v54 = vld [vmem:[#allocation20 + $0x5d0] sm:$0xf0] }
 0x653   : > { %4385 = vmatpush.bf16.msra.mxu0 %v9888_v57  ;;  %4398 = vmatpush.bf16.msra.mxu1 %v10016_v35  ;;  %v13467_v57 = vld [vmem:[#allocation20 + $0x6c4] sm:$0xf]  ;;  %v10701_v35 = vld [vmem:[#allocation20 + $0x6d0] sm:$0xf0] }
 0x654   : > { %4411 = vmatpush.bf16.msra.mxu2 %v10144_v58  ;;  %4424 = vmatpush.bf16.msra.mxu3 %v10272_v61  ;;  %v13499_v55 = vld [vmem:[#allocation20 + $0x7c4] sm:$0xf]  ;;  %v10829_v30 = vld [vmem:[#allocation20 + $0x7d0] sm:$0xf0]  ;;  %v10448_v58 = vor.u32 %v13403_v47, %v10445_v13  ;;  %v10576_v61 = vor.u32 %v13435_v52, %v10573_v54  ;;  %v10704_v42 = vor.u32 %v13467_v57, %v10701_v35 }
 0x655   : > { %v13399_v62 = vld [vmem:[#allocation20 + $0x4a4] sm:$0xf]  ;;  %v10429_v5 = vld [vmem:[#allocation20 + $0x4b0] sm:$0xf0]  ;;  %v10832_v49 = vor.u32 %v13499_v55, %v10829_v30 }
 0x656   : > { %v10557_v10 = vld [vmem:[#allocation20 + $0x5b0] sm:$0xf0]  ;;  %v13495_v12 = vld [vmem:[#allocation20 + $0x7a4] sm:$0xf] }
 0x657   : > { %4386 = vmatpush.bf16.msra.mxu0 %v9872_v11  ;;  %4399 = vmatpush.bf16.msra.mxu1 %v10000_v9  ;;  %v13463_v11 = vld [vmem:[#allocation20 + $0x6a4] sm:$0xf]  ;;  %v10685_v9 = vld [vmem:[#allocation20 + $0x6b0] sm:$0xf0] }
 0x658   : > { %4412 = vmatpush.bf16.msra.mxu2 %v10128_v17  ;;  %4425 = vmatpush.bf16.msra.mxu3 %v10256_v18  ;;  %v10813_v15 = vld [vmem:[#allocation20 + $0x7b0] sm:$0xf0]  ;;  %v10432_v17 = vor.u32 %v13399_v62, %v10429_v5  ;;  %v10560_v18 = vor.u32 %v13431_v8, %v10557_v10  ;;  %v13395_v19 = vld [vmem:[#allocation20 + $0x484] sm:$0xf]  ;;  %v10688_v21 = vor.u32 %v13463_v11, %v10685_v9 }
 0x659   : > { %v10413_v20 = vld [vmem:[#allocation20 + $0x490] sm:$0xf0]  ;;  %v10816_v22 = vor.u32 %v13495_v12, %v10813_v15  ;;  %v13427_v23 = vld [vmem:[#allocation20 + $0x584] sm:$0xf] }
 0x65a   : > { %v10541_v25 = vld [vmem:[#allocation20 + $0x590] sm:$0xf0]  ;;  %v13459_v4 = vld [vmem:[#allocation20 + $0x684] sm:$0xf]  ;;  %v10416_v24 = vor.u32 %v13395_v19, %v10413_v20 }
 0x65b   : > { %4387 = vmatpush.bf16.msra.mxu0 %v9856_v3  ;;  %4400 = vmatpush.bf16.msra.mxu1 %v9984_v26  ;;  %v10669_v3 = vld [vmem:[#allocation20 + $0x690] sm:$0xf0]  ;;  %v13491_v26 = vld [vmem:[#allocation20 + $0x784] sm:$0xf]  ;;  %v10544_v53 = vor.u32 %v13427_v23, %v10541_v25  ;;  %v10083_v23 = vld [vmem:[#allocation20 + $0x1e8] sm:$0xf] }
 0x65c   : > { %4413 = vmatpush.bf16.msra.mxu2 %v10112_v32  ;;  %4426 = vmatpush.bf16.msra.mxu3 %v10240_v33  ;;  %v10797_v27 = vld [vmem:[#allocation20 + $0x790] sm:$0xf0]  ;;  %v13391_v32 = vld [vmem:[#allocation20 + $0x464] sm:$0xf]  ;;  %v10672_v63 = vor.u32 %v13459_v4, %v10669_v3  ;;  %v13314_v25 = vld [vmem:[#allocation20 + $0x1f4] sm:$0xf0] }
 0x65d   : > { %v10397_v33 = vld [vmem:[#allocation20 + $0x470] sm:$0xf0]  ;;  %v10800_v14 = vor.u32 %v13491_v26, %v10797_v27  ;;  %v13423_v37 = vld [vmem:[#allocation20 + $0x564] sm:$0xf]  ;;  %v10211_v4 = vld [vmem:[#allocation20 + $0x2e8] sm:$0xf] }
 0x65e   : > { %v10525_v2 = vld [vmem:[#allocation20 + $0x570] sm:$0xf0]  ;;  %v13455_v36 = vld [vmem:[#allocation20 + $0x664] sm:$0xf]  ;;  %v10400_v28 = vor.u32 %v13391_v32, %v10397_v33  ;;  %v13346_v27 = vld [vmem:[#allocation20 + $0x2f4] sm:$0xf0] }
 0x65f   : > { %4388 = vmatpush.bf16.msra.mxu0 %v9840_v34  ;;  %4401 = vmatpush.bf16.msra.mxu1 %v9968_v48  ;;  %v10653_v1 = vld [vmem:[#allocation20 + $0x670] sm:$0xf0]  ;;  %v13487_v50 = vld [vmem:[#allocation20 + $0x764] sm:$0xf]  ;;  %v10528_v34 = vor.u32 %v13423_v37, %v10525_v2  ;;  %v9939_v37 = vld [vmem:[#allocation20 + $0xc8] sm:$0xf] }
 0x660   : > { %4414 = vmatpush.bf16.msra.mxu2 %v10096_v41  ;;  %4427 = vmatpush.bf16.msra.mxu3 %v10224_v6  ;;  %v10781_v38 = vld [vmem:[#allocation20 + $0x770] sm:$0xf0]  ;;  %v13387_v48 = vld [vmem:[#allocation20 + $0x444] sm:$0xf]  ;;  %v10656_v39 = vor.u32 %v13455_v36, %v10653_v1  ;;  %v13278_v2 = vld [vmem:[#allocation20 + $0xd4] sm:$0xf0]  ;;  %v10212_v36 = vor.u32 %v13346_v27, %v10211_v4 }
 0x661   : > { %v10381_v7 = vld [vmem:[#allocation20 + $0x450] sm:$0xf0]  ;;  %v10784_v40 = vor.u32 %v13487_v50, %v10781_v38  ;;  %v13419_v41 = vld [vmem:[#allocation20 + $0x544] sm:$0xf]  ;;  %v10067_v50 = vld [vmem:[#allocation20 + $0x1c8] sm:$0xf] }
 0x662   : > { %4389 = vmatmul.bf16.vlgmr.msra.gmra.mxu0 %v15327_v0  ;;  %4402 = vmatmul.bf16.vlgmr.msra.gmra.mxu1 %v15329_v45  ;;  %v10509_v6 = vld [vmem:[#allocation20 + $0x550] sm:$0xf0]  ;;  %v13483_v47 = vld [vmem:[#allocation20 + $0x744] sm:$0xf]  ;;  %v13310_v38 = vld [vmem:[#allocation20 + $0x1d4] sm:$0xf0] }
 0x663   : > { %4433 = vmatpush.bf16.msrb.mxu0 %v10464_v43  ;;  %4446 = vmatpush.bf16.msrb.mxu1 %v10592_v44  ;;  %v13451_v43 = vld [vmem:[#allocation20 + $0x644] sm:$0xf]  ;;  %v10637_v44 = vld [vmem:[#allocation20 + $0x650] sm:$0xf0]  ;;  %v13262_v27 = vld [vmem:[#allocation20 + $0x54] sm:$0xf0] }
 0x664   : > { %4459 = vmatpush.bf16.msrb.mxu2 %v10720_v16  ;;  %4472 = vmatpush.bf16.msrb.mxu3 %v10848_v51  ;;  %v10765_v13 = vld [vmem:[#allocation20 + $0x750] sm:$0xf0]  ;;  %v10384_v16 = vor.u32 %v13387_v48, %v10381_v7  ;;  %v10512_v51 = vor.u32 %v13419_v41, %v10509_v6  ;;  %v13383_v52 = vld [vmem:[#allocation20 + $0x424] sm:$0xf]  ;;  %v10640_v57 = vor.u32 %v13451_v43, %v10637_v44  ;;  %v10323_v48 = vld [vmem:[#allocation20 + $0x3c8] sm:$0xf] }
 0x665   : > { %4415 = vmatmul.bf16.vlgmr.msra.gmra.mxu2 %v15331_v29  ;;  %4428 = vmatmul.bf16.vlgmr.msra.gmra.mxu3 %v15333_v46  ;;  %v10365_v54 = vld [vmem:[#allocation20 + $0x430] sm:$0xf0]  ;;  %v10768_v35 = vor.u32 %v13483_v47, %v10765_v13  ;;  %v13415_v55 = vld [vmem:[#allocation20 + $0x524] sm:$0xf]  ;;  %v13374_v7 = vld [vmem:[#allocation20 + $0x3d4] sm:$0xf0] }
 0x666   : > { %v10493_v30 = vld [vmem:[#allocation20 + $0x530] sm:$0xf0]  ;;  %v13479_v62 = vld [vmem:[#allocation20 + $0x724] sm:$0xf]  ;;  %v9923_v41 = vld [vmem:[#allocation20 + $0xa8] sm:$0xf]  ;;  %v10324_v44 = vor.u32 %v13374_v7, %v10323_v48 }
 0x667   : > { %4434 = vmatpush.bf16.msrb.mxu0 %v10448_v58  ;;  %4447 = vmatpush.bf16.msrb.mxu1 %v10576_v61  ;;  %v13447_v58 = vld [vmem:[#allocation20 + $0x624] sm:$0xf]  ;;  %v10621_v61 = vld [vmem:[#allocation20 + $0x630] sm:$0xf0]  ;;  %v10496_v8 = vor.u32 %v13415_v55, %v10493_v30  ;;  %v13274_v6 = vld [vmem:[#allocation20 + $0xb4] sm:$0xf0] }
 0x668   : > { %4460 = vmatpush.bf16.msrb.mxu2 %v10704_v42  ;;  %4473 = vmatpush.bf16.msrb.mxu3 %v10832_v49  ;;  %v10749_v5 = vld [vmem:[#allocation20 + $0x730] sm:$0xf0]  ;;  %v13379_v42 = vld [vmem:[#allocation20 + $0x404] sm:$0xf]  ;;  %v10368_v49 = vor.u32 %v13383_v52, %v10365_v54  ;;  %v10624_v12 = vor.u32 %v13447_v58, %v10621_v61  ;;  %v10051_v47 = vld [vmem:[#allocation20 + $0x1a8] sm:$0xf] }
 0x669   : > { %v10349_v10 = vld [vmem:[#allocation20 + $0x410] sm:$0xf0]  ;;  %v13411_v11 = vld [vmem:[#allocation20 + $0x504] sm:$0xf]  ;;  %v10752_v15 = vor.u32 %v13479_v62, %v10749_v5  ;;  %v13306_v13 = vld [vmem:[#allocation20 + $0x1b4] sm:$0xf0] }
 0x66a   : > { %v10477_v9 = vld [vmem:[#allocation20 + $0x510] sm:$0xf0]  ;;  %v13475_v19 = vld [vmem:[#allocation20 + $0x704] sm:$0xf]  ;;  %v10352_v3 = vor.u32 %v13379_v42, %v10349_v10  ;;  %v10307_v52 = vld [vmem:[#allocation20 + $0x3a8] sm:$0xf] }
 0x66b   : > { %4435 = vmatpush.bf16.msrb.mxu0 %v10432_v17  ;;  %4448 = vmatpush.bf16.msrb.mxu1 %v10560_v18  ;;  %v13443_v17 = vld [vmem:[#allocation20 + $0x604] sm:$0xf]  ;;  %v10605_v18 = vld [vmem:[#allocation20 + $0x610] sm:$0xf0]  ;;  %v10480_v26 = vor.u32 %v13411_v11, %v10477_v9  ;;  %v13370_v54 = vld [vmem:[#allocation20 + $0x3b4] sm:$0xf0] }
 0x66c   : > { %4461 = vmatpush.bf16.msrb.mxu2 %v10688_v21  ;;  %4474 = vmatpush.bf16.msrb.mxu3 %v10816_v22  ;;  %v10733_v20 = vld [vmem:[#allocation20 + $0x710] sm:$0xf0]  ;;  %v9955_v21 = vld [vmem:[#allocation20 + $0xe8] sm:$0xf]  ;;  %v13282_v22 = vld [vmem:[#allocation20 + $0xf4] sm:$0xf0]  ;;  %v10608_v32 = vor.u32 %v13443_v17, %v10605_v18  ;;  %v10308_v61 = vor.u32 %v13370_v54, %v10307_v52 }
 0x66d   : > { %v10736_v33 = vor.u32 %v13475_v19, %v10733_v20  ;;  %v9907_v55 = vld [vmem:[#allocation20 + $0x88] sm:$0xf]  ;;  %v13270_v30 = vld [vmem:[#allocation20 + $0x94] sm:$0xf0] }
 0x66e   : > { %v10035_v62 = vld [vmem:[#allocation20 + $0x188] sm:$0xf]  ;;  %v13302_v5 = vld [vmem:[#allocation20 + $0x194] sm:$0xf0]  ;;  %v9908_v11 = vor.u32 %v13270_v30, %v9907_v55 }
 0x66f   : > { %4436 = vmatpush.bf16.msrb.mxu0 %v10416_v24  ;;  %4449 = vmatpush.bf16.msrb.mxu1 %v10544_v53  ;;  %v10339_v24 = vld [vmem:[#allocation20 + $0x3e8] sm:$0xf]  ;;  %v13378_v53 = vld [vmem:[#allocation20 + $0x3f4] sm:$0xf0]  ;;  %v10036_v9 = vor.u32 %v13302_v5, %v10035_v62 }
 0x670   : > { %4462 = vmatpush.bf16.msrb.mxu2 %v10672_v63  ;;  %4475 = vmatpush.bf16.msrb.mxu3 %v10800_v14  ;;  %v9956_v63 = vor.u32 %v13282_v22, %v9955_v21  ;;  %v10084_v14 = vor.u32 %v13314_v25, %v10083_v23  ;;  %v10340_v1 = vor.u32 %v13378_v53, %v10339_v24  ;;  %v10163_v42 = vld [vmem:[#allocation20 + $0x288] sm:$0xf]  ;;  %v13366_v10 = vld [vmem:[#allocation20 + $0x394] sm:$0xf0] }
 0x671   : > { %v10019_v19 = vld [vmem:[#allocation20 + $0x168] sm:$0xf]  ;;  %v13298_v20 = vld [vmem:[#allocation20 + $0x174] sm:$0xf0] }
 0x672   : > { %v10147_v21 = vld [vmem:[#allocation20 + $0x268] sm:$0xf]  ;;  %v13330_v22 = vld [vmem:[#allocation20 + $0x274] sm:$0xf0] }
 0x673   : > { %4437 = vmatpush.bf16.msrb.mxu0 %v10400_v28  ;;  %4450 = vmatpush.bf16.msrb.mxu1 %v10528_v34  ;;  %v10195_v28 = vld [vmem:[#allocation20 + $0x2c8] sm:$0xf]  ;;  %v13342_v34 = vld [vmem:[#allocation20 + $0x2d4] sm:$0xf0]  ;;  %v10148_v24 = vor.u32 %v13330_v22, %v10147_v21 }
 0x674   : > { %4463 = vmatpush.bf16.msrb.mxu2 %v10656_v39  ;;  %4476 = vmatpush.bf16.msrb.mxu3 %v10784_v40  ;;  %v9940_v39 = vor.u32 %v13278_v2, %v9939_v37  ;;  %v10068_v40 = vor.u32 %v13310_v38, %v10067_v50  ;;  %v10196_v43 = vor.u32 %v13342_v34, %v10195_v28  ;;  %v10275_v23 = vld [vmem:[#allocation20 + $0x368] sm:$0xf]  ;;  %v13362_v25 = vld [vmem:[#allocation20 + $0x374] sm:$0xf0] }
 0x675   : > { %v10276_v53 = vor.u32 %v13362_v25, %v10275_v23  ;;  %v10259_v37 = vld [vmem:[#allocation20 + $0x348] sm:$0xf]  ;;  %v13358_v2 = vld [vmem:[#allocation20 + $0x354] sm:$0xf0] }
 0x676   : > { %v9859_v50 = vld [vmem:[#allocation20 + $0x28] sm:$0xf]  ;;  %v13258_v38 = vld [vmem:[#allocation20 + $0x34] sm:$0xf0]  ;;  %v10260_v34 = vor.u32 %v13358_v2, %v10259_v37 }
 0x677   : > { %4438 = vmatpush.bf16.msrb.mxu0 %v10384_v16  ;;  %4451 = vmatpush.bf16.msrb.mxu1 %v10512_v51  ;;  %v10179_v16 = vld [vmem:[#allocation20 + $0x2a8] sm:$0xf]  ;;  %v13338_v51 = vld [vmem:[#allocation20 + $0x2b4] sm:$0xf0] }
 0x678   : > { %4464 = vmatpush.bf16.msrb.mxu2 %v10640_v57  ;;  %4477 = vmatpush.bf16.msrb.mxu3 %v10768_v35  ;;  %v9924_v57 = vor.u32 %v13274_v6, %v9923_v41  ;;  %v10052_v35 = vor.u32 %v13306_v13, %v10051_v47  ;;  %v10180_v58 = vor.u32 %v13338_v51, %v10179_v16  ;;  %v9987_v48 = vld [vmem:[#allocation20 + $0x128] sm:$0xf]  ;;  %v13290_v7 = vld [vmem:[#allocation20 + $0x134] sm:$0xf0] }
 0x679   : > { %v10243_v41 = vld [vmem:[#allocation20 + $0x328] sm:$0xf]  ;;  %v13354_v6 = vld [vmem:[#allocation20 + $0x334] sm:$0xf0]  ;;  %v9988_v47 = vor.u32 %v13290_v7, %v9987_v48 }
 0x67a   : > { %v13254_v13 = vld [vmem:[#allocation20 + $0x14] sm:$0xf0]  ;;  %v9971_v16 = vld [vmem:[#allocation20 + $0x108] sm:$0xf]  ;;  %v10244_v54 = vor.u32 %v13354_v6, %v10243_v41 }
 0x67b   : > { %4439 = vmatpush.bf16.msrb.mxu0 %v10368_v49  ;;  %4452 = vmatpush.bf16.msrb.mxu1 %v10496_v8  ;;  %v13334_v49 = vld [vmem:[#allocation20 + $0x294] sm:$0xf0]  ;;  %v10291_v8 = vld [vmem:[#allocation20 + $0x388] sm:$0xf] }
 0x67c   : > { %4465 = vmatpush.bf16.msrb.mxu2 %v10624_v12  ;;  %4478 = vmatpush.bf16.msrb.mxu3 %v10752_v15  ;;  %v9891_v12 = vld [vmem:[#allocation20 + $0x68] sm:$0xf]  ;;  %v13266_v15 = vld [vmem:[#allocation20 + $0x74] sm:$0xf0]  ;;  %v10164_v17 = vor.u32 %v13334_v49, %v10163_v42  ;;  %v10292_v18 = vor.u32 %v13366_v10, %v10291_v8 }
 0x67d   : > { %v9892_v4 = vor.u32 %v13266_v15, %v9891_v12  ;;  %v13286_v51 = vld [vmem:[#allocation20 + $0x114] sm:$0xf0]  ;;  %v10227_v55 = vld [vmem:[#allocation20 + $0x308] sm:$0xf] }
 0x67e   : > { %v13350_v30 = vld [vmem:[#allocation20 + $0x314] sm:$0xf0]  ;;  %v10595_v62 = vld [vmem:[#allocation20 + $0x5e8] sm:$0xf]  ;;  %v9972_v8 = vor.u32 %v13286_v51, %v9971_v16 }
 0x67f   : > { %4440 = vmatpush.bf16.msrb.mxu0 %v10352_v3  ;;  %4453 = vmatpush.bf16.msrb.mxu1 %v10480_v26  ;;  %v10020_v3 = vor.u32 %v13298_v20, %v10019_v19  ;;  %v9875_v26 = vld [vmem:[#allocation20 + $0x48] sm:$0xf]  ;;  %v13442_v5 = vld [vmem:[#allocation20 + $0x5f4] sm:$0xf0]  ;;  %v10228_v15 = vor.u32 %v13350_v30, %v10227_v55 }
 0x680   : > { %4466 = vmatpush.bf16.msrb.mxu2 %v10608_v32  ;;  %4479 = vmatpush.bf16.msrb.mxu3 %v10736_v33  ;;  %v10003_v32 = vld [vmem:[#allocation20 + $0x148] sm:$0xf]  ;;  %v13294_v33 = vld [vmem:[#allocation20 + $0x154] sm:$0xf0] }
 0x681   : > { %v10723_v42 = vld [vmem:[#allocation20 + $0x6e8] sm:$0xf]  ;;  %v13474_v10 = vld [vmem:[#allocation20 + $0x6f4] sm:$0xf0] }
 0x682   : > { %4441 = vmatmul.bf16.vlgmr.msrb.gmra.mxu0 %v15376_v31  ;;  %4454 = vmatmul.bf16.vlgmr.msrb.gmra.mxu1 %v15380_v59  ;;  %v10451_v19 = vld [vmem:[#allocation20 + $0x4c8] sm:$0xf]  ;;  %v13406_v20 = vld [vmem:[#allocation20 + $0x4d4] sm:$0xf0]  ;;  %v10724_v21 = vor.u32 %v13474_v10, %v10723_v42 }
 0x683   : > { %4485 = vmatpush.bf16.msra.mxu0 %v9956_v63  ;;  %4498 = vmatpush.bf16.msra.mxu1 %v10084_v14  ;;  %v10131_v63 = vld [vmem:[#allocation20 + $0x248] sm:$0xf]  ;;  %v13326_v14 = vld [vmem:[#allocation20 + $0x254] sm:$0xf0] }
 0x684   : > { %4511 = vmatpush.bf16.msra.mxu2 %v10212_v36  ;;  %4524 = vmatpush.bf16.msra.mxu3 %v10340_v1  ;;  %v9876_v36 = vor.u32 %v13262_v27, %v9875_v26  ;;  %v10004_v1 = vor.u32 %v13294_v33, %v10003_v32  ;;  %v10132_v28 = vor.u32 %v13326_v14, %v10131_v63  ;;  %v10579_v23 = vld [vmem:[#allocation20 + $0x5c8] sm:$0xf]  ;;  %v13438_v25 = vld [vmem:[#allocation20 + $0x5d4] sm:$0xf0] }
 0x685   : > { %4467 = vmatmul.bf16.vlgmr.msrb.gmra.mxu2 %v15378_v56  ;;  %4480 = vmatmul.bf16.vlgmr.msrb.gmra.mxu3 %v15382_v60  ;;  %v10835_v26 = vld [vmem:[#allocation20 + $0x7c8] sm:$0xf]  ;;  %v13502_v27 = vld [vmem:[#allocation20 + $0x7d4] sm:$0xf0] }
 0x686   : > { %v10435_v32 = vld [vmem:[#allocation20 + $0x4a8] sm:$0xf]  ;;  %v13402_v33 = vld [vmem:[#allocation20 + $0x4b4] sm:$0xf0]  ;;  %v10836_v14 = vor.u32 %v13502_v27, %v10835_v26 }
 0x687   : > { %4486 = vmatpush.bf16.msra.mxu0 %v9940_v39  ;;  %4499 = vmatpush.bf16.msra.mxu1 %v10068_v40  ;;  %v10115_v39 = vld [vmem:[#allocation20 + $0x228] sm:$0xf]  ;;  %v13322_v40 = vld [vmem:[#allocation20 + $0x234] sm:$0xf0] }
 0x688   : > { %4512 = vmatpush.bf16.msra.mxu2 %v10196_v43  ;;  %4525 = vmatpush.bf16.msra.mxu3 %v10324_v44  ;;  %v9843_v43 = vld [vmem:[#allocation20 + $0x8] sm:$0xf]  ;;  %v9860_v44 = vor.u32 %v13258_v38, %v9859_v50  ;;  %v10116_v52 = vor.u32 %v13322_v40, %v10115_v39  ;;  %v13434_v2 = vld [vmem:[#allocation20 + $0x5b4] sm:$0xf0] }
 0x689   : > { %v9844_v49 = vor.u32 %v13254_v13, %v9843_v43  ;;  %v10563_v37 = vld [vmem:[#allocation20 + $0x5a8] sm:$0xf]  ;;  %v13498_v38 = vld [vmem:[#allocation20 + $0x7b4] sm:$0xf0] }
 0x68a   : > { %v10819_v50 = vld [vmem:[#allocation20 + $0x7a8] sm:$0xf]  ;;  %v13398_v7 = vld [vmem:[#allocation20 + $0x494] sm:$0xf0] }
 0x68b   : > { %4487 = vmatpush.bf16.msra.mxu0 %v9924_v57  ;;  %4500 = vmatpush.bf16.msra.mxu1 %v10052_v35  ;;  %v10099_v57 = vld [vmem:[#allocation20 + $0x208] sm:$0xf]  ;;  %v13318_v35 = vld [vmem:[#allocation20 + $0x214] sm:$0xf0]  ;;  %v10820_v40 = vor.u32 %v13498_v38, %v10819_v50 }
 0x68c   : > { %4513 = vmatpush.bf16.msra.mxu2 %v10180_v58  ;;  %4526 = vmatpush.bf16.msra.mxu3 %v10308_v61  ;;  %v10467_v58 = vld [vmem:[#allocation20 + $0x4e8] sm:$0xf]  ;;  %v13410_v61 = vld [vmem:[#allocation20 + $0x4f4] sm:$0xf0]  ;;  %v10100_v12 = vor.u32 %v13318_v35, %v10099_v57 }
 0x68d   : > { %v10419_v48 = vld [vmem:[#allocation20 + $0x488] sm:$0xf]  ;;  %v13430_v6 = vld [vmem:[#allocation20 + $0x594] sm:$0xf0] }
 0x68e   : > { %v10547_v41 = vld [vmem:[#allocation20 + $0x588] sm:$0xf]  ;;  %v13494_v13 = vld [vmem:[#allocation20 + $0x794] sm:$0xf0]  ;;  %v10420_v16 = vor.u32 %v13398_v7, %v10419_v48 }
 0x68f   : > { %4488 = vmatpush.bf16.msra.mxu0 %v9908_v11  ;;  %4501 = vmatpush.bf16.msra.mxu1 %v10036_v9  ;;  %v10851_v11 = vld [vmem:[#allocation20 + $0x7e8] sm:$0xf]  ;;  %v13506_v9 = vld [vmem:[#allocation20 + $0x7f4] sm:$0xf0]  ;;  %v10548_v51 = vor.u32 %v13430_v6, %v10547_v41  ;;  %v13312_v41 = vld [vmem:[#allocation20 + $0x1ec] sm:$0xf] }
 0x690   : > { %4514 = vmatpush.bf16.msra.mxu2 %v10164_v17  ;;  %4527 = vmatpush.bf16.msra.mxu3 %v10292_v18  ;;  %v10468_v17 = vor.u32 %v13410_v61, %v10467_v58  ;;  %v10596_v18 = vor.u32 %v13442_v5, %v10595_v62  ;;  %v10852_v22 = vor.u32 %v13506_v9, %v10851_v11  ;;  %v10675_v43 = vld [vmem:[#allocation20 + $0x688] sm:$0xf]  ;;  %v13426_v30 = vld [vmem:[#allocation20 + $0x574] sm:$0xf0]  ;;  %v10085_v6 = vld [vmem:[#allocation20 + $0x1f8] sm:$0xf0] }
 0x691   : > { %v10531_v55 = vld [vmem:[#allocation20 + $0x568] sm:$0xf]  ;;  %v13458_v61 = vld [vmem:[#allocation20 + $0x674] sm:$0xf0] }
 0x692   : > { %v10659_v58 = vld [vmem:[#allocation20 + $0x668] sm:$0xf]  ;;  %v13490_v5 = vld [vmem:[#allocation20 + $0x774] sm:$0xf0] }
 0x693   : > { %4489 = vmatpush.bf16.msra.mxu0 %v9892_v4  ;;  %4502 = vmatpush.bf16.msra.mxu1 %v10020_v3  ;;  %v10707_v4 = vld [vmem:[#allocation20 + $0x6c8] sm:$0xf]  ;;  %v13470_v3 = vld [vmem:[#allocation20 + $0x6d4] sm:$0xf0]  ;;  %v10660_v11 = vor.u32 %v13458_v61, %v10659_v58  ;;  %v13308_v58 = vld [vmem:[#allocation20 + $0x1cc] sm:$0xf] }
 0x694   : > { %4515 = vmatpush.bf16.msra.mxu2 %v10148_v24  ;;  %4528 = vmatpush.bf16.msra.mxu3 %v10276_v53  ;;  %v10452_v24 = vor.u32 %v13406_v20, %v10451_v19  ;;  %v10580_v53 = vor.u32 %v13438_v25, %v10579_v23  ;;  %v10708_v63 = vor.u32 %v13470_v3, %v10707_v4  ;;  %v10787_v62 = vld [vmem:[#allocation20 + $0x768] sm:$0xf]  ;;  %v13390_v10 = vld [vmem:[#allocation20 + $0x454] sm:$0xf0] }
 0x695   : > { %v10788_v9 = vor.u32 %v13490_v5, %v10787_v62  ;;  %v10771_v19 = vld [vmem:[#allocation20 + $0x748] sm:$0xf]  ;;  %v13486_v20 = vld [vmem:[#allocation20 + $0x754] sm:$0xf0]  ;;  %v10069_v5 = vld [vmem:[#allocation20 + $0x1d8] sm:$0xf0] }
 0x696   : > { %v10371_v23 = vld [vmem:[#allocation20 + $0x428] sm:$0xf]  ;;  %v13386_v25 = vld [vmem:[#allocation20 + $0x434] sm:$0xf0]  ;;  %v10772_v3 = vor.u32 %v13486_v20, %v10771_v19 }
 0x697   : > { %4490 = vmatpush.bf16.msra.mxu0 %v9876_v36  ;;  %4503 = vmatpush.bf16.msra.mxu1 %v10004_v1  ;;  %v10691_v36 = vld [vmem:[#allocation20 + $0x6a8] sm:$0xf]  ;;  %v13466_v1 = vld [vmem:[#allocation20 + $0x6b4] sm:$0xf0] }
 0x698   : > { %4516 = vmatpush.bf16.msra.mxu2 %v10132_v28  ;;  %4529 = vmatpush.bf16.msra.mxu3 %v10260_v34  ;;  %v10436_v28 = vor.u32 %v13402_v33, %v10435_v32  ;;  %v10564_v34 = vor.u32 %v13434_v2, %v10563_v37  ;;  %v10692_v39 = vor.u32 %v13466_v1, %v10691_v36  ;;  %v10499_v26 = vld [vmem:[#allocation20 + $0x528] sm:$0xf]  ;;  %v13418_v27 = vld [vmem:[#allocation20 + $0x534] sm:$0xf0] }
 0x699   : > { %v10755_v32 = vld [vmem:[#allocation20 + $0x728] sm:$0xf]  ;;  %v13482_v33 = vld [vmem:[#allocation20 + $0x734] sm:$0xf0]  ;;  %v10500_v37 = vor.u32 %v13418_v27, %v10499_v26 }
 0x69a   : > { %v13382_v2 = vld [vmem:[#allocation20 + $0x414] sm:$0xf0]  ;;  %v10483_v36 = vld [vmem:[#allocation20 + $0x508] sm:$0xf]  ;;  %v10756_v38 = vor.u32 %v13482_v33, %v10755_v32  ;;  %v13268_v33 = vld [vmem:[#allocation20 + $0x8c] sm:$0xf] }
 0x69b   : > { %4491 = vmatpush.bf16.msra.mxu0 %v9860_v44  ;;  %4504 = vmatpush.bf16.msra.mxu1 %v9988_v47  ;;  %v13462_v44 = vld [vmem:[#allocation20 + $0x694] sm:$0xf0]  ;;  %v10803_v47 = vld [vmem:[#allocation20 + $0x788] sm:$0xf] }
 0x69c   : > { %4517 = vmatpush.bf16.msra.mxu2 %v10116_v52  ;;  %4530 = vmatpush.bf16.msra.mxu3 %v10244_v54  ;;  %v10403_v52 = vld [vmem:[#allocation20 + $0x468] sm:$0xf]  ;;  %v13394_v54 = vld [vmem:[#allocation20 + $0x474] sm:$0xf0]  ;;  %v10676_v57 = vor.u32 %v13462_v44, %v10675_v43  ;;  %v10804_v35 = vor.u32 %v13494_v13, %v10803_v47  ;;  %v13344_v43 = vld [vmem:[#allocation20 + $0x2ec] sm:$0xf] }
 0x69d   : > { %v10404_v42 = vor.u32 %v13394_v54, %v10403_v52  ;;  %v13414_v1 = vld [vmem:[#allocation20 + $0x514] sm:$0xf0]  ;;  %v10739_v48 = vld [vmem:[#allocation20 + $0x708] sm:$0xf]  ;;  %v10213_v13 = vld [vmem:[#allocation20 + $0x2f8] sm:$0xf0] }
 0x69e   : > { %v13478_v7 = vld [vmem:[#allocation20 + $0x714] sm:$0xf0]  ;;  %v10484_v47 = vor.u32 %v13414_v1, %v10483_v36  ;;  %v10216_v61 = vor.u32 %v13344_v43, %v10213_v13  ;;  %v10037_v36 = vld [vmem:[#allocation20 + $0x198] sm:$0xf0]  ;;  %v13332_v1 = vld [vmem:[#allocation20 + $0x28c] sm:$0xf] }
 0x69f   : > { %4492 = vmatpush.bf16.msra.mxu0 %v9844_v49  ;;  %4505 = vmatpush.bf16.msra.mxu1 %v9972_v8  ;;  %v10532_v49 = vor.u32 %v13426_v30, %v10531_v55  ;;  %v10387_v8 = vld [vmem:[#allocation20 + $0x448] sm:$0xf]  ;;  %v10740_v54 = vor.u32 %v13478_v7, %v10739_v48  ;;  %v13276_v55 = vld [vmem:[#allocation20 + $0xcc] sm:$0xf]  ;;  %v9941_v30 = vld [vmem:[#allocation20 + $0xd8] sm:$0xf0] }
 0x6a0   : > { %4518 = vmatpush.bf16.msra.mxu2 %v10100_v12  ;;  %4531 = vmatpush.bf16.msra.mxu3 %v10228_v15  ;;  %v10515_v12 = vld [vmem:[#allocation20 + $0x548] sm:$0xf]  ;;  %v13422_v15 = vld [vmem:[#allocation20 + $0x554] sm:$0xf0]  ;;  %v13296_v43 = vld [vmem:[#allocation20 + $0x16c] sm:$0xf] }
 0x6a2   : > { %4493 = vmatmul.bf16.vlgmr.msra.gmra.mxu0 %v15327_v0  ;;  %4506 = vmatmul.bf16.vlgmr.msra.gmra.mxu1 %v15329_v45 }
 0x6a3   : > { %4537 = vmatpush.bf16.msrb.mxu0 %v10468_v17  ;;  %4550 = vmatpush.bf16.msrb.mxu1 %v10596_v18  ;;  %v10643_v17 = vld [vmem:[#allocation20 + $0x648] sm:$0xf]  ;;  %v13454_v18 = vld [vmem:[#allocation20 + $0x654] sm:$0xf0] }
 0x6a4   : > { %4563 = vmatpush.bf16.msrb.mxu2 %v10724_v21  ;;  %4576 = vmatpush.bf16.msrb.mxu3 %v10852_v22  ;;  %v10388_v21 = vor.u32 %v13390_v10, %v10387_v8  ;;  %v10516_v22 = vor.u32 %v13422_v15, %v10515_v12  ;;  %v10644_v4 = vor.u32 %v13454_v18, %v10643_v17  ;;  %v10197_v8 = vld [vmem:[#allocation20 + $0x2d8] sm:$0xf0]  ;;  %v13372_v10 = vld [vmem:[#allocation20 + $0x3cc] sm:$0xf] }
 0x6a5   : > { %4519 = vmatmul.bf16.vlgmr.msra.gmra.mxu2 %v15331_v29  ;;  %4532 = vmatmul.bf16.vlgmr.msra.gmra.mxu3 %v15333_v46  ;;  %v10072_v12 = vor.u32 %v13308_v58, %v10069_v5  ;;  %v13272_v15 = vld [vmem:[#allocation20 + $0xac] sm:$0xf]  ;;  %v9925_v17 = vld [vmem:[#allocation20 + $0xb8] sm:$0xf0] }
 0x6a7   : > { %4538 = vmatpush.bf16.msrb.mxu0 %v10452_v24  ;;  %4551 = vmatpush.bf16.msrb.mxu1 %v10580_v53  ;;  %v10627_v24 = vld [vmem:[#allocation20 + $0x628] sm:$0xf]  ;;  %v13450_v53 = vld [vmem:[#allocation20 + $0x634] sm:$0xf0] }
 0x6a8   : > { %4564 = vmatpush.bf16.msrb.mxu2 %v10708_v63  ;;  %4577 = vmatpush.bf16.msrb.mxu3 %v10836_v14  ;;  %v10355_v63 = vld [vmem:[#allocation20 + $0x408] sm:$0xf]  ;;  %v10372_v14 = vor.u32 %v13386_v25, %v10371_v23  ;;  %v10628_v50 = vor.u32 %v13450_v53, %v10627_v24  ;;  %v13336_v23 = vld [vmem:[#allocation20 + $0x2ac] sm:$0xf]  ;;  %v10181_v25 = vld [vmem:[#allocation20 + $0x2b8] sm:$0xf0]  ;;  %v9928_v24 = vor.u32 %v13272_v15, %v9925_v17 }
 0x6a9   : > { %v10356_v44 = vor.u32 %v13382_v2, %v10355_v63  ;;  %v9909_v63 = vld [vmem:[#allocation20 + $0x98] sm:$0xf0]  ;;  %v13300_v2 = vld [vmem:[#allocation20 + $0x18c] sm:$0xf] }
 0x6aa   : > { %v9912_v48 = vor.u32 %v13268_v33, %v9909_v63  ;;  %v10040_v7 = vor.u32 %v13300_v2, %v10037_v36  ;;  %v13356_v15 = vld [vmem:[#allocation20 + $0x34c] sm:$0xf]  ;;  %v10261_v17 = vld [vmem:[#allocation20 + $0x358] sm:$0xf0] }
 0x6ab   : > { %4539 = vmatpush.bf16.msrb.mxu0 %v10436_v28  ;;  %4552 = vmatpush.bf16.msrb.mxu1 %v10564_v34  ;;  %v10611_v28 = vld [vmem:[#allocation20 + $0x608] sm:$0xf]  ;;  %v13446_v34 = vld [vmem:[#allocation20 + $0x614] sm:$0xf0]  ;;  %v9845_v36 = vld [vmem:[#allocation20 + $0x18] sm:$0xf0] }
 0x6ac   : > { %4565 = vmatpush.bf16.msrb.mxu2 %v10692_v39  ;;  %4578 = vmatpush.bf16.msrb.mxu3 %v10820_v40  ;;  %v13280_v39 = vld [vmem:[#allocation20 + $0xec] sm:$0xf]  ;;  %v9957_v40 = vld [vmem:[#allocation20 + $0xf8] sm:$0xf0]  ;;  %v10612_v52 = vor.u32 %v13446_v34, %v10611_v28 }
 0x6ad   : > { %v13364_v28 = vld [vmem:[#allocation20 + $0x38c] sm:$0xf]  ;;  %v10293_v34 = vld [vmem:[#allocation20 + $0x398] sm:$0xf0] }
 0x6af   : > { %4540 = vmatpush.bf16.msrb.mxu0 %v10420_v16  ;;  %4553 = vmatpush.bf16.msrb.mxu1 %v10548_v51  ;;  %v13376_v16 = vld [vmem:[#allocation20 + $0x3ec] sm:$0xf]  ;;  %v10341_v51 = vld [vmem:[#allocation20 + $0x3f8] sm:$0xf0] }
 0x6b0   : > { %4566 = vmatpush.bf16.msrb.mxu2 %v10676_v57  ;;  %4579 = vmatpush.bf16.msrb.mxu3 %v10804_v35  ;;  %v9960_v57 = vor.u32 %v13280_v39, %v9957_v40  ;;  %v10088_v35 = vor.u32 %v13312_v41, %v10085_v6  ;;  %v10344_v62 = vor.u32 %v13376_v16, %v10341_v51  ;;  %v13264_v39 = vld [vmem:[#allocation20 + $0x6c] sm:$0xf]  ;;  %v9893_v40 = vld [vmem:[#allocation20 + $0x78] sm:$0xf0] }
 0x6b1   : > { %v10296_v6 = vor.u32 %v13364_v28, %v10293_v34  ;;  %v10149_v51 = vld [vmem:[#allocation20 + $0x278] sm:$0xf0]  ;;  %v13316_v34 = vld [vmem:[#allocation20 + $0x20c] sm:$0xf] }
 0x6b3   : > { %4541 = vmatpush.bf16.msrb.mxu0 %v10404_v42  ;;  %4554 = vmatpush.bf16.msrb.mxu1 %v10532_v49  ;;  %v13340_v42 = vld [vmem:[#allocation20 + $0x2cc] sm:$0xf]  ;;  %v15400_v49 = vld [vmem:[#allocation21] sm:$0xf] }
 0x6b4   : > { %4567 = vmatpush.bf16.msrb.mxu2 %v10660_v11  ;;  %4580 = vmatpush.bf16.msrb.mxu3 %v10788_v9  ;;  %v10325_v11 = vld [vmem:[#allocation20 + $0x3d8] sm:$0xf0]  ;;  %v9944_v9 = vor.u32 %v13276_v55, %v9941_v30  ;;  %v2989_v18 = vperm.slane %v15400_v49, 0  ;;  %v10200_v19 = vor.u32 %v13340_v42, %v10197_v8  ;;  %v9896_v30 = vor.u32 %v13264_v39, %v9893_v40  ;;  %v13408_v40 = vld [vmem:[#allocation20 + $0x4ec] sm:$0xf] }
 0x6b5   : > { %v10328_v20 = vor.u32 %v13372_v10, %v10325_v11  ;;  %v13292_v10 = vld [vmem:[#allocation20 + $0x14c] sm:$0xf]  ;;  %v10005_v11 = vld [vmem:[#allocation20 + $0x158] sm:$0xf0] }
 0x6b6   : > { %v10229_v39 = vld [vmem:[#allocation20 + $0x318] sm:$0xf0] }
 0x6b7   : > { %4542 = vmatpush.bf16.msrb.mxu0 %v10388_v21  ;;  %4555 = vmatpush.bf16.msrb.mxu1 %v10516_v22  ;;  %v13304_v21 = vld [vmem:[#allocation20 + $0x1ac] sm:$0xf]  ;;  %v10053_v22 = vld [vmem:[#allocation20 + $0x1b8] sm:$0xf0] }
 0x6b8   : > { %4568 = vmatpush.bf16.msrb.mxu2 %v10644_v4  ;;  %4581 = vmatpush.bf16.msrb.mxu3 %v10772_v3  ;;  %v13368_v4 = vld [vmem:[#allocation20 + $0x3ac] sm:$0xf]  ;;  %v10309_v3 = vld [vmem:[#allocation20 + $0x3b8] sm:$0xf0]  ;;  %v10056_v53 = vor.u32 %v13304_v21, %v10053_v22 }
 0x6b9   : > { %v9861_v21 = vld [vmem:[#allocation20 + $0x38] sm:$0xf0] }
 0x6bb   : > { %4543 = vmatpush.bf16.msrb.mxu0 %v10372_v14  ;;  %4556 = vmatpush.bf16.msrb.mxu1 %v10500_v37  ;;  %v10184_v14 = vor.u32 %v13336_v23, %v10181_v25  ;;  %v10312_v37 = vor.u32 %v13368_v4, %v10309_v3  ;;  %v10264_v23 = vor.u32 %v13356_v15, %v10261_v17  ;;  %v13288_v25 = vld [vmem:[#allocation20 + $0x12c] sm:$0xf]  ;;  %v9989_v4 = vld [vmem:[#allocation20 + $0x138] sm:$0xf0] }
 0x6bc   : > { %4569 = vmatpush.bf16.msrb.mxu2 %v10628_v50  ;;  %4582 = vmatpush.bf16.msrb.mxu3 %v10756_v38  ;;  %v10165_v38 = vld [vmem:[#allocation20 + $0x298] sm:$0xf0]  ;;  %v13320_v3 = vld [vmem:[#allocation20 + $0x22c] sm:$0xf]  ;;  %v9992_v2 = vor.u32 %v13288_v25, %v9989_v4 }
 0x6bd   : > { %v10168_v41 = vor.u32 %v13332_v1, %v10165_v38  ;;  %v13284_v1 = vld [vmem:[#allocation20 + $0x10c] sm:$0xf]  ;;  %v10709_v17 = vld [vmem:[#allocation20 + $0x6d8] sm:$0xf0] }
 0x6be   : > { %v4286_v26 = vpop.f32.mrf.mxu0  ;;  %v4299_v27 = vpop.f32.mrf.mxu1 }
 0x6bf   : > { %4544 = vmatpush.bf16.msrb.mxu0 %v10356_v44  ;;  %4557 = vmatpush.bf16.msrb.mxu1 %v10484_v47  ;;  %v4287_v32 = vadd.f32 %v4286_v26, %v2989_v18  ;;  %v10021_v44 = vld [vmem:[#allocation20 + $0x178] sm:$0xf0]  ;;  %v13328_v47 = vld [vmem:[#allocation20 + $0x26c] sm:$0xf] }
 0x6c0   : > { %4570 = vmatpush.bf16.msrb.mxu2 %v10612_v52  ;;  %4583 = vmatpush.bf16.msrb.mxu3 %v10740_v54  ;;  %v13360_v52 = vld [vmem:[#allocation20 + $0x36c] sm:$0xf]  ;;  %v10277_v54 = vld [vmem:[#allocation20 + $0x378] sm:$0xf0]  ;;  %v10024_v58 = vor.u32 %v13296_v43, %v10021_v44  ;;  %v10152_v42 = vor.u32 %v13328_v47, %v10149_v51 }
 0x6c1   : > { %v4300_v50 = vadd.f32 %v4299_v27, %v4287_v32  ;;  %v10280_v8 = vor.u32 %v13360_v52, %v10277_v54  ;;  %v10245_v32 = vld [vmem:[#allocation20 + $0x338] sm:$0xf0]  ;;  %v13472_v44 = vld [vmem:[#allocation20 + $0x6ec] sm:$0xf] }
 0x6c2   : > { %4545 = vmatmul.bf16.vlgmr.msrb.gmra.mxu0 %v15376_v31  ;;  %4558 = vmatmul.bf16.vlgmr.msrb.gmra.mxu1 %v15380_v59  ;;  %v10597_v43 = vld [vmem:[#allocation20 + $0x5f8] sm:$0xf0]  ;;  %v13504_v51 = vld [vmem:[#allocation20 + $0x7ec] sm:$0xf] }
 0x6c3   : > { %4589 = vmatpush.bf16.msra.mxu0 %v9960_v57  ;;  %4602 = vmatpush.bf16.msra.mxu1 %v10088_v35  ;;  %v10853_v52 = vld [vmem:[#allocation20 + $0x7f8] sm:$0xf0] }
 0x6c4   : > { %4615 = vmatpush.bf16.msra.mxu2 %v10216_v61  ;;  %4628 = vmatpush.bf16.msra.mxu3 %v10344_v62  ;;  %v13260_v61 = vld [vmem:[#allocation20 + $0x4c] sm:$0xf]  ;;  %v9877_v62 = vld [vmem:[#allocation20 + $0x58] sm:$0xf0] }
 0x6c5   : > { %4571 = vmatmul.bf16.vlgmr.msrb.gmra.mxu2 %v15378_v56  ;;  %4584 = vmatmul.bf16.vlgmr.msrb.gmra.mxu3 %v15382_v60  ;;  %v4312_v13 = vpop.f32.mrf.mxu2  ;;  %v4325_v16 = vpop.f32.mrf.mxu3  ;;  %v9880_v18 = vor.u32 %v13260_v61, %v9877_v62  ;;  %v13404_v61 = vld [vmem:[#allocation20 + $0x4cc] sm:$0xf]  ;;  %v10453_v62 = vld [vmem:[#allocation20 + $0x4d8] sm:$0xf0] }
 0x6c6   : > { %v4313_v57 = vadd.f32 %v4312_v13, %v4300_v50  ;;  %v4288_v35 = vpop.f32.mrf.mxu0  ;;  %v4301_v55 = vpop.f32.mrf.mxu1  ;;  %v9973_v50 = vld [vmem:[#allocation20 + $0x118] sm:$0xf0] }
 0x6c7   : > { %4590 = vmatpush.bf16.msra.mxu0 %v9944_v9  ;;  %4603 = vmatpush.bf16.msra.mxu1 %v10072_v12  ;;  %v13324_v9 = vld [vmem:[#allocation20 + $0x24c] sm:$0xf]  ;;  %v10133_v12 = vld [vmem:[#allocation20 + $0x258] sm:$0xf0]  ;;  %v9976_v13 = vor.u32 %v13284_v1, %v9973_v50 }
 0x6c8   : > { %4616 = vmatpush.bf16.msra.mxu2 %v10200_v19  ;;  %4629 = vmatpush.bf16.msra.mxu3 %v10328_v20  ;;  %v15407_v5 = vadd.f32 %v4325_v16, %v4313_v57  ;;  %v10008_v19 = vor.u32 %v13292_v10, %v10005_v11  ;;  %v13256_v20 = vld [vmem:[#allocation20 + $0x2c] sm:$0xf]  ;;  %v10136_v22 = vor.u32 %v13324_v9, %v10133_v12  ;;  %v10725_v16 = vld [vmem:[#allocation20 + $0x6f8] sm:$0xf0] }
 0x6c9   : > { %v13436_v10 = vld [vmem:[#allocation20 + $0x5cc] sm:$0xf]  ;;  %v10581_v11 = vld [vmem:[#allocation20 + $0x5d8] sm:$0xf0] }
 0x6ca   : > { %v13468_v9 = vld [vmem:[#allocation20 + $0x6cc] sm:$0xf] }
 0x6cb   : > { %4591 = vmatpush.bf16.msra.mxu0 %v9928_v24  ;;  %4604 = vmatpush.bf16.msra.mxu1 %v10056_v53  ;;  %v10117_v24 = vld [vmem:[#allocation20 + $0x238] sm:$0xf0]  ;;  %v13352_v53 = vld [vmem:[#allocation20 + $0x32c] sm:$0xf]  ;;  %v10712_v25 = vor.u32 %v13468_v9, %v10709_v17 }
 0x6cc   : > { %4617 = vmatpush.bf16.msra.mxu2 %v10184_v14  ;;  %4630 = vmatpush.bf16.msra.mxu3 %v10312_v37  ;;  %v13252_v14 = vld [vmem:[#allocation20 + $0xc] sm:$0xf]  ;;  %v9864_v37 = vor.u32 %v13256_v20, %v9861_v21  ;;  %v10120_v38 = vor.u32 %v13320_v3, %v10117_v24  ;;  %v10248_v28 = vor.u32 %v13352_v53, %v10245_v32  ;;  %v10693_v24 = vld [vmem:[#allocation20 + $0x6b8] sm:$0xf0] }
 0x6cd   : > { %v4314_v26 = vpop.f32.mrf.mxu2  ;;  %v4327_v27 = vpop.f32.mrf.mxu3  ;;  %v9848_v47 = vor.u32 %v13252_v14, %v9845_v36  ;;  %v10456_v20 = vor.u32 %v13404_v61, %v10453_v62  ;;  %v10584_v21 = vor.u32 %v13436_v10, %v10581_v11  ;;  %v13432_v3 = vld [vmem:[#allocation20 + $0x5ac] sm:$0xf]  ;;  %v10821_v32 = vld [vmem:[#allocation20 + $0x7b8] sm:$0xf0] }
 0x6ce   : > { %v15409_v33 = vpop.f32.mrf.mxu0  ;;  %v15411_v63 = vpop.f32.mrf.mxu1  ;;  %v10565_v26 = vld [vmem:[#allocation20 + $0x5b8] sm:$0xf0]  ;;  %v13464_v27 = vld [vmem:[#allocation20 + $0x6ac] sm:$0xf] }
 0x6cf   : > { %4592 = vmatpush.bf16.msra.mxu0 %v9912_v48  ;;  %4605 = vmatpush.bf16.msra.mxu1 %v10040_v7  ;;  %v10101_v48 = vld [vmem:[#allocation20 + $0x218] sm:$0xf0]  ;;  %v13348_v7 = vld [vmem:[#allocation20 + $0x30c] sm:$0xf] }
 0x6d0   : > { %4618 = vmatpush.bf16.msra.mxu2 %v10168_v41  ;;  %4631 = vmatpush.bf16.msra.mxu3 %v10296_v6  ;;  %v10469_v41 = vld [vmem:[#allocation20 + $0x4f8] sm:$0xf0]  ;;  %v13440_v6 = vld [vmem:[#allocation20 + $0x5ec] sm:$0xf]  ;;  %v10104_v54 = vor.u32 %v13316_v34, %v10101_v48  ;;  %v10232_v57 = vor.u32 %v13348_v7, %v10229_v39 }
 0x6d1   : > { %v10472_v35 = vor.u32 %v13408_v40, %v10469_v41  ;;  %v10600_v55 = vor.u32 %v13440_v6, %v10597_v43  ;;  %v13496_v53 = vld [vmem:[#allocation20 + $0x7ac] sm:$0xf]  ;;  %v10421_v36 = vld [vmem:[#allocation20 + $0x498] sm:$0xf0] }
 0x6d2   : > { %v10549_v34 = vld [vmem:[#allocation20 + $0x598] sm:$0xf0]  ;;  %v13460_v48 = vld [vmem:[#allocation20 + $0x68c] sm:$0xf] }
 0x6d3   : > { %4593 = vmatpush.bf16.msra.mxu0 %v9896_v30  ;;  %4606 = vmatpush.bf16.msra.mxu1 %v10024_v58  ;;  %v13492_v7 = vld [vmem:[#allocation20 + $0x78c] sm:$0xf]  ;;  %v10405_v6 = vld [vmem:[#allocation20 + $0x478] sm:$0xf0] }
 0x6d4   : > { %4619 = vmatpush.bf16.msra.mxu2 %v10152_v42  ;;  %4632 = vmatpush.bf16.msra.mxu3 %v10280_v8  ;;  %v10728_v42 = vor.u32 %v13472_v44, %v10725_v16  ;;  %v10856_v8 = vor.u32 %v13504_v51, %v10853_v52  ;;  %v13392_v41 = vld [vmem:[#allocation20 + $0x46c] sm:$0xf]  ;;  %v10533_v16 = vld [vmem:[#allocation20 + $0x578] sm:$0xf0] }
 0x6d5   : > { %v15413_v30 = vpop.f32.mrf.mxu2  ;;  %v15415_v58 = vpop.f32.mrf.mxu3  ;;  %v13456_v51 = vld [vmem:[#allocation20 + $0x66c] sm:$0xf]  ;;  %v10661_v52 = vld [vmem:[#allocation20 + $0x678] sm:$0xf0] }
 0x6d6   : > { %v4340_v12 = vpop.f32.mrf.mxu0  ;;  %v4353_v15 = vpop.f32.mrf.mxu1  ;;  %v13388_v61 = vld [vmem:[#allocation20 + $0x44c] sm:$0xf]  ;;  %v10389_v62 = vld [vmem:[#allocation20 + $0x458] sm:$0xf0] }
 0x6d7   : > { %4594 = vmatpush.bf16.msra.mxu0 %v9880_v18  ;;  %4607 = vmatpush.bf16.msra.mxu1 %v10008_v19  ;;  %v13500_v18 = vld [vmem:[#allocation20 + $0x7cc] sm:$0xf]  ;;  %v10837_v19 = vld [vmem:[#allocation20 + $0x7d8] sm:$0xf0] }
 0x6d8   : > { %4620 = vmatpush.bf16.msra.mxu2 %v10136_v22  ;;  %4633 = vmatpush.bf16.msra.mxu3 %v10264_v23  ;;  %v13400_v22 = vld [vmem:[#allocation20 + $0x4ac] sm:$0xf]  ;;  %v10437_v23 = vld [vmem:[#allocation20 + $0x4b8] sm:$0xf0]  ;;  %v10840_v4 = vor.u32 %v13500_v18, %v10837_v19 }
 0x6d9   : > { %v10440_v14 = vor.u32 %v13400_v22, %v10437_v23  ;;  %v13420_v10 = vld [vmem:[#allocation20 + $0x54c] sm:$0xf]  ;;  %v10517_v11 = vld [vmem:[#allocation20 + $0x558] sm:$0xf0] }
 0x6da   : > { %v13452_v9 = vld [vmem:[#allocation20 + $0x64c] sm:$0xf]  ;;  %v10645_v15 = vld [vmem:[#allocation20 + $0x658] sm:$0xf0]  ;;  %v10520_v22 = vor.u32 %v13420_v10, %v10517_v11 }
 0x6db   : > { %4595 = vmatpush.bf16.msra.mxu0 %v9864_v37  ;;  %4608 = vmatpush.bf16.msra.mxu1 %v9992_v2  ;;  %v10568_v37 = vor.u32 %v13432_v3, %v10565_v26  ;;  %v13396_v2 = vld [vmem:[#allocation20 + $0x48c] sm:$0xf]  ;;  %v10773_v18 = vld [vmem:[#allocation20 + $0x758] sm:$0xf0]  ;;  %v10648_v26 = vor.u32 %v13452_v9, %v10645_v15  ;;  %v10899_v15 = vld [vmem:[#allocation23 + $0x50] sm:$0xf] }
 0x6dc   : > { %4621 = vmatpush.bf16.msra.mxu2 %v10120_v38  ;;  %4634 = vmatpush.bf16.msra.mxu3 %v10248_v28  ;;  %v10824_v38 = vor.u32 %v13496_v53, %v10821_v32  ;;  %v13428_v28 = vld [vmem:[#allocation20 + $0x58c] sm:$0xf]  ;;  %v10629_v32 = vld [vmem:[#allocation20 + $0x638] sm:$0xf0] }
 0x6dd   : > { %v4366_v1 = vpop.f32.mrf.mxu2  ;;  %v4379_v50 = vpop.f32.mrf.mxu3  ;;  %v10552_v40 = vor.u32 %v13428_v28, %v10549_v34  ;;  %v13484_v17 = vld [vmem:[#allocation20 + $0x74c] sm:$0xf] }
 0x6de   : > { %v13384_v23 = vld [vmem:[#allocation20 + $0x42c] sm:$0xf] }
 0x6df   : > { %4596 = vmatpush.bf16.msra.mxu0 %v9848_v47  ;;  %4609 = vmatpush.bf16.msra.mxu1 %v9976_v13  ;;  %v15421_v39 = vpop.f32.mrf.mxu0  ;;  %v15423_v43 = vpop.f32.mrf.mxu1  ;;  %v13424_v13 = vld [vmem:[#allocation20 + $0x56c] sm:$0xf] }
 0x6e0   : > { %4622 = vmatpush.bf16.msra.mxu2 %v10104_v54  ;;  %4635 = vmatpush.bf16.msra.mxu3 %v10232_v57  ;;  %v13488_v54 = vld [vmem:[#allocation20 + $0x76c] sm:$0xf]  ;;  %v10789_v57 = vld [vmem:[#allocation20 + $0x778] sm:$0xf0] }
 0x6e1   : > { %v13448_v53 = vld [vmem:[#allocation20 + $0x62c] sm:$0xf] }
 0x6e2   : > { %4597 = vmatmul.bf16.vlgmr.msra.gmra.mxu0 %v15327_v0  ;;  %4610 = vmatmul.bf16.vlgmr.msra.gmra.mxu1 %v15329_v45  ;;  %v10677_v0 = vld [vmem:[#allocation20 + $0x698] sm:$0xf0]  ;;  %v10424_v45 = vor.u32 %v13396_v2, %v10421_v36  ;;  %v2990_v2 = vperm.slane %v15400_v49, 1  ;;  %v13380_v50 = vld [vmem:[#allocation20 + $0x40c] sm:$0xf]  ;;  %v10632_v28 = vor.u32 %v13448_v53, %v10629_v32 }
 0x6e3   : > { %4641 = vmatpush.bf16.msrb.mxu0 %v10472_v35  ;;  %4654 = vmatpush.bf16.msrb.mxu1 %v10600_v55  ;;  %v10680_v44 = vor.u32 %v13460_v48, %v10677_v0  ;;  %v10408_v35 = vor.u32 %v13392_v41, %v10405_v6  ;;  %v10536_v55 = vor.u32 %v13424_v13, %v10533_v16  ;;  %v10485_v48 = vld [vmem:[#allocation20 + $0x518] sm:$0xf0]  ;;  %v13444_v0 = vld [vmem:[#allocation20 + $0x60c] sm:$0xf]  ;;  %v10915_v41 = vld [vmem:[#allocation23 + $0x70] sm:$0xf] }
 0x6e4   : > { %4667 = vmatpush.bf16.msrb.mxu2 %v10728_v42  ;;  %4680 = vmatpush.bf16.msrb.mxu3 %v10856_v8  ;;  %v10664_v42 = vor.u32 %v13456_v51, %v10661_v52  ;;  %v10792_v8 = vor.u32 %v13488_v54, %v10789_v57  ;;  %v4391_v6 = vadd.f32 %v15421_v39, %v2990_v2  ;;  %v10979_v13 = vld [vmem:[#allocation23 + $0xf0] sm:$0xf]  ;;  %v13538_v16 = vld [vmem:[#allocation23 + $0xf4] sm:$0xf0]  ;;  %v13536_v39 = vld [vmem:[#allocation23 + $0xe4] sm:$0xf0] }
 0x6e5   : > { %4623 = vmatmul.bf16.vlgmr.msra.gmra.mxu2 %v15331_v29  ;;  %4636 = vmatmul.bf16.vlgmr.msra.gmra.mxu3 %v15333_v46  ;;  %v10696_v29 = vor.u32 %v13464_v27, %v10693_v24  ;;  %v10805_v46 = vld [vmem:[#allocation20 + $0x798] sm:$0xf0]  ;;  %v10776_v27 = vor.u32 %v13484_v17, %v10773_v18  ;;  %v10963_v17 = vld [vmem:[#allocation23 + $0xd0] sm:$0xf]  ;;  %v13552_v2 = vld [vmem:[#allocation23 + $0x164] sm:$0xf0] }
 0x6e6   : > { %v10808_v47 = vor.u32 %v13492_v7, %v10805_v46  ;;  %v10501_v24 = vld [vmem:[#allocation20 + $0x538] sm:$0xf0]  ;;  %v10947_v53 = vld [vmem:[#allocation23 + $0xb0] sm:$0xf] }
 0x6e7   : > { %4642 = vmatpush.bf16.msrb.mxu0 %v10456_v20  ;;  %4655 = vmatpush.bf16.msrb.mxu1 %v10584_v21  ;;  %v4392_v20 = vpop.f32.mrf.mxu0  ;;  %v10392_v21 = vor.u32 %v13388_v61, %v10389_v62  ;;  %v4405_v3 = vpop.f32.mrf.mxu1  ;;  %v10613_v7 = vld [vmem:[#allocation20 + $0x618] sm:$0xf0]  ;;  %v4404_v61 = vadd.f32 %v15423_v43, %v4391_v6  ;;  %v10907_v62 = vld [vmem:[#allocation23 + $0x60] sm:$0xf] }
 0x6e8   : > { %4668 = vmatpush.bf16.msrb.mxu2 %v10712_v25  ;;  %4681 = vmatpush.bf16.msrb.mxu3 %v10840_v4  ;;  %v15425_v12 = vpop.f32.mrf.mxu2  ;;  %v15427_v19 = vpop.f32.mrf.mxu3  ;;  %v10373_v25 = vld [vmem:[#allocation20 + $0x438] sm:$0xf0]  ;;  %v13416_v4 = vld [vmem:[#allocation20 + $0x52c] sm:$0xf]  ;;  %v10616_v54 = vor.u32 %v13444_v0, %v10613_v7 }
 0x6e9   : > { %v10376_v36 = vor.u32 %v13384_v23, %v10373_v25  ;;  %v10504_v1 = vor.u32 %v13416_v4, %v10501_v24  ;;  %v4417_v9 = vadd.f32 %v15425_v12, %v4404_v61  ;;  %v13518_v43 = vld [vmem:[#allocation23 + $0x54] sm:$0xf0]  ;;  %v10891_v23 = vld [vmem:[#allocation23 + $0x40] sm:$0xf]  ;;  %v13516_v12 = vld [vmem:[#allocation23 + $0x44] sm:$0xf0] }
 0x6ea   : > { %v13534_v18 = vld [vmem:[#allocation23 + $0xd4] sm:$0xf0]  ;;  %v10955_v25 = vld [vmem:[#allocation23 + $0xc0] sm:$0xf]  ;;  %v13532_v4 = vld [vmem:[#allocation23 + $0xc4] sm:$0xf0] }
 0x6eb   : > { %4643 = vmatpush.bf16.msrb.mxu0 %v10440_v14  ;;  %4656 = vmatpush.bf16.msrb.mxu1 %v10568_v37  ;;  %v13480_v14 = vld [vmem:[#allocation20 + $0x72c] sm:$0xf]  ;;  %v10757_v37 = vld [vmem:[#allocation20 + $0x738] sm:$0xf0]  ;;  %v4430_v20 = vadd.f32 %v15427_v19, %v4417_v9  ;;  %v10883_v24 = vld [vmem:[#allocation23 + $0x30] sm:$0xf] }
 0x6ec   : > { %4669 = vmatpush.bf16.msrb.mxu2 %v10696_v29  ;;  %4682 = vmatpush.bf16.msrb.mxu3 %v10824_v38  ;;  %v10357_v29 = vld [vmem:[#allocation20 + $0x418] sm:$0xf0]  ;;  %v13412_v38 = vld [vmem:[#allocation20 + $0x50c] sm:$0xf]  ;;  %v10760_v34 = vor.u32 %v13480_v14, %v10757_v37  ;;  %v11035_v37 = vld [vmem:[#allocation23 + $0x160] sm:$0xf] }
 0x6ed   : > { %v10360_v51 = vor.u32 %v13380_v50, %v10357_v29  ;;  %v10488_v52 = vor.u32 %v13412_v38, %v10485_v48  ;;  %v13554_v3 = vld [vmem:[#allocation23 + $0x174] sm:$0xf0]  ;;  %v10939_v48 = vld [vmem:[#allocation23 + $0xa0] sm:$0xf]  ;;  %v13528_v0 = vld [vmem:[#allocation23 + $0xa4] sm:$0xf0] }
 0x6ee   : > { %v13530_v19 = vld [vmem:[#allocation23 + $0xb4] sm:$0xf0]  ;;  %v13521_v9 = vld [vmem:[#allocation23 + $0x74] sm:$0xf] }
 0x6ef   : > { %4644 = vmatpush.bf16.msrb.mxu0 %v10424_v45  ;;  %4657 = vmatpush.bf16.msrb.mxu1 %v10552_v40  ;;  %v13476_v45 = vld [vmem:[#allocation20 + $0x70c] sm:$0xf]  ;;  %v10741_v40 = vld [vmem:[#allocation20 + $0x718] sm:$0xf0]  ;;  %v10948_v38 = vor.u32 %v13530_v19, %v10947_v53 }
 0x6f0   : > { %4670 = vmatpush.bf16.msrb.mxu2 %v10680_v44  ;;  %4683 = vmatpush.bf16.msrb.mxu3 %v10808_v47  ;;  %v4418_v46 = vpop.f32.mrf.mxu2  ;;  %v4431_v44 = vpop.f32.mrf.mxu3  ;;  %v13522_v47 = vld [vmem:[#allocation23 + $0x74] sm:$0xf0]  ;;  %v10744_v57 = vor.u32 %v13476_v45, %v10741_v40 }
 0x6f1   : > { %v11027_v46 = vld [vmem:[#allocation23 + $0x150] sm:$0xf]  ;;  %v13550_v45 = vld [vmem:[#allocation23 + $0x154] sm:$0xf0] }
 0x6f2   : > { %v11028_v6 = vor.u32 %v13550_v45, %v11027_v46  ;;  %v13542_v19 = vld [vmem:[#allocation23 + $0x114] sm:$0xf0] }
 0x6f3   : > { %4645 = vmatpush.bf16.msrb.mxu0 %v10408_v35  ;;  %4658 = vmatpush.bf16.msrb.mxu1 %v10536_v55  ;;  %v10916_v35 = vor.u32 %v13522_v47, %v10915_v41  ;;  %v10980_v55 = vor.u32 %v13538_v16, %v10979_v13  ;;  %v10940_v13 = vor.u32 %v13528_v0, %v10939_v48  ;;  %v10867_v16 = vld [vmem:[#allocation23 + $0x10] sm:$0xf]  ;;  %v13540_v48 = vld [vmem:[#allocation23 + $0x104] sm:$0xf0]  ;;  %v13553_v0 = vld [vmem:[#allocation23 + $0x174] sm:$0xf] }
 0x6f4   : > { %4671 = vmatpush.bf16.msrb.mxu2 %v10664_v42  ;;  %4684 = vmatpush.bf16.msrb.mxu3 %v10792_v8  ;;  %v13520_v42 = vld [vmem:[#allocation23 + $0x64] sm:$0xf0]  ;;  %v10971_v8 = vld [vmem:[#allocation23 + $0xe0] sm:$0xf] }
 0x6f5   : > { %v10908_v10 = vor.u32 %v13520_v42, %v10907_v62  ;;  %v10972_v11 = vor.u32 %v13536_v39, %v10971_v8  ;;  %v10859_v62 = vld [vmem:[#allocation23] sm:$0xf]  ;;  %v13508_v39 = vld [vmem:[#allocation23 + $0x4] sm:$0xf0] }
 0x6f7   : > { %4646 = vmatpush.bf16.msrb.mxu0 %v10392_v21  ;;  %4659 = vmatpush.bf16.msrb.mxu1 %v10520_v22  ;;  %v10900_v21 = vor.u32 %v13518_v43, %v10899_v15  ;;  %v10964_v22 = vor.u32 %v13534_v18, %v10963_v17  ;;  %v11011_v43 = vld [vmem:[#allocation23 + $0x130] sm:$0xf]  ;;  %v13546_v17 = vld [vmem:[#allocation23 + $0x134] sm:$0xf0]  ;;  %v10917_v18 = vld [vmem:[#allocation23 + $0x78] sm:$0xf0] }
 0x6f8   : > { %4672 = vmatpush.bf16.msrb.mxu2 %v10648_v26  ;;  %4685 = vmatpush.bf16.msrb.mxu3 %v10776_v27  ;;  %v10892_v27 = vor.u32 %v13516_v12, %v10891_v23  ;;  %v11012_v23 = vor.u32 %v13546_v17, %v11011_v43 }
 0x6fb   : > { %4647 = vmatpush.bf16.msrb.mxu0 %v10376_v36  ;;  %4660 = vmatpush.bf16.msrb.mxu1 %v10504_v1  ;;  %v4339_v36 = vadd.f32 %v15409_v33, %v15407_v5  ;;  %v11036_v1 = vor.u32 %v13552_v2, %v11035_v37 }
 0x6fc   : > { %4673 = vmatpush.bf16.msrb.mxu2 %v10632_v28  ;;  %4686 = vmatpush.bf16.msrb.mxu3 %v10760_v34  ;;  %v10875_v28 = vld [vmem:[#allocation23 + $0x20] sm:$0xf]  ;;  %v13512_v34 = vld [vmem:[#allocation23 + $0x24] sm:$0xf0] }
 0x6fd   : > { %v4352_v40 = vadd.f32 %v15411_v63, %v4339_v36  ;;  %v10876_v47 = vor.u32 %v13512_v34, %v10875_v28  ;;  %v10987_v34 = vld [vmem:[#allocation23 + $0x100] sm:$0xf] }
 0x6ff   : > { %4648 = vmatpush.bf16.msrb.mxu0 %v10360_v51  ;;  %4661 = vmatpush.bf16.msrb.mxu1 %v10488_v52  ;;  %v4442_v26 = vpop.f32.mrf.mxu0  ;;  %v4455_v14 = vpop.f32.mrf.mxu1  ;;  %v4365_v33 = vadd.f32 %v15413_v30, %v4352_v40  ;;  %v13510_v51 = vld [vmem:[#allocation23 + $0x14] sm:$0xf0]  ;;  %v10931_v52 = vld [vmem:[#allocation23 + $0x90] sm:$0xf]  ;;  %v13515_v40 = vld [vmem:[#allocation23 + $0x44] sm:$0xf] }
 0x700   : > { %4674 = vmatpush.bf16.msrb.mxu2 %v10616_v54  ;;  %4687 = vmatpush.bf16.msrb.mxu3 %v10744_v57  ;;  %v4443_v32 = vadd.f32 %v4442_v26, %v4430_v20  ;;  %v13526_v57 = vld [vmem:[#allocation23 + $0x94] sm:$0xf0]  ;;  %v10868_v30 = vor.u32 %v13510_v51, %v10867_v16  ;;  %v13537_v20 = vld [vmem:[#allocation23 + $0xf4] sm:$0xf]  ;;  %v11003_v26 = vld [vmem:[#allocation23 + $0x120] sm:$0xf] }
 0x701   : > { %v4378_v42 = vadd.f32 %v15415_v58, %v4365_v33  ;;  %v10932_v8 = vor.u32 %v13526_v57, %v10931_v52  ;;  %v10860_v58 = vor.u32 %v13508_v39, %v10859_v62  ;;  %v13513_v16 = vld [vmem:[#allocation23 + $0x34] sm:$0xf]  ;;  %v10885_v51 = vld [vmem:[#allocation23 + $0x38] sm:$0xf0]  ;;  %v13527_v39 = vld [vmem:[#allocation23 + $0xa4] sm:$0xf] }
 0x702   : > { %4649 = vmatmul.bf16.vlgmr.msrb.gmra.mxu0 %v15376_v31  ;;  %4662 = vmatmul.bf16.vlgmr.msrb.gmra.mxu1 %v15380_v59  ;;  %v11043_v31 = vld [vmem:[#allocation23 + $0x170] sm:$0xf]  ;;  %v4456_v50 = vadd.f32 %v4455_v14, %v4443_v32  ;;  %v13529_v52 = vld [vmem:[#allocation23 + $0xb4] sm:$0xf]  ;;  %v10949_v57 = vld [vmem:[#allocation23 + $0xb8] sm:$0xf0]  ;;  %v10888_v62 = vor.u32 %v13513_v16, %v10885_v51 }
 0x703   : > { %5091 = vmatpush.bf16.msra.mxu0 %v10916_v35  ;;  %5104 = vmatpush.bf16.msra.mxu1 %v10980_v55  ;;  %v11044_v59 = vor.u32 %v13554_v3, %v11043_v31  ;;  %v11019_v35 = vld [vmem:[#allocation23 + $0x140] sm:$0xf]  ;;  %v13548_v55 = vld [vmem:[#allocation23 + $0x144] sm:$0xf0]  ;;  %v10920_v31 = vor.u32 %v13521_v9, %v10917_v18  ;;  %v10995_v14 = vld [vmem:[#allocation23 + $0x110] sm:$0xf] }
 0x704   : > { %4675 = vmatmul.bf16.vlgmr.msrb.gmra.mxu2 %v15378_v56  ;;  %4688 = vmatmul.bf16.vlgmr.msrb.gmra.mxu3 %v15382_v60  ;;  %v10956_v56 = vor.u32 %v13532_v4, %v10955_v25  ;;  %v13514_v60 = vld [vmem:[#allocation23 + $0x34] sm:$0xf0]  ;;  %v11020_v61 = vor.u32 %v13548_v55, %v11019_v35  ;;  %v4693_v25 = vmax.f32 %v4378_v42, 0.0  ;;  %v10996_v28 = vor.u32 %v13542_v19, %v10995_v14  ;;  %v13551_v55 = vld [vmem:[#allocation23 + $0x164] sm:$0xf] }
 0x705   : > { %5117 = vmatpush.bf16.msra.mxu2 %v11044_v59  ;;  %v10884_v29 = vor.u32 %v13514_v60, %v10883_v24  ;;  %v13519_v59 = vld [vmem:[#allocation23 + $0x64] sm:$0xf]  ;;  %v10973_v60 = vld [vmem:[#allocation23 + $0xe8] sm:$0xf0]  ;;  %v10952_v42 = vor.u32 %v13529_v52, %v10949_v57  ;;  %v11029_v9 = vld [vmem:[#allocation23 + $0x158] sm:$0xf0] }
 0x706   : > { %v13535_v24 = vld [vmem:[#allocation23 + $0xe4] sm:$0xf]  ;;  %v15445_v37 = vpack.c.bf16 %v4693_v25, %v4693_v25  ;;  %v10933_v25 = vld [vmem:[#allocation23 + $0x98] sm:$0xf0]  ;;  %v13545_v14 = vld [vmem:[#allocation23 + $0x134] sm:$0xf] }
 0x707   : > { %5092 = vmatpush.bf16.msra.mxu0 %v10908_v10  ;;  %5105 = vmatpush.bf16.msra.mxu1 %v10972_v11  ;;  %v4444_v5 = vpop.f32.mrf.mxu0  ;;  %v4457_v54 = vpop.f32.mrf.mxu1  ;;  %v10923_v10 = vld [vmem:[#allocation23 + $0x80] sm:$0xf]  ;;  %v13524_v11 = vld [vmem:[#allocation23 + $0x84] sm:$0xf0]  ;;  %v10976_v36 = vor.u32 %v13535_v24, %v10973_v60  ;;  %v10861_v24 = vld [vmem:[#allocation23 + $0x8] sm:$0xf0] }
 0x708   : > { %v4468_v7 = vpop.f32.mrf.mxu2  ;;  %v4481_v41 = vpop.f32.mrf.mxu3  ;;  %v10924_v4 = vor.u32 %v13524_v11, %v10923_v10  ;;  %v10988_v5 = vor.u32 %v13540_v48, %v10987_v34  ;;  %v10941_v10 = vld [vmem:[#allocation23 + $0xa8] sm:$0xf0]  ;;  %v13549_v11 = vld [vmem:[#allocation23 + $0x154] sm:$0xf]  ;;  %v13523_v60 = vld [vmem:[#allocation23 + $0x84] sm:$0xf] }
 0x709   : > { %5118 = vmatpush.bf16.msra.mxu2 %v11036_v1  ;;  %v4469_v44 = vadd.f32 %v4468_v7, %v4456_v50  ;;  %v13517_v1 = vld [vmem:[#allocation23 + $0x54] sm:$0xf]  ;;  %v10901_v50 = vld [vmem:[#allocation23 + $0x58] sm:$0xf0]  ;;  %v11032_v43 = vor.u32 %v13549_v11, %v11029_v9  ;;  %v13570_v48 = vld [vmem:[#allocation23 + $0x1f4] sm:$0xf0] }
 0x70a   : > { %v11045_v7 = vld [vmem:[#allocation23 + $0x178] sm:$0xf0]  ;;  %v10904_v46 = vor.u32 %v13517_v1, %v10901_v50  ;;  %v13568_v16 = vld [vmem:[#allocation23 + $0x1e4] sm:$0xf0]  ;;  %v13566_v57 = vld [vmem:[#allocation23 + $0x1d4] sm:$0xf0] }
 0x70b   : > { %5093 = vmatpush.bf16.msra.mxu0 %v10900_v21  ;;  %5106 = vmatpush.bf16.msra.mxu1 %v10964_v22  ;;  %v4482_v63 = vadd.f32 %v4481_v41, %v4469_v44  ;;  %v10981_v21 = vld [vmem:[#allocation23 + $0xf8] sm:$0xf0]  ;;  %v10893_v41 = vld [vmem:[#allocation23 + $0x48] sm:$0xf0]  ;;  %v11048_v33 = vor.u32 %v13553_v0, %v11045_v7 }
 0x70c   : > { %v10984_v3 = vor.u32 %v13537_v20, %v10981_v21  ;;  %v10957_v44 = vld [vmem:[#allocation23 + $0xc8] sm:$0xf0]  ;;  %v10944_v20 = vor.u32 %v13527_v39, %v10941_v10  ;;  %v13509_v21 = vld [vmem:[#allocation23 + $0x14] sm:$0xf]  ;;  %v11013_v19 = vld [vmem:[#allocation23 + $0x138] sm:$0xf0] }
 0x70d   : > { %5119 = vmatpush.bf16.msra.mxu2 %v11028_v6  ;;  %v4694_v12 = vmax.f32 %v4482_v63, 0.0  ;;  %v13531_v6 = vld [vmem:[#allocation23 + $0xc4] sm:$0xf]  ;;  %v11075_v39 = vld [vmem:[#allocation23 + $0x1b0] sm:$0xf] }
 0x70e   : > { %v13562_v10 = vld [vmem:[#allocation23 + $0x1b4] sm:$0xf0] }
 0x70f   : > { %5094 = vmatpush.bf16.msra.mxu0 %v10892_v27  ;;  %5107 = vmatpush.bf16.msra.mxu1 %v10956_v56  ;;  %v13544_v27 = vld [vmem:[#allocation23 + $0x124] sm:$0xf0]  ;;  %v10909_v56 = vld [vmem:[#allocation23 + $0x68] sm:$0xf0]  ;;  %v15443_v32 = vpack.c.bf16 %v4694_v12, %v4694_v12 }
 0x710   : > { %v4470_v15 = vpop.f32.mrf.mxu2  ;;  %v4483_v22 = vpop.f32.mrf.mxu3  ;;  %v11004_v53 = vor.u32 %v13544_v27, %v11003_v26  ;;  %v10912_v2 = vor.u32 %v13519_v59, %v10909_v56  ;;  %v2991_v59 = vperm.slane %v15400_v49, 2  ;;  %v13507_v56 = vld [vmem:[#allocation23 + $0x4] sm:$0xf] }
 0x711   : > { %5120 = vmatpush.bf16.msra.mxu2 %v11020_v61  ;;  %v11037_v61 = vld [vmem:[#allocation23 + $0x168] sm:$0xf0]  ;;  %v10869_v22 = vld [vmem:[#allocation23 + $0x18] sm:$0xf0]  ;;  %v10864_v49 = vor.u32 %v13507_v56, %v10861_v24  ;;  %v13567_v24 = vld [vmem:[#allocation23 + $0x1e4] sm:$0xf] }
 0x712   : > { %v11040_v63 = vor.u32 %v13551_v55, %v11037_v61  ;;  %v10872_v26 = vor.u32 %v13509_v21, %v10869_v22 }
 0x713   : > { %5095 = vmatpush.bf16.msra.mxu0 %v10884_v29  ;;  %5108 = vmatpush.bf16.msra.mxu1 %v10948_v38  ;;  %v13533_v29 = vld [vmem:[#allocation23 + $0xd4] sm:$0xf]  ;;  %v10965_v38 = vld [vmem:[#allocation23 + $0xd8] sm:$0xf0] }
 0x714   : > { %v10968_v45 = vor.u32 %v13533_v29, %v10965_v38  ;;  %v13543_v29 = vld [vmem:[#allocation23 + $0x124] sm:$0xf]  ;;  %v11005_v38 = vld [vmem:[#allocation23 + $0x128] sm:$0xf0] }
 0x715   : > { %5121 = vmatpush.bf16.msra.mxu2 %v11012_v23  ;;  %v13525_v23 = vld [vmem:[#allocation23 + $0x94] sm:$0xf]  ;;  %v11008_v7 = vor.u32 %v13543_v29, %v11005_v38  ;;  %v13563_v38 = vld [vmem:[#allocation23 + $0x1c4] sm:$0xf] }
 0x716   : > { %v10936_v27 = vor.u32 %v13525_v23, %v10933_v25  ;;  %v11059_v25 = vld [vmem:[#allocation23 + $0x190] sm:$0xf] }
 0x717   : > { %5096 = vmatpush.bf16.msra.mxu0 %v10876_v47  ;;  %5109 = vmatpush.bf16.msra.mxu1 %v10940_v13  ;;  %v10896_v47 = vor.u32 %v13515_v40, %v10893_v41  ;;  %v10960_v13 = vor.u32 %v13531_v6, %v10957_v44  ;;  %v10997_v40 = vld [vmem:[#allocation23 + $0x118] sm:$0xf0]  ;;  %v13539_v44 = vld [vmem:[#allocation23 + $0x104] sm:$0xf] }
 0x719   : > { %5122 = vmatpush.bf16.msra.mxu2 %v11004_v53  ;;  %v10925_v53 = vld [vmem:[#allocation23 + $0x88] sm:$0xf0] }
 0x71a   : > { %v10928_v34 = vor.u32 %v13523_v60, %v10925_v53  ;;  %v11101_v60 = vld [vmem:[#allocation23 + $0x1e8] sm:$0xf0] }
 0x71b   : > { %5097 = vmatpush.bf16.msra.mxu0 %v10868_v30  ;;  %5110 = vmatpush.bf16.msra.mxu1 %v10932_v8  ;;  %v13511_v30 = vld [vmem:[#allocation23 + $0x24] sm:$0xf]  ;;  %v10877_v8 = vld [vmem:[#allocation23 + $0x28] sm:$0xf0] }
 0x71c   : > { %v10880_v18 = vor.u32 %v13511_v30, %v10877_v8 }
 0x71d   : > { %5123 = vmatpush.bf16.msra.mxu2 %v10996_v28  ;;  %v11107_v28 = vld [vmem:[#allocation23 + $0x1f0] sm:$0xf] }
 0x71e   : > { %v11108_v0 = vor.u32 %v13570_v48, %v11107_v28  ;;  %v11085_v28 = vld [vmem:[#allocation23 + $0x1c8] sm:$0xf0] }
 0x71f   : > { %5098 = vmatpush.bf16.msra.mxu0 %v10860_v58  ;;  %5111 = vmatpush.bf16.msra.mxu1 %v10924_v4  ;;  %v4494_v54 = vpop.f32.mrf.mxu0  ;;  %v4507_v35 = vpop.f32.mrf.mxu1  ;;  %v13547_v4 = vld [vmem:[#allocation23 + $0x144] sm:$0xf] }
 0x720   : > { %v4495_v1 = vadd.f32 %v4494_v54, %v2991_v59  ;;  %5130 = vmatpush.bf16.msra.mxu3 %v11108_v0  ;;  %v11091_v54 = vld [vmem:[#allocation23 + $0x1d0] sm:$0xf]  ;;  %v13561_v0 = vld [vmem:[#allocation23 + $0x1b4] sm:$0xf] }
 0x721   : > { %5124 = vmatpush.bf16.msra.mxu2 %v10988_v5  ;;  %v10989_v5 = vld [vmem:[#allocation23 + $0x108] sm:$0xf0]  ;;  %v11092_v61 = vor.u32 %v13566_v57, %v11091_v54 }
 0x722   : > { %5099 = vmatmul.bf16.vlgmr.msra.gmra.mxu0 %v15445_v37  ;;  %5112 = vmatmul.bf16.vlgmr.msra.gmra.mxu1 %v15443_v32  ;;  %v11053_v54 = vld [vmem:[#allocation23 + $0x188] sm:$0xf0] }
 0x723   : > { %5143 = vmatpush.bf16.msrb.mxu0 %v10920_v31  ;;  %5156 = vmatpush.bf16.msrb.mxu1 %v10984_v3  ;;  %v11021_v31 = vld [vmem:[#allocation23 + $0x148] sm:$0xf0] }
 0x724   : > { %v11024_v3 = vor.u32 %v13547_v4, %v11021_v31  ;;  %v11051_v31 = vld [vmem:[#allocation23 + $0x180] sm:$0xf] }
 0x725   : > { %5169 = vmatpush.bf16.msrb.mxu2 %v11048_v33  ;;  %v10992_v33 = vor.u32 %v13539_v44, %v10989_v5 }
 0x727   : > { %5144 = vmatpush.bf16.msrb.mxu0 %v10912_v2  ;;  %5157 = vmatpush.bf16.msrb.mxu1 %v10976_v36  ;;  %v4496_v12 = vpop.f32.mrf.mxu0  ;;  %v4509_v58 = vpop.f32.mrf.mxu1  ;;  %v11016_v36 = vor.u32 %v13545_v14, %v11013_v19  ;;  %v11104_v14 = vor.u32 %v13567_v24, %v11101_v60 }
 0x728   : > { %v4520_v15 = vpop.f32.mrf.mxu2  ;;  %v4533_v17 = vpop.f32.mrf.mxu3  ;;  %v13558_v58 = vld [vmem:[#allocation23 + $0x194] sm:$0xf0] }
 0x729   : > { %5170 = vmatpush.bf16.msrb.mxu2 %v11040_v63  ;;  %v11060_v4 = vor.u32 %v13558_v58, %v11059_v25 }
 0x72b   : > { %5145 = vmatpush.bf16.msrb.mxu0 %v10904_v46  ;;  %5158 = vmatpush.bf16.msrb.mxu1 %v10968_v45  ;;  %v4508_v46 = vadd.f32 %v4507_v35, %v4495_v1  ;;  %v13541_v45 = vld [vmem:[#allocation23 + $0x114] sm:$0xf] }
 0x72c   : > { %v11000_v41 = vor.u32 %v13541_v45, %v10997_v40  ;;  %v14263_v45 = vld [vmem:[#allocation21] sm:$0xf] }
 0x72d   : > { %5171 = vmatpush.bf16.msrb.mxu2 %v11032_v43  ;;  %v4521_v6 = vadd.f32 %v4520_v15, %v4508_v46  ;;  %v11076_v43 = vor.u32 %v13562_v10, %v11075_v39  ;;  %v2992_v40 = vperm.slane %v14263_v45, 3  ;;  %v11627_v45 = vld [vmem:[#allocation26 + $0x400] sm:$0xf] }
 0x72f   : > { %5146 = vmatpush.bf16.msrb.mxu0 %v10896_v47  ;;  %5159 = vmatpush.bf16.msrb.mxu1 %v10960_v13  ;;  %v4534_v47 = vadd.f32 %v4533_v17, %v4521_v6  ;;  %v11099_v13 = vld [vmem:[#allocation23 + $0x1e0] sm:$0xf]  ;;  %v11069_v6 = vld [vmem:[#allocation23 + $0x1a8] sm:$0xf0] }
 0x730   : > { %v4522_v2 = vpop.f32.mrf.mxu2  ;;  %v4535_v50 = vpop.f32.mrf.mxu3  ;;  %v11100_v52 = vor.u32 %v13568_v16, %v11099_v13  ;;  %v11061_v13 = vld [vmem:[#allocation23 + $0x198] sm:$0xf0] }
 0x731   : > { %5172 = vmatpush.bf16.msrb.mxu2 %v11024_v3  ;;  %v13556_v3 = vld [vmem:[#allocation23 + $0x184] sm:$0xf0]  ;;  %v13565_v2 = vld [vmem:[#allocation23 + $0x1d4] sm:$0xf] }
 0x732   : > { %5131 = vmatpush.bf16.msra.mxu3 %v11100_v52  ;;  %v11052_v59 = vor.u32 %v13556_v3, %v11051_v31  ;;  %v13555_v52 = vld [vmem:[#allocation23 + $0x184] sm:$0xf] }
 0x733   : > { %5147 = vmatpush.bf16.msrb.mxu0 %v10888_v62  ;;  %5160 = vmatpush.bf16.msrb.mxu1 %v10952_v42  ;;  %v13564_v62 = vld [vmem:[#allocation23 + $0x1c4] sm:$0xf0]  ;;  %v12011_v31 = vld [vmem:[#allocation26 + $0x700] sm:$0xf] }
 0x734   : > { %v13811_v3 = vld [vmem:[#allocation26 + $0x77c] sm:$0xf0] }
 0x735   : > { %5173 = vmatpush.bf16.msrb.mxu2 %v11016_v36  ;;  %v11093_v36 = vld [vmem:[#allocation23 + $0x1d8] sm:$0xf0] }
 0x736   : > { %5132 = vmatpush.bf16.msra.mxu3 %v11092_v61  ;;  %v11096_v1 = vor.u32 %v13565_v2, %v11093_v36  ;;  %v13779_v2 = vld [vmem:[#allocation26 + $0x67c] sm:$0xf0]  ;;  %v13763_v36 = vld [vmem:[#allocation26 + $0x604] sm:$0xf] }
 0x737   : > { %5148 = vmatpush.bf16.msrb.mxu0 %v10880_v18  ;;  %5161 = vmatpush.bf16.msrb.mxu1 %v10944_v20  ;;  %v11067_v18 = vld [vmem:[#allocation23 + $0x1a0] sm:$0xf]  ;;  %v13560_v20 = vld [vmem:[#allocation23 + $0x1a4] sm:$0xf0] }
 0x738   : > { %v11068_v23 = vor.u32 %v13560_v20, %v11067_v18  ;;  %v4765_v18 = vld [vmem:[#allocation24] sm:$0x3] }
 0x739   : > { %5174 = vmatpush.bf16.msrb.mxu2 %v11008_v7  ;;  %v11077_v7 = vld [vmem:[#allocation23 + $0x1b8] sm:$0xf0]  ;;  %v4767_v20 = vperm.slane %v4765_v18, 0 }
 0x73a   : > { %v11080_v46 = vor.u32 %v13561_v0, %v11077_v7 }
 0x73b   : > { %5149 = vmatpush.bf16.msrb.mxu0 %v10872_v26  ;;  %5162 = vmatpush.bf16.msrb.mxu1 %v10936_v27  ;;  %v13569_v26 = vld [vmem:[#allocation23 + $0x1f4] sm:$0xf]  ;;  %v11109_v27 = vld [vmem:[#allocation23 + $0x1f8] sm:$0xf0] }
 0x73c   : > { %v11112_v56 = vor.u32 %v13569_v26, %v11109_v27  ;;  %v12012_v26 = vor.u32 %v13811_v3, %v12011_v31  ;;  %v12013_v27 = vld [vmem:[#allocation26 + $0x780] sm:$0xf0] }
 0x73d   : > { %5175 = vmatpush.bf16.msrb.mxu2 %v11000_v41  ;;  %v13559_v41 = vld [vmem:[#allocation23 + $0x1a4] sm:$0xf] }
 0x73e   : > { %v11072_v5 = vor.u32 %v13559_v41, %v11069_v6  ;;  %v13699_v41 = vld [vmem:[#allocation26 + $0x404] sm:$0xf] }
 0x73f   : > { %5150 = vmatpush.bf16.msrb.mxu0 %v10864_v49  ;;  %5163 = vmatpush.bf16.msrb.mxu1 %v10928_v34  ;;  %v4546_v51 = vpop.f32.mrf.mxu0  ;;  %v4559_v55 = vpop.f32.mrf.mxu1  ;;  %v11088_v34 = vor.u32 %v13563_v38, %v11085_v28  ;;  %v13747_v38 = vld [vmem:[#allocation26 + $0x57c] sm:$0xf0]  ;;  %v12781_v3 = vld [vmem:[#allocation26 + $0xd80] sm:$0xf0] }
 0x740   : > { %v4547_v35 = vadd.f32 %v4546_v51, %v4534_v47  ;;  %v13557_v47 = vld [vmem:[#allocation23 + $0x194] sm:$0xf] }
 0x741   : > { %5176 = vmatpush.bf16.msrb.mxu2 %v10992_v33  ;;  %v11064_v51 = vor.u32 %v13557_v47, %v11061_v13  ;;  %v13035_v13 = vld [vmem:[#allocation26 + $0xf00] sm:$0xf] }
 0x742   : > { %5151 = vmatmul.bf16.vlgmr.msrb.gmra.mxu0 %v15445_v37  ;;  %5164 = vmatmul.bf16.vlgmr.msrb.gmra.mxu1 %v15443_v32  ;;  %v4560_v63 = vadd.f32 %v4559_v55, %v4547_v35  ;;  %v11083_v37 = vld [vmem:[#allocation23 + $0x1c0] sm:$0xf]  ;;  %v11056_v35 = vor.u32 %v13555_v52, %v11053_v54 }
 0x743   : > { %v11084_v42 = vor.u32 %v13564_v62, %v11083_v37  ;;  %8343 = vmatpush.bf16.msra.mxu0 %v12012_v26  ;;  %v13587_v26 = vld [vmem:[#allocation26 + $0x7c] sm:$0xf0] }
 0x745   : > { %5133 = vmatpush.bf16.msra.mxu3 %v11084_v42 }
 0x747   : > { %v4548_v11 = vpop.f32.mrf.mxu0  ;;  %v4561_v15 = vpop.f32.mrf.mxu1 }
 0x748   : > { %v4572_v32 = vpop.f32.mrf.mxu2  ;;  %v4585_v8 = vpop.f32.mrf.mxu3 }
 0x749   : > { %v4573_v30 = vadd.f32 %v4572_v32, %v4560_v63  ;;  %5134 = vmatpush.bf16.msra.mxu3 %v11076_v43 }
 0x74b   : > { %v4586_v9 = vadd.f32 %v4585_v8, %v4573_v30 }
 0x74d   : > { %v4695_v17 = vmax.f32 %v4586_v9, 0.0  ;;  %5135 = vmatpush.bf16.msra.mxu3 %v11068_v23 }
 0x74f   : > { %v4699_v21 = vpack.c.bf16 %v4695_v17, %v4695_v17 }
 0x750   : > { %v4574_v22 = vpop.f32.mrf.mxu2  ;;  %v4587_v12 = vpop.f32.mrf.mxu3 }
 0x751   : > { %5125 = vmatmul.bf16.vlgmr.msra.gmra.mxu2 %v4699_v21  ;;  %5136 = vmatpush.bf16.msra.mxu3 %v11060_v4  ;;  %v4768_v4 = vperm.slane %v4765_v18, 1  ;;  %v13619_v18 = vld [vmem:[#allocation26 + $0x17c] sm:$0xf0] }
 0x755   : > { %5137 = vmatpush.bf16.msra.mxu3 %v11052_v59  ;;  %v13795_v59 = vld [vmem:[#allocation26 + $0x704] sm:$0xf] }
 0x759   : > { %5182 = vmatpush.bf16.msrb.mxu3 %v11112_v56  ;;  %v12016_v56 = vor.u32 %v13795_v59, %v12013_v27  ;;  %v11115_v59 = vld [vmem:[#allocation26] sm:$0xf] }
 0x75b   : > { %8369 = vmatpush.bf16.msra.mxu2 %v12016_v56  ;;  %v12651_v56 = vld [vmem:[#allocation26 + $0xc00] sm:$0xf] }
 0x75d   : > { %5183 = vmatpush.bf16.msrb.mxu3 %v11104_v14 }
 0x75f   : > { %v4598_v53 = vpop.f32.mrf.mxu0  ;;  %v4611_v19 = vpop.f32.mrf.mxu1 }
 0x760   : > { %v4599_v16 = vadd.f32 %v4598_v53, %v2992_v40  ;;  %v13715_v40 = vld [vmem:[#allocation26 + $0x47c] sm:$0xf0] }
 0x761   : > { %5177 = vmatmul.bf16.vlgmr.msrb.gmra.mxu2 %v4699_v21  ;;  %5184 = vmatpush.bf16.msrb.mxu3 %v11096_v1  ;;  %v11628_v6 = vor.u32 %v13715_v40, %v11627_v45  ;;  %v13923_v40 = vld [vmem:[#allocation26 + $0xb04] sm:$0xf] }
 0x762   : > { %v4612_v57 = vadd.f32 %v4611_v19, %v4599_v16  ;;  %v11883_v19 = vld [vmem:[#allocation26 + $0x600] sm:$0xf] }
 0x763   : > { %v11884_v1 = vor.u32 %v13779_v2, %v11883_v19  ;;  %v14067_v16 = vld [vmem:[#allocation26 + $0xf7c] sm:$0xf0]  ;;  %v13955_v19 = vld [vmem:[#allocation26 + $0xc04] sm:$0xf] }
 0x764   : > { %v13036_v54 = vor.u32 %v14067_v16, %v13035_v13  ;;  %v12653_v2 = vld [vmem:[#allocation26 + $0xc80] sm:$0xf0]  ;;  %v12395_v16 = vld [vmem:[#allocation26 + $0xa00] sm:$0xf] }
 0x765   : > { %5185 = vmatpush.bf16.msrb.mxu3 %v11088_v34  ;;  %v11757_v34 = vld [vmem:[#allocation26 + $0x580] sm:$0xf0]  ;;  %8344 = vmatpush.bf16.msra.mxu0 %v11884_v1  ;;  %v11116_v1 = vor.u32 %v13587_v26, %v11115_v59  ;;  %v13043_v59 = vld [vmem:[#allocation26 + $0xf08] sm:$0xf] }
 0x766   : > { %8356 = vmatpush.bf16.msra.mxu1 %v13036_v54  ;;  %v14068_v26 = vld [vmem:[#allocation26 + $0xf84] sm:$0xf0] }
 0x767   : > { %v4600_v49 = vpop.f32.mrf.mxu0  ;;  %v4613_v48 = vpop.f32.mrf.mxu1 }
 0x768   : > { %v4624_v50 = vpop.f32.mrf.mxu2  ;;  %v4637_v29 = vpop.f32.mrf.mxu3  ;;  %v13731_v49 = vld [vmem:[#allocation26 + $0x504] sm:$0xf] }
 0x769   : > { %5186 = vmatpush.bf16.msrb.mxu3 %v11080_v46  ;;  %v4625_v55 = vadd.f32 %v4624_v50, %v4612_v57  ;;  %v11885_v50 = vld [vmem:[#allocation26 + $0x680] sm:$0xf0]  ;;  %v11760_v46 = vor.u32 %v13731_v49, %v11757_v34  ;;  %v12656_v34 = vor.u32 %v13955_v19, %v12653_v2  ;;  %v14052_v19 = vld [vmem:[#allocation26 + $0xf0c] sm:$0xf] }
 0x76a   : > { %v11888_v28 = vor.u32 %v13763_v36, %v11885_v50  ;;  %v11501_v57 = vld [vmem:[#allocation26 + $0x380] sm:$0xf0]  ;;  %v13045_v2 = vld [vmem:[#allocation26 + $0xf88] sm:$0xf0] }
 0x76b   : > { %v4638_v61 = vadd.f32 %v4637_v29, %v4625_v55  ;;  %v11755_v29 = vld [vmem:[#allocation26 + $0x500] sm:$0xf]  ;;  %v13037_v55 = vld [vmem:[#allocation26 + $0xf80] sm:$0xf0] }
 0x76c   : > { %v11756_v48 = vor.u32 %v13747_v38, %v11755_v29  ;;  %8370 = vmatpush.bf16.msra.mxu2 %v11888_v28  ;;  %v12019_v29 = vld [vmem:[#allocation26 + $0x708] sm:$0xf]  ;;  %v13796_v28 = vld [vmem:[#allocation26 + $0x70c] sm:$0xf] }
 0x76d   : > { %5187 = vmatpush.bf16.msrb.mxu3 %v11072_v5  ;;  %v11499_v5 = vld [vmem:[#allocation26 + $0x300] sm:$0xf]  ;;  %v13812_v38 = vld [vmem:[#allocation26 + $0x784] sm:$0xf0] }
 0x76e   : > { %8345 = vmatpush.bf16.msra.mxu0 %v11756_v48  ;;  %v12021_v48 = vld [vmem:[#allocation26 + $0x788] sm:$0xf0] }
 0x76f   : > { %v12024_v45 = vor.u32 %v13796_v28, %v12021_v48  ;;  %v11379_v28 = vld [vmem:[#allocation26 + $0x208] sm:$0xf]  ;;  %v13048_v48 = vor.u32 %v14052_v19, %v13045_v2  ;;  %v12277_v19 = vld [vmem:[#allocation26 + $0x988] sm:$0xf0] }
 0x770   : > { %v4626_v44 = vpop.f32.mrf.mxu2  ;;  %v4639_v33 = vpop.f32.mrf.mxu3  ;;  %8371 = vmatpush.bf16.msra.mxu2 %v11760_v46  ;;  %v12020_v46 = vor.u32 %v13812_v38, %v12019_v29 }
 0x771   : > { %5188 = vmatpush.bf16.msrb.mxu3 %v11064_v51  ;;  %v11629_v44 = vld [vmem:[#allocation26 + $0x480] sm:$0xf0]  ;;  %v13683_v33 = vld [vmem:[#allocation26 + $0x37c] sm:$0xf0] }
 0x772   : > { %v11632_v47 = vor.u32 %v13699_v41, %v11629_v44  ;;  %v13667_v51 = vld [vmem:[#allocation26 + $0x304] sm:$0xf]  ;;  %8346 = vmatpush.bf16.msra.mxu0 %v11628_v6  ;;  %v11500_v52 = vor.u32 %v13683_v33, %v11499_v5  ;;  %v11891_v6 = vld [vmem:[#allocation26 + $0x608] sm:$0xf]  ;;  %v13764_v5 = vld [vmem:[#allocation26 + $0x60c] sm:$0xf] }
 0x773   : > { %v12525_v41 = vld [vmem:[#allocation26 + $0xb80] sm:$0xf0]  ;;  %v13780_v44 = vld [vmem:[#allocation26 + $0x684] sm:$0xf0]  ;;  %v11893_v33 = vld [vmem:[#allocation26 + $0x688] sm:$0xf0] }
 0x774   : > { %8372 = vmatpush.bf16.msra.mxu2 %v11632_v47  ;;  %v12528_v13 = vor.u32 %v13923_v40, %v12525_v41  ;;  %v11896_v54 = vor.u32 %v13764_v5, %v11893_v33  ;;  %v12917_v40 = vld [vmem:[#allocation26 + $0xe88] sm:$0xf0] }
 0x775   : > { %5189 = vmatpush.bf16.msrb.mxu3 %v11056_v35  ;;  %v14051_v35 = vld [vmem:[#allocation26 + $0xf04] sm:$0xf] }
 0x776   : > { %8347 = vmatpush.bf16.msra.mxu0 %v11500_v52  ;;  %v11892_v52 = vor.u32 %v13780_v44, %v11891_v6 }
 0x77f   : > { %v4650_v63 = vpop.f32.mrf.mxu0  ;;  %v4663_v37 = vpop.f32.mrf.mxu1 }
 0x780   : > { %v4651_v62 = vadd.f32 %v4650_v63, %v4638_v61  ;;  %v11504_v61 = vor.u32 %v13667_v51, %v11501_v57  ;;  %v13040_v63 = vor.u32 %v14051_v35, %v13037_v55  ;;  %v13907_v51 = vld [vmem:[#allocation26 + $0xa7c] sm:$0xf0]  ;;  %v13891_v57 = vld [vmem:[#allocation26 + $0xa04] sm:$0xf]  ;;  %v11763_v55 = vld [vmem:[#allocation26 + $0x508] sm:$0xf] }
 0x781   : > { %v12397_v35 = vld [vmem:[#allocation26 + $0xa80] sm:$0xf0] }
 0x782   : > { %v4664_v32 = vadd.f32 %v4663_v37, %v4651_v62  ;;  %v11371_v37 = vld [vmem:[#allocation26 + $0x200] sm:$0xf]  ;;  %8373 = vmatpush.bf16.msra.mxu2 %v11504_v61  ;;  %v13748_v61 = vld [vmem:[#allocation26 + $0x584] sm:$0xf0] }
 0x783   : > { %v13651_v62 = vld [vmem:[#allocation26 + $0x27c] sm:$0xf0] }
 0x787   : > { %v4676_v42 = vpop.f32.mrf.mxu2  ;;  %v4689_v30 = vpop.f32.mrf.mxu3 }
 0x788   : > { %v4677_v8 = vadd.f32 %v4676_v42, %v4664_v32  ;;  %v4652_v39 = vpop.f32.mrf.mxu0  ;;  %v4665_v10 = vpop.f32.mrf.mxu1  ;;  %v12907_v32 = vld [vmem:[#allocation26 + $0xe00] sm:$0xf]  ;;  %v11372_v42 = vor.u32 %v13651_v62, %v11371_v37  ;;  %v11765_v37 = vld [vmem:[#allocation26 + $0x588] sm:$0xf0] }
 0x789   : > { %v11373_v39 = vld [vmem:[#allocation26 + $0x280] sm:$0xf0] }
 0x78a   : > { %v4690_v11 = vadd.f32 %v4689_v30, %v4677_v8  ;;  %v14035_v30 = vld [vmem:[#allocation26 + $0xe7c] sm:$0xf0]  ;;  %v13635_v8 = vld [vmem:[#allocation26 + $0x204] sm:$0xf]  ;;  %8348 = vmatpush.bf16.msra.mxu0 %v11372_v42  ;;  %v12400_v42 = vor.u32 %v13891_v57, %v12397_v35  ;;  %v11253_v57 = vld [vmem:[#allocation26 + $0x188] sm:$0xf0] }
 0x78b   : > { %v12908_v10 = vor.u32 %v14035_v30, %v12907_v32  ;;  %v12396_v32 = vor.u32 %v13907_v51, %v12395_v16  ;;  %v12267_v30 = vld [vmem:[#allocation26 + $0x900] sm:$0xf]  ;;  %v12787_v16 = vld [vmem:[#allocation26 + $0xd08] sm:$0xf] }
 0x78c   : > { %v4696_v9 = vmax.f32 %v4690_v11, 0.0  ;;  %v11376_v11 = vor.u32 %v13635_v8, %v11373_v39  ;;  %v13875_v8 = vld [vmem:[#allocation26 + $0x97c] sm:$0xf0]  ;;  %v11764_v39 = vor.u32 %v13748_v61, %v11763_v55  ;;  %v13988_v61 = vld [vmem:[#allocation26 + $0xd0c] sm:$0xf] }
 0x78d   : > { %8357 = vmatpush.bf16.msra.mxu1 %v12908_v10 }
 0x78e   : > { %v4700_v15 = vpack.c.bf16 %v4696_v9, %v4696_v9  ;;  %v14019_v9 = vld [vmem:[#allocation26 + $0xe04] sm:$0xf]  ;;  %8374 = vmatpush.bf16.msra.mxu2 %v11376_v11 }
 0x78f   : > { %v4678_v43 = vpop.f32.mrf.mxu2  ;;  %v4691_v17 = vpop.f32.mrf.mxu3  ;;  %v13859_v11 = vld [vmem:[#allocation26 + $0x904] sm:$0xf] }
 0x790   : > { %5138 = vmatmul.bf16.vlgmr.msra.gmra.mxu3 %v4700_v15  ;;  %v11243_v43 = vld [vmem:[#allocation26 + $0x100] sm:$0xf] }
 0x791   : > { %8382 = vmatpush.bf16.msra.mxu3 %v13040_v63  ;;  %v13732_v63 = vld [vmem:[#allocation26 + $0x50c] sm:$0xf] }
 0x792   : > { %v11768_v10 = vor.u32 %v13732_v63, %v11765_v37  ;;  %v12789_v63 = vld [vmem:[#allocation26 + $0xd88] sm:$0xf0] }
 0x793   : > { %v12792_v37 = vor.u32 %v13988_v61, %v12789_v63  ;;  %v11643_v63 = vld [vmem:[#allocation26 + $0x410] sm:$0xf] }
 0x79f   : > { %v5100_v21 = vpop.f32.mrf.mxu0  ;;  %v5113_v22 = vpop.f32.mrf.mxu1 }
 0x7a0   : > { %v5101_v23 = vadd.f32 %v5100_v21, %v4767_v20  ;;  %5190 = vmatmul.bf16.vlgmr.msrb.gmra.mxu3 %v4700_v15  ;;  %v12909_v15 = vld [vmem:[#allocation26 + $0xe80] sm:$0xf0]  ;;  %v12779_v20 = vld [vmem:[#allocation26 + $0xd00] sm:$0xf] }
 0x7a1   : > { %v12912_v17 = vor.u32 %v14019_v9, %v12909_v15  ;;  %v14003_v21 = vld [vmem:[#allocation26 + $0xd7c] sm:$0xf0]  ;;  %v12269_v9 = vld [vmem:[#allocation26 + $0x980] sm:$0xf0]  ;;  %v11635_v15 = vld [vmem:[#allocation26 + $0x408] sm:$0xf] }
 0x7a2   : > { %v15452_v12 = vadd.f32 %v5113_v22, %v5101_v23  ;;  %v11244_v22 = vor.u32 %v13619_v18, %v11243_v43  ;;  %v12780_v23 = vor.u32 %v14003_v21, %v12779_v20  ;;  %v13716_v43 = vld [vmem:[#allocation26 + $0x484] sm:$0xf0]  ;;  %v11637_v18 = vld [vmem:[#allocation26 + $0x488] sm:$0xf0]  ;;  %v12268_v20 = vor.u32 %v13875_v8, %v12267_v30  ;;  %v12139_v21 = vld [vmem:[#allocation26 + $0x800] sm:$0xf] }
 0x7a3   : > { %8383 = vmatpush.bf16.msra.mxu3 %v12912_v17  ;;  %v13700_v17 = vld [vmem:[#allocation26 + $0x40c] sm:$0xf]  ;;  %v13972_v8 = vld [vmem:[#allocation26 + $0xc84] sm:$0xf0] }
 0x7a4   : > { %8349 = vmatpush.bf16.msra.mxu0 %v11244_v22  ;;  %8358 = vmatpush.bf16.msra.mxu1 %v12780_v23  ;;  %v12272_v22 = vor.u32 %v13859_v11, %v12269_v9  ;;  %v13843_v23 = vld [vmem:[#allocation26 + $0x87c] sm:$0xf0] }
 0x7a7   : > { %v5102_v25 = vpop.f32.mrf.mxu0  ;;  %v5115_v58 = vpop.f32.mrf.mxu1 }
 0x7a8   : > { %v13603_v25 = vld [vmem:[#allocation26 + $0x104] sm:$0xf]  ;;  %8350 = vmatpush.bf16.msra.mxu0 %v11116_v1 }
 0x7a9   : > { %v11245_v58 = vld [vmem:[#allocation26 + $0x180] sm:$0xf0] }
 0x7aa   : > { %v11248_v31 = vor.u32 %v13603_v25, %v11245_v58  ;;  %v13827_v25 = vld [vmem:[#allocation26 + $0x804] sm:$0xf] }
 0x7ab   : > { %v12141_v58 = vld [vmem:[#allocation26 + $0x880] sm:$0xf0] }
 0x7ac   : > { %8375 = vmatpush.bf16.msra.mxu2 %v11248_v31  ;;  %8395 = vmatpush.bf16.msrb.mxu0 %v12020_v46  ;;  %v11640_v31 = vor.u32 %v13700_v17, %v11637_v18  ;;  %v12144_v1 = vor.u32 %v13827_v25, %v12141_v58  ;;  %v11381_v46 = vld [vmem:[#allocation26 + $0x288] sm:$0xf0]  ;;  %v12531_v18 = vld [vmem:[#allocation26 + $0xb08] sm:$0xf] }
 0x7ad   : > { %v12403_v58 = vld [vmem:[#allocation26 + $0xa08] sm:$0xf] }
 0x7b0   : > { %8396 = vmatpush.bf16.msrb.mxu0 %v11892_v52  ;;  %v14004_v52 = vld [vmem:[#allocation26 + $0xd84] sm:$0xf0] }
 0x7b1   : > { %v12788_v35 = vor.u32 %v14004_v52, %v12787_v16  ;;  %v11901_v16 = vld [vmem:[#allocation26 + $0x690] sm:$0xf0]  ;;  %v11771_v52 = vld [vmem:[#allocation26 + $0x510] sm:$0xf] }
 0x7b4   : > { %8397 = vmatpush.bf16.msrb.mxu0 %v11764_v39  ;;  %v13572_v39 = vld [vmem:[#allocation26 + $0xc] sm:$0xf] }
 0x7bf   : > { %v5152_v24 = vpop.f32.mrf.mxu0  ;;  %v5165_v60 = vpop.f32.mrf.mxu1 }
 0x7c0   : > { %v5153_v53 = vadd.f32 %v5152_v24, %v4768_v4  ;;  %v13987_v4 = vld [vmem:[#allocation26 + $0xd04] sm:$0xf]  ;;  %v13971_v24 = vld [vmem:[#allocation26 + $0xc7c] sm:$0xf0] }
 0x7c1   : > { %v12784_v27 = vor.u32 %v13987_v4, %v12781_v3  ;;  %v12652_v50 = vor.u32 %v13971_v24, %v12651_v56  ;;  %v11636_v4 = vor.u32 %v13716_v43, %v11635_v15  ;;  %v11507_v3 = vld [vmem:[#allocation26 + $0x308] sm:$0xf]  ;;  %v13668_v56 = vld [vmem:[#allocation26 + $0x30c] sm:$0xf] }
 0x7c2   : > { %v15454_v14 = vadd.f32 %v5165_v60, %v5153_v53  ;;  %v13571_v60 = vld [vmem:[#allocation26 + $0x4] sm:$0xf]  ;;  %v11509_v24 = vld [vmem:[#allocation26 + $0x388] sm:$0xf0] }
 0x7c3   : > { %v11117_v53 = vld [vmem:[#allocation26 + $0x80] sm:$0xf0]  ;;  %8384 = vmatpush.bf16.msra.mxu3 %v12784_v27  ;;  %8359 = vmatpush.bf16.msra.mxu1 %v12652_v50  ;;  %v13684_v27 = vld [vmem:[#allocation26 + $0x384] sm:$0xf0]  ;;  %v13044_v50 = vor.u32 %v14068_v26, %v13043_v59  ;;  %v11512_v38 = vor.u32 %v13668_v56, %v11509_v24  ;;  %v13956_v15 = vld [vmem:[#allocation26 + $0xc0c] sm:$0xf] }
 0x7c4   : > { %v11120_v49 = vor.u32 %v13571_v60, %v11117_v53  ;;  %v12140_v53 = vor.u32 %v13843_v23, %v12139_v21  ;;  %8398 = vmatpush.bf16.msrb.mxu0 %v11636_v4  ;;  %v11508_v29 = vor.u32 %v13684_v27, %v11507_v3  ;;  %v12661_v43 = vld [vmem:[#allocation26 + $0xc88] sm:$0xf0]  ;;  %v13908_v4 = vld [vmem:[#allocation26 + $0xa84] sm:$0xf0] }
 0x7c5   : > { %v12664_v17 = vor.u32 %v13956_v15, %v12661_v43  ;;  %v13924_v21 = vld [vmem:[#allocation26 + $0xb0c] sm:$0xf]  ;;  %v12404_v3 = vor.u32 %v13908_v4, %v12403_v58  ;;  %v12275_v27 = vld [vmem:[#allocation26 + $0x908] sm:$0xf]  ;;  %v13051_v15 = vld [vmem:[#allocation26 + $0xf10] sm:$0xf] }
 0x7c6   : > { %8376 = vmatpush.bf16.msra.mxu2 %v11120_v49  ;;  %v12915_v49 = vld [vmem:[#allocation26 + $0xe08] sm:$0xf]  ;;  %v12533_v23 = vld [vmem:[#allocation26 + $0xb88] sm:$0xf0]  ;;  %v14069_v43 = vld [vmem:[#allocation26 + $0xf8c] sm:$0xf0] }
 0x7c7   : > { %v5154_v0 = vpop.f32.mrf.mxu0  ;;  %v5167_v7 = vpop.f32.mrf.mxu1  ;;  %8385 = vmatpush.bf16.msra.mxu3 %v12656_v34  ;;  %v14036_v34 = vld [vmem:[#allocation26 + $0xe84] sm:$0xf0]  ;;  %v12536_v25 = vor.u32 %v13924_v21, %v12533_v23  ;;  %v12405_v59 = vld [vmem:[#allocation26 + $0xa88] sm:$0xf0]  ;;  %v14053_v21 = vld [vmem:[#allocation26 + $0xf14] sm:$0xf] }
 0x7c8   : > { %v12523_v0 = vld [vmem:[#allocation26 + $0xb00] sm:$0xf]  ;;  %v12916_v41 = vor.u32 %v14036_v34, %v12915_v49  ;;  %8399 = vmatpush.bf16.msrb.mxu0 %v11508_v29  ;;  %v13876_v56 = vld [vmem:[#allocation26 + $0x984] sm:$0xf0]  ;;  %v13860_v24 = vld [vmem:[#allocation26 + $0x90c] sm:$0xf] }
 0x7c9   : > { %v13939_v7 = vld [vmem:[#allocation26 + $0xb7c] sm:$0xf0]  ;;  %v12280_v2 = vor.u32 %v13860_v24, %v12277_v19  ;;  %v13828_v29 = vld [vmem:[#allocation26 + $0x80c] sm:$0xf]  ;;  %v13653_v58 = vld [vmem:[#allocation26 + $0x28c] sm:$0xf0] }
 0x7ca   : > { %v12524_v47 = vor.u32 %v13939_v7, %v12523_v0  ;;  %8421 = vmatpush.bf16.msrb.mxu2 %v12024_v45  ;;  %v13652_v0 = vld [vmem:[#allocation26 + $0x284] sm:$0xf0]  ;;  %v13636_v7 = vld [vmem:[#allocation26 + $0x20c] sm:$0xf]  ;;  %v12925_v24 = vld [vmem:[#allocation26 + $0xe90] sm:$0xf0] }
 0x7cb   : > { %8386 = vmatpush.bf16.msra.mxu3 %v12528_v13  ;;  %v14020_v45 = vld [vmem:[#allocation26 + $0xe0c] sm:$0xf]  ;;  %v11380_v6 = vor.u32 %v13652_v0, %v11379_v28  ;;  %v11384_v44 = vor.u32 %v13636_v7, %v11381_v46  ;;  %v13620_v13 = vld [vmem:[#allocation26 + $0x184] sm:$0xf0]  ;;  %v12027_v0 = vld [vmem:[#allocation26 + $0x710] sm:$0xf] }
 0x7cc   : > { %8360 = vmatpush.bf16.msra.mxu1 %v12524_v47  ;;  %v12920_v5 = vor.u32 %v14020_v45, %v12917_v40  ;;  %v11251_v47 = vld [vmem:[#allocation26 + $0x108] sm:$0xf]  ;;  %v12149_v28 = vld [vmem:[#allocation26 + $0x888] sm:$0xf0]  ;;  %v13813_v46 = vld [vmem:[#allocation26 + $0x78c] sm:$0xf0] }
 0x7cd   : > { %8400 = vmatpush.bf16.msrb.mxu0 %v11380_v6  ;;  %v11252_v51 = vor.u32 %v13620_v13, %v11251_v47  ;;  %v12152_v49 = vor.u32 %v13828_v29, %v12149_v28  ;;  %v13797_v45 = vld [vmem:[#allocation26 + $0x714] sm:$0xf]  ;;  %v12028_v6 = vor.u32 %v13813_v46, %v12027_v0  ;;  %v13781_v47 = vld [vmem:[#allocation26 + $0x68c] sm:$0xf0] }
 0x7ce   : > { %8422 = vmatpush.bf16.msrb.mxu2 %v11896_v54  ;;  %v13604_v54 = vld [vmem:[#allocation26 + $0x10c] sm:$0xf]  ;;  %v12029_v40 = vld [vmem:[#allocation26 + $0x790] sm:$0xf0]  ;;  %v12795_v28 = vld [vmem:[#allocation26 + $0xd10] sm:$0xf] }
 0x7cf   : > { %8387 = vmatpush.bf16.msra.mxu3 %v12400_v42  ;;  %v11256_v55 = vor.u32 %v13604_v54, %v11253_v57  ;;  %v12659_v42 = vld [vmem:[#allocation26 + $0xc08] sm:$0xf]  ;;  %v13765_v13 = vld [vmem:[#allocation26 + $0x614] sm:$0xf]  ;;  %v13749_v54 = vld [vmem:[#allocation26 + $0x58c] sm:$0xf0] }
 0x7d0   : > { %8361 = vmatpush.bf16.msra.mxu1 %v12396_v32  ;;  %v13588_v32 = vld [vmem:[#allocation26 + $0x84] sm:$0xf0]  ;;  %v12660_v11 = vor.u32 %v13972_v8, %v12659_v42  ;;  %v13733_v57 = vld [vmem:[#allocation26 + $0x514] sm:$0xf] }
 0x7d1   : > { %8401 = vmatpush.bf16.msrb.mxu0 %v11252_v51  ;;  %v11904_v51 = vor.u32 %v13765_v13, %v11901_v16  ;;  %v13989_v0 = vld [vmem:[#allocation26 + $0xd14] sm:$0xf] }
 0x7d2   : > { %8423 = vmatpush.bf16.msrb.mxu2 %v11768_v10  ;;  %v11125_v10 = vld [vmem:[#allocation26 + $0x88] sm:$0xf0]  ;;  %v13573_v13 = vld [vmem:[#allocation26 + $0x14] sm:$0xf] }
 0x7d3   : > { %8388 = vmatpush.bf16.msra.mxu3 %v12272_v22  ;;  %v11128_v9 = vor.u32 %v13572_v39, %v11125_v10  ;;  %v11133_v16 = vld [vmem:[#allocation26 + $0x90] sm:$0xf0] }
 0x7d4   : > { %v15456_v36 = vpop.f32.mrf.mxu2  ;;  %8362 = vmatpush.bf16.msra.mxu1 %v12268_v20  ;;  %v13940_v20 = vld [vmem:[#allocation26 + $0xb84] sm:$0xf0] }
 0x7d5   : > { %v12532_v22 = vor.u32 %v13940_v20, %v12531_v18  ;;  %v5127_v34 = vadd.f32 %v15456_v36, %v15452_v12  ;;  %v11517_v18 = vld [vmem:[#allocation26 + $0x390] sm:$0xf0] }
 0x7d6   : > { %8424 = vmatpush.bf16.msrb.mxu2 %v11640_v31  ;;  %v13892_v31 = vld [vmem:[#allocation26 + $0xa0c] sm:$0xf] }
 0x7d7   : > { %8389 = vmatpush.bf16.msra.mxu3 %v12144_v1  ;;  %v12408_v26 = vor.u32 %v13892_v31, %v12405_v59  ;;  %v12147_v1 = vld [vmem:[#allocation26 + $0x808] sm:$0xf]  ;;  %v14037_v59 = vld [vmem:[#allocation26 + $0xe8c] sm:$0xf0] }
 0x7d8   : > { %8363 = vmatpush.bf16.msra.mxu1 %v12140_v53  ;;  %v12276_v53 = vor.u32 %v13876_v56, %v12275_v27  ;;  %v11389_v27 = vld [vmem:[#allocation26 + $0x290] sm:$0xf0] }
 0x7d9   : > { %v14021_v56 = vld [vmem:[#allocation26 + $0xe14] sm:$0xf] }
 0x7da   : > { %8425 = vmatpush.bf16.msrb.mxu2 %v11512_v38 }
 0x7db   : > { %8434 = vmatpush.bf16.msrb.mxu3 %v13048_v48 }
 0x7dc   : > { %v5128_v62 = vpop.f32.mrf.mxu2  ;;  %8408 = vmatpush.bf16.msrb.mxu1 %v13044_v50  ;;  %v13844_v50 = vld [vmem:[#allocation26 + $0x884] sm:$0xf0] }
 0x7dd   : > { %v11123_v62 = vld [vmem:[#allocation26 + $0x8] sm:$0xf]  ;;  %v12148_v38 = vor.u32 %v13844_v50, %v12147_v1  ;;  %v11259_v1 = vld [vmem:[#allocation26 + $0x110] sm:$0xf] }
 0x7de   : > { %8426 = vmatpush.bf16.msrb.mxu2 %v11384_v44  ;;  %v11124_v30 = vor.u32 %v13588_v32, %v11123_v62  ;;  %v12032_v44 = vor.u32 %v13797_v45, %v12029_v40  ;;  %v13701_v62 = vld [vmem:[#allocation26 + $0x414] sm:$0xf]  ;;  %v13621_v50 = vld [vmem:[#allocation26 + $0x18c] sm:$0xf0] }
 0x7df   : > { %8435 = vmatpush.bf16.msrb.mxu3 %v12920_v5  ;;  %v11899_v5 = vld [vmem:[#allocation26 + $0x610] sm:$0xf]  ;;  %v11645_v32 = vld [vmem:[#allocation26 + $0x490] sm:$0xf0]  ;;  %v11260_v46 = vor.u32 %v13621_v50, %v11259_v1  ;;  %v13702_v1 = vld [vmem:[#allocation26 + $0x41c] sm:$0xf] }
 0x7e0   : > { %8409 = vmatpush.bf16.msrb.mxu1 %v12916_v41  ;;  %8402 = vmatpush.bf16.msrb.mxu0 %v11124_v30  ;;  %v11900_v36 = vor.u32 %v13781_v47, %v11899_v5  ;;  %v11648_v39 = vor.u32 %v13701_v62, %v11645_v32  ;;  %v11131_v40 = vld [vmem:[#allocation26 + $0x10] sm:$0xf]  ;;  %v11653_v50 = vld [vmem:[#allocation26 + $0x498] sm:$0xf0] }
 0x7e1   : > { %v13973_v47 = vld [vmem:[#allocation26 + $0xc8c] sm:$0xf0] }
 0x7e2   : > { %8427 = vmatpush.bf16.msrb.mxu2 %v11256_v55  ;;  %v11772_v55 = vor.u32 %v13749_v54, %v11771_v52  ;;  %v13814_v52 = vld [vmem:[#allocation26 + $0x794] sm:$0xf0]  ;;  %v13798_v54 = vld [vmem:[#allocation26 + $0x71c] sm:$0xf]  ;;  %v13941_v62 = vld [vmem:[#allocation26 + $0xb8c] sm:$0xf0] }
 0x7e3   : > { %8436 = vmatpush.bf16.msrb.mxu3 %v12792_v37  ;;  %v13717_v37 = vld [vmem:[#allocation26 + $0x48c] sm:$0xf0] }
 0x7e4   : > { %v15458_v60 = vpop.f32.mrf.mxu2  ;;  %8410 = vmatpush.bf16.msrb.mxu1 %v12788_v35  ;;  %v11773_v35 = vld [vmem:[#allocation26 + $0x590] sm:$0xf0]  ;;  %v11644_v8 = vor.u32 %v13717_v37, %v11643_v63  ;;  %v12539_v37 = vld [vmem:[#allocation26 + $0xb10] sm:$0xf] }
 0x7e5   : > { %v11776_v61 = vor.u32 %v13733_v57, %v11773_v35  ;;  %v5179_v42 = vadd.f32 %v15458_v60, %v15454_v14  ;;  %v13052_v60 = vor.u32 %v14069_v43, %v13051_v15  ;;  %v12037_v57 = vld [vmem:[#allocation26 + $0x798] sm:$0xf0]  ;;  %v12540_v15 = vor.u32 %v13941_v62, %v12539_v37 }
 0x7e6   : > { %8428 = vmatpush.bf16.msrb.mxu2 %v11128_v9  ;;  %v13685_v9 = vld [vmem:[#allocation26 + $0x38c] sm:$0xf0]  ;;  %v14022_v37 = vld [vmem:[#allocation26 + $0xe1c] sm:$0xf] }
 0x7e7   : > { %8437 = vmatpush.bf16.msrb.mxu3 %v12664_v17  ;;  %v13669_v17 = vld [vmem:[#allocation26 + $0x314] sm:$0xf]  ;;  %v12933_v62 = vld [vmem:[#allocation26 + $0xe98] sm:$0xf0] }
 0x7e8   : > { %8411 = vmatpush.bf16.msrb.mxu1 %v12660_v11  ;;  %v11515_v11 = vld [vmem:[#allocation26 + $0x310] sm:$0xf]  ;;  %v11520_v4 = vor.u32 %v13669_v17, %v11517_v18 }
 0x7e9   : > { %v11516_v14 = vor.u32 %v13685_v9, %v11515_v11  ;;  %v13766_v11 = vld [vmem:[#allocation26 + $0x61c] sm:$0xf]  ;;  %v12411_v17 = vld [vmem:[#allocation26 + $0xa10] sm:$0xf] }
 0x7ea   : > { %v11909_v9 = vld [vmem:[#allocation26 + $0x698] sm:$0xf0]  ;;  %v13909_v18 = vld [vmem:[#allocation26 + $0xa8c] sm:$0xf0] }
 0x7eb   : > { %8438 = vmatpush.bf16.msrb.mxu3 %v12536_v25  ;;  %v11387_v25 = vld [vmem:[#allocation26 + $0x210] sm:$0xf] }
 0x7ec   : > { %v5180_v33 = vpop.f32.mrf.mxu2  ;;  %8412 = vmatpush.bf16.msrb.mxu1 %v12532_v22  ;;  %v13053_v22 = vld [vmem:[#allocation26 + $0xf90] sm:$0xf0]  ;;  %v11388_v19 = vor.u32 %v13653_v58, %v11387_v25  ;;  %v13750_v25 = vld [vmem:[#allocation26 + $0x594] sm:$0xf0]  ;;  %v13734_v58 = vld [vmem:[#allocation26 + $0x51c] sm:$0xf] }
 0x7ed   : > { %v13056_v31 = vor.u32 %v14053_v21, %v13053_v22  ;;  %v11912_v21 = vor.u32 %v13766_v11, %v11909_v9  ;;  %v13893_v22 = vld [vmem:[#allocation26 + $0xa14] sm:$0xf]  ;;  %v12936_v11 = vor.u32 %v14022_v37, %v12933_v62  ;;  %v13622_v9 = vld [vmem:[#allocation26 + $0x194] sm:$0xf0]  ;;  %v12293_v62 = vld [vmem:[#allocation26 + $0x998] sm:$0xf0] }
 0x7ef   : > { %8439 = vmatpush.bf16.msrb.mxu3 %v12408_v26  ;;  %v13637_v26 = vld [vmem:[#allocation26 + $0x214] sm:$0xf] }
 0x7f0   : > { %8413 = vmatpush.bf16.msrb.mxu1 %v12404_v3  ;;  %v12923_v3 = vld [vmem:[#allocation26 + $0xe10] sm:$0xf]  ;;  %v11392_v29 = vor.u32 %v13637_v26, %v11389_v27 }
 0x7f1   : > { %v13877_v26 = vld [vmem:[#allocation26 + $0x98c] sm:$0xf0] }
 0x7f3   : > { %8440 = vmatpush.bf16.msrb.mxu3 %v12280_v2  ;;  %v12924_v2 = vor.u32 %v14037_v59, %v12923_v3  ;;  %v12283_v59 = vld [vmem:[#allocation26 + $0x910] sm:$0xf] }
 0x7f4   : > { %8414 = vmatpush.bf16.msrb.mxu1 %v12276_v53 }
 0x7f7   : > { %8441 = vmatpush.bf16.msrb.mxu3 %v12152_v49  ;;  %v14005_v49 = vld [vmem:[#allocation26 + $0xd8c] sm:$0xf0] }
 0x7f8   : > { %8415 = vmatpush.bf16.msrb.mxu1 %v12148_v38  ;;  %v12928_v38 = vor.u32 %v14021_v56, %v12925_v24  ;;  %v12796_v45 = vor.u32 %v14005_v49, %v12795_v28  ;;  %v13861_v24 = vld [vmem:[#allocation26 + $0x914] sm:$0xf]  ;;  %v13845_v49 = vld [vmem:[#allocation26 + $0x88c] sm:$0xf0] }
 0x813   : > { %v5139_v48 = vpop.f32.mrf.mxu3 }
 0x814   : > { %v5140_v7 = vadd.f32 %v5139_v48, %v5127_v34  ;;  %v13605_v34 = vld [vmem:[#allocation26 + $0x114] sm:$0xf] }
 0x815   : > { %v11261_v48 = vld [vmem:[#allocation26 + $0x190] sm:$0xf0] }
 0x816   : > { %v5195_v41 = vmax.f32 %v5140_v7, 0.0  ;;  %v12797_v7 = vld [vmem:[#allocation26 + $0xd90] sm:$0xf0] }
 0x817   : > { %v12800_v5 = vor.u32 %v13989_v0, %v12797_v7  ;;  %v11656_v7 = vor.u32 %v13702_v1, %v11653_v50 }
 0x818   : > { %v15462_v33 = vpack.c.bf16 %v5195_v41, %v5195_v41  ;;  %v13589_v41 = vld [vmem:[#allocation26 + $0x8c] sm:$0xf0] }
 0x819   : > { %v11132_v35 = vor.u32 %v13589_v41, %v11131_v40  ;;  %v14070_v40 = vld [vmem:[#allocation26 + $0xf94] sm:$0xf0] }
 0x81a   : > { %8351 = vmatmul.bf16.vlgmr.msra.gmra.mxu0 %v15462_v33  ;;  %8377 = vmatmul.bf16.vlgmr.msra.gmra.mxu2 %v15462_v33  ;;  %v13686_v41 = vld [vmem:[#allocation26 + $0x394] sm:$0xf0] }
 0x81b   : > { %8447 = vmatpush.bf16.msra.mxu0 %v12028_v6  ;;  %8473 = vmatpush.bf16.msra.mxu2 %v12032_v44  ;;  %v5141_v12 = vpop.f32.mrf.mxu3  ;;  %v12667_v6 = vld [vmem:[#allocation26 + $0xc10] sm:$0xf]  ;;  %v11264_v44 = vor.u32 %v13605_v34, %v11261_v48  ;;  %v13829_v34 = vld [vmem:[#allocation26 + $0x814] sm:$0xf] }
 0x81c   : > { %v13957_v12 = vld [vmem:[#allocation26 + $0xc14] sm:$0xf] }
 0x81d   : > { %v12157_v48 = vld [vmem:[#allocation26 + $0x890] sm:$0xf0] }
 0x81f   : > { %8448 = vmatpush.bf16.msra.mxu0 %v11900_v36  ;;  %8474 = vmatpush.bf16.msra.mxu2 %v11904_v51  ;;  %v12669_v36 = vld [vmem:[#allocation26 + $0xc90] sm:$0xf0]  ;;  %v12035_v51 = vld [vmem:[#allocation26 + $0x718] sm:$0xf] }
 0x820   : > { %v12672_v63 = vor.u32 %v13957_v12, %v12669_v36  ;;  %v12036_v32 = vor.u32 %v13814_v52, %v12035_v51  ;;  %v11395_v52 = vld [vmem:[#allocation26 + $0x218] sm:$0xf] }
 0x823   : > { %8449 = vmatpush.bf16.msra.mxu0 %v11772_v55  ;;  %8475 = vmatpush.bf16.msra.mxu2 %v11776_v61  ;;  %v5191_v30 = vpop.f32.mrf.mxu3  ;;  %v12668_v55 = vor.u32 %v13973_v47, %v12667_v6  ;;  %v11136_v61 = vor.u32 %v13573_v13, %v11133_v16  ;;  %v13670_v6 = vld [vmem:[#allocation26 + $0x31c] sm:$0xf]  ;;  %v12160_v16 = vor.u32 %v13829_v34, %v12157_v48 }
 0x824   : > { %v5192_v10 = vadd.f32 %v5191_v30, %v5179_v42  ;;  %v12040_v42 = vor.u32 %v13798_v54, %v12037_v57  ;;  %v13925_v30 = vld [vmem:[#allocation26 + $0xb14] sm:$0xf]  ;;  %v14054_v47 = vld [vmem:[#allocation26 + $0xf1c] sm:$0xf]  ;;  %v12931_v54 = vld [vmem:[#allocation26 + $0xe18] sm:$0xf] }
 0x825   : > { %v13061_v13 = vld [vmem:[#allocation26 + $0xf98] sm:$0xf0]  ;;  %v14038_v57 = vld [vmem:[#allocation26 + $0xe94] sm:$0xf0] }
 0x826   : > { %v5196_v20 = vmax.f32 %v5192_v10, 0.0  ;;  %v13782_v10 = vld [vmem:[#allocation26 + $0x694] sm:$0xf0]  ;;  %v12549_v48 = vld [vmem:[#allocation26 + $0xb98] sm:$0xf0] }
 0x827   : > { %8450 = vmatpush.bf16.msra.mxu0 %v11644_v8  ;;  %8476 = vmatpush.bf16.msra.mxu2 %v11648_v39  ;;  %v12541_v8 = vld [vmem:[#allocation26 + $0xb90] sm:$0xf0]  ;;  %v11907_v39 = vld [vmem:[#allocation26 + $0x618] sm:$0xf] }
 0x828   : > { %v15468_v23 = vpack.c.bf16 %v5196_v20, %v5196_v20  ;;  %v12544_v43 = vor.u32 %v13925_v30, %v12541_v8  ;;  %v11908_v20 = vor.u32 %v13782_v10, %v11907_v39  ;;  %v11267_v8 = vld [vmem:[#allocation26 + $0x118] sm:$0xf] }
 0x829   : > { %v12803_v39 = vld [vmem:[#allocation26 + $0xd18] sm:$0xf] }
 0x82a   : > { %8364 = vmatmul.bf16.vlgmr.msra.gmra.mxu1 %v15468_v23  ;;  %8390 = vmatmul.bf16.vlgmr.msra.gmra.mxu3 %v15468_v23  ;;  %v14006_v10 = vld [vmem:[#allocation26 + $0xd94] sm:$0xf0] }
 0x82b   : > { %8403 = vmatmul.bf16.vlgmr.msrb.gmra.mxu0 %v15462_v33  ;;  %8429 = vmatmul.bf16.vlgmr.msrb.gmra.mxu2 %v15462_v33  ;;  %v5193_v53 = vpop.f32.mrf.mxu3 }
 0x82c   : > { %8451 = vmatpush.bf16.msra.mxu0 %v11516_v14  ;;  %8460 = vmatpush.bf16.msra.mxu1 %v13052_v60  ;;  %v12413_v14 = vld [vmem:[#allocation26 + $0xa90] sm:$0xf0]  ;;  %v11779_v60 = vld [vmem:[#allocation26 + $0x518] sm:$0xf] }
 0x82d   : > { %8477 = vmatpush.bf16.msra.mxu2 %v11520_v4  ;;  %8486 = vmatpush.bf16.msra.mxu3 %v13056_v31  ;;  %v11781_v4 = vld [vmem:[#allocation26 + $0x598] sm:$0xf0]  ;;  %v12412_v31 = vor.u32 %v13909_v18, %v12411_v17  ;;  %v12416_v3 = vor.u32 %v13893_v22, %v12413_v14  ;;  %v11780_v27 = vor.u32 %v13750_v25, %v11779_v60  ;;  %v12285_v53 = vld [vmem:[#allocation26 + $0x990] sm:$0xf0]  ;;  %v13590_v60 = vld [vmem:[#allocation26 + $0x94] sm:$0xf0] }
 0x82e   : > { %v11784_v56 = vor.u32 %v13734_v58, %v11781_v4  ;;  %v12288_v28 = vor.u32 %v13861_v24, %v12285_v53  ;;  %v13990_v17 = vld [vmem:[#allocation26 + $0xd1c] sm:$0xf]  ;;  %v11268_v22 = vor.u32 %v13622_v9, %v11267_v8  ;;  %v12675_v25 = vld [vmem:[#allocation26 + $0xc18] sm:$0xf]  ;;  %v13799_v53 = vld [vmem:[#allocation26 + $0x724] sm:$0xf] }
 0x82f   : > { %v12805_v18 = vld [vmem:[#allocation26 + $0xd98] sm:$0xf0]  ;;  %v13974_v58 = vld [vmem:[#allocation26 + $0xc94] sm:$0xf0]  ;;  %v11661_v8 = vld [vmem:[#allocation26 + $0x4a0] sm:$0xf0] }
 0x830   : > { %8452 = vmatpush.bf16.msra.mxu0 %v11388_v19  ;;  %8461 = vmatpush.bf16.msra.mxu1 %v12924_v2  ;;  %v11651_v19 = vld [vmem:[#allocation26 + $0x418] sm:$0xf]  ;;  %v12808_v4 = vor.u32 %v13990_v17, %v12805_v18  ;;  %v12676_v24 = vor.u32 %v13974_v58, %v12675_v25  ;;  %v12165_v17 = vld [vmem:[#allocation26 + $0x898] sm:$0xf0]  ;;  %v11533_v25 = vld [vmem:[#allocation26 + $0x3a0] sm:$0xf0] }
 0x831   : > { %8478 = vmatpush.bf16.msra.mxu2 %v11392_v29  ;;  %8487 = vmatpush.bf16.msra.mxu3 %v12928_v38  ;;  %v13718_v2 = vld [vmem:[#allocation26 + $0x494] sm:$0xf0]  ;;  %v12284_v29 = vor.u32 %v13877_v26, %v12283_v59  ;;  %v12155_v38 = vld [vmem:[#allocation26 + $0x810] sm:$0xf]  ;;  %v13958_v59 = vld [vmem:[#allocation26 + $0xc1c] sm:$0xf] }
 0x832   : > { %v11652_v0 = vor.u32 %v13718_v2, %v11651_v19  ;;  %v12677_v26 = vld [vmem:[#allocation26 + $0xc98] sm:$0xf0]  ;;  %v12045_v19 = vld [vmem:[#allocation26 + $0x7a0] sm:$0xf0] }
 0x833   : > { %v12680_v50 = vor.u32 %v13958_v59, %v12677_v26  ;;  %v12048_v34 = vor.u32 %v13799_v53, %v12045_v19  ;;  %v12939_v53 = vld [vmem:[#allocation26 + $0xe20] sm:$0xf] }
 0x834   : > { %8453 = vmatpush.bf16.msra.mxu0 %v11260_v46  ;;  %8462 = vmatpush.bf16.msra.mxu1 %v12796_v45  ;;  %v11523_v46 = vld [vmem:[#allocation26 + $0x318] sm:$0xf] }
 0x835   : > { %8479 = vmatpush.bf16.msra.mxu2 %v11264_v44  ;;  %8488 = vmatpush.bf16.msra.mxu3 %v12800_v5  ;;  %v13059_v45 = vld [vmem:[#allocation26 + $0xf18] sm:$0xf]  ;;  %v11525_v44 = vld [vmem:[#allocation26 + $0x398] sm:$0xf0]  ;;  %v12156_v5 = vor.u32 %v13845_v49, %v12155_v38  ;;  %v11524_v36 = vor.u32 %v13686_v41, %v11523_v46  ;;  %v13767_v46 = vld [vmem:[#allocation26 + $0x624] sm:$0xf] }
 0x836   : > { %v13060_v12 = vor.u32 %v14070_v40, %v13059_v45  ;;  %v11528_v51 = vor.u32 %v13670_v6, %v11525_v44  ;;  %v12547_v38 = vld [vmem:[#allocation26 + $0xb18] sm:$0xf]  ;;  %v13926_v49 = vld [vmem:[#allocation26 + $0xb1c] sm:$0xf]  ;;  %v11917_v45 = vld [vmem:[#allocation26 + $0x6a0] sm:$0xf0] }
 0x837   : > { %v12552_v41 = vor.u32 %v13926_v49, %v12549_v48  ;;  %v12419_v44 = vld [vmem:[#allocation26 + $0xa18] sm:$0xf]  ;;  %v11275_v48 = vld [vmem:[#allocation26 + $0x120] sm:$0xf] }
 0x838   : > { %8454 = vmatpush.bf16.msra.mxu0 %v11132_v35  ;;  %8463 = vmatpush.bf16.msra.mxu1 %v12668_v55  ;;  %v13064_v35 = vor.u32 %v14054_v47, %v13061_v13  ;;  %v13654_v55 = vld [vmem:[#allocation26 + $0x294] sm:$0xf0]  ;;  %v13894_v47 = vld [vmem:[#allocation26 + $0xa1c] sm:$0xf]  ;;  %v11920_v13 = vor.u32 %v13767_v46, %v11917_v45  ;;  %v14007_v45 = vld [vmem:[#allocation26 + $0xd9c] sm:$0xf0] }
 0x839   : > { %8480 = vmatpush.bf16.msra.mxu2 %v11136_v61  ;;  %8489 = vmatpush.bf16.msra.mxu3 %v12672_v63  ;;  %v13638_v61 = vld [vmem:[#allocation26 + $0x21c] sm:$0xf] }
 0x83a   : > { %8416 = vmatmul.bf16.vlgmr.msrb.gmra.mxu1 %v15468_v23  ;;  %8442 = vmatmul.bf16.vlgmr.msrb.gmra.mxu3 %v15468_v23  ;;  %v11397_v63 = vld [vmem:[#allocation26 + $0x298] sm:$0xf0] }
 0x83b   : > { %8455 = vmatmul.bf16.vlgmr.msra.gmra.mxu0 %v15462_v33  ;;  %v11400_v30 = vor.u32 %v13638_v61, %v11397_v63  ;;  %v13878_v61 = vld [vmem:[#allocation26 + $0x994] sm:$0xf0]  ;;  %v13862_v63 = vld [vmem:[#allocation26 + $0x91c] sm:$0xf] }
 0x83c   : > { %8499 = vmatpush.bf16.msrb.mxu0 %v12036_v32  ;;  %8464 = vmatpush.bf16.msra.mxu1 %v12540_v15  ;;  %v12932_v32 = vor.u32 %v14038_v57, %v12931_v54  ;;  %v13606_v15 = vld [vmem:[#allocation26 + $0x11c] sm:$0xf] }
 0x83d   : > { %8525 = vmatpush.bf16.msrb.mxu2 %v12040_v42  ;;  %8490 = vmatpush.bf16.msra.mxu3 %v12544_v43  ;;  %v11396_v42 = vor.u32 %v13654_v55, %v11395_v52  ;;  %v11269_v43 = vld [vmem:[#allocation26 + $0x198] sm:$0xf0]  ;;  %v11789_v52 = vld [vmem:[#allocation26 + $0x5a0] sm:$0xf0]  ;;  %v12291_v55 = vld [vmem:[#allocation26 + $0x918] sm:$0xf] }
 0x83e   : > { %8481 = vmatmul.bf16.vlgmr.msra.gmra.mxu2 %v15462_v33  ;;  %v11272_v14 = vor.u32 %v13606_v15, %v11269_v43  ;;  %v13846_v15 = vld [vmem:[#allocation26 + $0x894] sm:$0xf0]  ;;  %v13830_v43 = vld [vmem:[#allocation26 + $0x81c] sm:$0xf] }
 0x840   : > { %8500 = vmatpush.bf16.msrb.mxu0 %v11908_v20  ;;  %8465 = vmatpush.bf16.msra.mxu1 %v12412_v31  ;;  %v12804_v20 = vor.u32 %v14006_v10, %v12803_v39  ;;  %v13574_v31 = vld [vmem:[#allocation26 + $0x1c] sm:$0xf]  ;;  %v12292_v39 = vor.u32 %v13878_v61, %v12291_v55  ;;  %v12163_v10 = vld [vmem:[#allocation26 + $0x818] sm:$0xf]  ;;  %v12685_v55 = vld [vmem:[#allocation26 + $0xca0] sm:$0xf0] }
 0x841   : > { %8526 = vmatpush.bf16.msrb.mxu2 %v11912_v21  ;;  %8491 = vmatpush.bf16.msra.mxu3 %v12416_v3  ;;  %v11139_v21 = vld [vmem:[#allocation26 + $0x18] sm:$0xf]  ;;  %v11141_v3 = vld [vmem:[#allocation26 + $0x98] sm:$0xf0]  ;;  %v12164_v58 = vor.u32 %v13846_v15, %v12163_v10  ;;  %v12051_v61 = vld [vmem:[#allocation26 + $0x728] sm:$0xf] }
 0x842   : > { %v11140_v2 = vor.u32 %v13590_v60, %v11139_v21  ;;  %v11144_v1 = vor.u32 %v13574_v31, %v11141_v3  ;;  %v13687_v21 = vld [vmem:[#allocation26 + $0x39c] sm:$0xf0]  ;;  %v13671_v60 = vld [vmem:[#allocation26 + $0x324] sm:$0xf]  ;;  %v12168_v3 = vor.u32 %v13830_v43, %v12165_v17  ;;  %v11923_v17 = vld [vmem:[#allocation26 + $0x628] sm:$0xf] }
 0x843   : > { %v13069_v31 = vld [vmem:[#allocation26 + $0xfa0] sm:$0xf0]  ;;  %v12555_v10 = vld [vmem:[#allocation26 + $0xb20] sm:$0xf] }
 0x844   : > { %8501 = vmatpush.bf16.msrb.mxu0 %v11780_v27  ;;  %8466 = vmatpush.bf16.msra.mxu1 %v12284_v29  ;;  %v12043_v27 = vld [vmem:[#allocation26 + $0x720] sm:$0xf]  ;;  %v12557_v43 = vld [vmem:[#allocation26 + $0xba0] sm:$0xf0] }
 0x845   : > { %8527 = vmatpush.bf16.msrb.mxu2 %v11784_v56  ;;  %8492 = vmatpush.bf16.msra.mxu3 %v12288_v28  ;;  %v13815_v56 = vld [vmem:[#allocation26 + $0x79c] sm:$0xf0]  ;;  %v13942_v28 = vld [vmem:[#allocation26 + $0xb94] sm:$0xf0] }
 0x846   : > { %v12044_v29 = vor.u32 %v13815_v56, %v12043_v27  ;;  %v12548_v40 = vor.u32 %v13942_v28, %v12547_v38  ;;  %v11536_v27 = vor.u32 %v13671_v60, %v11533_v25  ;;  %v11403_v56 = vld [vmem:[#allocation26 + $0x220] sm:$0xf]  ;;  %v12941_v38 = vld [vmem:[#allocation26 + $0xea0] sm:$0xf0] }
 0x847   : > { %v12427_v25 = vld [vmem:[#allocation26 + $0xa20] sm:$0xf] }
 0x848   : > { %8502 = vmatpush.bf16.msrb.mxu0 %v11652_v0  ;;  %8467 = vmatpush.bf16.msra.mxu1 %v12156_v5  ;;  %v11915_v0 = vld [vmem:[#allocation26 + $0x620] sm:$0xf]  ;;  %v13910_v5 = vld [vmem:[#allocation26 + $0xa94] sm:$0xf0] }
 0x849   : > { %8528 = vmatpush.bf16.msrb.mxu2 %v11656_v7  ;;  %8493 = vmatpush.bf16.msra.mxu3 %v12160_v16  ;;  %v13783_v7 = vld [vmem:[#allocation26 + $0x69c] sm:$0xf0]  ;;  %v12421_v16 = vld [vmem:[#allocation26 + $0xa98] sm:$0xf0]  ;;  %v12420_v54 = vor.u32 %v13910_v5, %v12419_v44  ;;  %v12813_v44 = vld [vmem:[#allocation26 + $0xda0] sm:$0xf0] }
 0x84a   : > { %v11916_v6 = vor.u32 %v13783_v7, %v11915_v0  ;;  %v12424_v57 = vor.u32 %v13894_v47, %v12421_v16  ;;  %v13623_v0 = vld [vmem:[#allocation26 + $0x19c] sm:$0xf0] }
 0x84b   : > { %8468 = vmatmul.bf16.vlgmr.msra.gmra.mxu1 %v15468_v23  ;;  %v12811_v7 = vld [vmem:[#allocation26 + $0xd20] sm:$0xf]  ;;  %v11276_v5 = vor.u32 %v13623_v0, %v11275_v48  ;;  %v11669_v48 = vld [vmem:[#allocation26 + $0x4a8] sm:$0xf0] }
 0x84c   : > { %8512 = vmatpush.bf16.msrb.mxu1 %v13060_v12  ;;  %8503 = vmatpush.bf16.msrb.mxu0 %v11524_v36  ;;  %v11787_v12 = vld [vmem:[#allocation26 + $0x520] sm:$0xf] }
 0x84d   : > { %8529 = vmatpush.bf16.msrb.mxu2 %v11528_v51  ;;  %8538 = vmatpush.bf16.msrb.mxu3 %v13064_v35  ;;  %v13751_v36 = vld [vmem:[#allocation26 + $0x59c] sm:$0xf0]  ;;  %v13735_v51 = vld [vmem:[#allocation26 + $0x524] sm:$0xf] }
 0x84e   : > { %8494 = vmatmul.bf16.vlgmr.msra.gmra.mxu3 %v15468_v23  ;;  %v11788_v35 = vor.u32 %v13751_v36, %v11787_v12  ;;  %v11792_v37 = vor.u32 %v13735_v51, %v11789_v52  ;;  %v11147_v47 = vld [vmem:[#allocation26 + $0x20] sm:$0xf] }
 0x84f   : > { %v13591_v12 = vld [vmem:[#allocation26 + $0x9c] sm:$0xf0] }
 0x850   : > { %8513 = vmatpush.bf16.msrb.mxu1 %v12932_v32  ;;  %8504 = vmatpush.bf16.msrb.mxu0 %v11396_v42  ;;  %v11659_v32 = vld [vmem:[#allocation26 + $0x420] sm:$0xf] }
 0x851   : > { %8530 = vmatpush.bf16.msrb.mxu2 %v11400_v30  ;;  %8539 = vmatpush.bf16.msrb.mxu3 %v12936_v11  ;;  %v13719_v42 = vld [vmem:[#allocation26 + $0x49c] sm:$0xf0]  ;;  %v13703_v30 = vld [vmem:[#allocation26 + $0x424] sm:$0xf]  ;;  %v12296_v11 = vor.u32 %v13862_v63, %v12293_v62  ;;  %v13816_v63 = vld [vmem:[#allocation26 + $0x7a4] sm:$0xf0] }
 0x852   : > { %v11660_v9 = vor.u32 %v13719_v42, %v11659_v32  ;;  %v11664_v18 = vor.u32 %v13703_v30, %v11661_v8  ;;  %v12683_v36 = vld [vmem:[#allocation26 + $0xc20] sm:$0xf]  ;;  %v13800_v62 = vld [vmem:[#allocation26 + $0x72c] sm:$0xf] }
 0x853   : > { %v13975_v51 = vld [vmem:[#allocation26 + $0xc9c] sm:$0xf0]  ;;  %v12053_v32 = vld [vmem:[#allocation26 + $0x7a8] sm:$0xf0] }
 0x854   : > { %8514 = vmatpush.bf16.msrb.mxu1 %v12804_v20  ;;  %8505 = vmatpush.bf16.msrb.mxu0 %v11268_v22  ;;  %v11531_v20 = vld [vmem:[#allocation26 + $0x320] sm:$0xf]  ;;  %v12684_v42 = vor.u32 %v13975_v51, %v12683_v36  ;;  %v12056_v15 = vor.u32 %v13800_v62, %v12053_v32  ;;  %v11541_v36 = vld [vmem:[#allocation26 + $0x3a8] sm:$0xf0]  ;;  %v12947_v62 = vld [vmem:[#allocation26 + $0xe28] sm:$0xf] }
 0x855   : > { %8531 = vmatpush.bf16.msrb.mxu2 %v11272_v14  ;;  %8540 = vmatpush.bf16.msrb.mxu3 %v12808_v4  ;;  %v13067_v22 = vld [vmem:[#allocation26 + $0xf20] sm:$0xf]  ;;  %v14055_v4 = vld [vmem:[#allocation26 + $0xf24] sm:$0xf]  ;;  %v11532_v59 = vor.u32 %v13687_v21, %v11531_v20  ;;  %v13768_v20 = vld [vmem:[#allocation26 + $0x62c] sm:$0xf] }
 0x856   : > { %v14071_v14 = vld [vmem:[#allocation26 + $0xf9c] sm:$0xf0]  ;;  %v13072_v19 = vor.u32 %v14055_v4, %v13069_v31  ;;  %v11925_v21 = vld [vmem:[#allocation26 + $0x6a8] sm:$0xf0]  ;;  %v13895_v4 = vld [vmem:[#allocation26 + $0xa24] sm:$0xf] }
 0x857   : > { %v13068_v26 = vor.u32 %v14071_v14, %v13067_v22  ;;  %v11928_v31 = vor.u32 %v13768_v20, %v11925_v21  ;;  %v14008_v21 = vld [vmem:[#allocation26 + $0xda4] sm:$0xf0] }
 0x858   : > { %8515 = vmatpush.bf16.msrb.mxu1 %v12676_v24  ;;  %8506 = vmatpush.bf16.msrb.mxu0 %v11140_v2  ;;  %v13655_v24 = vld [vmem:[#allocation26 + $0x29c] sm:$0xf0] }
 0x859   : > { %8532 = vmatpush.bf16.msrb.mxu2 %v11144_v1  ;;  %8541 = vmatpush.bf16.msrb.mxu3 %v12680_v50  ;;  %v14039_v2 = vld [vmem:[#allocation26 + $0xe9c] sm:$0xf0]  ;;  %v13639_v1 = vld [vmem:[#allocation26 + $0x224] sm:$0xf]  ;;  %v11404_v28 = vor.u32 %v13655_v24, %v11403_v56  ;;  %v11797_v56 = vld [vmem:[#allocation26 + $0x5a8] sm:$0xf0] }
 0x85a   : > { %v11405_v50 = vld [vmem:[#allocation26 + $0x2a0] sm:$0xf0]  ;;  %v12940_v49 = vor.u32 %v14039_v2, %v12939_v53  ;;  %v12299_v2 = vld [vmem:[#allocation26 + $0x920] sm:$0xf] }
 0x85b   : > { %8507 = vmatmul.bf16.vlgmr.msrb.gmra.mxu0 %v15462_v33 }
 0x85c   : > { %8551 = vmatpush.bf16.msra.mxu0 %v12044_v29  ;;  %8533 = vmatmul.bf16.vlgmr.msrb.gmra.mxu2 %v15462_v33  ;;  %v14023_v29 = vld [vmem:[#allocation26 + $0xe24] sm:$0xf] }
 0x85d   : > { %8577 = vmatpush.bf16.msra.mxu2 %v12048_v34  ;;  %8516 = vmatpush.bf16.msrb.mxu1 %v12548_v40  ;;  %v11408_v34 = vor.u32 %v13639_v1, %v11405_v50  ;;  %v12944_v46 = vor.u32 %v14023_v29, %v12941_v38  ;;  %v13607_v40 = vld [vmem:[#allocation26 + $0x124] sm:$0xf]  ;;  %v13879_v1 = vld [vmem:[#allocation26 + $0x99c] sm:$0xf0] }
 0x85e   : > { %8542 = vmatpush.bf16.msrb.mxu3 %v12552_v41  ;;  %v11277_v41 = vld [vmem:[#allocation26 + $0x1a0] sm:$0xf0]  ;;  %v12300_v0 = vor.u32 %v13879_v1, %v12299_v2  ;;  %v12693_v2 = vld [vmem:[#allocation26 + $0xca8] sm:$0xf0]  ;;  %v12059_v1 = vld [vmem:[#allocation26 + $0x730] sm:$0xf] }
 0x85f   : > { %v11280_v16 = vor.u32 %v13607_v40, %v11277_v41  ;;  %v13863_v50 = vld [vmem:[#allocation26 + $0x924] sm:$0xf]  ;;  %v13847_v40 = vld [vmem:[#allocation26 + $0x89c] sm:$0xf0] }
 0x860   : > { %8552 = vmatpush.bf16.msra.mxu0 %v11916_v6  ;;  %v13991_v6 = vld [vmem:[#allocation26 + $0xd24] sm:$0xf] }
 0x861   : > { %8578 = vmatpush.bf16.msra.mxu2 %v11920_v13  ;;  %8517 = vmatpush.bf16.msrb.mxu1 %v12420_v54  ;;  %v12812_v13 = vor.u32 %v14007_v45, %v12811_v7  ;;  %v12816_v52 = vor.u32 %v13991_v6, %v12813_v44  ;;  %v13575_v54 = vld [vmem:[#allocation26 + $0x24] sm:$0xf]  ;;  %v12171_v7 = vld [vmem:[#allocation26 + $0x820] sm:$0xf] }
 0x862   : > { %8543 = vmatpush.bf16.msrb.mxu3 %v12424_v57  ;;  %v11149_v57 = vld [vmem:[#allocation26 + $0xa0] sm:$0xf0]  ;;  %v12172_v51 = vor.u32 %v13847_v40, %v12171_v7  ;;  %v12563_v7 = vld [vmem:[#allocation26 + $0xb28] sm:$0xf] }
 0x863   : > { %v11152_v30 = vor.u32 %v13575_v54, %v11149_v57  ;;  %v12301_v38 = vld [vmem:[#allocation26 + $0x9a0] sm:$0xf0]  ;;  %v13077_v54 = vld [vmem:[#allocation26 + $0xfa8] sm:$0xf0] }
 0x864   : > { %8553 = vmatpush.bf16.msra.mxu0 %v11788_v35  ;;  %v13959_v35 = vld [vmem:[#allocation26 + $0xc24] sm:$0xf] }
 0x865   : > { %8579 = vmatpush.bf16.msra.mxu2 %v11792_v37  ;;  %8518 = vmatpush.bf16.msrb.mxu1 %v12292_v39  ;;  %v11148_v37 = vor.u32 %v13591_v12, %v11147_v47  ;;  %v12688_v8 = vor.u32 %v13959_v35, %v12685_v55  ;;  %v12052_v39 = vor.u32 %v13816_v63, %v12051_v61  ;;  %v13831_v41 = vld [vmem:[#allocation26 + $0x824] sm:$0xf]  ;;  %v13688_v47 = vld [vmem:[#allocation26 + $0x3a4] sm:$0xf0]  ;;  %v13672_v12 = vld [vmem:[#allocation26 + $0x32c] sm:$0xf] }
 0x866   : > { %8544 = vmatpush.bf16.msrb.mxu3 %v12296_v11  ;;  %v13943_v11 = vld [vmem:[#allocation26 + $0xb9c] sm:$0xf0]  ;;  %v12173_v6 = vld [vmem:[#allocation26 + $0x8a0] sm:$0xf0]  ;;  %v11544_v61 = vor.u32 %v13672_v12, %v11541_v36  ;;  %v11411_v63 = vld [vmem:[#allocation26 + $0x228] sm:$0xf] }
 0x867   : > { %v12556_v22 = vor.u32 %v13943_v11, %v12555_v10  ;;  %v12176_v57 = vor.u32 %v13831_v41, %v12173_v6  ;;  %v12949_v10 = vld [vmem:[#allocation26 + $0xea8] sm:$0xf0]  ;;  %v11931_v6 = vld [vmem:[#allocation26 + $0x630] sm:$0xf]  ;;  %v12435_v36 = vld [vmem:[#allocation26 + $0xa28] sm:$0xf] }
 0x868   : > { %8554 = vmatpush.bf16.msra.mxu0 %v11660_v9  ;;  %v13927_v9 = vld [vmem:[#allocation26 + $0xb24] sm:$0xf]  ;;  %v12565_v41 = vld [vmem:[#allocation26 + $0xba8] sm:$0xf0] }
 0x869   : > { %8580 = vmatpush.bf16.msra.mxu2 %v11664_v18  ;;  %8519 = vmatpush.bf16.msrb.mxu1 %v12164_v58  ;;  %v13784_v18 = vld [vmem:[#allocation26 + $0x6a4] sm:$0xf0]  ;;  %v12560_v14 = vor.u32 %v13927_v9, %v12557_v43  ;;  %v13911_v58 = vld [vmem:[#allocation26 + $0xa9c] sm:$0xf0] }
 0x86a   : > { %8545 = vmatpush.bf16.msrb.mxu3 %v12168_v3  ;;  %v11924_v60 = vor.u32 %v13784_v18, %v11923_v17  ;;  %v12429_v3 = vld [vmem:[#allocation26 + $0xaa0] sm:$0xf0]  ;;  %v12428_v24 = vor.u32 %v13911_v58, %v12427_v25  ;;  %v11283_v43 = vld [vmem:[#allocation26 + $0x128] sm:$0xf]  ;;  %v12821_v25 = vld [vmem:[#allocation26 + $0xda8] sm:$0xf0] }
 0x86b   : > { %v12432_v53 = vor.u32 %v13895_v4, %v12429_v3  ;;  %v13624_v17 = vld [vmem:[#allocation26 + $0x1a4] sm:$0xf0] }
 0x86c   : > { %8555 = vmatpush.bf16.msra.mxu0 %v11532_v59  ;;  %8520 = vmatmul.bf16.vlgmr.msrb.gmra.mxu1 %v15468_v23  ;;  %v11795_v59 = vld [vmem:[#allocation26 + $0x528] sm:$0xf]  ;;  %v11284_v58 = vor.u32 %v13624_v17, %v11283_v43  ;;  %v13705_v43 = vld [vmem:[#allocation26 + $0x434] sm:$0xf] }
 0x86d   : > { %8564 = vmatpush.bf16.msra.mxu1 %v13068_v26  ;;  %8581 = vmatpush.bf16.msra.mxu2 %v11536_v27  ;;  %v13752_v26 = vld [vmem:[#allocation26 + $0x5a4] sm:$0xf0]  ;;  %v13736_v27 = vld [vmem:[#allocation26 + $0x52c] sm:$0xf]  ;;  %v11677_v17 = vld [vmem:[#allocation26 + $0x4b0] sm:$0xf0] }
 0x86e   : > { %8590 = vmatpush.bf16.msra.mxu3 %v13072_v19  ;;  %v11796_v19 = vor.u32 %v13752_v26, %v11795_v59  ;;  %v11800_v29 = vor.u32 %v13736_v27, %v11797_v56  ;;  %v12819_v18 = vld [vmem:[#allocation26 + $0xd28] sm:$0xf] }
 0x86f   : > { %8546 = vmatmul.bf16.vlgmr.msrb.gmra.mxu3 %v15468_v23  ;;  %v11155_v4 = vld [vmem:[#allocation26 + $0x28] sm:$0xf] }
 0x870   : > { %8556 = vmatpush.bf16.msra.mxu0 %v11404_v28  ;;  %v11667_v28 = vld [vmem:[#allocation26 + $0x428] sm:$0xf] }
 0x871   : > { %8565 = vmatpush.bf16.msra.mxu1 %v12940_v49  ;;  %8582 = vmatpush.bf16.msra.mxu2 %v11408_v34  ;;  %v13720_v49 = vld [vmem:[#allocation26 + $0x4a4] sm:$0xf0]  ;;  %v13704_v34 = vld [vmem:[#allocation26 + $0x42c] sm:$0xf] }
 0x872   : > { %8591 = vmatpush.bf16.msra.mxu3 %v12944_v46  ;;  %v12304_v46 = vor.u32 %v13863_v50, %v12301_v38  ;;  %v11668_v45 = vor.u32 %v13720_v49, %v11667_v28  ;;  %v11672_v44 = vor.u32 %v13704_v34, %v11669_v48  ;;  %v13592_v59 = vld [vmem:[#allocation26 + $0xa4] sm:$0xf0]  ;;  %v13817_v50 = vld [vmem:[#allocation26 + $0x7ac] sm:$0xf0]  ;;  %v13801_v38 = vld [vmem:[#allocation26 + $0x734] sm:$0xf] }
 0x873   : > { %v12691_v26 = vld [vmem:[#allocation26 + $0xc28] sm:$0xf]  ;;  %v12061_v28 = vld [vmem:[#allocation26 + $0x7b0] sm:$0xf0] }
 0x874   : > { %8557 = vmatpush.bf16.msra.mxu0 %v11276_v5  ;;  %v11539_v5 = vld [vmem:[#allocation26 + $0x328] sm:$0xf]  ;;  %v12064_v40 = vor.u32 %v13801_v38, %v12061_v28  ;;  %v11419_v28 = vld [vmem:[#allocation26 + $0x230] sm:$0xf] }
 0x875   : > { %8566 = vmatpush.bf16.msra.mxu1 %v12812_v13  ;;  %8583 = vmatpush.bf16.msra.mxu2 %v11280_v16  ;;  %v13075_v13 = vld [vmem:[#allocation26 + $0xf28] sm:$0xf]  ;;  %v11540_v35 = vor.u32 %v13688_v47, %v11539_v5  ;;  %v13769_v5 = vld [vmem:[#allocation26 + $0x634] sm:$0xf] }
 0x876   : > { %8592 = vmatpush.bf16.msra.mxu3 %v12816_v52  ;;  %v14072_v16 = vld [vmem:[#allocation26 + $0xfa4] sm:$0xf0]  ;;  %v14056_v52 = vld [vmem:[#allocation26 + $0xf2c] sm:$0xf]  ;;  %v11933_v47 = vld [vmem:[#allocation26 + $0x6b0] sm:$0xf0] }
 0x877   : > { %v13076_v55 = vor.u32 %v14072_v16, %v13075_v13  ;;  %v13080_v32 = vor.u32 %v14056_v52, %v13077_v54  ;;  %v13976_v27 = vld [vmem:[#allocation26 + $0xca4] sm:$0xf0]  ;;  %v13896_v52 = vld [vmem:[#allocation26 + $0xa2c] sm:$0xf]  ;;  %v11936_v54 = vor.u32 %v13769_v5, %v11933_v47  ;;  %v11291_v5 = vld [vmem:[#allocation26 + $0x130] sm:$0xf] }
 0x878   : > { %8558 = vmatpush.bf16.msra.mxu0 %v11148_v37  ;;  %v13656_v37 = vld [vmem:[#allocation26 + $0x2a4] sm:$0xf0]  ;;  %v12692_v49 = vor.u32 %v13976_v27, %v12691_v26  ;;  %v14073_v26 = vld [vmem:[#allocation26 + $0xfac] sm:$0xf0]  ;;  %v13673_v27 = vld [vmem:[#allocation26 + $0x334] sm:$0xf] }
 0x879   : > { %8567 = vmatpush.bf16.msra.mxu1 %v12684_v42  ;;  %8584 = vmatpush.bf16.msra.mxu2 %v11152_v30  ;;  %v14040_v42 = vld [vmem:[#allocation26 + $0xea4] sm:$0xf0]  ;;  %v13640_v30 = vld [vmem:[#allocation26 + $0x22c] sm:$0xf]  ;;  %v11412_v11 = vor.u32 %v13656_v37, %v11411_v63  ;;  %v11805_v63 = vld [vmem:[#allocation26 + $0x5b0] sm:$0xf0] }
 0x87a   : > { %8593 = vmatpush.bf16.msra.mxu3 %v12688_v8  ;;  %v11413_v8 = vld [vmem:[#allocation26 + $0x2a8] sm:$0xf0]  ;;  %v12948_v9 = vor.u32 %v14040_v42, %v12947_v62  ;;  %v13625_v47 = vld [vmem:[#allocation26 + $0x1ac] sm:$0xf0] }
 0x87b   : > { %8559 = vmatmul.bf16.vlgmr.msra.gmra.mxu0 %v15462_v33 }
 0x87c   : > { %8603 = vmatpush.bf16.msrb.mxu0 %v12052_v39  ;;  %8585 = vmatmul.bf16.vlgmr.msra.gmra.mxu2 %v15462_v33  ;;  %v14024_v39 = vld [vmem:[#allocation26 + $0xe2c] sm:$0xf] }
 0x87d   : > { %8629 = vmatpush.bf16.msrb.mxu2 %v12056_v15  ;;  %8568 = vmatpush.bf16.msra.mxu1 %v12556_v22  ;;  %v11416_v15 = vor.u32 %v13640_v30, %v11413_v8  ;;  %v12952_v20 = vor.u32 %v14024_v39, %v12949_v10  ;;  %v13608_v22 = vld [vmem:[#allocation26 + $0x12c] sm:$0xf]  ;;  %v12307_v30 = vld [vmem:[#allocation26 + $0x928] sm:$0xf] }
 0x87e   : > { %8594 = vmatpush.bf16.msra.mxu3 %v12560_v14  ;;  %v11285_v14 = vld [vmem:[#allocation26 + $0x1a8] sm:$0xf0]  ;;  %v13880_v8 = vld [vmem:[#allocation26 + $0x9a4] sm:$0xf0] }
 0x87f   : > { %v11288_v3 = vor.u32 %v13608_v22, %v11285_v14  ;;  %v13864_v39 = vld [vmem:[#allocation26 + $0x92c] sm:$0xf]  ;;  %v13848_v14 = vld [vmem:[#allocation26 + $0x8a4] sm:$0xf0] }
 0x880   : > { %8604 = vmatpush.bf16.msrb.mxu0 %v11924_v60  ;;  %v13992_v60 = vld [vmem:[#allocation26 + $0xd2c] sm:$0xf] }
 0x881   : > { %8630 = vmatpush.bf16.msrb.mxu2 %v11928_v31  ;;  %8569 = vmatpush.bf16.msra.mxu1 %v12428_v24  ;;  %v12820_v31 = vor.u32 %v14008_v21, %v12819_v18  ;;  %v12824_v56 = vor.u32 %v13992_v60, %v12821_v25  ;;  %v13576_v24 = vld [vmem:[#allocation26 + $0x2c] sm:$0xf]  ;;  %v12308_v18 = vor.u32 %v13880_v8, %v12307_v30  ;;  %v12699_v30 = vld [vmem:[#allocation26 + $0xc30] sm:$0xf] }
 0x882   : > { %8595 = vmatpush.bf16.msra.mxu3 %v12432_v53  ;;  %v11157_v53 = vld [vmem:[#allocation26 + $0xa8] sm:$0xf0]  ;;  %v13977_v8 = vld [vmem:[#allocation26 + $0xcac] sm:$0xf0] }
 0x883   : > { %v11160_v34 = vor.u32 %v13576_v24, %v11157_v53  ;;  %v13832_v60 = vld [vmem:[#allocation26 + $0x82c] sm:$0xf]  ;;  %v14057_v53 = vld [vmem:[#allocation26 + $0xf34] sm:$0xf] }
 0x884   : > { %8605 = vmatpush.bf16.msrb.mxu0 %v11796_v19  ;;  %v13960_v19 = vld [vmem:[#allocation26 + $0xc2c] sm:$0xf] }
 0x885   : > { %8631 = vmatpush.bf16.msrb.mxu2 %v11800_v29  ;;  %8570 = vmatpush.bf16.msra.mxu1 %v12300_v0  ;;  %v11156_v29 = vor.u32 %v13592_v59, %v11155_v4  ;;  %v12696_v48 = vor.u32 %v13960_v19, %v12693_v2  ;;  %v12060_v0 = vor.u32 %v13817_v50, %v12059_v1  ;;  %v12181_v25 = vld [vmem:[#allocation26 + $0x8a8] sm:$0xf0]  ;;  %v11547_v4 = vld [vmem:[#allocation26 + $0x330] sm:$0xf]  ;;  %v13085_v19 = vld [vmem:[#allocation26 + $0xfb0] sm:$0xf0] }
 0x886   : > { %8596 = vmatpush.bf16.msra.mxu3 %v12304_v46  ;;  %v13944_v46 = vld [vmem:[#allocation26 + $0xba4] sm:$0xf0]  ;;  %v12184_v2 = vor.u32 %v13832_v60, %v12181_v25 }
 0x887   : > { %v12564_v13 = vor.u32 %v13944_v46, %v12563_v7  ;;  %v13641_v7 = vld [vmem:[#allocation26 + $0x234] sm:$0xf] }
 0x888   : > { %8606 = vmatpush.bf16.msrb.mxu0 %v11668_v45  ;;  %v13928_v45 = vld [vmem:[#allocation26 + $0xb2c] sm:$0xf]  ;;  %v11421_v46 = vld [vmem:[#allocation26 + $0x2b0] sm:$0xf0] }
 0x889   : > { %8632 = vmatpush.bf16.msrb.mxu2 %v11672_v44  ;;  %8571 = vmatpush.bf16.msra.mxu1 %v12172_v51  ;;  %v13785_v44 = vld [vmem:[#allocation26 + $0x6ac] sm:$0xf0]  ;;  %v12568_v16 = vor.u32 %v13928_v45, %v12565_v41  ;;  %v13912_v51 = vld [vmem:[#allocation26 + $0xaa4] sm:$0xf0]  ;;  %v14025_v45 = vld [vmem:[#allocation26 + $0xe34] sm:$0xf] }
 0x88a   : > { %8597 = vmatpush.bf16.msra.mxu3 %v12176_v57  ;;  %v11932_v12 = vor.u32 %v13785_v44, %v11931_v6  ;;  %v12437_v57 = vld [vmem:[#allocation26 + $0xaa8] sm:$0xf0]  ;;  %v12436_v37 = vor.u32 %v13912_v51, %v12435_v36  ;;  %v11424_v44 = vor.u32 %v13641_v7, %v11421_v46  ;;  %v14009_v36 = vld [vmem:[#allocation26 + $0xdac] sm:$0xf0]  ;;  %v13609_v51 = vld [vmem:[#allocation26 + $0x134] sm:$0xf] }
 0x88b   : > { %v12440_v62 = vor.u32 %v13896_v52, %v12437_v57  ;;  %v11293_v52 = vld [vmem:[#allocation26 + $0x1b0] sm:$0xf0]  ;;  %v11811_v46 = vld [vmem:[#allocation26 + $0x538] sm:$0xf] }
 0x88c   : > { %8607 = vmatpush.bf16.msrb.mxu0 %v11540_v35  ;;  %8572 = vmatmul.bf16.vlgmr.msra.gmra.mxu1 %v15468_v23  ;;  %v11803_v35 = vld [vmem:[#allocation26 + $0x530] sm:$0xf]  ;;  %v12829_v57 = vld [vmem:[#allocation26 + $0xdb0] sm:$0xf0] }
 0x88d   : > { %8616 = vmatpush.bf16.msrb.mxu1 %v13076_v55  ;;  %8633 = vmatpush.bf16.msrb.mxu2 %v11544_v61  ;;  %v13753_v55 = vld [vmem:[#allocation26 + $0x5ac] sm:$0xf0]  ;;  %v13737_v61 = vld [vmem:[#allocation26 + $0x534] sm:$0xf] }
 0x88e   : > { %8642 = vmatpush.bf16.msrb.mxu3 %v13080_v32  ;;  %v11804_v32 = vor.u32 %v13753_v55, %v11803_v35  ;;  %v11808_v10 = vor.u32 %v13737_v61, %v11805_v63  ;;  %v11292_v35 = vor.u32 %v13625_v47, %v11291_v5  ;;  %v11163_v61 = vld [vmem:[#allocation26 + $0x30] sm:$0xf]  ;;  %v12445_v7 = vld [vmem:[#allocation26 + $0xab0] sm:$0xf0] }
 0x88f   : > { %8598 = vmatmul.bf16.vlgmr.msra.gmra.mxu3 %v15468_v23 }
 0x890   : > { %8608 = vmatpush.bf16.msrb.mxu0 %v11412_v11  ;;  %v12309_v11 = vld [vmem:[#allocation26 + $0x9a8] sm:$0xf0] }
 0x891   : > { %8617 = vmatpush.bf16.msrb.mxu1 %v12948_v9  ;;  %8634 = vmatpush.bf16.msrb.mxu2 %v11416_v15  ;;  %v11675_v9 = vld [vmem:[#allocation26 + $0x430] sm:$0xf]  ;;  %v12312_v21 = vor.u32 %v13864_v39, %v12309_v11  ;;  %v11165_v11 = vld [vmem:[#allocation26 + $0xb0] sm:$0xf0] }
 0x892   : > { %8643 = vmatpush.bf16.msrb.mxu3 %v12952_v20  ;;  %v13721_v15 = vld [vmem:[#allocation26 + $0x4ac] sm:$0xf0]  ;;  %v12179_v20 = vld [vmem:[#allocation26 + $0x828] sm:$0xf] }
 0x893   : > { %v11676_v22 = vor.u32 %v13721_v15, %v11675_v9  ;;  %v12180_v24 = vor.u32 %v13848_v14, %v12179_v20  ;;  %v13961_v9 = vld [vmem:[#allocation26 + $0xc34] sm:$0xf]  ;;  %v13802_v20 = vld [vmem:[#allocation26 + $0x73c] sm:$0xf] }
 0x894   : > { %8609 = vmatpush.bf16.msrb.mxu0 %v11284_v58  ;;  %v11680_v58 = vor.u32 %v13705_v43, %v11677_v17  ;;  %v12701_v15 = vld [vmem:[#allocation26 + $0xcb0] sm:$0xf0]  ;;  %v12067_v43 = vld [vmem:[#allocation26 + $0x738] sm:$0xf] }
 0x895   : > { %8618 = vmatpush.bf16.msrb.mxu1 %v12820_v31  ;;  %8635 = vmatpush.bf16.msrb.mxu2 %v11288_v3  ;;  %v13689_v31 = vld [vmem:[#allocation26 + $0x3ac] sm:$0xf0]  ;;  %v13818_v17 = vld [vmem:[#allocation26 + $0x7b4] sm:$0xf0]  ;;  %v12704_v60 = vor.u32 %v13961_v9, %v12701_v15 }
 0x896   : > { %8644 = vmatpush.bf16.msrb.mxu3 %v12824_v56  ;;  %v13083_v3 = vld [vmem:[#allocation26 + $0xf30] sm:$0xf]  ;;  %v11549_v56 = vld [vmem:[#allocation26 + $0x3b0] sm:$0xf0]  ;;  %v11548_v1 = vor.u32 %v13689_v31, %v11547_v4  ;;  %v12068_v25 = vor.u32 %v13818_v17, %v12067_v43 }
 0x897   : > { %v15490_v42 = vpop.f32.mrf.mxu0  ;;  %v11552_v38 = vor.u32 %v13673_v27, %v11549_v56  ;;  %v12571_v4 = vld [vmem:[#allocation26 + $0xb30] sm:$0xf]  ;;  %v12573_v56 = vld [vmem:[#allocation26 + $0xbb0] sm:$0xf0] }
 0x898   : > { %8610 = vmatpush.bf16.msrb.mxu0 %v11156_v29  ;;  %v13084_v29 = vor.u32 %v14073_v26, %v13083_v3  ;;  %v13945_v31 = vld [vmem:[#allocation26 + $0xbac] sm:$0xf0]  ;;  %v13929_v3 = vld [vmem:[#allocation26 + $0xb34] sm:$0xf] }
 0x899   : > { %8619 = vmatpush.bf16.msrb.mxu1 %v12692_v49  ;;  %8636 = vmatpush.bf16.msrb.mxu2 %v11160_v34  ;;  %v13657_v49 = vld [vmem:[#allocation26 + $0x2ac] sm:$0xf0] }
 0x89a   : > { %8645 = vmatpush.bf16.msrb.mxu3 %v12696_v48  ;;  %v12955_v34 = vld [vmem:[#allocation26 + $0xe30] sm:$0xf]  ;;  %v13088_v48 = vor.u32 %v14057_v53, %v13085_v19  ;;  %v11420_v41 = vor.u32 %v13657_v49, %v11419_v28  ;;  %v13786_v53 = vld [vmem:[#allocation26 + $0x6b4] sm:$0xf0] }
 0x89b   : > { %8611 = vmatmul.bf16.vlgmr.msrb.gmra.mxu0 %v15462_v33  ;;  %v12443_v49 = vld [vmem:[#allocation26 + $0xa30] sm:$0xf] }
 0x89c   : > { %8655 = vmatpush.bf16.msra.mxu0 %v12060_v0  ;;  %8637 = vmatmul.bf16.vlgmr.msrb.gmra.mxu2 %v15462_v33  ;;  %v14041_v0 = vld [vmem:[#allocation26 + $0xeac] sm:$0xf0] }
 0x89d   : > { %8681 = vmatpush.bf16.msra.mxu2 %v12064_v40  ;;  %8620 = vmatpush.bf16.msrb.mxu1 %v12564_v13  ;;  %v15492_v59 = vpop.f32.mrf.mxu2  ;;  %v12957_v40 = vld [vmem:[#allocation26 + $0xeb0] sm:$0xf0]  ;;  %v12956_v6 = vor.u32 %v14041_v0, %v12955_v34  ;;  %v12827_v13 = vld [vmem:[#allocation26 + $0xd30] sm:$0xf] }
 0x89e   : > { %8646 = vmatpush.bf16.msrb.mxu3 %v12568_v16  ;;  %v12960_v16 = vor.u32 %v14025_v45, %v12957_v40  ;;  %v12828_v63 = vor.u32 %v14009_v36, %v12827_v13  ;;  %v13913_v34 = vld [vmem:[#allocation26 + $0xaac] sm:$0xf0]  ;;  %v13754_v45 = vld [vmem:[#allocation26 + $0x5b4] sm:$0xf0] }
 0x89f   : > { %v8354_v50 = vpop.f32.mrf.mxu0  ;;  %v15508_v40 = vld [vmem:[%s15811_s3] sm:$0xff]  ;;  %v12444_v5 = vor.u32 %v13913_v34, %v12443_v49  ;;  %v11812_v13 = vor.u32 %v13754_v45, %v11811_v46  ;;  %v13642_v45 = vld [vmem:[#allocation26 + $0x23c] sm:$0xf] }
 0x8a0   : > { %8656 = vmatpush.bf16.msra.mxu0 %v11932_v12  ;;  %v12572_v50 = vor.u32 %v13945_v31, %v12571_v4  ;;  %v13881_v36 = vld [vmem:[#allocation26 + $0x9ac] sm:$0xf0]  ;;  %v12963_v49 = vld [vmem:[#allocation26 + $0xe38] sm:$0xf] }
 0x8a1   : > { %8682 = vmatpush.bf16.msra.mxu2 %v11936_v54  ;;  %8621 = vmatpush.bf16.msrb.mxu1 %v12436_v37  ;;  %v13993_v54 = vld [vmem:[#allocation26 + $0xd34] sm:$0xf]  ;;  %v11296_v37 = vor.u32 %v13609_v51, %v11293_v52  ;;  %v14042_v34 = vld [vmem:[#allocation26 + $0xeb4] sm:$0xf0] }
 0x8a2   : > { %8647 = vmatpush.bf16.msrb.mxu3 %v12440_v62  ;;  %v12832_v39 = vor.u32 %v13993_v54, %v12829_v57  ;;  %v13865_v51 = vld [vmem:[#allocation26 + $0x934] sm:$0xf] }
 0x8a3   : > { %v12317_v57 = vld [vmem:[#allocation26 + $0x9b0] sm:$0xf0] }
 0x8a4   : > { %8657 = vmatpush.bf16.msra.mxu0 %v11804_v32  ;;  %v13593_v32 = vld [vmem:[#allocation26 + $0xac] sm:$0xf0]  ;;  %v12320_v15 = vor.u32 %v13865_v51, %v12317_v57  ;;  %v12835_v57 = vld [vmem:[#allocation26 + $0xd38] sm:$0xf] }
 0x8a5   : > { %8683 = vmatpush.bf16.msra.mxu2 %v11808_v10  ;;  %8622 = vmatpush.bf16.msrb.mxu1 %v12308_v18  ;;  %v8380_v12 = vpop.f32.mrf.mxu2  ;;  %v13577_v10 = vld [vmem:[#allocation26 + $0x34] sm:$0xf]  ;;  %v11164_v18 = vor.u32 %v13593_v32, %v11163_v61  ;;  %v13722_v61 = vld [vmem:[#allocation26 + $0x4b4] sm:$0xf0]  ;;  %v11685_v32 = vld [vmem:[#allocation26 + $0x4b8] sm:$0xf0] }
 0x8a6   : > { %8648 = vmatpush.bf16.msrb.mxu3 %v12312_v21  ;;  %v12069_v21 = vld [vmem:[#allocation26 + $0x7b8] sm:$0xf0]  ;;  %v11168_v14 = vor.u32 %v13577_v10, %v11165_v11  ;;  %v12315_v12 = vld [vmem:[#allocation26 + $0x930] sm:$0xf] }
 0x8a7   : > { %v15496_v55 = vpop.f32.mrf.mxu1  ;;  %v12072_v26 = vor.u32 %v13802_v20, %v12069_v21  ;;  %v12187_v11 = vld [vmem:[#allocation26 + $0x830] sm:$0xf]  ;;  %v13833_v20 = vld [vmem:[#allocation26 + $0x834] sm:$0xf] }
 0x8a8   : > { %8658 = vmatpush.bf16.msra.mxu0 %v11676_v22  ;;  %v15498_v62 = vpop.f32.mrf.mxu0  ;;  %v12700_v22 = vor.u32 %v13977_v8, %v12699_v30  ;;  %v5719_v30 = vperm.slane %v15508_v40, 0  ;;  %v5722_v8 = vperm.slane %v15508_v40, 3  ;;  %v12189_v21 = vld [vmem:[#allocation26 + $0x8b0] sm:$0xf0] }
 0x8a9   : > { %8684 = vmatpush.bf16.msra.mxu2 %v11680_v58  ;;  %8623 = vmatpush.bf16.msrb.mxu1 %v12180_v24  ;;  %v11939_v24 = vld [vmem:[#allocation26 + $0x638] sm:$0xf] }
 0x8aa   : > { %8649 = vmatpush.bf16.msrb.mxu3 %v12184_v2  ;;  %v13770_v2 = vld [vmem:[#allocation26 + $0x63c] sm:$0xf]  ;;  %v11940_v28 = vor.u32 %v13786_v53, %v11939_v24  ;;  %v12192_v24 = vor.u32 %v13833_v20, %v12189_v21  ;;  %v12707_v20 = vld [vmem:[#allocation26 + $0xc38] sm:$0xf] }
 0x8ab   : > { %v14058_v53 = vld [vmem:[#allocation26 + $0xf3c] sm:$0xf]  ;;  %v13978_v21 = vld [vmem:[#allocation26 + $0xcb4] sm:$0xf0] }
 0x8ac   : > { %8659 = vmatpush.bf16.msra.mxu0 %v11548_v1  ;;  %8624 = vmatmul.bf16.vlgmr.msrb.gmra.mxu1 %v15468_v23  ;;  %v11941_v1 = vld [vmem:[#allocation26 + $0x6b8] sm:$0xf0] }
 0x8ad   : > { %8668 = vmatpush.bf16.msra.mxu1 %v13084_v29  ;;  %8685 = vmatpush.bf16.msra.mxu2 %v11552_v38  ;;  %v15500_v58 = vpop.f32.mrf.mxu3  ;;  %v12576_v38 = vor.u32 %v13929_v3, %v12573_v56  ;;  %v11944_v0 = vor.u32 %v13770_v2, %v11941_v1  ;;  %v14074_v3 = vld [vmem:[#allocation26 + $0xfb4] sm:$0xf0] }
 0x8ae   : > { %8694 = vmatpush.bf16.msra.mxu3 %v13088_v48  ;;  %v15502_v27 = vpop.f32.mrf.mxu2  ;;  %v13897_v48 = vld [vmem:[#allocation26 + $0xa34] sm:$0xf] }
 0x8af   : > { %8650 = vmatmul.bf16.vlgmr.msrb.gmra.mxu3 %v15468_v23  ;;  %v8367_v19 = vpop.f32.mrf.mxu1  ;;  %v12448_v47 = vor.u32 %v13897_v48, %v12445_v7  ;;  %v8431_v2 = vadd.f32 %v15502_v27, %v5722_v8  ;;  %v8353_v48 = vadd.f32 %v15490_v42, %v5719_v30  ;;  %v12964_v42 = vor.u32 %v14042_v34, %v12963_v49  ;;  %v13994_v8 = vld [vmem:[#allocation26 + $0xd3c] sm:$0xf]  ;;  %v11947_v49 = vld [vmem:[#allocation26 + $0x640] sm:$0xf] }
 0x8b0   : > { %8660 = vmatpush.bf16.msra.mxu0 %v11420_v41  ;;  %v8406_v29 = vpop.f32.mrf.mxu0  ;;  %v13738_v41 = vld [vmem:[#allocation26 + $0x53c] sm:$0xf]  ;;  %v13787_v34 = vld [vmem:[#allocation26 + $0x6bc] sm:$0xf0] }
 0x8b1   : > { %8669 = vmatpush.bf16.msra.mxu1 %v12956_v6  ;;  %8686 = vmatpush.bf16.msra.mxu2 %v11424_v44  ;;  %v11813_v6 = vld [vmem:[#allocation26 + $0x5b8] sm:$0xf0]  ;;  %v5720_v44 = vperm.slane %v15508_v40, 1  ;;  %v11427_v29 = vld [vmem:[#allocation26 + $0x238] sm:$0xf] }
 0x8b2   : > { %8695 = vmatpush.bf16.msra.mxu3 %v12960_v16  ;;  %v11816_v52 = vor.u32 %v13738_v41, %v11813_v6  ;;  %v13093_v19 = vld [vmem:[#allocation26 + $0xfb8] sm:$0xf0] }
 0x8b3   : > { %v8379_v9 = vadd.f32 %v15492_v59, %v5720_v44  ;;  %v13674_v59 = vld [vmem:[#allocation26 + $0x33c] sm:$0xf]  ;;  %v13096_v7 = vor.u32 %v14058_v53, %v13093_v19  ;;  %v12077_v53 = vld [vmem:[#allocation26 + $0x7c0] sm:$0xf0]  ;;  %v12708_v19 = vor.u32 %v13978_v21, %v12707_v20  ;;  %v13850_v20 = vld [vmem:[#allocation26 + $0x8b4] sm:$0xf0] }
 0x8b4   : > { %8661 = vmatpush.bf16.msra.mxu0 %v11292_v35  ;;  %v11683_v35 = vld [vmem:[#allocation26 + $0x438] sm:$0xf]  ;;  %v11429_v41 = vld [vmem:[#allocation26 + $0x2b8] sm:$0xf0] }
 0x8b5   : > { %8670 = vmatpush.bf16.msra.mxu1 %v12828_v63  ;;  %8687 = vmatpush.bf16.msra.mxu2 %v11296_v37  ;;  %v8393_v16 = vpop.f32.mrf.mxu3  ;;  %v5721_v63 = vperm.slane %v15508_v40, 2  ;;  %v13706_v37 = vld [vmem:[#allocation26 + $0x43c] sm:$0xf]  ;;  %v11684_v17 = vor.u32 %v13722_v61, %v11683_v35  ;;  %v8392_v31 = vadd.f32 %v15500_v58, %v8379_v9  ;;  %v13658_v58 = vld [vmem:[#allocation26 + $0x2b4] sm:$0xf0]  ;;  %v11432_v51 = vor.u32 %v13642_v45, %v11429_v41 }
 0x8b6   : > { %8696 = vmatpush.bf16.msra.mxu3 %v12832_v39  ;;  %v8432_v54 = vpop.f32.mrf.mxu2  ;;  %v12316_v39 = vor.u32 %v13881_v36, %v12315_v12  ;;  %v14026_v44 = vld [vmem:[#allocation26 + $0xe3c] sm:$0xf]  ;;  %v11428_v36 = vor.u32 %v13658_v58, %v11427_v29  ;;  %v12579_v29 = vld [vmem:[#allocation26 + $0xb38] sm:$0xf]  ;;  %v11948_v45 = vor.u32 %v13787_v34, %v11947_v49  ;;  %v14043_v49 = vld [vmem:[#allocation26 + $0xebc] sm:$0xf0] }
 0x8b7   : > { %v8417_v10 = vpop.f32.mrf.mxu1  ;;  %v8405_v4 = vadd.f32 %v15498_v62, %v5721_v63  ;;  %v13626_v54 = vld [vmem:[#allocation26 + $0x1b4] sm:$0xf0]  ;;  %v12581_v58 = vld [vmem:[#allocation26 + $0xbb8] sm:$0xf0]  ;;  %v13643_v34 = vld [vmem:[#allocation26 + $0x244] sm:$0xf] }
 0x8b8   : > { %8662 = vmatpush.bf16.msra.mxu0 %v11164_v18  ;;  %v15516_v43 = vpop.f32.mrf.mxu0  ;;  %v13849_v18 = vld [vmem:[#allocation26 + $0x8ac] sm:$0xf0]  ;;  %v14010_v63 = vld [vmem:[#allocation26 + $0xdb4] sm:$0xf0]  ;;  %v13834_v21 = vld [vmem:[#allocation26 + $0x83c] sm:$0xf] }
 0x8b9   : > { %8671 = vmatpush.bf16.msra.mxu1 %v12700_v22  ;;  %8688 = vmatpush.bf16.msra.mxu2 %v11168_v14  ;;  %v11688_v22 = vor.u32 %v13706_v37, %v11685_v32  ;;  %v11555_v14 = vld [vmem:[#allocation26 + $0x338] sm:$0xf]  ;;  %v12188_v56 = vor.u32 %v13849_v18, %v12187_v11  ;;  %v8418_v1 = vadd.f32 %v8417_v10, %v8405_v4  ;;  %v13610_v37 = vld [vmem:[#allocation26 + $0x13c] sm:$0xf] }
 0x8ba   : > { %8697 = vmatpush.bf16.msra.mxu3 %v12704_v60  ;;  %v13690_v60 = vld [vmem:[#allocation26 + $0x3b4] sm:$0xf0]  ;;  %v11301_v32 = vld [vmem:[#allocation26 + $0x1b8] sm:$0xf0]  ;;  %v12836_v9 = vor.u32 %v14010_v63, %v12835_v57 }
 0x8bb   : > { %8663 = vmatmul.bf16.vlgmr.msra.gmra.mxu0 %v15462_v33  ;;  %v11171_v11 = vld [vmem:[#allocation26 + $0x38] sm:$0xf] }
 0x8bc   : > { %8707 = vmatpush.bf16.msrb.mxu0 %v12068_v25  ;;  %8689 = vmatmul.bf16.vlgmr.msra.gmra.mxu2 %v15462_v33  ;;  %v13091_v25 = vld [vmem:[#allocation26 + $0xf38] sm:$0xf] }
 0x8bd   : > { %8733 = vmatpush.bf16.msrb.mxu2 %v12072_v26  ;;  %8672 = vmatpush.bf16.msra.mxu1 %v12572_v50  ;;  %v11557_v26 = vld [vmem:[#allocation26 + $0x3b8] sm:$0xf0]  ;;  %v11556_v50 = vor.u32 %v13690_v60, %v11555_v14  ;;  %v13594_v18 = vld [vmem:[#allocation26 + $0xb4] sm:$0xf0] }
 0x8be   : > { %8698 = vmatpush.bf16.msra.mxu3 %v12576_v38  ;;  %v13092_v38 = vor.u32 %v14074_v3, %v13091_v25  ;;  %v11560_v62 = vor.u32 %v13674_v59, %v11557_v26  ;;  %v13578_v14 = vld [vmem:[#allocation26 + $0x3c] sm:$0xf]  ;;  %v12075_v59 = vld [vmem:[#allocation26 + $0x740] sm:$0xf] }
 0x8bf   : > { %v8419_v6 = vpop.f32.mrf.mxu1  ;;  %v11173_v60 = vld [vmem:[#allocation26 + $0xb8] sm:$0xf0]  ;;  %v13819_v26 = vld [vmem:[#allocation26 + $0x7bc] sm:$0xf0] }
 0x8c0   : > { %8708 = vmatpush.bf16.msrb.mxu0 %v11940_v28  ;;  %v8443_v28 = vpop.f32.mrf.mxu3  ;;  %v8458_v12 = vpop.f32.mrf.mxu0  ;;  %v13962_v25 = vld [vmem:[#allocation26 + $0xc3c] sm:$0xf]  ;;  %v12451_v6 = vld [vmem:[#allocation26 + $0xa38] sm:$0xf] }
 0x8c1   : > { %8734 = vmatpush.bf16.msrb.mxu2 %v11944_v0  ;;  %8673 = vmatpush.bf16.msra.mxu1 %v12444_v5  ;;  %v9207_v0 = vrot.slane %v8392_v31, 6  ;;  %v8444_v46 = vadd.f32 %v8443_v28, %v8431_v2  ;;  %v15522_v27 = vpop.f32.mrf.mxu2  ;;  %v12965_v5 = vld [vmem:[#allocation26 + $0xeb8] sm:$0xf0]  ;;  %v11176_v2 = vor.u32 %v13578_v14, %v11173_v60  ;;  %v11819_v12 = vld [vmem:[#allocation26 + $0x540] sm:$0xf] }
 0x8c2   : > { %8699 = vmatpush.bf16.msra.mxu3 %v12448_v47  ;;  %v8366_v47 = vadd.f32 %v15496_v55, %v8353_v48  ;;  %v12968_v55 = vor.u32 %v14026_v44, %v12965_v5  ;;  %v12709_v3 = vld [vmem:[#allocation26 + $0xcb8] sm:$0xf0]  ;;  %v13771_v48 = vld [vmem:[#allocation26 + $0x644] sm:$0xf]  ;;  %v13914_v44 = vld [vmem:[#allocation26 + $0xab4] sm:$0xf0] }
 0x8c3   : > { %v9209_v16 = vrot.slane %v8444_v46, 2  ;;  %v13898_v5 = vld [vmem:[#allocation26 + $0xa3c] sm:$0xf]  ;;  %v11563_v60 = vld [vmem:[#allocation26 + $0x340] sm:$0xf] }
 0x8c4   : > { %8709 = vmatpush.bf16.msrb.mxu0 %v11812_v13  ;;  %v9208_v13 = vrot.slane %v8418_v1, 4  ;;  %v9231_v35 = vsel %vm2604_vm12, %v8366_v47, %v9207_v0  ;;  %v12712_v1 = vor.u32 %v13962_v25, %v12709_v3  ;;  %v11949_v0 = vld [vmem:[#allocation26 + $0x6c0] sm:$0xf0]  ;;  %v13691_v25 = vld [vmem:[#allocation26 + $0x3bc] sm:$0xf0] }
 0x8c5   : > { %8735 = vmatpush.bf16.msrb.mxu2 %v11816_v52  ;;  %8674 = vmatpush.bf16.msra.mxu1 %v12316_v39  ;;  %v11299_v52 = vld [vmem:[#allocation26 + $0x138] sm:$0xf]  ;;  %v12837_v39 = vld [vmem:[#allocation26 + $0xdb8] sm:$0xf0]  ;;  %v11952_v47 = vor.u32 %v13771_v48, %v11949_v0  ;;  %v14075_v3 = vld [vmem:[#allocation26 + $0xfbc] sm:$0xf0] }
 0x8c6   : > { %8700 = vmatpush.bf16.msra.mxu3 %v12320_v15  ;;  %v9232_v61 = vsel %vm2606_vm13, %v9208_v13, %v9209_v16  ;;  %v11300_v10 = vor.u32 %v13626_v54, %v11299_v52  ;;  %v11304_v15 = vor.u32 %v13610_v37, %v11301_v32  ;;  %v12453_v16 = vld [vmem:[#allocation26 + $0xab8] sm:$0xf0]  ;;  %v12452_v52 = vor.u32 %v13914_v44, %v12451_v6  ;;  %v11691_v32 = vld [vmem:[#allocation26 + $0x440] sm:$0xf]  ;;  %v11437_v48 = vld [vmem:[#allocation26 + $0x2c0] sm:$0xf0] }
 0x8c7   : > { %v9233_v30 = vsel %vm2608_vm14, %v9231_v35, %v9232_v61  ;;  %v12456_v54 = vor.u32 %v13898_v5, %v12453_v16  ;;  %v12323_v35 = vld [vmem:[#allocation26 + $0x938] sm:$0xf]  ;;  %v12325_v37 = vld [vmem:[#allocation26 + $0x9b8] sm:$0xf0]  ;;  %v11440_v44 = vor.u32 %v13643_v34, %v11437_v48  ;;  %v11307_v5 = vld [vmem:[#allocation26 + $0x140] sm:$0xf] }
 0x8c8   : > { %8710 = vmatpush.bf16.msrb.mxu0 %v11684_v17  ;;  %9263 = vst [vmem:[%s15812_s5] sm:$0xff] %v9233_v30  ;;  %v8445_v17 = vpop.f32.mrf.mxu3  ;;  %v15533_v31 = vpop.f32.mrf.mxu1  ;;  %v13882_v61 = vld [vmem:[#allocation26 + $0x9b4] sm:$0xf0]  ;;  %v13723_v30 = vld [vmem:[#allocation26 + $0x4bc] sm:$0xf0] }
 0x8c9   : > { %8736 = vmatpush.bf16.msrb.mxu2 %v11688_v22  ;;  %8675 = vmatpush.bf16.msra.mxu1 %v12188_v56  ;;  %v12840_v22 = vor.u32 %v13994_v8, %v12837_v39  ;;  %v8484_v4 = vpop.f32.mrf.mxu2  ;;  %v11172_v56 = vor.u32 %v13594_v18, %v11171_v11  ;;  %v13707_v8 = vld [vmem:[#allocation26 + $0x444] sm:$0xf]  ;;  %v12324_v11 = vor.u32 %v13882_v61, %v12323_v35  ;;  %v11179_v61 = vld [vmem:[#allocation26 + $0x40] sm:$0xf] }
 0x8ca   : > { %8701 = vmatpush.bf16.msra.mxu3 %v12192_v24  ;;  %v13803_v24 = vld [vmem:[#allocation26 + $0x744] sm:$0xf]  ;;  %v11692_v17 = vor.u32 %v13723_v30, %v11691_v32  ;;  %v13099_v4 = vld [vmem:[#allocation26 + $0xf40] sm:$0xf] }
 0x8cb   : > { %v12080_v28 = vor.u32 %v13803_v24, %v12077_v53  ;;  %v11693_v39 = vld [vmem:[#allocation26 + $0x4c0] sm:$0xf0]  ;;  %v13595_v32 = vld [vmem:[#allocation26 + $0xbc] sm:$0xf0] }
 0x8cc   : > { %8711 = vmatpush.bf16.msrb.mxu0 %v11556_v50  ;;  %8676 = vmatmul.bf16.vlgmr.msra.gmra.mxu1 %v15468_v23  ;;  %v12076_v50 = vor.u32 %v13819_v26, %v12075_v59  ;;  %v11696_v14 = vor.u32 %v13707_v8, %v11693_v39  ;;  %v13675_v59 = vld [vmem:[#allocation26 + $0x344] sm:$0xf]  ;;  %v12715_v30 = vld [vmem:[#allocation26 + $0xc40] sm:$0xf] }
 0x8cd   : > { %8720 = vmatpush.bf16.msrb.mxu1 %v13092_v38  ;;  %8737 = vmatpush.bf16.msrb.mxu2 %v11560_v62  ;;  %v13946_v38 = vld [vmem:[#allocation26 + $0xbb4] sm:$0xf0]  ;;  %v13930_v62 = vld [vmem:[#allocation26 + $0xb3c] sm:$0xf]  ;;  %v11565_v26 = vld [vmem:[#allocation26 + $0x3c0] sm:$0xf0] }
 0x8ce   : > { %8746 = vmatpush.bf16.msrb.mxu3 %v13096_v7  ;;  %v12580_v7 = vor.u32 %v13946_v38, %v12579_v29  ;;  %v12584_v46 = vor.u32 %v13930_v62, %v12581_v58  ;;  %v14059_v24 = vld [vmem:[#allocation26 + $0xf44] sm:$0xf]  ;;  %v11435_v38 = vld [vmem:[#allocation26 + $0x240] sm:$0xf] }
 0x8cf   : > { %8702 = vmatmul.bf16.vlgmr.msra.gmra.mxu3 %v15468_v23  ;;  %v13101_v53 = vld [vmem:[#allocation26 + $0xfc0] sm:$0xf0]  ;;  %v13659_v62 = vld [vmem:[#allocation26 + $0x2bc] sm:$0xf0] }
 0x8d0   : > { %8712 = vmatpush.bf16.msrb.mxu0 %v11428_v36  ;;  %v8471_v13 = vpop.f32.mrf.mxu1  ;;  %v13755_v36 = vld [vmem:[#allocation26 + $0x5bc] sm:$0xf0]  ;;  %v13104_v58 = vor.u32 %v14059_v24, %v13101_v53 }
 0x8d1   : > { %8721 = vmatpush.bf16.msrb.mxu1 %v12964_v42  ;;  %8738 = vmatpush.bf16.msrb.mxu2 %v11432_v51  ;;  %v15535_v41 = vpop.f32.mrf.mxu3  ;;  %v13739_v42 = vld [vmem:[#allocation26 + $0x544] sm:$0xf]  ;;  %v11820_v57 = vor.u32 %v13755_v36, %v11819_v12  ;;  %v12843_v13 = vld [vmem:[#allocation26 + $0xd40] sm:$0xf] }
 0x8d2   : > { %8747 = vmatpush.bf16.msrb.mxu3 %v12968_v55  ;;  %v11821_v51 = vld [vmem:[#allocation26 + $0x5c0] sm:$0xf0]  ;;  %v13866_v55 = vld [vmem:[#allocation26 + $0x93c] sm:$0xf]  ;;  %v14011_v12 = vld [vmem:[#allocation26 + $0xdbc] sm:$0xf0] }
 0x8d3   : > { %v11824_v63 = vor.u32 %v13739_v42, %v11821_v51  ;;  %v13611_v36 = vld [vmem:[#allocation26 + $0x144] sm:$0xf]  ;;  %v5724_v51 = vperm.slane %v15508_v40, 5  ;;  %v13979_v8 = vld [vmem:[#allocation26 + $0xcbc] sm:$0xf0] }
 0x8d4   : > { %8713 = vmatpush.bf16.msrb.mxu0 %v11300_v10  ;;  %v11309_v42 = vld [vmem:[#allocation26 + $0x1c0] sm:$0xf0]  ;;  %v12587_v53 = vld [vmem:[#allocation26 + $0xb40] sm:$0xf] }
 0x8d5   : > { %8722 = vmatpush.bf16.msrb.mxu1 %v12836_v9  ;;  %8739 = vmatpush.bf16.msrb.mxu2 %v11304_v15  ;;  %v12195_v9 = vld [vmem:[#allocation26 + $0x838] sm:$0xf]  ;;  %v12328_v15 = vor.u32 %v13866_v55, %v12325_v37  ;;  %v12844_v55 = vor.u32 %v14011_v12, %v12843_v13  ;;  %v12461_v13 = vld [vmem:[#allocation26 + $0xac0] sm:$0xf0]  ;;  %v13756_v12 = vld [vmem:[#allocation26 + $0x5c4] sm:$0xf0] }
 0x8d6   : > { %8748 = vmatpush.bf16.msrb.mxu3 %v12840_v22  ;;  %v12197_v22 = vld [vmem:[#allocation26 + $0x8b8] sm:$0xf0] }
 0x8d8   : > { %8714 = vmatpush.bf16.msrb.mxu0 %v11172_v56  ;;  %v15539_v10 = vpop.f32.mrf.mxu0  ;;  %v12196_v56 = vor.u32 %v13850_v20, %v12195_v9  ;;  %v11181_v9 = vld [vmem:[#allocation26 + $0xc0] sm:$0xf0] }
 0x8d9   : > { %8723 = vmatpush.bf16.msrb.mxu1 %v12708_v19  ;;  %8740 = vmatpush.bf16.msrb.mxu2 %v11176_v2  ;;  %v8497_v18 = vpop.f32.mrf.mxu3  ;;  %v12200_v19 = vor.u32 %v13834_v21, %v12197_v22  ;;  %v11564_v2 = vor.u32 %v13691_v25, %v11563_v60  ;;  %v12717_v20 = vld [vmem:[#allocation26 + $0xcc0] sm:$0xf0]  ;;  %v12083_v21 = vld [vmem:[#allocation26 + $0x748] sm:$0xf]  ;;  %v11180_v60 = vor.u32 %v13595_v32, %v11179_v61  ;;  %v13804_v25 = vld [vmem:[#allocation26 + $0x74c] sm:$0xf] }
 0x8da   : > { %8749 = vmatpush.bf16.msrb.mxu3 %v12712_v1  ;;  %v13100_v1 = vor.u32 %v14075_v3, %v13099_v4  ;;  %v13820_v22 = vld [vmem:[#allocation26 + $0x7c4] sm:$0xf0]  ;;  %v12085_v4 = vld [vmem:[#allocation26 + $0x7c8] sm:$0xf0]  ;;  %v12331_v61 = vld [vmem:[#allocation26 + $0x940] sm:$0xf] }
 0x8db   : > { %8715 = vmatmul.bf16.vlgmr.msrb.gmra.mxu0 %v15462_v33  ;;  %v12084_v24 = vor.u32 %v13820_v22, %v12083_v21 }
 0x8dc   : > { %8759 = vmatpush.bf16.msra.mxu0 %v12076_v50  ;;  %8741 = vmatmul.bf16.vlgmr.msrb.gmra.mxu2 %v15462_v33  ;;  %v11568_v50 = vor.u32 %v13675_v59, %v11565_v26  ;;  %v5726_v59 = vperm.slane %v15508_v40, 7  ;;  %v12716_v26 = vor.u32 %v13979_v8, %v12715_v30  ;;  %v12333_v8 = vld [vmem:[#allocation26 + $0x9c0] sm:$0xf0] }
 0x8dd   : > { %8785 = vmatpush.bf16.msra.mxu2 %v12080_v28  ;;  %8724 = vmatpush.bf16.msrb.mxu1 %v12580_v7  ;;  %v12971_v28 = vld [vmem:[#allocation26 + $0xe40] sm:$0xf]  ;;  %v14027_v7 = vld [vmem:[#allocation26 + $0xe44] sm:$0xf] }
 0x8de   : > { %8750 = vmatpush.bf16.msrb.mxu3 %v12584_v46  ;;  %v12973_v46 = vld [vmem:[#allocation26 + $0xec0] sm:$0xf0]  ;;  %v12972_v6 = vor.u32 %v14043_v49, %v12971_v28  ;;  %v13788_v28 = vld [vmem:[#allocation26 + $0x6c4] sm:$0xf0] }
 0x8df   : > { %v15541_v29 = vpop.f32.mrf.mxu2  ;;  %v12976_v16 = vor.u32 %v14027_v7, %v12973_v46 }
 0x8e0   : > { %8760 = vmatpush.bf16.msra.mxu0 %v11948_v45  ;;  %v8510_v0 = vpop.f32.mrf.mxu0  ;;  %v11436_v45 = vor.u32 %v13659_v62, %v11435_v38  ;;  %v12589_v38 = vld [vmem:[#allocation26 + $0xbc0] sm:$0xf0]  ;;  %v11955_v62 = vld [vmem:[#allocation26 + $0x648] sm:$0xf]  ;;  %v8535_v49 = vadd.f32 %v15541_v29, %v5726_v59 }
 0x8e1   : > { %8786 = vmatpush.bf16.msra.mxu2 %v11952_v47  ;;  %8725 = vmatpush.bf16.msrb.mxu1 %v12452_v52  ;;  %v13627_v47 = vld [vmem:[#allocation26 + $0x1bc] sm:$0xf0]  ;;  %v13995_v52 = vld [vmem:[#allocation26 + $0xd44] sm:$0xf]  ;;  %v11956_v46 = vor.u32 %v13788_v28, %v11955_v62  ;;  %v11571_v59 = vld [vmem:[#allocation26 + $0x348] sm:$0xf] }
 0x8e2   : > { %8751 = vmatpush.bf16.msrb.mxu3 %v12456_v54  ;;  %v12845_v54 = vld [vmem:[#allocation26 + $0xdc0] sm:$0xf0]  ;;  %v11308_v35 = vor.u32 %v13627_v47, %v11307_v5 }
 0x8e3   : > { %v12848_v39 = vor.u32 %v13995_v52, %v12845_v54 }
 0x8e4   : > { %8761 = vmatpush.bf16.msra.mxu0 %v11820_v57  ;;  %v5725_v57 = vperm.slane %v15508_v40, 6 }
 0x8e5   : > { %8787 = vmatpush.bf16.msra.mxu2 %v11824_v63  ;;  %8726 = vmatpush.bf16.msrb.mxu1 %v12324_v11  ;;  %v11312_v63 = vor.u32 %v13611_v36, %v11309_v42  ;;  %v13579_v11 = vld [vmem:[#allocation26 + $0x44] sm:$0xf]  ;;  %v13740_v36 = vld [vmem:[#allocation26 + $0x54c] sm:$0xf] }
 0x8e6   : > { %8752 = vmatpush.bf16.msrb.mxu3 %v12328_v15  ;;  %v13963_v15 = vld [vmem:[#allocation26 + $0xc44] sm:$0xf]  ;;  %v11829_v42 = vld [vmem:[#allocation26 + $0x5c8] sm:$0xf0] }
 0x8e7   : > { %v8536_v37 = vpop.f32.mrf.mxu2  ;;  %v11832_v30 = vor.u32 %v13740_v36, %v11829_v42  ;;  %v13612_v36 = vld [vmem:[#allocation26 + $0x14c] sm:$0xf] }
 0x8e8   : > { %8762 = vmatpush.bf16.msra.mxu0 %v11692_v17  ;;  %v8483_v17 = vadd.f32 %v15522_v27, %v5724_v51  ;;  %v12720_v27 = vor.u32 %v13963_v15, %v12717_v20  ;;  %v13708_v15 = vld [vmem:[#allocation26 + $0x44c] sm:$0xf]  ;;  %v12203_v20 = vld [vmem:[#allocation26 + $0x840] sm:$0xf] }
 0x8e9   : > { %8788 = vmatpush.bf16.msra.mxu2 %v11696_v14  ;;  %8727 = vmatpush.bf16.msrb.mxu1 %v12196_v56  ;;  %v8521_v18 = vpop.f32.mrf.mxu1  ;;  %v5723_v14 = vperm.slane %v15508_v40, 4  ;;  %v11184_v56 = vor.u32 %v13579_v11, %v11181_v9  ;;  %v11317_v42 = vld [vmem:[#allocation26 + $0x1c8] sm:$0xf0] }
 0x8ea   : > { %8753 = vmatpush.bf16.msrb.mxu3 %v12200_v19  ;;  %v8496_v3 = vadd.f32 %v15535_v41, %v8483_v17  ;;  %v13947_v19 = vld [vmem:[#allocation26 + $0xbbc] sm:$0xf0]  ;;  %v13772_v41 = vld [vmem:[#allocation26 + $0x64c] sm:$0xf] }
 0x8eb   : > { %v12588_v48 = vor.u32 %v13947_v19, %v12587_v53  ;;  %v11701_v17 = vld [vmem:[#allocation26 + $0x4c8] sm:$0xf0] }
 0x8ec   : > { %8763 = vmatpush.bf16.msra.mxu0 %v11564_v2  ;;  %8728 = vmatmul.bf16.vlgmr.msrb.gmra.mxu1 %v15468_v23  ;;  %v13931_v2 = vld [vmem:[#allocation26 + $0xb44] sm:$0xf]  ;;  %v9210_v40 = vrot.slane %v8496_v3, 6  ;;  %v11704_v3 = vor.u32 %v13708_v15, %v11701_v17  ;;  %v11573_v53 = vld [vmem:[#allocation26 + $0x3c8] sm:$0xf0] }
 0x8ed   : > { %8772 = vmatpush.bf16.msra.mxu1 %v13100_v1  ;;  %8789 = vmatpush.bf16.msra.mxu2 %v11568_v50  ;;  %v8509_v1 = vadd.f32 %v15539_v10, %v5725_v57  ;;  %v12088_v50 = vor.u32 %v13804_v25, %v12085_v4  ;;  %v12592_v0 = vor.u32 %v13931_v2, %v12589_v38  ;;  %v12459_v10 = vld [vmem:[#allocation26 + $0xa40] sm:$0xf]  ;;  %v13835_v25 = vld [vmem:[#allocation26 + $0x844] sm:$0xf]  ;;  %v14060_v2 = vld [vmem:[#allocation26 + $0xf4c] sm:$0xf] }
 0x8ee   : > { %8798 = vmatpush.bf16.msra.mxu3 %v13104_v58  ;;  %v11957_v58 = vld [vmem:[#allocation26 + $0x6c8] sm:$0xf0]  ;;  %v12205_v4 = vld [vmem:[#allocation26 + $0x8c0] sm:$0xf0]  ;;  %v12091_v15 = vld [vmem:[#allocation26 + $0x750] sm:$0xf] }
 0x8ef   : > { %8754 = vmatmul.bf16.vlgmr.msrb.gmra.mxu3 %v15468_v23  ;;  %v8522_v34 = vadd.f32 %v8521_v18, %v8509_v1  ;;  %v11960_v47 = vor.u32 %v13772_v41, %v11957_v58  ;;  %v13109_v1 = vld [vmem:[#allocation26 + $0xfc8] sm:$0xf0]  ;;  %v11443_v58 = vld [vmem:[#allocation26 + $0x248] sm:$0xf]  ;;  %v13821_v17 = vld [vmem:[#allocation26 + $0x7cc] sm:$0xf0] }
 0x8f0   : > { %8764 = vmatpush.bf16.msra.mxu0 %v11436_v45  ;;  %v13915_v45 = vld [vmem:[#allocation26 + $0xabc] sm:$0xf0] }
 0x8f1   : > { %8773 = vmatpush.bf16.msra.mxu1 %v12972_v6  ;;  %8790 = vmatpush.bf16.msra.mxu2 %v11440_v44  ;;  %v13899_v6 = vld [vmem:[#allocation26 + $0xa44] sm:$0xf]  ;;  %v8457_v44 = vadd.f32 %v15516_v43, %v5723_v14  ;;  %v8523_v29 = vpop.f32.mrf.mxu1  ;;  %v9211_v52 = vrot.slane %v8522_v34, 4  ;;  %v12460_v57 = vor.u32 %v13915_v45, %v12459_v10  ;;  %v13112_v34 = vor.u32 %v14060_v2, %v13109_v1  ;;  %v14028_v10 = vld [vmem:[#allocation26 + $0xe4c] sm:$0xf] }
 0x8f2   : > { %8799 = vmatpush.bf16.msra.mxu3 %v12976_v16  ;;  %v8547_v7 = vpop.f32.mrf.mxu3  ;;  %v11827_v16 = vld [vmem:[#allocation26 + $0x548] sm:$0xf]  ;;  %v12464_v43 = vor.u32 %v13899_v6, %v12461_v13  ;;  %v12981_v45 = vld [vmem:[#allocation26 + $0xec8] sm:$0xf0] }
 0x8f3   : > { %v8548_v5 = vadd.f32 %v8547_v7, %v8535_v49  ;;  %v8470_v51 = vadd.f32 %v15533_v31, %v8457_v44  ;;  %v13724_v31 = vld [vmem:[#allocation26 + $0x4c4] sm:$0xf0]  ;;  %v13644_v7 = vld [vmem:[#allocation26 + $0x24c] sm:$0xf] }
 0x8f4   : > { %8765 = vmatpush.bf16.msra.mxu0 %v11308_v35  ;;  %v11828_v35 = vor.u32 %v13756_v12, %v11827_v16  ;;  %v12979_v49 = vld [vmem:[#allocation26 + $0xe48] sm:$0xf]  ;;  %v12984_v16 = vor.u32 %v14028_v10, %v12981_v45 }
 0x8f5   : > { %8774 = vmatpush.bf16.msra.mxu1 %v12844_v55  ;;  %8791 = vmatpush.bf16.msra.mxu2 %v11312_v63  ;;  %v9212_v54 = vrot.slane %v8548_v5, 2  ;;  %v13883_v55 = vld [vmem:[#allocation26 + $0x9bc] sm:$0xf0]  ;;  %v13867_v63 = vld [vmem:[#allocation26 + $0x944] sm:$0xf]  ;;  %v9234_v37 = vsel %vm2604_vm12, %v8470_v51, %v9210_v40 }
 0x8f6   : > { %8800 = vmatpush.bf16.msra.mxu3 %v12848_v39  ;;  %v11699_v39 = vld [vmem:[#allocation26 + $0x448] sm:$0xf]  ;;  %v12332_v18 = vor.u32 %v13883_v55, %v12331_v61  ;;  %v12336_v21 = vor.u32 %v13867_v63, %v12333_v8  ;;  %v13996_v51 = vld [vmem:[#allocation26 + $0xd4c] sm:$0xf] }
 0x8f7   : > { %v9235_v32 = vsel %vm2606_vm13, %v9211_v52, %v9212_v54  ;;  %v11700_v14 = vor.u32 %v13724_v31, %v11699_v39  ;;  %v13660_v40 = vld [vmem:[#allocation26 + $0x2c4] sm:$0xf0]  ;;  %v12853_v52 = vld [vmem:[#allocation26 + $0xdc8] sm:$0xf0] }
 0x8f8   : > { %8766 = vmatpush.bf16.msra.mxu0 %v11180_v60  ;;  %v9236_v11 = vsel %vm2608_vm14, %v9234_v37, %v9235_v32  ;;  %v15560_v9 = vpop.f32.mrf.mxu0  ;;  %v13851_v60 = vld [vmem:[#allocation26 + $0x8bc] sm:$0xf0]  ;;  %v11444_v6 = vor.u32 %v13660_v40, %v11443_v58  ;;  %v13628_v29 = vld [vmem:[#allocation26 + $0x1c4] sm:$0xf0]  ;;  %v12856_v32 = vor.u32 %v13996_v51, %v12853_v52  ;;  %v11189_v8 = vld [vmem:[#allocation26 + $0xc8] sm:$0xf0] }
 0x8f9   : > { %8775 = vmatpush.bf16.msra.mxu1 %v12716_v26  ;;  %8792 = vmatpush.bf16.msra.mxu2 %v11184_v56  ;;  %9264 = vst [vmem:[%s15812_s5 + $0x8] sm:$0xff] %v9236_v11  ;;  %v13692_v26 = vld [vmem:[#allocation26 + $0x3c4] sm:$0xf0]  ;;  %v12204_v19 = vor.u32 %v13851_v60, %v12203_v20  ;;  %v13964_v39 = vld [vmem:[#allocation26 + $0xc4c] sm:$0xf] }
 0x8fa   : > { %8801 = vmatpush.bf16.msra.mxu3 %v12720_v27  ;;  %v8549_v22 = vpop.f32.mrf.mxu3  ;;  %v13107_v56 = vld [vmem:[#allocation26 + $0xf48] sm:$0xf]  ;;  %v11572_v38 = vor.u32 %v13692_v26, %v11571_v59  ;;  %v12725_v11 = vld [vmem:[#allocation26 + $0xcc8] sm:$0xf0]  ;;  %v13805_v20 = vld [vmem:[#allocation26 + $0x754] sm:$0xf] }
 0x8fb   : > { %8767 = vmatmul.bf16.vlgmr.msra.gmra.mxu0 %v15462_v33  ;;  %v14076_v27 = vld [vmem:[#allocation26 + $0xfc4] sm:$0xf0]  ;;  %v12728_v60 = vor.u32 %v13964_v39, %v12725_v11  ;;  %v13932_v59 = vld [vmem:[#allocation26 + $0xb4c] sm:$0xf]  ;;  %v11709_v51 = vld [vmem:[#allocation26 + $0x4d0] sm:$0xf0] }
 0x8fc   : > { %8811 = vmatpush.bf16.msrb.mxu0 %v12084_v24  ;;  %8793 = vmatmul.bf16.vlgmr.msra.gmra.mxu2 %v15462_v33  ;;  %v13676_v24 = vld [vmem:[#allocation26 + $0x34c] sm:$0xf]  ;;  %v13108_v62 = vor.u32 %v14076_v27, %v13107_v56  ;;  %v12851_v13 = vld [vmem:[#allocation26 + $0xd48] sm:$0xf]  ;;  %v11963_v27 = vld [vmem:[#allocation26 + $0x650] sm:$0xf] }
 0x8fd   : > { %8837 = vmatpush.bf16.msrb.mxu2 %v12088_v50  ;;  %8776 = vmatpush.bf16.msra.mxu1 %v12588_v48  ;;  %v12208_v50 = vor.u32 %v13835_v25, %v12205_v4  ;;  %v11576_v28 = vor.u32 %v13676_v24, %v11573_v53  ;;  %v14012_v12 = vld [vmem:[#allocation26 + $0xdc4] sm:$0xf0]  ;;  %v12092_v25 = vor.u32 %v13821_v17, %v12091_v15  ;;  %v12597_v56 = vld [vmem:[#allocation26 + $0xbc8] sm:$0xf0]  ;;  %v13789_v24 = vld [vmem:[#allocation26 + $0x6cc] sm:$0xf0] }
 0x8fe   : > { %8802 = vmatpush.bf16.msra.mxu3 %v12592_v0  ;;  %v14044_v0 = vld [vmem:[#allocation26 + $0xec4] sm:$0xf0]  ;;  %v13773_v53 = vld [vmem:[#allocation26 + $0x654] sm:$0xf]  ;;  %v12600_v1 = vor.u32 %v13932_v59, %v12597_v56  ;;  %v13900_v58 = vld [vmem:[#allocation26 + $0xa4c] sm:$0xf] }
 0x8ff   : > { %v15565_v41 = vpop.f32.mrf.mxu2  ;;  %v12980_v44 = vor.u32 %v14044_v0, %v12979_v49  ;;  %v13596_v55 = vld [vmem:[#allocation26 + $0xc4] sm:$0xf0]  ;;  %v13757_v0 = vld [vmem:[#allocation26 + $0x5cc] sm:$0xf0]  ;;  %v13677_v11 = vld [vmem:[#allocation26 + $0x354] sm:$0xf] }
 0x900   : > { %8812 = vmatpush.bf16.msrb.mxu0 %v11956_v46  ;;  %v8562_v48 = vpop.f32.mrf.mxu0  ;;  %v11445_v46 = vld [vmem:[#allocation26 + $0x2c8] sm:$0xf0]  ;;  %v12723_v63 = vld [vmem:[#allocation26 + $0xc48] sm:$0xf]  ;;  %v14077_v39 = vld [vmem:[#allocation26 + $0xfcc] sm:$0xf0] }
 0x901   : > { %8838 = vmatpush.bf16.msrb.mxu2 %v11960_v47  ;;  %8777 = vmatpush.bf16.msra.mxu1 %v12460_v57  ;;  %v11448_v5 = vor.u32 %v13644_v7, %v11445_v46  ;;  %v11315_v47 = vld [vmem:[#allocation26 + $0x148] sm:$0xf]  ;;  %v11835_v48 = vld [vmem:[#allocation26 + $0x550] sm:$0xf]  ;;  %v13741_v7 = vld [vmem:[#allocation26 + $0x554] sm:$0xf] }
 0x902   : > { %8803 = vmatpush.bf16.msra.mxu3 %v12464_v43  ;;  %v11316_v54 = vor.u32 %v13628_v29, %v11315_v47  ;;  %v11187_v57 = vld [vmem:[#allocation26 + $0x48] sm:$0xf]  ;;  %v12852_v43 = vor.u32 %v14012_v12, %v12851_v13  ;;  %v11837_v46 = vld [vmem:[#allocation26 + $0x5d0] sm:$0xf0]  ;;  %v13868_v47 = vld [vmem:[#allocation26 + $0x94c] sm:$0xf] }
 0x903   : > { %v13980_v37 = vld [vmem:[#allocation26 + $0xcc4] sm:$0xf0]  ;;  %v11840_v29 = vor.u32 %v13741_v7, %v11837_v46  ;;  %v12341_v13 = vld [vmem:[#allocation26 + $0x9c8] sm:$0xf0]  ;;  %v13725_v12 = vld [vmem:[#allocation26 + $0x4cc] sm:$0xf0] }
 0x904   : > { %8813 = vmatpush.bf16.msrb.mxu0 %v11828_v35  ;;  %v11320_v35 = vor.u32 %v13612_v36, %v11317_v42  ;;  %v12724_v22 = vor.u32 %v13980_v37, %v12723_v63  ;;  %v12595_v4 = vld [vmem:[#allocation26 + $0xb48] sm:$0xf]  ;;  %v13709_v42 = vld [vmem:[#allocation26 + $0x454] sm:$0xf]  ;;  %v12213_v63 = vld [vmem:[#allocation26 + $0x8c8] sm:$0xf0] }
 0x905   : > { %8839 = vmatpush.bf16.msrb.mxu2 %v11832_v30  ;;  %8778 = vmatpush.bf16.msra.mxu1 %v12332_v18  ;;  %v13580_v30 = vld [vmem:[#allocation26 + $0x4c] sm:$0xf]  ;;  %v11188_v18 = vor.u32 %v13596_v55, %v11187_v57  ;;  %v12344_v57 = vor.u32 %v13868_v47, %v12341_v13  ;;  %v11712_v37 = vor.u32 %v13709_v42, %v11709_v51  ;;  %v11581_v15 = vld [vmem:[#allocation26 + $0x3d0] sm:$0xf0]  ;;  %v12987_v59 = vld [vmem:[#allocation26 + $0xe50] sm:$0xf] }
 0x906   : > { %8804 = vmatpush.bf16.msra.mxu3 %v12336_v21  ;;  %v12093_v21 = vld [vmem:[#allocation26 + $0x7d0] sm:$0xf0]  ;;  %v13836_v55 = vld [vmem:[#allocation26 + $0x84c] sm:$0xf]  ;;  %v13981_v42 = vld [vmem:[#allocation26 + $0xccc] sm:$0xf0] }
 0x907   : > { %v8588_v61 = vpop.f32.mrf.mxu2  ;;  %v12096_v26 = vor.u32 %v13805_v20, %v12093_v21  ;;  %v13117_v20 = vld [vmem:[#allocation26 + $0xfd0] sm:$0xf0]  ;;  %v12216_v21 = vor.u32 %v13836_v55, %v12213_v63  ;;  %v12099_v55 = vld [vmem:[#allocation26 + $0x758] sm:$0xf] }
 0x908   : > { %8814 = vmatpush.bf16.msrb.mxu0 %v11700_v14  ;;  %v11192_v14 = vor.u32 %v13580_v30, %v11189_v8  ;;  %v13852_v61 = vld [vmem:[#allocation26 + $0x8c4] sm:$0xf0]  ;;  %v13693_v30 = vld [vmem:[#allocation26 + $0x3cc] sm:$0xf0]  ;;  %v11325_v7 = vld [vmem:[#allocation26 + $0x1d0] sm:$0xf0] }
 0x909   : > { %8840 = vmatpush.bf16.msrb.mxu2 %v11704_v3  ;;  %8779 = vmatpush.bf16.msra.mxu1 %v12204_v19  ;;  %v15569_v31 = vpop.f32.mrf.mxu1  ;;  %v13948_v3 = vld [vmem:[#allocation26 + $0xbc4] sm:$0xf0]  ;;  %v11965_v19 = vld [vmem:[#allocation26 + $0x6d0] sm:$0xf0]  ;;  %v13115_v8 = vld [vmem:[#allocation26 + $0xf50] sm:$0xf] }
 0x90a   : > { %8805 = vmatpush.bf16.msra.mxu3 %v12208_v50  ;;  %v12596_v2 = vor.u32 %v13948_v3, %v12595_v4  ;;  %v11968_v40 = vor.u32 %v13773_v53, %v11965_v19  ;;  %v11451_v4 = vld [vmem:[#allocation26 + $0x250] sm:$0xf]  ;;  %v11453_v53 = vld [vmem:[#allocation26 + $0x2d0] sm:$0xf0]  ;;  %v13822_v63 = vld [vmem:[#allocation26 + $0x7d4] sm:$0xf0] }
 0x90b   : > { %v13661_v3 = vld [vmem:[#allocation26 + $0x2cc] sm:$0xf0]  ;;  %v14029_v19 = vld [vmem:[#allocation26 + $0xe54] sm:$0xf] }
 0x90c   : > { %8815 = vmatpush.bf16.msrb.mxu0 %v11572_v38  ;;  %8780 = vmatmul.bf16.vlgmr.msra.gmra.mxu1 %v15468_v23  ;;  %v11964_v38 = vor.u32 %v13789_v24, %v11963_v27  ;;  %v14045_v27 = vld [vmem:[#allocation26 + $0xecc] sm:$0xf0]  ;;  %v13645_v24 = vld [vmem:[#allocation26 + $0x254] sm:$0xf] }
 0x90d   : > { %8824 = vmatpush.bf16.msrb.mxu1 %v13108_v62  ;;  %8841 = vmatpush.bf16.msrb.mxu2 %v11576_v28  ;;  %v12467_v62 = vld [vmem:[#allocation26 + $0xa48] sm:$0xf] }
 0x90e   : > { %8850 = vmatpush.bf16.msrb.mxu3 %v13112_v34  ;;  %v13916_v28 = vld [vmem:[#allocation26 + $0xac4] sm:$0xf0]  ;;  %v12469_v34 = vld [vmem:[#allocation26 + $0xac8] sm:$0xf0] }
 0x90f   : > { %8806 = vmatmul.bf16.vlgmr.msra.gmra.mxu3 %v15468_v23  ;;  %v12468_v10 = vor.u32 %v13916_v28, %v12467_v62  ;;  %v12472_v45 = vor.u32 %v13900_v58, %v12469_v34  ;;  %v12988_v62 = vor.u32 %v14045_v27, %v12987_v59  ;;  %v11456_v28 = vor.u32 %v13645_v24, %v11453_v53  ;;  %v11323_v58 = vld [vmem:[#allocation26 + $0x150] sm:$0xf]  ;;  %v13790_v59 = vld [vmem:[#allocation26 + $0x6d4] sm:$0xf0] }
 0x910   : > { %8816 = vmatpush.bf16.msrb.mxu0 %v11444_v6  ;;  %v11836_v6 = vor.u32 %v13757_v0, %v11835_v48  ;;  %v14013_v48 = vld [vmem:[#allocation26 + $0xdcc] sm:$0xf0]  ;;  %v13613_v0 = vld [vmem:[#allocation26 + $0x154] sm:$0xf] }
 0x911   : > { %8825 = vmatpush.bf16.msrb.mxu1 %v12980_v44  ;;  %8842 = vmatpush.bf16.msrb.mxu2 %v11448_v5  ;;  %v8575_v49 = vpop.f32.mrf.mxu1  ;;  %v12339_v44 = vld [vmem:[#allocation26 + $0x948] sm:$0xf] }
 0x912   : > { %8851 = vmatpush.bf16.msrb.mxu3 %v12984_v16  ;;  %v15571_v50 = vpop.f32.mrf.mxu3  ;;  %v13884_v5 = vld [vmem:[#allocation26 + $0x9c4] sm:$0xf0]  ;;  %v11707_v16 = vld [vmem:[#allocation26 + $0x450] sm:$0xf] }
 0x913   : > { %v12340_v52 = vor.u32 %v13884_v5, %v12339_v44  ;;  %v12859_v49 = vld [vmem:[#allocation26 + $0xd50] sm:$0xf] }
 0x914   : > { %8817 = vmatpush.bf16.msrb.mxu0 %v11316_v54  ;;  %v12211_v54 = vld [vmem:[#allocation26 + $0x848] sm:$0xf]  ;;  %v11195_v5 = vld [vmem:[#allocation26 + $0x50] sm:$0xf]  ;;  %v12860_v47 = vor.u32 %v14013_v48, %v12859_v49  ;;  %v11843_v48 = vld [vmem:[#allocation26 + $0x558] sm:$0xf] }
 0x915   : > { %8826 = vmatpush.bf16.msrb.mxu1 %v12852_v43  ;;  %8843 = vmatpush.bf16.msrb.mxu2 %v11320_v35  ;;  %v11708_v35 = vor.u32 %v13725_v12, %v11707_v16  ;;  %v12212_v17 = vor.u32 %v13852_v61, %v12211_v54  ;;  %v13597_v16 = vld [vmem:[#allocation26 + $0xcc] sm:$0xf0]  ;;  %v11197_v54 = vld [vmem:[#allocation26 + $0xd0] sm:$0xf0] }
 0x916   : > { %8852 = vmatpush.bf16.msrb.mxu3 %v12856_v32  ;;  %v11579_v32 = vld [vmem:[#allocation26 + $0x350] sm:$0xf]  ;;  %v12733_v61 = vld [vmem:[#allocation26 + $0xcd0] sm:$0xf0] }
 0x917   : > { %v12731_v12 = vld [vmem:[#allocation26 + $0xc50] sm:$0xf] }
 0x918   : > { %8818 = vmatpush.bf16.msrb.mxu0 %v11188_v18  ;;  %v15575_v36 = vpop.f32.mrf.mxu0  ;;  %v14061_v18 = vld [vmem:[#allocation26 + $0xf54] sm:$0xf] }
 0x919   : > { %8827 = vmatpush.bf16.msrb.mxu1 %v12724_v22  ;;  %8844 = vmatpush.bf16.msrb.mxu2 %v11192_v14  ;;  %v11580_v22 = vor.u32 %v13693_v30, %v11579_v32  ;;  %v13116_v14 = vor.u32 %v14077_v39, %v13115_v8  ;;  %v11196_v32 = vor.u32 %v13597_v16, %v11195_v5  ;;  %v13806_v30 = vld [vmem:[#allocation26 + $0x75c] sm:$0xf] }
 0x91a   : > { %8853 = vmatpush.bf16.msrb.mxu3 %v12728_v60  ;;  %v8601_v43 = vpop.f32.mrf.mxu3  ;;  %v11584_v60 = vor.u32 %v13677_v11, %v11581_v15  ;;  %v12101_v8 = vld [vmem:[#allocation26 + $0x7d8] sm:$0xf0]  ;;  %v12732_v15 = vor.u32 %v13981_v42, %v12731_v12 }
 0x91b   : > { %8819 = vmatmul.bf16.vlgmr.msrb.gmra.mxu0 %v15462_v33 }
 0x91c   : > { %8863 = vmatpush.bf16.msra.mxu0 %v12092_v25  ;;  %8845 = vmatmul.bf16.vlgmr.msrb.gmra.mxu2 %v15462_v33 }
 0x91d   : > { %8889 = vmatpush.bf16.msra.mxu2 %v12096_v26  ;;  %8828 = vmatpush.bf16.msrb.mxu1 %v12596_v2  ;;  %v13120_v26 = vor.u32 %v14061_v18, %v13117_v20  ;;  %v12989_v2 = vld [vmem:[#allocation26 + $0xed0] sm:$0xf0]  ;;  %v12100_v18 = vor.u32 %v13822_v63, %v12099_v55  ;;  %v12603_v20 = vld [vmem:[#allocation26 + $0xb50] sm:$0xf] }
 0x91e   : > { %8854 = vmatpush.bf16.msrb.mxu3 %v12600_v1  ;;  %v15582_v1 = vld [vmem:[%s15811_s3 + $0x8] sm:$0xff]  ;;  %v12992_v34 = vor.u32 %v14029_v19, %v12989_v2  ;;  %v12219_v55 = vld [vmem:[#allocation26 + $0x850] sm:$0xf] }
 0x91f   : > { %v15577_v25 = vpop.f32.mrf.mxu2  ;;  %v5728_v46 = vperm.slane %v15582_v1, 1  ;;  %v5730_v11 = vperm.slane %v15582_v1, 3 }
 0x920   : > { %8864 = vmatpush.bf16.msra.mxu0 %v11964_v38  ;;  %v8614_v56 = vpop.f32.mrf.mxu0  ;;  %v11452_v38 = vor.u32 %v13661_v3, %v11451_v4  ;;  %v12605_v4 = vld [vmem:[#allocation26 + $0xbd0] sm:$0xf0]  ;;  %v11971_v3 = vld [vmem:[#allocation26 + $0x658] sm:$0xf] }
 0x921   : > { %8890 = vmatpush.bf16.msra.mxu2 %v11968_v40  ;;  %8829 = vmatpush.bf16.msrb.mxu1 %v12468_v10  ;;  %v13629_v40 = vld [vmem:[#allocation26 + $0x1cc] sm:$0xf0]  ;;  %v13997_v10 = vld [vmem:[#allocation26 + $0xd54] sm:$0xf]  ;;  %v8587_v43 = vadd.f32 %v15565_v41, %v5728_v46  ;;  %v8639_v27 = vadd.f32 %v15577_v25, %v5730_v11  ;;  %v11845_v46 = vld [vmem:[#allocation26 + $0x5d8] sm:$0xf0] }
 0x922   : > { %8855 = vmatpush.bf16.msrb.mxu3 %v12472_v45  ;;  %v12861_v45 = vld [vmem:[#allocation26 + $0xdd0] sm:$0xf0]  ;;  %v11324_v44 = vor.u32 %v13629_v40, %v11323_v58 }
 0x923   : > { %v12864_v51 = vor.u32 %v13997_v10, %v12861_v45  ;;  %v8600_v39 = vadd.f32 %v15571_v50, %v8587_v43  ;;  %v13774_v50 = vld [vmem:[#allocation26 + $0x65c] sm:$0xf] }
 0x924   : > { %8865 = vmatpush.bf16.msra.mxu0 %v11836_v6  ;;  %v5729_v6 = vperm.slane %v15582_v1, 2  ;;  %v13710_v43 = vld [vmem:[#allocation26 + $0x45c] sm:$0xf] }
 0x925   : > { %8891 = vmatpush.bf16.msra.mxu2 %v11840_v29  ;;  %8830 = vmatpush.bf16.msrb.mxu1 %v12340_v52  ;;  %v11328_v29 = vor.u32 %v13613_v0, %v11325_v7  ;;  %v13581_v52 = vld [vmem:[#allocation26 + $0x54] sm:$0xf]  ;;  %v9213_v56 = vrot.slane %v8600_v39, 6  ;;  %v13758_v0 = vld [vmem:[#allocation26 + $0x5d4] sm:$0xf0] }
 0x926   : > { %8856 = vmatpush.bf16.msrb.mxu3 %v12344_v57  ;;  %v13965_v57 = vld [vmem:[#allocation26 + $0xc54] sm:$0xf]  ;;  %v13742_v7 = vld [vmem:[#allocation26 + $0x55c] sm:$0xf]  ;;  %v11844_v5 = vor.u32 %v13758_v0, %v11843_v48  ;;  %v12867_v48 = vld [vmem:[#allocation26 + $0xd58] sm:$0xf] }
 0x927   : > { %v8640_v13 = vpop.f32.mrf.mxu2  ;;  %v12736_v41 = vor.u32 %v13965_v57, %v12733_v61  ;;  %v11848_v42 = vor.u32 %v13742_v7, %v11845_v46  ;;  %v12221_v39 = vld [vmem:[#allocation26 + $0x8d0] sm:$0xf0]  ;;  %v14014_v7 = vld [vmem:[#allocation26 + $0xdd4] sm:$0xf0]  ;;  %v13614_v46 = vld [vmem:[#allocation26 + $0x15c] sm:$0xf] }
 0x928   : > { %8866 = vmatpush.bf16.msra.mxu0 %v11708_v35  ;;  %v13869_v13 = vld [vmem:[#allocation26 + $0x954] sm:$0xf] }
 0x929   : > { %8892 = vmatpush.bf16.msra.mxu2 %v11712_v37  ;;  %8831 = vmatpush.bf16.msrb.mxu1 %v12212_v17  ;;  %v8625_v35 = vpop.f32.mrf.mxu1  ;;  %v5727_v37 = vperm.slane %v15582_v1, 0  ;;  %v11200_v17 = vor.u32 %v13581_v52, %v11197_v54  ;;  %v11715_v52 = vld [vmem:[#allocation26 + $0x458] sm:$0xf] }
 0x92a   : > { %8857 = vmatpush.bf16.msrb.mxu3 %v12216_v21  ;;  %v13949_v21 = vld [vmem:[#allocation26 + $0xbcc] sm:$0xf0] }
 0x92b   : > { %v12604_v53 = vor.u32 %v13949_v21, %v12603_v20  ;;  %v8561_v58 = vadd.f32 %v15560_v9, %v5727_v37  ;;  %v13678_v20 = vld [vmem:[#allocation26 + $0x35c] sm:$0xf] }
 0x92c   : > { %8867 = vmatpush.bf16.msra.mxu0 %v11580_v22  ;;  %8832 = vmatmul.bf16.vlgmr.msrb.gmra.mxu1 %v15468_v23  ;;  %v13933_v22 = vld [vmem:[#allocation26 + $0xb54] sm:$0xf]  ;;  %v11589_v21 = vld [vmem:[#allocation26 + $0x3d8] sm:$0xf0] }
 0x92d   : > { %8876 = vmatpush.bf16.msra.mxu1 %v13116_v14  ;;  %8893 = vmatpush.bf16.msra.mxu2 %v11584_v60  ;;  %v8613_v14 = vadd.f32 %v15575_v36, %v5729_v6  ;;  %v12104_v60 = vor.u32 %v13806_v30, %v12101_v8  ;;  %v12608_v19 = vor.u32 %v13933_v22, %v12605_v4  ;;  %v12475_v36 = vld [vmem:[#allocation26 + $0xa50] sm:$0xf]  ;;  %v13837_v8 = vld [vmem:[#allocation26 + $0x854] sm:$0xf] }
 0x92e   : > { %8902 = vmatpush.bf16.msra.mxu3 %v13120_v26  ;;  %v11973_v26 = vld [vmem:[#allocation26 + $0x6d8] sm:$0xf0]  ;;  %v8574_v10 = vadd.f32 %v15569_v31, %v8561_v58  ;;  %v13726_v31 = vld [vmem:[#allocation26 + $0x4d4] sm:$0xf0]  ;;  %v13853_v30 = vld [vmem:[#allocation26 + $0x8cc] sm:$0xf0]  ;;  %v12224_v4 = vor.u32 %v13837_v8, %v12221_v39 }
 0x92f   : > { %8858 = vmatmul.bf16.vlgmr.msrb.gmra.mxu3 %v15468_v23  ;;  %v8626_v24 = vadd.f32 %v8625_v35, %v8613_v14  ;;  %v11976_v49 = vor.u32 %v13774_v50, %v11973_v26  ;;  %v11717_v35 = vld [vmem:[#allocation26 + $0x4d8] sm:$0xf0]  ;;  %v12220_v22 = vor.u32 %v13853_v30, %v12219_v55  ;;  %v11592_v50 = vor.u32 %v13678_v20, %v11589_v21  ;;  %v11979_v20 = vld [vmem:[#allocation26 + $0x660] sm:$0xf] }
 0x930   : > { %8868 = vmatpush.bf16.msra.mxu0 %v11452_v38  ;;  %v11972_v38 = vor.u32 %v13790_v59, %v11971_v3  ;;  %v9237_v16 = vsel %vm2604_vm12, %v8574_v10, %v9213_v56  ;;  %v11720_v11 = vor.u32 %v13710_v43, %v11717_v35  ;;  %v14062_v14 = vld [vmem:[#allocation26 + $0xf5c] sm:$0xf]  ;;  %v11459_v56 = vld [vmem:[#allocation26 + $0x258] sm:$0xf]  ;;  %v12107_v35 = vld [vmem:[#allocation26 + $0x760] sm:$0xf] }
 0x931   : > { %8877 = vmatpush.bf16.msra.mxu1 %v12988_v62  ;;  %8894 = vmatpush.bf16.msra.mxu2 %v11456_v28  ;;  %v13917_v62 = vld [vmem:[#allocation26 + $0xacc] sm:$0xf0]  ;;  %v13901_v28 = vld [vmem:[#allocation26 + $0xa54] sm:$0xf]  ;;  %v8627_v25 = vpop.f32.mrf.mxu1  ;;  %v9214_v45 = vrot.slane %v8626_v24, 4 }
 0x932   : > { %8903 = vmatpush.bf16.msra.mxu3 %v12992_v34  ;;  %v8651_v2 = vpop.f32.mrf.mxu3  ;;  %v12477_v34 = vld [vmem:[#allocation26 + $0xad0] sm:$0xf0]  ;;  %v12995_v24 = vld [vmem:[#allocation26 + $0xe58] sm:$0xf]  ;;  %v11333_v10 = vld [vmem:[#allocation26 + $0x1d8] sm:$0xf0] }
 0x933   : > { %v8652_v40 = vadd.f32 %v8651_v2, %v8639_v27  ;;  %v12480_v9 = vor.u32 %v13901_v28, %v12477_v34  ;;  %v13662_v27 = vld [vmem:[#allocation26 + $0x2d4] sm:$0xf0]  ;;  %v12997_v28 = vld [vmem:[#allocation26 + $0xed8] sm:$0xf0]  ;;  %v13791_v21 = vld [vmem:[#allocation26 + $0x6dc] sm:$0xf0] }
 0x934   : > { %8869 = vmatpush.bf16.msra.mxu0 %v11324_v44  ;;  %v12476_v44 = vor.u32 %v13917_v62, %v12475_v36  ;;  %v14046_v2 = vld [vmem:[#allocation26 + $0xed4] sm:$0xf0]  ;;  %v11461_v36 = vld [vmem:[#allocation26 + $0x2d8] sm:$0xf0]  ;;  %v11460_v58 = vor.u32 %v13662_v27, %v11459_v56 }
 0x935   : > { %8878 = vmatpush.bf16.msra.mxu1 %v12860_v47  ;;  %8895 = vmatpush.bf16.msra.mxu2 %v11328_v29  ;;  %v9215_v6 = vrot.slane %v8652_v40, 2  ;;  %v12347_v47 = vld [vmem:[#allocation26 + $0x950] sm:$0xf]  ;;  %v14030_v62 = vld [vmem:[#allocation26 + $0xe5c] sm:$0xf]  ;;  %v12996_v40 = vor.u32 %v14046_v2, %v12995_v24 }
 0x936   : > { %8904 = vmatpush.bf16.msra.mxu3 %v12864_v51  ;;  %v13885_v29 = vld [vmem:[#allocation26 + $0x9cc] sm:$0xf0]  ;;  %v12349_v51 = vld [vmem:[#allocation26 + $0x9d0] sm:$0xf0]  ;;  %v11331_v25 = vld [vmem:[#allocation26 + $0x158] sm:$0xf]  ;;  %v13000_v0 = vor.u32 %v14030_v62, %v12997_v28 }
 0x937   : > { %v9238_v12 = vsel %vm2606_vm13, %v9214_v45, %v9215_v6  ;;  %v12348_v61 = vor.u32 %v13885_v29, %v12347_v47  ;;  %v12352_v63 = vor.u32 %v13869_v13, %v12349_v51  ;;  %v13630_v34 = vld [vmem:[#allocation26 + $0x1d4] sm:$0xf0]  ;;  %v13998_v45 = vld [vmem:[#allocation26 + $0xd5c] sm:$0xf]  ;;  %v11336_v47 = vor.u32 %v13614_v46, %v11333_v10  ;;  %v11851_v2 = vld [vmem:[#allocation26 + $0x560] sm:$0xf] }
 0x938   : > { %8870 = vmatpush.bf16.msra.mxu0 %v11196_v32  ;;  %v9239_v54 = vsel %vm2608_vm14, %v9237_v16, %v9238_v12  ;;  %v15601_v57 = vpop.f32.mrf.mxu0  ;;  %v11716_v32 = vor.u32 %v13726_v31, %v11715_v52  ;;  %v12869_v6 = vld [vmem:[#allocation26 + $0xdd8] sm:$0xf0]  ;;  %v13598_v13 = vld [vmem:[#allocation26 + $0xd4] sm:$0xf0]  ;;  %v11853_v62 = vld [vmem:[#allocation26 + $0x5e0] sm:$0xf0] }
 0x939   : > { %8879 = vmatpush.bf16.msra.mxu1 %v12732_v15  ;;  %8896 = vmatpush.bf16.msra.mxu2 %v11200_v17  ;;  %9265 = vst [vmem:[%s15812_s5 + $0x10] sm:$0xff] %v9239_v54  ;;  %v11587_v15 = vld [vmem:[#allocation26 + $0x358] sm:$0xf]  ;;  %v13582_v51 = vld [vmem:[#allocation26 + $0x5c] sm:$0xf] }
 0x93a   : > { %8905 = vmatpush.bf16.msra.mxu3 %v12736_v41  ;;  %v8653_v37 = vpop.f32.mrf.mxu3  ;;  %v13694_v17 = vld [vmem:[#allocation26 + $0x3d4] sm:$0xf0]  ;;  %v11205_v52 = vld [vmem:[#allocation26 + $0xd8] sm:$0xf0]  ;;  %v13727_v46 = vld [vmem:[#allocation26 + $0x4dc] sm:$0xf0] }
 0x93b   : > { %8871 = vmatmul.bf16.vlgmr.msra.gmra.mxu0 %v15462_v33  ;;  %v13123_v41 = vld [vmem:[#allocation26 + $0xf58] sm:$0xf]  ;;  %v11588_v3 = vor.u32 %v13694_v17, %v11587_v15  ;;  %v13966_v31 = vld [vmem:[#allocation26 + $0xc5c] sm:$0xf]  ;;  %v12109_v37 = vld [vmem:[#allocation26 + $0x7e0] sm:$0xf0]  ;;  %v11208_v30 = vor.u32 %v13582_v51, %v11205_v52 }
 0x93c   : > { %8915 = vmatpush.bf16.msrb.mxu0 %v12100_v18  ;;  %8897 = vmatmul.bf16.vlgmr.msra.gmra.mxu2 %v15462_v33  ;;  %v14078_v18 = vld [vmem:[#allocation26 + $0xfd4] sm:$0xf0]  ;;  %v12741_v43 = vld [vmem:[#allocation26 + $0xcd8] sm:$0xf0]  ;;  %v11595_v51 = vld [vmem:[#allocation26 + $0x360] sm:$0xf] }
 0x93d   : > { %8941 = vmatpush.bf16.msrb.mxu2 %v12104_v60  ;;  %8880 = vmatpush.bf16.msra.mxu1 %v12604_v53  ;;  %v13125_v60 = vld [vmem:[#allocation26 + $0xfd8] sm:$0xf0]  ;;  %v13124_v59 = vor.u32 %v14078_v18, %v13123_v41  ;;  %v12739_v16 = vld [vmem:[#allocation26 + $0xc58] sm:$0xf]  ;;  %v12744_v8 = vor.u32 %v13966_v31, %v12741_v43  ;;  %v13695_v52 = vld [vmem:[#allocation26 + $0x3dc] sm:$0xf0] }
 0x93e   : > { %8906 = vmatpush.bf16.msra.mxu3 %v12608_v19  ;;  %v13128_v53 = vor.u32 %v14062_v14, %v13125_v60  ;;  %v13982_v12 = vld [vmem:[#allocation26 + $0xcd4] sm:$0xf0]  ;;  %v13934_v17 = vld [vmem:[#allocation26 + $0xb5c] sm:$0xf]  ;;  %v11981_v14 = vld [vmem:[#allocation26 + $0x6e0] sm:$0xf0] }
 0x93f   : > { %v15606_v26 = vpop.f32.mrf.mxu2  ;;  %v13950_v15 = vld [vmem:[#allocation26 + $0xbd4] sm:$0xf0]  ;;  %v12613_v18 = vld [vmem:[#allocation26 + $0xbd8] sm:$0xf0]  ;;  %v13131_v31 = vld [vmem:[#allocation26 + $0xf60] sm:$0xf] }
 0x940   : > { %8916 = vmatpush.bf16.msrb.mxu0 %v11972_v38  ;;  %v8666_v19 = vpop.f32.mrf.mxu0  ;;  %v13646_v38 = vld [vmem:[#allocation26 + $0x25c] sm:$0xf]  ;;  %v13918_v56 = vld [vmem:[#allocation26 + $0xad4] sm:$0xf0]  ;;  %v14079_v43 = vld [vmem:[#allocation26 + $0xfdc] sm:$0xf0] }
 0x941   : > { %8942 = vmatpush.bf16.msrb.mxu2 %v11976_v49  ;;  %8881 = vmatpush.bf16.msra.mxu1 %v12476_v44  ;;  %v11464_v49 = vor.u32 %v13646_v38, %v11461_v36  ;;  %v11332_v44 = vor.u32 %v13630_v34, %v11331_v25  ;;  %v13902_v27 = vld [vmem:[#allocation26 + $0xa5c] sm:$0xf]  ;;  %v13759_v38 = vld [vmem:[#allocation26 + $0x5dc] sm:$0xf0]  ;;  %v13743_v36 = vld [vmem:[#allocation26 + $0x564] sm:$0xf] }
 0x942   : > { %8907 = vmatpush.bf16.msra.mxu3 %v12480_v9  ;;  %v11203_v9 = vld [vmem:[#allocation26 + $0x58] sm:$0xf]  ;;  %v12485_v19 = vld [vmem:[#allocation26 + $0xad8] sm:$0xf0] }
 0x943   : > { %v11204_v55 = vor.u32 %v13598_v13, %v11203_v9  ;;  %v13886_v25 = vld [vmem:[#allocation26 + $0x9d4] sm:$0xf0]  ;;  %v13870_v34 = vld [vmem:[#allocation26 + $0x95c] sm:$0xf] }
 0x944   : > { %8917 = vmatpush.bf16.msrb.mxu0 %v11844_v5  ;;  %v12868_v5 = vor.u32 %v14014_v7, %v12867_v48  ;;  %v11856_v48 = vor.u32 %v13743_v36, %v11853_v62  ;;  %v11723_v7 = vld [vmem:[#allocation26 + $0x460] sm:$0xf]  ;;  %v12227_v9 = vld [vmem:[#allocation26 + $0x858] sm:$0xf]  ;;  %v11341_v36 = vld [vmem:[#allocation26 + $0x1e0] sm:$0xf0] }
 0x945   : > { %8943 = vmatpush.bf16.msrb.mxu2 %v11848_v42  ;;  %8882 = vmatpush.bf16.msra.mxu1 %v12348_v61  ;;  %v12872_v42 = vor.u32 %v13998_v45, %v12869_v6  ;;  %v13823_v61 = vld [vmem:[#allocation26 + $0x7dc] sm:$0xf0]  ;;  %v13711_v45 = vld [vmem:[#allocation26 + $0x464] sm:$0xf]  ;;  %v13854_v13 = vld [vmem:[#allocation26 + $0x8d4] sm:$0xf0] }
 0x946   : > { %8908 = vmatpush.bf16.msra.mxu3 %v12352_v63  ;;  %v13807_v63 = vld [vmem:[#allocation26 + $0x764] sm:$0xf]  ;;  %v12108_v39 = vor.u32 %v13823_v61, %v12107_v35  ;;  %v5732_v62 = vperm.slane %v15582_v1, 5 }
 0x947   : > { %v8692_v29 = vpop.f32.mrf.mxu2  ;;  %v12112_v41 = vor.u32 %v13807_v63, %v12109_v37  ;;  %v11725_v6 = vld [vmem:[#allocation26 + $0x4e0] sm:$0xf0] }
 0x948   : > { %8918 = vmatpush.bf16.msrb.mxu0 %v11716_v32  ;;  %v12740_v32 = vor.u32 %v13982_v12, %v12739_v16  ;;  %v11724_v29 = vor.u32 %v13727_v46, %v11723_v7  ;;  %v13838_v16 = vld [vmem:[#allocation26 + $0x85c] sm:$0xf]  ;;  %v13679_v35 = vld [vmem:[#allocation26 + $0x364] sm:$0xf]  ;;  %v13599_v7 = vld [vmem:[#allocation26 + $0xdc] sm:$0xf0] }
 0x949   : > { %8944 = vmatpush.bf16.msrb.mxu2 %v11720_v11  ;;  %8883 = vmatpush.bf16.msra.mxu1 %v12220_v22  ;;  %v15610_v54 = vpop.f32.mrf.mxu1  ;;  %v12611_v11 = vld [vmem:[#allocation26 + $0xb58] sm:$0xf]  ;;  %v13775_v22 = vld [vmem:[#allocation26 + $0x664] sm:$0xf]  ;;  %v12229_v12 = vld [vmem:[#allocation26 + $0x8d8] sm:$0xf0] }
 0x94a   : > { %8909 = vmatpush.bf16.msra.mxu3 %v12224_v4  ;;  %v12612_v60 = vor.u32 %v13950_v15, %v12611_v11  ;;  %v12616_v4 = vor.u32 %v13934_v17, %v12613_v18  ;;  %v11984_v24 = vor.u32 %v13775_v22, %v11981_v14  ;;  %v11597_v61 = vld [vmem:[#allocation26 + $0x3e0] sm:$0xf0]  ;;  %v11467_v15 = vld [vmem:[#allocation26 + $0x260] sm:$0xf] }
 0x94b   : > { %v14063_v63 = vld [vmem:[#allocation26 + $0xf64] sm:$0xf]  ;;  %v13663_v17 = vld [vmem:[#allocation26 + $0x2dc] sm:$0xf0] }
 0x94c   : > { %8919 = vmatpush.bf16.msrb.mxu0 %v11588_v3  ;;  %8884 = vmatmul.bf16.vlgmr.msra.gmra.mxu1 %v15468_v23  ;;  %v13133_v37 = vld [vmem:[#allocation26 + $0xfe0] sm:$0xf0]  ;;  %v12747_v46 = vld [vmem:[#allocation26 + $0xc60] sm:$0xf] }
 0x94d   : > { %8928 = vmatpush.bf16.msrb.mxu1 %v13124_v59  ;;  %8945 = vmatpush.bf16.msrb.mxu2 %v11592_v50  ;;  %v11980_v59 = vor.u32 %v13791_v21, %v11979_v20  ;;  %v12483_v50 = vld [vmem:[#allocation26 + $0xa58] sm:$0xf]  ;;  %v13136_v18 = vor.u32 %v14063_v63, %v13133_v37  ;;  %v14047_v21 = vld [vmem:[#allocation26 + $0xedc] sm:$0xf0]  ;;  %v13647_v22 = vld [vmem:[#allocation26 + $0x264] sm:$0xf] }
 0x94e   : > { %8954 = vmatpush.bf16.msrb.mxu3 %v13128_v53  ;;  %v12484_v28 = vor.u32 %v13918_v56, %v12483_v50  ;;  %v11469_v14 = vld [vmem:[#allocation26 + $0x2e0] sm:$0xf0]  ;;  %v12619_v37 = vld [vmem:[#allocation26 + $0xb60] sm:$0xf] }
 0x94f   : > { %8910 = vmatmul.bf16.vlgmr.msra.gmra.mxu3 %v15468_v23  ;;  %v11472_v56 = vor.u32 %v13647_v22, %v11469_v14 }
 0x950   : > { %8920 = vmatpush.bf16.msrb.mxu0 %v11460_v58  ;;  %v12488_v58 = vor.u32 %v13902_v27, %v12485_v19  ;;  %v11339_v27 = vld [vmem:[#allocation26 + $0x160] sm:$0xf] }
 0x951   : > { %8929 = vmatpush.bf16.msrb.mxu1 %v12996_v40  ;;  %8946 = vmatpush.bf16.msrb.mxu2 %v11464_v49  ;;  %v8679_v53 = vpop.f32.mrf.mxu1  ;;  %v11852_v40 = vor.u32 %v13759_v38, %v11851_v2  ;;  %v12355_v49 = vld [vmem:[#allocation26 + $0x958] sm:$0xf]  ;;  %v14015_v2 = vld [vmem:[#allocation26 + $0xddc] sm:$0xf0]  ;;  %v13615_v38 = vld [vmem:[#allocation26 + $0x164] sm:$0xf] }
 0x952   : > { %8955 = vmatpush.bf16.msrb.mxu3 %v13000_v0  ;;  %v15612_v3 = vpop.f32.mrf.mxu3  ;;  %v12357_v0 = vld [vmem:[#allocation26 + $0x9d8] sm:$0xf0]  ;;  %v12875_v53 = vld [vmem:[#allocation26 + $0xd60] sm:$0xf] }
 0x954   : > { %8921 = vmatpush.bf16.msrb.mxu0 %v11332_v44  ;;  %v12356_v44 = vor.u32 %v13886_v25, %v12355_v49  ;;  %v11211_v25 = vld [vmem:[#allocation26 + $0x60] sm:$0xf] }
 0x955   : > { %8930 = vmatpush.bf16.msrb.mxu1 %v12868_v5  ;;  %8947 = vmatpush.bf16.msrb.mxu2 %v11336_v47  ;;  %v12360_v5 = vor.u32 %v13870_v34, %v12357_v0  ;;  %v12876_v34 = vor.u32 %v14015_v2, %v12875_v53  ;;  %v12493_v53 = vld [vmem:[#allocation26 + $0xae0] sm:$0xf0]  ;;  %v13760_v2 = vld [vmem:[#allocation26 + $0x5e4] sm:$0xf0] }
 0x956   : > { %8956 = vmatpush.bf16.msrb.mxu3 %v12872_v42  ;;  %v11728_v42 = vor.u32 %v13711_v45, %v11725_v6  ;;  %v13983_v45 = vld [vmem:[#allocation26 + $0xcdc] sm:$0xf0] }
 0x958   : > { %8922 = vmatpush.bf16.msrb.mxu0 %v11204_v55  ;;  %v15616_v10 = vpop.f32.mrf.mxu0  ;;  %v12228_v55 = vor.u32 %v13854_v13, %v12227_v9  ;;  %v11213_v9 = vld [vmem:[#allocation26 + $0xe0] sm:$0xf0] }
 0x959   : > { %8931 = vmatpush.bf16.msrb.mxu1 %v12740_v32  ;;  %8948 = vmatpush.bf16.msrb.mxu2 %v11208_v30  ;;  %v12232_v32 = vor.u32 %v13838_v16, %v12229_v12  ;;  %v11596_v30 = vor.u32 %v13695_v52, %v11595_v51  ;;  %v12749_v13 = vld [vmem:[#allocation26 + $0xce0] sm:$0xf0]  ;;  %v12115_v16 = vld [vmem:[#allocation26 + $0x768] sm:$0xf]  ;;  %v11212_v51 = vor.u32 %v13599_v7, %v11211_v25  ;;  %v13808_v52 = vld [vmem:[#allocation26 + $0x76c] sm:$0xf] }
 0x95a   : > { %8957 = vmatpush.bf16.msrb.mxu3 %v12744_v8  ;;  %v8705_v47 = vpop.f32.mrf.mxu3  ;;  %v13132_v8 = vor.u32 %v14079_v43, %v13131_v31  ;;  %v13824_v12 = vld [vmem:[#allocation26 + $0x7e4] sm:$0xf0]  ;;  %v12117_v31 = vld [vmem:[#allocation26 + $0x7e8] sm:$0xf0]  ;;  %v12363_v25 = vld [vmem:[#allocation26 + $0x960] sm:$0xf] }
 0x95b   : > { %8923 = vmatmul.bf16.vlgmr.msrb.gmra.mxu0 %v15462_v33  ;;  %v8691_v47 = vadd.f32 %v15606_v26, %v5732_v62  ;;  %v12116_v63 = vor.u32 %v13824_v12, %v12115_v16 }
 0x95c   : > { %8967 = vmatpush.bf16.msra.mxu0 %v12108_v39  ;;  %8949 = vmatmul.bf16.vlgmr.msrb.gmra.mxu2 %v15462_v33  ;;  %v11600_v39 = vor.u32 %v13679_v35, %v11597_v61  ;;  %v5734_v35 = vperm.slane %v15582_v1, 7  ;;  %v12748_v61 = vor.u32 %v13983_v45, %v12747_v46  ;;  %v12365_v45 = vld [vmem:[#allocation26 + $0x9e0] sm:$0xf0] }
 0x95d   : > { %8993 = vmatpush.bf16.msra.mxu2 %v12112_v41  ;;  %8932 = vmatpush.bf16.msrb.mxu1 %v12612_v60  ;;  %v13003_v41 = vld [vmem:[#allocation26 + $0xe60] sm:$0xf]  ;;  %v14031_v60 = vld [vmem:[#allocation26 + $0xe64] sm:$0xf]  ;;  %v8704_v43 = vadd.f32 %v15612_v3, %v8691_v47  ;;  %v13776_v3 = vld [vmem:[#allocation26 + $0x66c] sm:$0xf] }
 0x95e   : > { %8958 = vmatpush.bf16.msrb.mxu3 %v12616_v4  ;;  %v13005_v4 = vld [vmem:[#allocation26 + $0xee0] sm:$0xf0]  ;;  %v13004_v50 = vor.u32 %v14047_v21, %v13003_v41  ;;  %v13792_v41 = vld [vmem:[#allocation26 + $0x6e4] sm:$0xf0]  ;;  %v11733_v47 = vld [vmem:[#allocation26 + $0x4e8] sm:$0xf0] }
 0x95f   : > { %v15618_v11 = vpop.f32.mrf.mxu2  ;;  %v13008_v19 = vor.u32 %v14031_v60, %v13005_v4 }
 0x960   : > { %8968 = vmatpush.bf16.msra.mxu0 %v11980_v59  ;;  %v8718_v20 = vpop.f32.mrf.mxu0  ;;  %v11468_v59 = vor.u32 %v13663_v17, %v11467_v15  ;;  %v12621_v15 = vld [vmem:[#allocation26 + $0xbe0] sm:$0xf0]  ;;  %v11987_v17 = vld [vmem:[#allocation26 + $0x668] sm:$0xf] }
 0x961   : > { %8994 = vmatpush.bf16.msra.mxu2 %v11984_v24  ;;  %8933 = vmatpush.bf16.msrb.mxu1 %v12484_v28  ;;  %v13631_v24 = vld [vmem:[#allocation26 + $0x1dc] sm:$0xf0]  ;;  %v13999_v28 = vld [vmem:[#allocation26 + $0xd64] sm:$0xf]  ;;  %v8743_v20 = vadd.f32 %v15618_v11, %v5734_v35  ;;  %v11988_v4 = vor.u32 %v13792_v41, %v11987_v17  ;;  %v11603_v35 = vld [vmem:[#allocation26 + $0x368] sm:$0xf] }
 0x962   : > { %8959 = vmatpush.bf16.msrb.mxu3 %v12488_v58  ;;  %v12877_v58 = vld [vmem:[#allocation26 + $0xde0] sm:$0xf0]  ;;  %v11340_v49 = vor.u32 %v13631_v24, %v11339_v27 }
 0x963   : > { %v12880_v6 = vor.u32 %v13999_v28, %v12877_v58 }
 0x964   : > { %8969 = vmatpush.bf16.msra.mxu0 %v11852_v40  ;;  %v5733_v40 = vperm.slane %v15582_v1, 6 }
 0x965   : > { %8995 = vmatpush.bf16.msra.mxu2 %v11856_v48  ;;  %8934 = vmatpush.bf16.msrb.mxu1 %v12356_v44  ;;  %v11344_v48 = vor.u32 %v13615_v38, %v11341_v36  ;;  %v13583_v44 = vld [vmem:[#allocation26 + $0x64] sm:$0xf]  ;;  %v13744_v38 = vld [vmem:[#allocation26 + $0x56c] sm:$0xf] }
 0x966   : > { %8960 = vmatpush.bf16.msrb.mxu3 %v12360_v5  ;;  %v13967_v5 = vld [vmem:[#allocation26 + $0xc64] sm:$0xf]  ;;  %v11861_v36 = vld [vmem:[#allocation26 + $0x5e8] sm:$0xf0] }
 0x967   : > { %v8744_v0 = vpop.f32.mrf.mxu2  ;;  %v12752_v26 = vor.u32 %v13967_v5, %v12749_v13  ;;  %v11864_v46 = vor.u32 %v13744_v38, %v11861_v36  ;;  %v13712_v5 = vld [vmem:[#allocation26 + $0x46c] sm:$0xf]  ;;  %v12235_v13 = vld [vmem:[#allocation26 + $0x860] sm:$0xf] }
 0x968   : > { %8970 = vmatpush.bf16.msra.mxu0 %v11724_v29  ;;  %v13616_v38 = vld [vmem:[#allocation26 + $0x16c] sm:$0xf] }
 0x969   : > { %8996 = vmatpush.bf16.msra.mxu2 %v11728_v42  ;;  %8935 = vmatpush.bf16.msrb.mxu1 %v12228_v55  ;;  %v8729_v29 = vpop.f32.mrf.mxu1  ;;  %v5731_v42 = vperm.slane %v15582_v1, 4  ;;  %v11216_v55 = vor.u32 %v13583_v44, %v11213_v9  ;;  %v9216_v1 = vrot.slane %v8704_v43, 6  ;;  %v11736_v43 = vor.u32 %v13712_v5, %v11733_v47  ;;  %v11349_v36 = vld [vmem:[#allocation26 + $0x1e8] sm:$0xf0]  ;;  %v12123_v5 = vld [vmem:[#allocation26 + $0x770] sm:$0xf] }
 0x96a   : > { %8961 = vmatpush.bf16.msrb.mxu3 %v12232_v32  ;;  %v13951_v32 = vld [vmem:[#allocation26 + $0xbdc] sm:$0xf0]  ;;  %v13825_v47 = vld [vmem:[#allocation26 + $0x7ec] sm:$0xf0] }
 0x96b   : > { %v12620_v22 = vor.u32 %v13951_v32, %v12619_v37  ;;  %v11605_v37 = vld [vmem:[#allocation26 + $0x3e8] sm:$0xf0] }
 0x96c   : > { %8971 = vmatpush.bf16.msra.mxu0 %v11596_v30  ;;  %8936 = vmatmul.bf16.vlgmr.msrb.gmra.mxu1 %v15468_v23  ;;  %v13935_v30 = vld [vmem:[#allocation26 + $0xb64] sm:$0xf] }
 0x96d   : > { %8980 = vmatpush.bf16.msra.mxu1 %v13132_v8  ;;  %8997 = vmatpush.bf16.msra.mxu2 %v11600_v39  ;;  %v8717_v8 = vadd.f32 %v15616_v10, %v5733_v40  ;;  %v12120_v39 = vor.u32 %v13808_v52, %v12117_v31  ;;  %v12624_v14 = vor.u32 %v13935_v30, %v12621_v15  ;;  %v12491_v10 = vld [vmem:[#allocation26 + $0xa60] sm:$0xf]  ;;  %v13839_v52 = vld [vmem:[#allocation26 + $0x864] sm:$0xf]  ;;  %v14064_v30 = vld [vmem:[#allocation26 + $0xf6c] sm:$0xf] }
 0x96e   : > { %9006 = vmatpush.bf16.msra.mxu3 %v13136_v18  ;;  %v11989_v18 = vld [vmem:[#allocation26 + $0x6e8] sm:$0xf0]  ;;  %v12237_v31 = vld [vmem:[#allocation26 + $0x8e0] sm:$0xf0] }
 0x96f   : > { %8962 = vmatmul.bf16.vlgmr.msrb.gmra.mxu3 %v15468_v23  ;;  %v8730_v21 = vadd.f32 %v8729_v29, %v8717_v8  ;;  %v11992_v24 = vor.u32 %v13776_v3, %v11989_v18  ;;  %v13141_v8 = vld [vmem:[#allocation26 + $0xfe8] sm:$0xf0]  ;;  %v11475_v18 = vld [vmem:[#allocation26 + $0x268] sm:$0xf] }
 0x970   : > { %8972 = vmatpush.bf16.msra.mxu0 %v11468_v59  ;;  %v13919_v59 = vld [vmem:[#allocation26 + $0xadc] sm:$0xf0] }
 0x971   : > { %8981 = vmatpush.bf16.msra.mxu1 %v13004_v50  ;;  %8998 = vmatpush.bf16.msra.mxu2 %v11472_v56  ;;  %v13903_v50 = vld [vmem:[#allocation26 + $0xa64] sm:$0xf]  ;;  %v8665_v56 = vadd.f32 %v15601_v57, %v5731_v42  ;;  %v8731_v11 = vpop.f32.mrf.mxu1  ;;  %v9217_v28 = vrot.slane %v8730_v21, 4  ;;  %v12492_v40 = vor.u32 %v13919_v59, %v12491_v10  ;;  %v13144_v21 = vor.u32 %v14064_v30, %v13141_v8  ;;  %v14032_v10 = vld [vmem:[#allocation26 + $0xe6c] sm:$0xf] }
 0x972   : > { %9007 = vmatpush.bf16.msra.mxu3 %v13008_v19  ;;  %v8755_v60 = vpop.f32.mrf.mxu3  ;;  %v11859_v19 = vld [vmem:[#allocation26 + $0x568] sm:$0xf]  ;;  %v12496_v57 = vor.u32 %v13903_v50, %v12493_v53  ;;  %v13013_v59 = vld [vmem:[#allocation26 + $0xee8] sm:$0xf0] }
 0x973   : > { %v8756_v27 = vadd.f32 %v8755_v60, %v8743_v20  ;;  %v8678_v62 = vadd.f32 %v15610_v54, %v8665_v56  ;;  %v13728_v54 = vld [vmem:[#allocation26 + $0x4e4] sm:$0xf0]  ;;  %v13648_v60 = vld [vmem:[#allocation26 + $0x26c] sm:$0xf] }
 0x974   : > { %8973 = vmatpush.bf16.msra.mxu0 %v11340_v49  ;;  %v11860_v49 = vor.u32 %v13760_v2, %v11859_v19  ;;  %v13011_v20 = vld [vmem:[#allocation26 + $0xe68] sm:$0xf]  ;;  %v13016_v19 = vor.u32 %v14032_v10, %v13013_v59 }
 0x975   : > { %8982 = vmatpush.bf16.msra.mxu1 %v12876_v34  ;;  %8999 = vmatpush.bf16.msra.mxu2 %v11344_v48  ;;  %v9218_v58 = vrot.slane %v8756_v27, 2  ;;  %v13887_v34 = vld [vmem:[#allocation26 + $0x9dc] sm:$0xf0]  ;;  %v13871_v48 = vld [vmem:[#allocation26 + $0x964] sm:$0xf]  ;;  %v9240_v0 = vsel %vm2604_vm12, %v8678_v62, %v9216_v1 }
 0x976   : > { %9008 = vmatpush.bf16.msra.mxu3 %v12880_v6  ;;  %v11731_v6 = vld [vmem:[#allocation26 + $0x468] sm:$0xf]  ;;  %v12364_v29 = vor.u32 %v13887_v34, %v12363_v25  ;;  %v12368_v16 = vor.u32 %v13871_v48, %v12365_v45  ;;  %v14000_v62 = vld [vmem:[#allocation26 + $0xd6c] sm:$0xf] }
 0x977   : > { %v9241_v7 = vsel %vm2606_vm13, %v9217_v28, %v9218_v58  ;;  %v11732_v42 = vor.u32 %v13728_v54, %v11731_v6  ;;  %v13664_v1 = vld [vmem:[#allocation26 + $0x2e4] sm:$0xf0]  ;;  %v12885_v28 = vld [vmem:[#allocation26 + $0xde8] sm:$0xf0] }
 0x978   : > { %8974 = vmatpush.bf16.msra.mxu0 %v11212_v51  ;;  %v9242_v44 = vsel %vm2608_vm14, %v9240_v0, %v9241_v7  ;;  %v15637_v9 = vpop.f32.mrf.mxu0  ;;  %v13855_v51 = vld [vmem:[#allocation26 + $0x8dc] sm:$0xf0]  ;;  %v11476_v50 = vor.u32 %v13664_v1, %v11475_v18  ;;  %v13632_v11 = vld [vmem:[#allocation26 + $0x1e4] sm:$0xf0]  ;;  %v12888_v7 = vor.u32 %v14000_v62, %v12885_v28  ;;  %v11221_v45 = vld [vmem:[#allocation26 + $0xe8] sm:$0xf0] }
 0x979   : > { %8983 = vmatpush.bf16.msra.mxu1 %v12748_v61  ;;  %9000 = vmatpush.bf16.msra.mxu2 %v11216_v55  ;;  %9266 = vst [vmem:[%s15812_s5 + $0x18] sm:$0xff] %v9242_v44  ;;  %v13696_v61 = vld [vmem:[#allocation26 + $0x3e4] sm:$0xf0]  ;;  %v12236_v32 = vor.u32 %v13855_v51, %v12235_v13  ;;  %v13968_v6 = vld [vmem:[#allocation26 + $0xc6c] sm:$0xf] }
 0x97a   : > { %9009 = vmatpush.bf16.msra.mxu3 %v12752_v26  ;;  %v8757_v12 = vpop.f32.mrf.mxu3  ;;  %v13139_v55 = vld [vmem:[#allocation26 + $0xf68] sm:$0xf]  ;;  %v11604_v15 = vor.u32 %v13696_v61, %v11603_v35  ;;  %v12757_v44 = vld [vmem:[#allocation26 + $0xce8] sm:$0xf0]  ;;  %v13809_v13 = vld [vmem:[#allocation26 + $0x774] sm:$0xf] }
 0x97b   : > { %8975 = vmatmul.bf16.vlgmr.msra.gmra.mxu0 %v15462_v33  ;;  %v14080_v26 = vld [vmem:[#allocation26 + $0xfe4] sm:$0xf0]  ;;  %v12760_v51 = vor.u32 %v13968_v6, %v12757_v44  ;;  %v13936_v35 = vld [vmem:[#allocation26 + $0xb6c] sm:$0xf]  ;;  %v11741_v62 = vld [vmem:[#allocation26 + $0x4f0] sm:$0xf0] }
 0x97c   : > { %9019 = vmatpush.bf16.msrb.mxu0 %v12116_v63  ;;  %9001 = vmatmul.bf16.vlgmr.msra.gmra.mxu2 %v15462_v33  ;;  %v13680_v63 = vld [vmem:[#allocation26 + $0x36c] sm:$0xf]  ;;  %v13140_v17 = vor.u32 %v14080_v26, %v13139_v55  ;;  %v12883_v53 = vld [vmem:[#allocation26 + $0xd68] sm:$0xf]  ;;  %v11995_v26 = vld [vmem:[#allocation26 + $0x670] sm:$0xf] }
 0x97d   : > { %9045 = vmatpush.bf16.msrb.mxu2 %v12120_v39  ;;  %8984 = vmatpush.bf16.msra.mxu1 %v12620_v22  ;;  %v12240_v39 = vor.u32 %v13839_v52, %v12237_v31  ;;  %v11608_v41 = vor.u32 %v13680_v63, %v11605_v37  ;;  %v14016_v2 = vld [vmem:[#allocation26 + $0xde4] sm:$0xf0]  ;;  %v12124_v52 = vor.u32 %v13825_v47, %v12123_v5  ;;  %v12629_v55 = vld [vmem:[#allocation26 + $0xbe8] sm:$0xf0]  ;;  %v13793_v63 = vld [vmem:[#allocation26 + $0x6ec] sm:$0xf0] }
 0x97e   : > { %9010 = vmatpush.bf16.msra.mxu3 %v12624_v14  ;;  %v14048_v14 = vld [vmem:[#allocation26 + $0xee4] sm:$0xf0]  ;;  %v13777_v37 = vld [vmem:[#allocation26 + $0x674] sm:$0xf]  ;;  %v12632_v8 = vor.u32 %v13936_v35, %v12629_v55  ;;  %v13904_v18 = vld [vmem:[#allocation26 + $0xa6c] sm:$0xf] }
 0x97f   : > { %v15642_v3 = vpop.f32.mrf.mxu2  ;;  %v13012_v56 = vor.u32 %v14048_v14, %v13011_v20  ;;  %v13600_v34 = vld [vmem:[#allocation26 + $0xe4] sm:$0xf0]  ;;  %v13761_v14 = vld [vmem:[#allocation26 + $0x5ec] sm:$0xf0]  ;;  %v13681_v44 = vld [vmem:[#allocation26 + $0x374] sm:$0xf] }
 0x980   : > { %9020 = vmatpush.bf16.msrb.mxu0 %v11988_v4  ;;  %v8770_v22 = vpop.f32.mrf.mxu0  ;;  %v11477_v4 = vld [vmem:[#allocation26 + $0x2e8] sm:$0xf0]  ;;  %v12755_v48 = vld [vmem:[#allocation26 + $0xc68] sm:$0xf]  ;;  %v14081_v6 = vld [vmem:[#allocation26 + $0xfec] sm:$0xf0] }
 0x981   : > { %9046 = vmatpush.bf16.msrb.mxu2 %v11992_v24  ;;  %8985 = vmatpush.bf16.msra.mxu1 %v12492_v40  ;;  %v11480_v27 = vor.u32 %v13648_v60, %v11477_v4  ;;  %v11347_v24 = vld [vmem:[#allocation26 + $0x168] sm:$0xf]  ;;  %v11867_v22 = vld [vmem:[#allocation26 + $0x570] sm:$0xf]  ;;  %v13745_v60 = vld [vmem:[#allocation26 + $0x574] sm:$0xf] }
 0x982   : > { %9011 = vmatpush.bf16.msra.mxu3 %v12496_v57  ;;  %v11348_v58 = vor.u32 %v13632_v11, %v11347_v24  ;;  %v11219_v40 = vld [vmem:[#allocation26 + $0x68] sm:$0xf]  ;;  %v12884_v57 = vor.u32 %v14016_v2, %v12883_v53  ;;  %v11869_v4 = vld [vmem:[#allocation26 + $0x5f0] sm:$0xf0]  ;;  %v13872_v24 = vld [vmem:[#allocation26 + $0x96c] sm:$0xf] }
 0x983   : > { %v13984_v0 = vld [vmem:[#allocation26 + $0xce4] sm:$0xf0]  ;;  %v11872_v11 = vor.u32 %v13745_v60, %v11869_v4  ;;  %v12373_v53 = vld [vmem:[#allocation26 + $0x9e8] sm:$0xf0]  ;;  %v13729_v2 = vld [vmem:[#allocation26 + $0x4ec] sm:$0xf0] }
 0x984   : > { %9021 = vmatpush.bf16.msrb.mxu0 %v11860_v49  ;;  %v11352_v49 = vor.u32 %v13616_v38, %v11349_v36  ;;  %v12756_v12 = vor.u32 %v13984_v0, %v12755_v48  ;;  %v12627_v31 = vld [vmem:[#allocation26 + $0xb68] sm:$0xf]  ;;  %v13713_v36 = vld [vmem:[#allocation26 + $0x474] sm:$0xf]  ;;  %v12245_v48 = vld [vmem:[#allocation26 + $0x8e8] sm:$0xf0] }
 0x985   : > { %9047 = vmatpush.bf16.msrb.mxu2 %v11864_v46  ;;  %8986 = vmatpush.bf16.msra.mxu1 %v12364_v29  ;;  %v13584_v46 = vld [vmem:[#allocation26 + $0x6c] sm:$0xf]  ;;  %v11220_v29 = vor.u32 %v13600_v34, %v11219_v40  ;;  %v12376_v40 = vor.u32 %v13872_v24, %v12373_v53  ;;  %v11744_v0 = vor.u32 %v13713_v36, %v11741_v62  ;;  %v11613_v5 = vld [vmem:[#allocation26 + $0x3f0] sm:$0xf0]  ;;  %v13019_v35 = vld [vmem:[#allocation26 + $0xe70] sm:$0xf] }
 0x986   : > { %9012 = vmatpush.bf16.msra.mxu3 %v12368_v16  ;;  %v12125_v16 = vld [vmem:[#allocation26 + $0x7f0] sm:$0xf0]  ;;  %v13840_v34 = vld [vmem:[#allocation26 + $0x86c] sm:$0xf]  ;;  %v13985_v36 = vld [vmem:[#allocation26 + $0xcec] sm:$0xf0] }
 0x987   : > { %v8796_v25 = vpop.f32.mrf.mxu2  ;;  %v12128_v61 = vor.u32 %v13809_v13, %v12125_v16  ;;  %v13149_v13 = vld [vmem:[#allocation26 + $0xff0] sm:$0xf0]  ;;  %v12248_v16 = vor.u32 %v13840_v34, %v12245_v48  ;;  %v12131_v34 = vld [vmem:[#allocation26 + $0x778] sm:$0xf] }
 0x988   : > { %9022 = vmatpush.bf16.msrb.mxu0 %v11732_v42  ;;  %v11224_v42 = vor.u32 %v13584_v46, %v11221_v45  ;;  %v13856_v25 = vld [vmem:[#allocation26 + $0x8e4] sm:$0xf0]  ;;  %v13697_v46 = vld [vmem:[#allocation26 + $0x3ec] sm:$0xf0]  ;;  %v11357_v60 = vld [vmem:[#allocation26 + $0x1f0] sm:$0xf0] }
 0x989   : > { %9048 = vmatpush.bf16.msrb.mxu2 %v11736_v43  ;;  %8987 = vmatpush.bf16.msra.mxu1 %v12236_v32  ;;  %v15646_v54 = vpop.f32.mrf.mxu1  ;;  %v13952_v43 = vld [vmem:[#allocation26 + $0xbe4] sm:$0xf0]  ;;  %v11997_v32 = vld [vmem:[#allocation26 + $0x6f0] sm:$0xf0]  ;;  %v13147_v45 = vld [vmem:[#allocation26 + $0xf70] sm:$0xf] }
 0x98a   : > { %9013 = vmatpush.bf16.msra.mxu3 %v12240_v39  ;;  %v12628_v30 = vor.u32 %v13952_v43, %v12627_v31  ;;  %v12000_v1 = vor.u32 %v13777_v37, %v11997_v32  ;;  %v11483_v31 = vld [vmem:[#allocation26 + $0x270] sm:$0xf]  ;;  %v11485_v37 = vld [vmem:[#allocation26 + $0x2f0] sm:$0xf0]  ;;  %v13826_v48 = vld [vmem:[#allocation26 + $0x7f4] sm:$0xf0] }
 0x98b   : > { %v13665_v43 = vld [vmem:[#allocation26 + $0x2ec] sm:$0xf0]  ;;  %v14033_v32 = vld [vmem:[#allocation26 + $0xe74] sm:$0xf] }
 0x98c   : > { %9023 = vmatpush.bf16.msrb.mxu0 %v11604_v15  ;;  %8988 = vmatmul.bf16.vlgmr.msra.gmra.mxu1 %v15468_v23  ;;  %v11996_v15 = vor.u32 %v13793_v63, %v11995_v26  ;;  %v14049_v26 = vld [vmem:[#allocation26 + $0xeec] sm:$0xf0]  ;;  %v13649_v63 = vld [vmem:[#allocation26 + $0x274] sm:$0xf] }
 0x98d   : > { %9032 = vmatpush.bf16.msrb.mxu1 %v13140_v17  ;;  %9049 = vmatpush.bf16.msrb.mxu2 %v11608_v41  ;;  %v12499_v17 = vld [vmem:[#allocation26 + $0xa68] sm:$0xf] }
 0x98e   : > { %9058 = vmatpush.bf16.msrb.mxu3 %v13144_v21  ;;  %v13920_v41 = vld [vmem:[#allocation26 + $0xae4] sm:$0xf0]  ;;  %v12501_v21 = vld [vmem:[#allocation26 + $0xae8] sm:$0xf0] }
 0x98f   : > { %9014 = vmatmul.bf16.vlgmr.msra.gmra.mxu3 %v15468_v23  ;;  %v12500_v10 = vor.u32 %v13920_v41, %v12499_v17  ;;  %v12504_v59 = vor.u32 %v13904_v18, %v12501_v21  ;;  %v13020_v17 = vor.u32 %v14049_v26, %v13019_v35  ;;  %v11488_v41 = vor.u32 %v13649_v63, %v11485_v37  ;;  %v11355_v18 = vld [vmem:[#allocation26 + $0x170] sm:$0xf]  ;;  %v13794_v35 = vld [vmem:[#allocation26 + $0x6f4] sm:$0xf0] }
 0x990   : > { %9024 = vmatpush.bf16.msrb.mxu0 %v11476_v50  ;;  %v11868_v50 = vor.u32 %v13761_v14, %v11867_v22  ;;  %v14017_v22 = vld [vmem:[#allocation26 + $0xdec] sm:$0xf0]  ;;  %v13617_v14 = vld [vmem:[#allocation26 + $0x174] sm:$0xf] }
 0x991   : > { %9033 = vmatpush.bf16.msrb.mxu1 %v13012_v56  ;;  %9050 = vmatpush.bf16.msrb.mxu2 %v11480_v27  ;;  %v8783_v20 = vpop.f32.mrf.mxu1  ;;  %v12371_v56 = vld [vmem:[#allocation26 + $0x968] sm:$0xf] }
 0x992   : > { %9059 = vmatpush.bf16.msrb.mxu3 %v13016_v19  ;;  %v15648_v39 = vpop.f32.mrf.mxu3  ;;  %v13888_v27 = vld [vmem:[#allocation26 + $0x9e4] sm:$0xf0]  ;;  %v11739_v19 = vld [vmem:[#allocation26 + $0x470] sm:$0xf] }
 0x993   : > { %v12372_v28 = vor.u32 %v13888_v27, %v12371_v56  ;;  %v12891_v20 = vld [vmem:[#allocation26 + $0xd70] sm:$0xf] }
 0x994   : > { %9025 = vmatpush.bf16.msrb.mxu0 %v11348_v58  ;;  %v12243_v58 = vld [vmem:[#allocation26 + $0x868] sm:$0xf]  ;;  %v11227_v27 = vld [vmem:[#allocation26 + $0x70] sm:$0xf]  ;;  %v12892_v24 = vor.u32 %v14017_v22, %v12891_v20  ;;  %v11875_v22 = vld [vmem:[#allocation26 + $0x578] sm:$0xf] }
 0x995   : > { %9034 = vmatpush.bf16.msrb.mxu1 %v12884_v57  ;;  %9051 = vmatpush.bf16.msrb.mxu2 %v11352_v49  ;;  %v11740_v49 = vor.u32 %v13729_v2, %v11739_v19  ;;  %v12244_v47 = vor.u32 %v13856_v25, %v12243_v58  ;;  %v13601_v19 = vld [vmem:[#allocation26 + $0xec] sm:$0xf0]  ;;  %v11229_v58 = vld [vmem:[#allocation26 + $0xf0] sm:$0xf0] }
 0x996   : > { %9060 = vmatpush.bf16.msrb.mxu3 %v12888_v7  ;;  %v11611_v7 = vld [vmem:[#allocation26 + $0x370] sm:$0xf]  ;;  %v12765_v25 = vld [vmem:[#allocation26 + $0xcf0] sm:$0xf0] }
 0x997   : > { %v12763_v2 = vld [vmem:[#allocation26 + $0xc70] sm:$0xf] }
 0x998   : > { %9026 = vmatpush.bf16.msrb.mxu0 %v11220_v29  ;;  %v15652_v38 = vpop.f32.mrf.mxu0  ;;  %v14065_v29 = vld [vmem:[#allocation26 + $0xf74] sm:$0xf] }
 0x999   : > { %9035 = vmatpush.bf16.msrb.mxu1 %v12756_v12  ;;  %9052 = vmatpush.bf16.msrb.mxu2 %v11224_v42  ;;  %v11612_v12 = vor.u32 %v13697_v46, %v11611_v7  ;;  %v13148_v42 = vor.u32 %v14081_v6, %v13147_v45  ;;  %v11228_v7 = vor.u32 %v13601_v19, %v11227_v27  ;;  %v13810_v46 = vld [vmem:[#allocation26 + $0x77c] sm:$0xf] }
 0x99a   : > { %9061 = vmatpush.bf16.msrb.mxu3 %v12760_v51  ;;  %v8809_v57 = vpop.f32.mrf.mxu3  ;;  %v11616_v51 = vor.u32 %v13681_v44, %v11613_v5  ;;  %v12133_v45 = vld [vmem:[#allocation26 + $0x7f8] sm:$0xf0]  ;;  %v12764_v5 = vor.u32 %v13985_v36, %v12763_v2 }
 0x99b   : > { %9027 = vmatmul.bf16.vlgmr.msrb.gmra.mxu0 %v15462_v33 }
 0x99c   : > { %9071 = vmatpush.bf16.msra.mxu0 %v12124_v52  ;;  %9053 = vmatmul.bf16.vlgmr.msrb.gmra.mxu2 %v15462_v33 }
 0x99d   : > { %9097 = vmatpush.bf16.msra.mxu2 %v12128_v61  ;;  %9036 = vmatpush.bf16.msrb.mxu1 %v12628_v30  ;;  %v13152_v61 = vor.u32 %v14065_v29, %v13149_v13  ;;  %v13021_v30 = vld [vmem:[#allocation26 + $0xef0] sm:$0xf0]  ;;  %v12132_v29 = vor.u32 %v13826_v48, %v12131_v34  ;;  %v12635_v13 = vld [vmem:[#allocation26 + $0xb70] sm:$0xf] }
 0x99e   : > { %9062 = vmatpush.bf16.msrb.mxu3 %v12632_v8  ;;  %v15659_v8 = vld [vmem:[%s15811_s3 + $0x10] sm:$0xff]  ;;  %v13024_v21 = vor.u32 %v14033_v32, %v13021_v30  ;;  %v12251_v34 = vld [vmem:[#allocation26 + $0x870] sm:$0xf] }
 0x99f   : > { %v15654_v52 = vpop.f32.mrf.mxu2  ;;  %v5736_v4 = vperm.slane %v15659_v8, 1  ;;  %v5738_v44 = vperm.slane %v15659_v8, 3 }
 0x9a0   : > { %9072 = vmatpush.bf16.msra.mxu0 %v11996_v15  ;;  %v8822_v55 = vpop.f32.mrf.mxu0  ;;  %v11484_v15 = vor.u32 %v13665_v43, %v11483_v31  ;;  %v12637_v31 = vld [vmem:[#allocation26 + $0xbf0] sm:$0xf0]  ;;  %v12003_v43 = vld [vmem:[#allocation26 + $0x678] sm:$0xf] }
 0x9a1   : > { %9098 = vmatpush.bf16.msra.mxu2 %v12000_v1  ;;  %9037 = vmatpush.bf16.msrb.mxu1 %v12500_v10  ;;  %v13633_v1 = vld [vmem:[#allocation26 + $0x1ec] sm:$0xf0]  ;;  %v14001_v10 = vld [vmem:[#allocation26 + $0xd74] sm:$0xf]  ;;  %v8795_v57 = vadd.f32 %v15642_v3, %v5736_v4  ;;  %v8847_v26 = vadd.f32 %v15654_v52, %v5738_v44  ;;  %v11877_v4 = vld [vmem:[#allocation26 + $0x5f8] sm:$0xf0] }
 0x9a2   : > { %9063 = vmatpush.bf16.msrb.mxu3 %v12504_v59  ;;  %v12893_v59 = vld [vmem:[#allocation26 + $0xdf0] sm:$0xf0]  ;;  %v11356_v56 = vor.u32 %v13633_v1, %v11355_v18 }
 0x9a3   : > { %v12896_v62 = vor.u32 %v14001_v10, %v12893_v59  ;;  %v8808_v6 = vadd.f32 %v15648_v39, %v8795_v57  ;;  %v13778_v39 = vld [vmem:[#allocation26 + $0x67c] sm:$0xf] }
 0x9a4   : > { %9073 = vmatpush.bf16.msra.mxu0 %v11868_v50  ;;  %v5737_v50 = vperm.slane %v15659_v8, 2  ;;  %v13714_v57 = vld [vmem:[#allocation26 + $0x47c] sm:$0xf] }
 0x9a5   : > { %9099 = vmatpush.bf16.msra.mxu2 %v11872_v11  ;;  %9038 = vmatpush.bf16.msrb.mxu1 %v12372_v28  ;;  %v11360_v11 = vor.u32 %v13617_v14, %v11357_v60  ;;  %v13585_v28 = vld [vmem:[#allocation26 + $0x74] sm:$0xf]  ;;  %v9219_v55 = vrot.slane %v8808_v6, 6  ;;  %v13762_v14 = vld [vmem:[#allocation26 + $0x5f4] sm:$0xf0] }
 0x9a6   : > { %9064 = vmatpush.bf16.msrb.mxu3 %v12376_v40  ;;  %v13969_v40 = vld [vmem:[#allocation26 + $0xc74] sm:$0xf]  ;;  %v13746_v60 = vld [vmem:[#allocation26 + $0x57c] sm:$0xf]  ;;  %v11876_v27 = vor.u32 %v13762_v14, %v11875_v22  ;;  %v12899_v22 = vld [vmem:[#allocation26 + $0xd78] sm:$0xf] }
 0x9a7   : > { %v8848_v53 = vpop.f32.mrf.mxu2  ;;  %v12768_v3 = vor.u32 %v13969_v40, %v12765_v25  ;;  %v11880_v36 = vor.u32 %v13746_v60, %v11877_v4  ;;  %v12253_v6 = vld [vmem:[#allocation26 + $0x8f0] sm:$0xf0]  ;;  %v14018_v60 = vld [vmem:[#allocation26 + $0xdf4] sm:$0xf0]  ;;  %v13618_v4 = vld [vmem:[#allocation26 + $0x17c] sm:$0xf] }
 0x9a8   : > { %9074 = vmatpush.bf16.msra.mxu0 %v11740_v49  ;;  %v13873_v53 = vld [vmem:[#allocation26 + $0x974] sm:$0xf] }
 0x9a9   : > { %9100 = vmatpush.bf16.msra.mxu2 %v11744_v0  ;;  %9039 = vmatpush.bf16.msrb.mxu1 %v12244_v47  ;;  %v8833_v49 = vpop.f32.mrf.mxu1  ;;  %v5735_v0 = vperm.slane %v15659_v8, 0  ;;  %v11232_v47 = vor.u32 %v13585_v28, %v11229_v58  ;;  %v11747_v28 = vld [vmem:[#allocation26 + $0x478] sm:$0xf] }
 0x9aa   : > { %9065 = vmatpush.bf16.msrb.mxu3 %v12248_v16  ;;  %v13953_v16 = vld [vmem:[#allocation26 + $0xbec] sm:$0xf0] }
 0x9ab   : > { %v12636_v37 = vor.u32 %v13953_v16, %v12635_v13  ;;  %v8769_v18 = vadd.f32 %v15637_v9, %v5735_v0  ;;  %v13682_v13 = vld [vmem:[#allocation26 + $0x37c] sm:$0xf] }
 0x9ac   : > { %9075 = vmatpush.bf16.msra.mxu0 %v11612_v12  ;;  %9040 = vmatmul.bf16.vlgmr.msrb.gmra.mxu1 %v15468_v23  ;;  %v13937_v12 = vld [vmem:[#allocation26 + $0xb74] sm:$0xf]  ;;  %v11621_v16 = vld [vmem:[#allocation26 + $0x3f8] sm:$0xf0] }
 0x9ad   : > { %9084 = vmatpush.bf16.msra.mxu1 %v13148_v42  ;;  %9101 = vmatpush.bf16.msra.mxu2 %v11616_v51  ;;  %v8821_v42 = vadd.f32 %v15652_v38, %v5737_v50  ;;  %v12136_v51 = vor.u32 %v13810_v46, %v12133_v45  ;;  %v12640_v32 = vor.u32 %v13937_v12, %v12637_v31  ;;  %v12507_v38 = vld [vmem:[#allocation26 + $0xa70] sm:$0xf]  ;;  %v13841_v45 = vld [vmem:[#allocation26 + $0x874] sm:$0xf] }
 0x9ae   : > { %9110 = vmatpush.bf16.msra.mxu3 %v13152_v61  ;;  %v12005_v61 = vld [vmem:[#allocation26 + $0x6f8] sm:$0xf0]  ;;  %v8782_v10 = vadd.f32 %v15646_v54, %v8769_v18  ;;  %v13730_v54 = vld [vmem:[#allocation26 + $0x4f4] sm:$0xf0]  ;;  %v13857_v46 = vld [vmem:[#allocation26 + $0x8ec] sm:$0xf0]  ;;  %v12256_v31 = vor.u32 %v13841_v45, %v12253_v6 }
 0x9af   : > { %9066 = vmatmul.bf16.vlgmr.msrb.gmra.mxu3 %v15468_v23  ;;  %v8834_v63 = vadd.f32 %v8833_v49, %v8821_v42  ;;  %v12008_v20 = vor.u32 %v13778_v39, %v12005_v61  ;;  %v11749_v49 = vld [vmem:[#allocation26 + $0x4f8] sm:$0xf0]  ;;  %v12252_v12 = vor.u32 %v13857_v46, %v12251_v34  ;;  %v11624_v39 = vor.u32 %v13682_v13, %v11621_v16 }
 0x9b0   : > { %9076 = vmatpush.bf16.msra.mxu0 %v11484_v15  ;;  %v12004_v15 = vor.u32 %v13794_v35, %v12003_v43  ;;  %v9243_v19 = vsel %vm2604_vm12, %v8782_v10, %v9219_v55  ;;  %v11752_v44 = vor.u32 %v13714_v57, %v11749_v49  ;;  %v14066_v42 = vld [vmem:[#allocation26 + $0xf7c] sm:$0xf]  ;;  %v11491_v55 = vld [vmem:[#allocation26 + $0x278] sm:$0xf] }
 0x9b1   : > { %9085 = vmatpush.bf16.msra.mxu1 %v13020_v17  ;;  %9102 = vmatpush.bf16.msra.mxu2 %v11488_v41  ;;  %v13921_v17 = vld [vmem:[#allocation26 + $0xaec] sm:$0xf0]  ;;  %v13905_v41 = vld [vmem:[#allocation26 + $0xa74] sm:$0xf]  ;;  %v8835_v52 = vpop.f32.mrf.mxu1  ;;  %v9220_v59 = vrot.slane %v8834_v63, 4 }
 0x9b2   : > { %9111 = vmatpush.bf16.msra.mxu3 %v13024_v21  ;;  %v8859_v30 = vpop.f32.mrf.mxu3  ;;  %v12509_v21 = vld [vmem:[#allocation26 + $0xaf0] sm:$0xf0]  ;;  %v13027_v63 = vld [vmem:[#allocation26 + $0xe78] sm:$0xf]  ;;  %v11365_v10 = vld [vmem:[#allocation26 + $0x1f8] sm:$0xf0] }
 0x9b3   : > { %v8860_v1 = vadd.f32 %v8859_v30, %v8847_v26  ;;  %v12512_v9 = vor.u32 %v13905_v41, %v12509_v21  ;;  %v13666_v26 = vld [vmem:[#allocation26 + $0x2f4] sm:$0xf0]  ;;  %v13029_v41 = vld [vmem:[#allocation26 + $0xef8] sm:$0xf0] }
 0x9b4   : > { %9077 = vmatpush.bf16.msra.mxu0 %v11356_v56  ;;  %v12508_v56 = vor.u32 %v13921_v17, %v12507_v38  ;;  %v14050_v30 = vld [vmem:[#allocation26 + $0xef4] sm:$0xf0]  ;;  %v11493_v38 = vld [vmem:[#allocation26 + $0x2f8] sm:$0xf0]  ;;  %v11492_v18 = vor.u32 %v13666_v26, %v11491_v55 }
 0x9b5   : > { %9086 = vmatpush.bf16.msra.mxu1 %v12892_v24  ;;  %9103 = vmatpush.bf16.msra.mxu2 %v11360_v11  ;;  %v9221_v50 = vrot.slane %v8860_v1, 2  ;;  %v12379_v24 = vld [vmem:[#allocation26 + $0x970] sm:$0xf]  ;;  %v14034_v17 = vld [vmem:[#allocation26 + $0xe7c] sm:$0xf]  ;;  %v13028_v1 = vor.u32 %v14050_v30, %v13027_v63 }
 0x9b6   : > { %9112 = vmatpush.bf16.msra.mxu3 %v12896_v62  ;;  %v13889_v11 = vld [vmem:[#allocation26 + $0x9ec] sm:$0xf0]  ;;  %v12381_v62 = vld [vmem:[#allocation26 + $0x9f0] sm:$0xf0]  ;;  %v11363_v52 = vld [vmem:[#allocation26 + $0x178] sm:$0xf]  ;;  %v13032_v14 = vor.u32 %v14034_v17, %v13029_v41 }
 0x9b7   : > { %v9244_v2 = vsel %vm2606_vm13, %v9220_v59, %v9221_v50  ;;  %v12380_v25 = vor.u32 %v13889_v11, %v12379_v24  ;;  %v12384_v48 = vor.u32 %v13873_v53, %v12381_v62  ;;  %v13634_v21 = vld [vmem:[#allocation26 + $0x1f4] sm:$0xf0]  ;;  %v14002_v59 = vld [vmem:[#allocation26 + $0xd7c] sm:$0xf] }
 0x9b8   : > { %9078 = vmatpush.bf16.msra.mxu0 %v11228_v7  ;;  %v9245_v58 = vsel %vm2608_vm14, %v9243_v19, %v9244_v2  ;;  %v15678_v40 = vpop.f32.mrf.mxu0  ;;  %v11748_v7 = vor.u32 %v13730_v54, %v11747_v28  ;;  %v12901_v50 = vld [vmem:[#allocation26 + $0xdf8] sm:$0xf0]  ;;  %v11235_v11 = vld [vmem:[#allocation26 + $0x78] sm:$0xf] }
 0x9b9   : > { %9087 = vmatpush.bf16.msra.mxu1 %v12764_v5  ;;  %9104 = vmatpush.bf16.msra.mxu2 %v11232_v47  ;;  %9267 = vst [vmem:[%s15812_s5 + $0x20] sm:$0xff] %v9245_v58  ;;  %v11619_v5 = vld [vmem:[#allocation26 + $0x378] sm:$0xf]  ;;  %v12904_v2 = vor.u32 %v14002_v59, %v12901_v50  ;;  %v13586_v62 = vld [vmem:[#allocation26 + $0x7c] sm:$0xf] }
 0x9ba   : > { %9113 = vmatpush.bf16.msra.mxu3 %v12768_v3  ;;  %v8861_v0 = vpop.f32.mrf.mxu3  ;;  %v13698_v47 = vld [vmem:[#allocation26 + $0x3f4] sm:$0xf0]  ;;  %v11237_v28 = vld [vmem:[#allocation26 + $0xf8] sm:$0xf0] }
 0x9bb   : > { %9079 = vmatmul.bf16.vlgmr.msra.gmra.mxu0 %v15462_v33  ;;  %v13155_v3 = vld [vmem:[#allocation26 + $0xf78] sm:$0xf]  ;;  %v11620_v43 = vor.u32 %v13698_v47, %v11619_v5  ;;  %v13970_v58 = vld [vmem:[#allocation26 + $0xc7c] sm:$0xf]  ;;  %v11240_v34 = vor.u32 %v13586_v62, %v11237_v28 }
 0x9bc   : > { %9123 = vmatpush.bf16.msrb.mxu0 %v12132_v29  ;;  %9105 = vmatmul.bf16.vlgmr.msra.gmra.mxu2 %v15462_v33  ;;  %v14082_v29 = vld [vmem:[#allocation26 + $0xff4] sm:$0xf0]  ;;  %v12773_v57 = vld [vmem:[#allocation26 + $0xcf8] sm:$0xf0] }
 0x9bd   : > { %9149 = vmatpush.bf16.msrb.mxu2 %v12136_v51  ;;  %9088 = vmatpush.bf16.msra.mxu1 %v12636_v37  ;;  %v13157_v51 = vld [vmem:[#allocation26 + $0xff8] sm:$0xf0]  ;;  %v13156_v35 = vor.u32 %v14082_v29, %v13155_v3  ;;  %v13602_v53 = vld [vmem:[#allocation26 + $0xf4] sm:$0xf0] }
 0x9be   : > { %9114 = vmatpush.bf16.msra.mxu3 %v12640_v32  ;;  %v13160_v37 = vor.u32 %v14066_v42, %v13157_v51  ;;  %v12771_v19 = vld [vmem:[#allocation26 + $0xc78] sm:$0xf]  ;;  %v11236_v49 = vor.u32 %v13602_v53, %v11235_v11  ;;  %v13938_v46 = vld [vmem:[#allocation26 + $0xb7c] sm:$0xf] }
 0x9bf   : > { %v15683_v61 = vpop.f32.mrf.mxu2  ;;  %v12643_v0 = vld [vmem:[#allocation26 + $0xb78] sm:$0xf]  ;;  %v12645_v45 = vld [vmem:[#allocation26 + $0xbf8] sm:$0xf0] }
 0x9c0   : > { %9124 = vmatpush.bf16.msrb.mxu0 %v12004_v15  ;;  %v8874_v32 = vpop.f32.mrf.mxu0  ;;  %v13650_v15 = vld [vmem:[#allocation26 + $0x27c] sm:$0xf]  ;;  %v12515_v47 = vld [vmem:[#allocation26 + $0xa78] sm:$0xf] }
 0x9c1   : > { %9150 = vmatpush.bf16.msrb.mxu2 %v12008_v20  ;;  %9089 = vmatpush.bf16.msra.mxu1 %v12508_v56  ;;  %v11496_v20 = vor.u32 %v13650_v15, %v11493_v38  ;;  %v11364_v56 = vor.u32 %v13634_v21, %v11363_v52  ;;  %v13922_v3 = vld [vmem:[#allocation26 + $0xaf4] sm:$0xf0]  ;;  %v13906_v13 = vld [vmem:[#allocation26 + $0xa7c] sm:$0xf] }
 0x9c2   : > { %9115 = vmatpush.bf16.msra.mxu3 %v12512_v9  ;;  %v12900_v9 = vor.u32 %v14018_v60, %v12899_v22  ;;  %v12517_v16 = vld [vmem:[#allocation26 + $0xaf8] sm:$0xf0]  ;;  %v12387_v51 = vld [vmem:[#allocation26 + $0x978] sm:$0xf]  ;;  %v5742_v22 = vperm.slane %v15659_v8, 7 }
 0x9c3   : > { %v12520_v42 = vor.u32 %v13906_v13, %v12517_v16  ;;  %v13858_v32 = vld [vmem:[#allocation26 + $0x8f4] sm:$0xf0]  ;;  %v13842_v30 = vld [vmem:[#allocation26 + $0x87c] sm:$0xf] }
 0x9c4   : > { %9125 = vmatpush.bf16.msrb.mxu0 %v11876_v27  ;;  %v11368_v27 = vor.u32 %v13618_v4, %v11365_v10  ;;  %v12261_v15 = vld [vmem:[#allocation26 + $0x8f8] sm:$0xf0] }
 0x9c5   : > { %9151 = vmatpush.bf16.msrb.mxu2 %v11880_v36  ;;  %9090 = vmatpush.bf16.msra.mxu1 %v12380_v25  ;;  %v13986_v36 = vld [vmem:[#allocation26 + $0xcf4] sm:$0xf0]  ;;  %v12264_v38 = vor.u32 %v13842_v30, %v12261_v15 }
 0x9c6   : > { %9116 = vmatpush.bf16.msra.mxu3 %v12384_v48  ;;  %v12772_v25 = vor.u32 %v13986_v36, %v12771_v19  ;;  %v12776_v48 = vor.u32 %v13970_v58, %v12773_v57 }
 0x9c7   : > { %v8900_v24 = vpop.f32.mrf.mxu2 }
 0x9c8   : > { %9126 = vmatpush.bf16.msrb.mxu0 %v11748_v7  ;;  %v13954_v7 = vld [vmem:[#allocation26 + $0xbf4] sm:$0xf0] }
 0x9c9   : > { %9152 = vmatpush.bf16.msrb.mxu2 %v11752_v44  ;;  %9091 = vmatpush.bf16.msra.mxu1 %v12252_v12  ;;  %v15687_v54 = vpop.f32.mrf.mxu1  ;;  %v12644_v6 = vor.u32 %v13954_v7, %v12643_v0  ;;  %v12648_v44 = vor.u32 %v13938_v46, %v12645_v45  ;;  %v12516_v12 = vor.u32 %v13922_v3, %v12515_v47  ;;  %v5714_v0 = vld [vmem:[%s15811_s3 + $0x18] sm:$0xff] }
 0x9ca   : > { %9117 = vmatpush.bf16.msra.mxu3 %v12256_v31  ;;  %v13890_v31 = vld [vmem:[#allocation26 + $0x9f4] sm:$0xf0]  ;;  %v5744_v7 = vperm.slane %v5714_v0, 1  ;;  %v5745_v45 = vperm.slane %v5714_v0, 2  ;;  %v5743_v47 = vperm.slane %v5714_v0, 0 }
 0x9cb   : > { %v12388_v55 = vor.u32 %v13890_v31, %v12387_v51 }
 0x9cc   : > { %9127 = vmatpush.bf16.msrb.mxu0 %v11620_v43  ;;  %9092 = vmatmul.bf16.vlgmr.msra.gmra.mxu1 %v15468_v23  ;;  %v13874_v43 = vld [vmem:[#allocation26 + $0x97c] sm:$0xf] }
 0x9cd   : > { %9136 = vmatpush.bf16.msrb.mxu1 %v13156_v35  ;;  %9153 = vmatpush.bf16.msrb.mxu2 %v11624_v39  ;;  %v12389_v35 = vld [vmem:[#allocation26 + $0x9f8] sm:$0xf0] }
 0x9ce   : > { %9162 = vmatpush.bf16.msrb.mxu3 %v13160_v37  ;;  %v12392_v26 = vor.u32 %v13874_v43, %v12389_v35  ;;  %v12259_v37 = vld [vmem:[#allocation26 + $0x878] sm:$0xf] }
 0x9cf   : > { %9118 = vmatmul.bf16.vlgmr.msra.gmra.mxu3 %v15468_v23 }
 0x9d0   : > { %9128 = vmatpush.bf16.msrb.mxu0 %v11492_v18  ;;  %v5740_v18 = vperm.slane %v15659_v8, 5 }
 0x9d1   : > { %9137 = vmatpush.bf16.msrb.mxu1 %v13028_v1  ;;  %9154 = vmatpush.bf16.msrb.mxu2 %v11496_v20  ;;  %v8887_v29 = vpop.f32.mrf.mxu1  ;;  %v5741_v20 = vperm.slane %v15659_v8, 6 }
 0x9d2   : > { %9163 = vmatpush.bf16.msrb.mxu3 %v13032_v14  ;;  %v8911_v5 = vpop.f32.mrf.mxu3  ;;  %v8899_v21 = vadd.f32 %v15683_v61, %v5740_v18  ;;  %v5739_v14 = vperm.slane %v15659_v8, 4 }
 0x9d4   : > { %9129 = vmatpush.bf16.msrb.mxu0 %v11364_v56  ;;  %v8912_v60 = vadd.f32 %v8911_v5, %v8899_v21  ;;  %v8873_v56 = vadd.f32 %v15678_v40, %v5739_v14  ;;  %v5746_v5 = vperm.slane %v5714_v0, 3 }
 0x9d5   : > { %9138 = vmatpush.bf16.msrb.mxu1 %v12900_v9  ;;  %9155 = vmatpush.bf16.msrb.mxu2 %v11368_v27 }
 0x9d6   : > { %9164 = vmatpush.bf16.msrb.mxu3 %v12904_v2  ;;  %v8886_v24 = vadd.f32 %v15687_v54, %v8873_v56 }
 0x9d8   : > { %9130 = vmatpush.bf16.msrb.mxu0 %v11236_v49  ;;  %v8924_v39 = vpop.f32.mrf.mxu0 }
 0x9d9   : > { %9139 = vmatpush.bf16.msrb.mxu1 %v12772_v25  ;;  %9156 = vmatpush.bf16.msrb.mxu2 %v11240_v34  ;;  %v8925_v4 = vadd.f32 %v8924_v39, %v5741_v20 }
 0x9da   : > { %9165 = vmatpush.bf16.msrb.mxu3 %v12776_v48  ;;  %v8913_v63 = vpop.f32.mrf.mxu3 }
 0x9db   : > { %9131 = vmatmul.bf16.vlgmr.msrb.gmra.mxu0 %v15462_v33 }
 0x9dc   : > { %9157 = vmatmul.bf16.vlgmr.msrb.gmra.mxu2 %v15462_v33  ;;  %v12260_v33 = vor.u32 %v13858_v32, %v12259_v37 }
 0x9dd   : > { %9140 = vmatpush.bf16.msrb.mxu1 %v12644_v6 }
 0x9de   : > { %9166 = vmatpush.bf16.msrb.mxu3 %v12648_v44 }
 0x9df   : > { %v8950_v17 = vpop.f32.mrf.mxu2 }
 0x9e0   : > { %v8926_v41 = vpop.f32.mrf.mxu0  ;;  %v8951_v10 = vadd.f32 %v8950_v17, %v5742_v22  ;;  %v5748_v22 = vperm.slane %v5714_v0, 5 }
 0x9e1   : > { %9141 = vmatpush.bf16.msrb.mxu1 %v12516_v12 }
 0x9e2   : > { %9167 = vmatpush.bf16.msrb.mxu3 %v12520_v42 }
 0x9e5   : > { %9142 = vmatpush.bf16.msrb.mxu1 %v12388_v55 }
 0x9e6   : > { %9168 = vmatpush.bf16.msrb.mxu3 %v12392_v26 }
 0x9e7   : > { %v8952_v1 = vpop.f32.mrf.mxu2 }
 0x9e9   : > { %9143 = vmatpush.bf16.msrb.mxu1 %v12260_v33  ;;  %v8937_v52 = vpop.f32.mrf.mxu1 }
 0x9ea   : > { %9169 = vmatpush.bf16.msrb.mxu3 %v12264_v38  ;;  %v8938_v59 = vadd.f32 %v8937_v52, %v8925_v4 }
 0x9ec   : > { %9144 = vmatmul.bf16.vlgmr.msrb.gmra.mxu1 %v15468_v23  ;;  %v9223_v11 = vrot.slane %v8938_v59, 4  ;;  %v5750_v59 = vperm.slane %v5714_v0, 7 }
 0x9ed   : > { %9170 = vmatmul.bf16.vlgmr.msrb.gmra.mxu3 %v15468_v23  ;;  %v9222_v23 = vrot.slane %v8912_v60, 6  ;;  %v5749_v60 = vperm.slane %v5714_v0, 6 }
 0x9ef   : > { %v9246_v61 = vsel %vm2604_vm12, %v8886_v24, %v9222_v23 }
 0x9f1   : > { %v8939_v27 = vpop.f32.mrf.mxu1 }
 0x9f2   : > { %v8963_v50 = vpop.f32.mrf.mxu3 }
 0x9f3   : > { %v8964_v9 = vadd.f32 %v8963_v50, %v8951_v10  ;;  %v5747_v50 = vperm.slane %v5714_v0, 4 }
 0x9f5   : > { %v9224_v53 = vrot.slane %v8964_v9, 2 }
 0x9f7   : > { %v9247_v19 = vsel %vm2606_vm13, %v9223_v11, %v9224_v53 }
 0x9f8   : > { %v9248_v8 = vsel %vm2608_vm14, %v9246_v61, %v9247_v19  ;;  %v8976_v2 = vpop.f32.mrf.mxu0 }
 0x9f9   : > { %9268 = vst [vmem:[%s15812_s5 + $0x28] sm:$0xff] %v9248_v8  ;;  %v8977_v42 = vadd.f32 %v8976_v2, %v5743_v47 }
 0x9fa   : > { %v8965_v36 = vpop.f32.mrf.mxu3 }
 0x9ff   : > { %v9002_v40 = vpop.f32.mrf.mxu2 }
 0xa00   : > { %v8978_v62 = vpop.f32.mrf.mxu0  ;;  %v9003_v44 = vadd.f32 %v9002_v40, %v5744_v7 }
 0xa07   : > { %v9004_v28 = vpop.f32.mrf.mxu2 }
 0xa09   : > { %v8989_v58 = vpop.f32.mrf.mxu1 }
 0xa0a   : > { %v8990_v35 = vadd.f32 %v8989_v58, %v8977_v42 }
 0xa11   : > { %v8991_v54 = vpop.f32.mrf.mxu1 }
 0xa12   : > { %v9015_v57 = vpop.f32.mrf.mxu3 }
 0xa13   : > { %v9016_v3 = vadd.f32 %v9015_v57, %v9003_v44 }
 0xa15   : > { %v9225_v51 = vrot.slane %v9016_v3, 6 }
 0xa17   : > { %v9249_v26 = vsel %vm2604_vm12, %v8990_v35, %v9225_v51 }
 0xa18   : > { %v9028_v49 = vpop.f32.mrf.mxu0 }
 0xa19   : > { %v9029_v29 = vadd.f32 %v9028_v49, %v5745_v45 }
 0xa1a   : > { %v9017_v25 = vpop.f32.mrf.mxu3 }
 0xa1f   : > { %v9054_v34 = vpop.f32.mrf.mxu2 }
 0xa20   : > { %v9030_v48 = vpop.f32.mrf.mxu0  ;;  %v9055_v13 = vadd.f32 %v9054_v34, %v5746_v5 }
 0xa27   : > { %v9056_v46 = vpop.f32.mrf.mxu2 }
 0xa29   : > { %v9041_v6 = vpop.f32.mrf.mxu1 }
 0xa2a   : > { %v9042_v16 = vadd.f32 %v9041_v6, %v9029_v29 }
 0xa2c   : > { %v9226_v39 = vrot.slane %v9042_v16, 4 }
 0xa31   : > { %v9043_v43 = vpop.f32.mrf.mxu1 }
 0xa32   : > { %v9067_v12 = vpop.f32.mrf.mxu3 }
 0xa33   : > { %v9068_v31 = vadd.f32 %v9067_v12, %v9055_v13 }
 0xa35   : > { %v9227_v55 = vrot.slane %v9068_v31, 2 }
 0xa37   : > { %v9250_v63 = vsel %vm2606_vm13, %v9226_v39, %v9227_v55 }
 0xa38   : > { %v9251_v37 = vsel %vm2608_vm14, %v9249_v26, %v9250_v63  ;;  %v9080_v32 = vpop.f32.mrf.mxu0 }
 0xa39   : > { %9269 = vst [vmem:[%s15812_s5 + $0x30] sm:$0xff] %v9251_v37  ;;  %v9081_v11 = vadd.f32 %v9080_v32, %v5747_v50 }
 0xa3a   : > { %v9069_v30 = vpop.f32.mrf.mxu3 }
 0xa3f   : > { %v9106_v15 = vpop.f32.mrf.mxu2 }
 0xa40   : > { %v9082_v33 = vpop.f32.mrf.mxu0  ;;  %v9107_v10 = vadd.f32 %v9106_v15, %v5748_v22 }
 0xa47   : > { %v9108_v38 = vpop.f32.mrf.mxu2 }
 0xa49   : > { %v9093_v17 = vpop.f32.mrf.mxu1 }
 0xa4a   : > { %v9094_v8 = vadd.f32 %v9093_v17, %v9081_v11 }
 0xa51   : > { %v9095_v18 = vpop.f32.mrf.mxu1 }
 0xa52   : > { %v9119_v41 = vpop.f32.mrf.mxu3 }
 0xa53   : > { %v9120_v56 = vadd.f32 %v9119_v41, %v9107_v10 }
 0xa55   : > { %v9228_v53 = vrot.slane %v9120_v56, 6 }
 0xa57   : > { %v9252_v40 = vsel %vm2604_vm12, %v9094_v8, %v9228_v53 }
 0xa58   : > { %v9132_v1 = vpop.f32.mrf.mxu0 }
 0xa59   : > { %v9133_v23 = vadd.f32 %v9132_v1, %v5749_v60 }
 0xa5a   : > { %v9121_v20 = vpop.f32.mrf.mxu3 }
 0xa5f   : > { %v9158_v52 = vpop.f32.mrf.mxu2 }
 0xa60   : > { %v9134_v21 = vpop.f32.mrf.mxu0  ;;  %v9159_v9 = vadd.f32 %v9158_v52, %v5750_v59 }
 0xa67   : > { %v9160_v14 = vpop.f32.mrf.mxu2 }
 0xa69   : > { %v9145_v4 = vpop.f32.mrf.mxu1 }
 0xa6a   : > { %v9146_v27 = vadd.f32 %v9145_v4, %v9133_v23 }
 0xa6c   : > { %v9229_v2 = vrot.slane %v9146_v27, 4 }
 0xa70   : > { %v9171_v24 = vpop.f32.mrf.mxu3 }
 0xa71   : > { %v9172_v61 = vadd.f32 %v9171_v24, %v9159_v9  ;;  %v9147_v19 = vpop.f32.mrf.mxu1 }
 0xa73   : > { %v9230_v36 = vrot.slane %v9172_v61, 2 }
 0xa75   : > { %v9253_v62 = vsel %vm2606_vm13, %v9229_v2, %v9230_v36 }
 0xa76   : > { %v9254_v28 = vsel %vm2608_vm14, %v9252_v40, %v9253_v62 }
 0xa77   : > { %9270 = vst [vmem:[%s15812_s5 + $0x38] sm:$0xff] %v9254_v28 }
 0xa78   : > { %v9173_v58 = vpop.f32.mrf.mxu3 }
 0xa79 PF: > { %s15813_s22 = sld [smem:[#allocation33_spill]]  ;;  %s15815_s0 = smov %s14648_s20 }
 0xa7a   : > { %s15814_s27 = sld [smem:[#allocation34_spill]]  ;;  %s15816_s30 = smov %s14652_s21 }
 0xa7b   : > { %s15817_s20 = smov %s15820_s29 }
 0xa7f   : > { %s35_s1 = sadd.s32 1, %s15813_s22  }
 0xa80   : > { %p32_p4 = scmp.ge.s32.totalorder %s35_s1, 8   ;;  %s15818_s21 = smov %s15814_s27 }
 0xa82   :  { %34 = sbr.rel (!%p32_p4) target bundleno = 22 (0x16), region = 193 }
 0xa87   :  { %9282 = vsyncpa [#allocation11], 1 }
 0xa88   :  { %9284 = vsyncpa [#allocation11 + $0x1], 1 }
 0xa89   :  { %9285 = vsyncpa [#allocation13], 1 }
 0xa8a   :  { %9286 = vsyncpa [#allocation16], 1 }
 0xa8b   :  { %9287 = vsyncpa [#allocation19], 1 }
 0xa8c   :  { %9288 = vsyncpa [#allocation22], 1 }
 0xa8d   :  { %9289 = vsyncpa [#allocation25], 1 }

</bundles_post_ra>
